<compile_context>
chip_gen: v6e
topology: v6e:2x2x1
jax: 0.10.0
libtpu: 0.0.40
codegen_flags: <defaults>
</compile_context>

<pallas_src>
import jax
import jax.numpy as jnp
from jax.experimental import pallas as pl
from jax.experimental.pallas import tpu as pltpu

# (cin, cout, kernel, stride) -- STATIC config.
CONV_CFG = (
    (4, 8, 4, 2), (8, 16, 3, 2), (16, 32, 3, 2),
    (32, 64, 3, 2), (64, 128, 3, 1), (128, 256, 3, 1),
)


# -----------------------------------------------------------------------------
# Pallas kernels
# -----------------------------------------------------------------------------
def _conv_mm_kernel(x_ref, w_ref, b_ref, o_ref):
    # x: (1, M, K) bf16 ; w: (K, Cout) bf16 ; b: (1, Cout) f32 -> o: (1, M, Cout) bf16
    acc = jnp.dot(x_ref[0], w_ref[...], preferred_element_type=jnp.float32)
    o_ref[0] = jnp.maximum(acc + b_ref[...], 0.0).astype(o_ref.dtype)


def _softplus(x):
    # Matches torch.nn.Softplus (beta=1, threshold=20): linear above threshold.
    safe = jnp.minimum(x, 20.0)
    return jnp.where(x > 20.0, x, jnp.log(1.0 + jnp.exp(safe)))


def _tail_kernel(p5_ref, w5_ref, b5_ref, w6_ref, b6_ref,
                 vw1_ref, vb1_ref, vw2_ref, vb2_ref,
                 fcw_ref, fcb_ref, aw_ref, ab_ref, bw_ref, bb_ref,
                 o_ref):
    # conv5 (3x3, stride 1): patches (9, 576) were built in the wrapper.
    h5 = jnp.dot(p5_ref[0], w5_ref[...], preferred_element_type=jnp.float32)
    h5 = jnp.maximum(h5 + b5_ref[...], 0.0)                      # (9, 128) f32

    # conv6 (3x3 map -> 1x1x256): accumulate over the 9 spatial positions using
    # static slices (no in-kernel relayout of the (9,128) tile).
    acc6 = b6_ref[...]                                           # (1, 256) f32
    for p in range(9):
        lhs = h5[p:p + 1, :].astype(jnp.bfloat16)                # (1, 128)
        rhs = w6_ref[p * 128:(p + 1) * 128, :]                   # (128, 256)
        acc6 = acc6 + jnp.dot(lhs, rhs, preferred_element_type=jnp.float32)
    feat = jnp.maximum(acc6, 0.0)                                # (1, 256) f32
    feat_b = feat.astype(jnp.bfloat16)

    # value head: Linear(256,100) -> ReLU -> Linear(100,1)  (no final ReLU)
    hv = jnp.maximum(
        jnp.dot(feat_b, vw1_ref[...], preferred_element_type=jnp.float32)
        + vb1_ref[...], 0.0)
    v = jnp.dot(hv.astype(jnp.bfloat16), vw2_ref[...],
                preferred_element_type=jnp.float32) + vb2_ref[...]        # (1, 1)

    # shared fc: Linear(256,100) -> ReLU
    h = jnp.maximum(
        jnp.dot(feat_b, fcw_ref[...], preferred_element_type=jnp.float32)
        + fcb_ref[...], 0.0)
    hb = h.astype(jnp.bfloat16)

    a_lin = jnp.dot(hb, aw_ref[...], preferred_element_type=jnp.float32) + ab_ref[...]
    b_lin = jnp.dot(hb, bw_ref[...], preferred_element_type=jnp.float32) + bb_ref[...]
    alpha = _softplus(a_lin) + 1.0                               # (1, 3)
    beta = _softplus(b_lin) + 1.0                                # (1, 3)

    # Pack [alpha(3) | beta(3) | v(1) | zeros] into one lane-dense (1, 128) row.
    o_ref[0] = jnp.concatenate(
        [alpha, beta, v, jnp.zeros((1, 121), jnp.float32)], axis=-1)


# -----------------------------------------------------------------------------
# Wrappers
# -----------------------------------------------------------------------------
def _im2col_nhwc(x, k, s):
    # x: (N, H, W, C) -> (N, Ho*Wo, k*k*C); pure slicing + last-axis concat,
    # patch flattening order is (kh, kw, Cin) to match the prepped weights.
    N, H, W, C = x.shape
    Ho = (H - k) // s + 1
    Wo = (W - k) // s + 1
    cols = [x[:, i:i + s * (Ho - 1) + 1:s, j:j + s * (Wo - 1) + 1:s, :]
            for i in range(k) for j in range(k)]
    patches = jnp.concatenate(cols, axis=-1)                     # (N, Ho, Wo, k*k*C)
    return patches.reshape(N, Ho * Wo, k * k * C), Ho, Wo


def conv2d_relu(x, w_flat, b, k, s):
    # x: (N, H, W, Cin) bf16 ; w_flat: (k*k*Cin, Cout) bf16 ; b: (1, Cout) f32
    N = x.shape[0]
    patches, Ho, Wo = _im2col_nhwc(x, k, s)
    M, K = patches.shape[1], patches.shape[2]
    cout = w_flat.shape[1]
    bytes_accessed = (patches.size * 2 + w_flat.size * 2 + b.size * 4
                      + N * M * cout * 2)
    out = pl.pallas_call(
        _conv_mm_kernel,
        out_shape=jax.ShapeDtypeStruct((N, M, cout), jnp.bfloat16),
        grid=(N,),
        in_specs=[
            pl.BlockSpec((1, M, K), lambda n: (n, 0, 0)),
            pl.BlockSpec((K, cout), lambda n: (0, 0)),
            pl.BlockSpec((1, cout), lambda n: (0, 0)),
        ],
        out_specs=pl.BlockSpec((1, M, cout), lambda n: (n, 0, 0)),
        compiler_params=pltpu.CompilerParams(dimension_semantics=("parallel",)),
        cost_estimate=pl.CostEstimate(
            flops=2 * N * M * K * cout, transcendentals=0,
            bytes_accessed=int(bytes_accessed)),
    )(patches, w_flat, b)
    return out.reshape(N, Ho, Wo, cout)


def tail_fused(x4, params):
    # x4: (N, 5, 5, 64) bf16  ->  packed (N, 128) f32 slab [alpha|beta|v|pad].
    N = x4.shape[0]
    p5, _, _ = _im2col_nhwc(x4, 3, 1)                            # (N, 9, 576) bf16
    args = (
        p5,
        params["conv_w"][4], params["conv_b"][4],
        params["conv_w"][5], params["conv_b"][5],
        params["v_w1"], params["v_b1"], params["v_w2"], params["v_b2"],
        params["fc_w"], params["fc_b"],
        params["a_w"], params["a_b"], params["b_w"], params["b_b"],
    )
    in_specs = [pl.BlockSpec((1, 9, 576), lambda n: (n, 0, 0))]
    in_specs += [pl.BlockSpec(a.shape, lambda n: (0, 0)) for a in args[1:]]
    flops = 2 * N * (9 * 576 * 128 + 9 * 128 * 256 + 2 * 256 * 100
                     + 100 * 1 + 2 * 100 * 3)
    bytes_accessed = sum(a.size * a.dtype.itemsize for a in args) + N * 128 * 4
    slab = pl.pallas_call(
        _tail_kernel,
        out_shape=jax.ShapeDtypeStruct((N, 1, 128), jnp.float32),
        grid=(N,),
        in_specs=in_specs,
        out_specs=pl.BlockSpec((1, 1, 128), lambda n: (n, 0, 0)),
        compiler_params=pltpu.CompilerParams(dimension_semantics=("parallel",)),
        cost_estimate=pl.CostEstimate(
            flops=int(flops), transcendentals=12 * N,
            bytes_accessed=int(bytes_accessed)),
    )(*args)
    return slab.reshape(N, 128)


# -----------------------------------------------------------------------------
# Parameter init (deterministic; mirrors the PyTorch init scheme)
# -----------------------------------------------------------------------------
def _prep_conv_weight(w_oihw):
    # torch (Cout, Cin, kh, kw) -> (kh*kw*Cin, Cout) bf16, matching im2col order.
    cout, cin, kh, kw = w_oihw.shape
    return (jnp.transpose(w_oihw, (2, 3, 1, 0))
            .reshape(kh * kw * cin, cout).astype(jnp.bfloat16))


def _xavier_uniform(key, shape, gain):
    cout, cin, kh, kw = shape
    fan_in = cin * kh * kw
    fan_out = cout * kh * kw
    bound = gain * (6.0 / (fan_in + fan_out)) ** 0.5
    return jax.random.uniform(key, shape, jnp.float32, -bound, bound)


def _linear_init(key, fan_in, fan_out):
    kw_, kb_ = jax.random.split(key)
    bound = 1.0 / (fan_in ** 0.5)
    w = jax.random.uniform(kw_, (fan_in, fan_out), jnp.float32, -bound, bound)
    b = jax.random.uniform(kb_, (1, fan_out), jnp.float32, -bound, bound)
    return w.astype(jnp.bfloat16), b


def init_params(key):
    keys = jax.random.split(key, len(CONV_CFG) + 5)
    gain = 2.0 ** 0.5                                   # calculate_gain('relu')
    conv_w, conv_b = [], []
    for i, (cin, cout, k, _s) in enumerate(CONV_CFG):
        w = _xavier_uniform(keys[i], (cout, cin, k, k), gain)
        conv_w.append(_prep_conv_weight(w))
        conv_b.append(jnp.full((1, cout), 0.1, jnp.float32))
    n = len(CONV_CFG)
    params = {"conv_w": conv_w, "conv_b": conv_b}
    params["v_w1"], params["v_b1"] = _linear_init(keys[n + 0], 256, 100)
    params["v_w2"], params["v_b2"] = _linear_init(keys[n + 1], 100, 1)
    params["fc_w"], params["fc_b"] = _linear_init(keys[n + 2], 256, 100)
    params["a_w"], params["a_b"] = _linear_init(keys[n + 3], 100, 3)
    params["b_w"], params["b_b"] = _linear_init(keys[n + 4], 100, 3)
    return params


# -----------------------------------------------------------------------------
# Forward pass (mirrors Net.forward)
# -----------------------------------------------------------------------------
@jax.jit
def net_forward(params, x):
    # x: (N, 4, 96, 96) NCHW float32 (PyTorch layout).  Spatial size 96x96 is
    # required so the last feature map is 1x1 and x.view(-1, 256) is valid.
    x = jnp.transpose(x, (0, 2, 3, 1)).astype(jnp.bfloat16)      # NHWC bf16
    for li in range(4):                                          # stride-2 convs
        _, _, k, s = CONV_CFG[li]
        x = conv2d_relu(x, params["conv_w"][li], params["conv_b"][li], k, s)
    slab = tail_fused(x, params)                                 # conv5+conv6+heads
    alpha = slab[:, 0:3]
    beta = slab[:, 3:6]
    v = slab[:, 6:7]
    return (alpha, beta), v


if __name__ == "__main__":
    key = jax.random.PRNGKey(0)
    kp, kx = jax.random.split(key)
    params = init_params(kp)
    # Batch=2, channels=4, spatial=96 (the architecture requires 96x96 inputs
    # so that the final feature map is 1x1x256, matching x.view(-1, 256)).
    x = jax.random.normal(kx, (2, 4, 96, 96), dtype=jnp.float32)

    (alpha, beta), v = net_forward(params, x)
    jax.block_until_ready((alpha, beta, v))

    assert alpha.shape == (2, 3) and beta.shape == (2, 3) and v.shape == (2, 1)
    assert bool(jnp.all(jnp.isfinite(alpha))) and bool(jnp.all(jnp.isfinite(beta)))
    assert bool(jnp.all(jnp.isfinite(v)))
    assert bool(jnp.all(alpha >= 1.0)) and bool(jnp.all(beta >= 1.0))
    print("KERNEL_OK")
</pallas_src>

<mosaic_0001>
module attributes {stable_mosaic.version = 11 : i64} {
  func.func @_conv_mm_kernel(%arg0: i32, %arg1: memref<1x2209x64xbf16, #tpu.memory_space<vmem>>, %arg2: memref<64x8xbf16, #tpu.memory_space<vmem>>, %arg3: memref<1x8xf32, #tpu.memory_space<vmem>>, %arg4: memref<1x2209x8xbf16, #tpu.memory_space<vmem>>) attributes {dimension_semantics = [#tpu.dimension_semantics<parallel>], iteration_bounds = array<i64: 2>, scalar_prefetch = 0 : i64, scratch_operands = 0 : i64, tpu.core_type = #tpu.core_type<tc>, window_params = [{transform_indices = @transform_0, window_bounds = array<i64: 1, 2209, 64>}, {pipeline_mode = #tpu.pipeline_mode<synchronous>, transform_indices = @transform_1, window_bounds = array<i64: 64, 8>}, {pipeline_mode = #tpu.pipeline_mode<synchronous>, transform_indices = @transform_2, window_bounds = array<i64: 1, 8>}, {transform_indices = @transform_3, window_bounds = array<i64: 1, 2209, 8>}]} {
    %c0 = arith.constant 0 : index
    %c0_0 = arith.constant 0 : index
    %c0_1 = arith.constant 0 : index
    %0 = vector.load %arg1[%c0, %c0_0, %c0_1] : memref<1x2209x64xbf16, #tpu.memory_space<vmem>>, vector<1x2209x64xbf16>
    %1 = vector.shape_cast %0 : vector<1x2209x64xbf16> to vector<2209x64xbf16>
    %c0_2 = arith.constant 0 : index
    %c0_3 = arith.constant 0 : index
    %2 = vector.load %arg2[%c0_2, %c0_3] : memref<64x8xbf16, #tpu.memory_space<vmem>>, vector<64x8xbf16>
    %cst = arith.constant dense<0.000000e+00> : vector<2209x8xf32>
    %3 = tpu.matmul %1, %2, %cst {dimension_numbers = #tpu.dot_dimension_numbers<[1], [0], [0], [1], [0, 0, 1, 1], [], []>} : vector<2209x64xbf16>, vector<64x8xbf16>, vector<2209x8xf32> -> vector<2209x8xf32>
    %c0_4 = arith.constant 0 : index
    %c0_5 = arith.constant 0 : index
    %4 = vector.load %arg3[%c0_4, %c0_5] : memref<1x8xf32, #tpu.memory_space<vmem>>, vector<1x8xf32>
    %5 = vector.broadcast %4 : vector<1x8xf32> to vector<2209x8xf32>
    %6 = arith.addf %3, %5 : vector<2209x8xf32>
    %cst_6 = arith.constant 0.000000e+00 : f32
    %7 = vector.broadcast %cst_6 : f32 to vector<2209x8xf32>
    %8 = arith.maximumf %6, %7 : vector<2209x8xf32>
    %9 = arith.truncf %8 : vector<2209x8xf32> to vector<2209x8xbf16>
    %c0_7 = arith.constant 0 : index
    %c0_8 = arith.constant 0 : index
    %c0_9 = arith.constant 0 : index
    %10 = vector.load %arg4[%c0_7, %c0_8, %c0_9] : memref<1x2209x8xbf16, #tpu.memory_space<vmem>>, vector<1x2209x8xbf16>
    %11 = vector.shape_cast %10 : vector<1x2209x8xbf16> to vector<2209x8xbf16>
    %12 = vector.shape_cast %9 : vector<2209x8xbf16> to vector<1x2209x8xbf16>
    tpu.vector_store %arg4[%c0_7, %c0_8, %c0_9], %12 {strides = array<i32>} : memref<1x2209x8xbf16, #tpu.memory_space<vmem>>, vector<1x2209x8xbf16>,
    return
  }
  func.func @transform_0(%arg0: i32) -> (i32, i32, i32) {
    %c0_i32 = arith.constant 0 : i32
    %c0_i32_0 = arith.constant 0 : i32
    %c0_i32_1 = arith.constant 0 : i32
    return %arg0, %c0_i32, %c0_i32_0 : i32, i32, i32
  }
  func.func @transform_1(%arg0: i32) -> (i32, i32) {
    %c0_i32 = arith.constant 0 : i32
    %c0_i32_0 = arith.constant 0 : i32
    %c0_i32_1 = arith.constant 0 : i32
    return %c0_i32, %c0_i32_0 : i32, i32
  }
  func.func @transform_2(%arg0: i32) -> (i32, i32) {
    %c0_i32 = arith.constant 0 : i32
    %c0_i32_0 = arith.constant 0 : i32
    %c0_i32_1 = arith.constant 0 : i32
    return %c0_i32, %c0_i32_0 : i32, i32
  }
  func.func @transform_3(%arg0: i32) -> (i32, i32, i32) {
    %c0_i32 = arith.constant 0 : i32
    %c0_i32_0 = arith.constant 0 : i32
    %c0_i32_1 = arith.constant 0 : i32
    return %arg0, %c0_i32, %c0_i32_0 : i32, i32, i32
  }
}

module attributes {stable_mosaic.version = 11 : i64} {
  func.func @_conv_mm_kernel(%arg0: i32, %arg1: memref<1x529x72xbf16, #tpu.memory_space<vmem>>, %arg2: memref<72x16xbf16, #tpu.memory_space<vmem>>, %arg3: memref<1x16xf32, #tpu.memory_space<vmem>>, %arg4: memref<1x529x16xbf16, #tpu.memory_space<vmem>>) attributes {dimension_semantics = [#tpu.dimension_semantics<parallel>], iteration_bounds = array<i64: 2>, scalar_prefetch = 0 : i64, scratch_operands = 0 : i64, tpu.core_type = #tpu.core_type<tc>, window_params = [{transform_indices = @transform_0, window_bounds = array<i64: 1, 529, 72>}, {pipeline_mode = #tpu.pipeline_mode<synchronous>, transform_indices = @transform_1, window_bounds = array<i64: 72, 16>}, {pipeline_mode = #tpu.pipeline_mode<synchronous>, transform_indices = @transform_2, window_bounds = array<i64: 1, 16>}, {transform_indices = @transform_3, window_bounds = array<i64: 1, 529, 16>}]} {
    %c0 = arith.constant 0 : index
    %c0_0 = arith.constant 0 : index
    %c0_1 = arith.constant 0 : index
    %0 = vector.load %arg1[%c0, %c0_0, %c0_1] : memref<1x529x72xbf16, #tpu.memory_space<vmem>>, vector<1x529x72xbf16>
    %1 = vector.shape_cast %0 : vector<1x529x72xbf16> to vector<529x72xbf16>
    %c0_2 = arith.constant 0 : index
    %c0_3 = arith.constant 0 : index
    %2 = vector.load %arg2[%c0_2, %c0_3] : memref<72x16xbf16, #tpu.memory_space<vmem>>, vector<72x16xbf16>
    %cst = arith.constant dense<0.000000e+00> : vector<529x16xf32>
    %3 = tpu.matmul %1, %2, %cst {dimension_numbers = #tpu.dot_dimension_numbers<[1], [0], [0], [1], [0, 0, 1, 1], [], []>} : vector<529x72xbf16>, vector<72x16xbf16>, vector<529x16xf32> -> vector<529x16xf32>
    %c0_4 = arith.constant 0 : index
    %c0_5 = arith.constant 0 : index
    %4 = vector.load %arg3[%c0_4, %c0_5] : memref<1x16xf32, #tpu.memory_space<vmem>>, vector<1x16xf32>
    %5 = vector.broadcast %4 : vector<1x16xf32> to vector<529x16xf32>
    %6 = arith.addf %3, %5 : vector<529x16xf32>
    %cst_6 = arith.constant 0.000000e+00 : f32
    %7 = vector.broadcast %cst_6 : f32 to vector<529x16xf32>
    %8 = arith.maximumf %6, %7 : vector<529x16xf32>
    %9 = arith.truncf %8 : vector<529x16xf32> to vector<529x16xbf16>
    %c0_7 = arith.constant 0 : index
    %c0_8 = arith.constant 0 : index
    %c0_9 = arith.constant 0 : index
    %10 = vector.load %arg4[%c0_7, %c0_8, %c0_9] : memref<1x529x16xbf16, #tpu.memory_space<vmem>>, vector<1x529x16xbf16>
    %11 = vector.shape_cast %10 : vector<1x529x16xbf16> to vector<529x16xbf16>
    %12 = vector.shape_cast %9 : vector<529x16xbf16> to vector<1x529x16xbf16>
    tpu.vector_store %arg4[%c0_7, %c0_8, %c0_9], %12 {strides = array<i32>} : memref<1x529x16xbf16, #tpu.memory_space<vmem>>, vector<1x529x16xbf16>,
    return
  }
  func.func @transform_0(%arg0: i32) -> (i32, i32, i32) {
    %c0_i32 = arith.constant 0 : i32
    %c0_i32_0 = arith.constant 0 : i32
    %c0_i32_1 = arith.constant 0 : i32
    return %arg0, %c0_i32, %c0_i32_0 : i32, i32, i32
  }
  func.func @transform_1(%arg0: i32) -> (i32, i32) {
    %c0_i32 = arith.constant 0 : i32
    %c0_i32_0 = arith.constant 0 : i32
    %c0_i32_1 = arith.constant 0 : i32
    return %c0_i32, %c0_i32_0 : i32, i32
  }
  func.func @transform_2(%arg0: i32) -> (i32, i32) {
    %c0_i32 = arith.constant 0 : i32
    %c0_i32_0 = arith.constant 0 : i32
    %c0_i32_1 = arith.constant 0 : i32
    return %c0_i32, %c0_i32_0 : i32, i32
  }
  func.func @transform_3(%arg0: i32) -> (i32, i32, i32) {
    %c0_i32 = arith.constant 0 : i32
    %c0_i32_0 = arith.constant 0 : i32
    %c0_i32_1 = arith.constant 0 : i32
    return %arg0, %c0_i32, %c0_i32_0 : i32, i32, i32
  }
}

module attributes {stable_mosaic.version = 11 : i64} {
  func.func @_conv_mm_kernel(%arg0: i32, %arg1: memref<1x121x144xbf16, #tpu.memory_space<vmem>>, %arg2: memref<144x32xbf16, #tpu.memory_space<vmem>>, %arg3: memref<1x32xf32, #tpu.memory_space<vmem>>, %arg4: memref<1x121x32xbf16, #tpu.memory_space<vmem>>) attributes {dimension_semantics = [#tpu.dimension_semantics<parallel>], iteration_bounds = array<i64: 2>, scalar_prefetch = 0 : i64, scratch_operands = 0 : i64, tpu.core_type = #tpu.core_type<tc>, window_params = [{transform_indices = @transform_0, window_bounds = array<i64: 1, 121, 144>}, {pipeline_mode = #tpu.pipeline_mode<synchronous>, transform_indices = @transform_1, window_bounds = array<i64: 144, 32>}, {pipeline_mode = #tpu.pipeline_mode<synchronous>, transform_indices = @transform_2, window_bounds = array<i64: 1, 32>}, {transform_indices = @transform_3, window_bounds = array<i64: 1, 121, 32>}]} {
    %c0 = arith.constant 0 : index
    %c0_0 = arith.constant 0 : index
    %c0_1 = arith.constant 0 : index
    %0 = vector.load %arg1[%c0, %c0_0, %c0_1] : memref<1x121x144xbf16, #tpu.memory_space<vmem>>, vector<1x121x144xbf16>
    %1 = vector.shape_cast %0 : vector<1x121x144xbf16> to vector<121x144xbf16>
    %c0_2 = arith.constant 0 : index
    %c0_3 = arith.constant 0 : index
    %2 = vector.load %arg2[%c0_2, %c0_3] : memref<144x32xbf16, #tpu.memory_space<vmem>>, vector<144x32xbf16>
    %cst = arith.constant dense<0.000000e+00> : vector<121x32xf32>
    %3 = tpu.matmul %1, %2, %cst {dimension_numbers = #tpu.dot_dimension_numbers<[1], [0], [0], [1], [0, 0, 1, 1], [], []>} : vector<121x144xbf16>, vector<144x32xbf16>, vector<121x32xf32> -> vector<121x32xf32>
    %c0_4 = arith.constant 0 : index
    %c0_5 = arith.constant 0 : index
    %4 = vector.load %arg3[%c0_4, %c0_5] : memref<1x32xf32, #tpu.memory_space<vmem>>, vector<1x32xf32>
    %5 = vector.broadcast %4 : vector<1x32xf32> to vector<121x32xf32>
    %6 = arith.addf %3, %5 : vector<121x32xf32>
    %cst_6 = arith.constant 0.000000e+00 : f32
    %7 = vector.broadcast %cst_6 : f32 to vector<121x32xf32>
    %8 = arith.maximumf %6, %7 : vector<121x32xf32>
    %9 = arith.truncf %8 : vector<121x32xf32> to vector<121x32xbf16>
    %c0_7 = arith.constant 0 : index
    %c0_8 = arith.constant 0 : index
    %c0_9 = arith.constant 0 : index
    %10 = vector.load %arg4[%c0_7, %c0_8, %c0_9] : memref<1x121x32xbf16, #tpu.memory_space<vmem>>, vector<1x121x32xbf16>
    %11 = vector.shape_cast %10 : vector<1x121x32xbf16> to vector<121x32xbf16>
    %12 = vector.shape_cast %9 : vector<121x32xbf16> to vector<1x121x32xbf16>
    tpu.vector_store %arg4[%c0_7, %c0_8, %c0_9], %12 {strides = array<i32>} : memref<1x121x32xbf16, #tpu.memory_space<vmem>>, vector<1x121x32xbf16>,
    return
  }
  func.func @transform_0(%arg0: i32) -> (i32, i32, i32) {
    %c0_i32 = arith.constant 0 : i32
    %c0_i32_0 = arith.constant 0 : i32
    %c0_i32_1 = arith.constant 0 : i32
    return %arg0, %c0_i32, %c0_i32_0 : i32, i32, i32
  }
  func.func @transform_1(%arg0: i32) -> (i32, i32) {
    %c0_i32 = arith.constant 0 : i32
    %c0_i32_0 = arith.constant 0 : i32
    %c0_i32_1 = arith.constant 0 : i32
    return %c0_i32, %c0_i32_0 : i32, i32
  }
  func.func @transform_2(%arg0: i32) -> (i32, i32) {
    %c0_i32 = arith.constant 0 : i32
    %c0_i32_0 = arith.constant 0 : i32
    %c0_i32_1 = arith.constant 0 : i32
    return %c0_i32, %c0_i32_0 : i32, i32
  }
  func.func @transform_3(%arg0: i32) -> (i32, i32, i32) {
    %c0_i32 = arith.constant 0 : i32
    %c0_i32_0 = arith.constant 0 : i32
    %c0_i32_1 = arith.constant 0 : i32
    return %arg0, %c0_i32, %c0_i32_0 : i32, i32, i32
  }
}

module attributes {stable_mosaic.version = 11 : i64} {
  func.func @_conv_mm_kernel(%arg0: i32, %arg1: memref<1x25x288xbf16, #tpu.memory_space<vmem>>, %arg2: memref<288x64xbf16, #tpu.memory_space<vmem>>, %arg3: memref<1x64xf32, #tpu.memory_space<vmem>>, %arg4: memref<1x25x64xbf16, #tpu.memory_space<vmem>>) attributes {dimension_semantics = [#tpu.dimension_semantics<parallel>], iteration_bounds = array<i64: 2>, scalar_prefetch = 0 : i64, scratch_operands = 0 : i64, tpu.core_type = #tpu.core_type<tc>, window_params = [{transform_indices = @transform_0, window_bounds = array<i64: 1, 25, 288>}, {pipeline_mode = #tpu.pipeline_mode<synchronous>, transform_indices = @transform_1, window_bounds = array<i64: 288, 64>}, {pipeline_mode = #tpu.pipeline_mode<synchronous>, transform_indices = @transform_2, window_bounds = array<i64: 1, 64>}, {transform_indices = @transform_3, window_bounds = array<i64: 1, 25, 64>}]} {
    %c0 = arith.constant 0 : index
    %c0_0 = arith.constant 0 : index
    %c0_1 = arith.constant 0 : index
    %0 = vector.load %arg1[%c0, %c0_0, %c0_1] : memref<1x25x288xbf16, #tpu.memory_space<vmem>>, vector<1x25x288xbf16>
    %1 = vector.shape_cast %0 : vector<1x25x288xbf16> to vector<25x288xbf16>
    %c0_2 = arith.constant 0 : index
    %c0_3 = arith.constant 0 : index
    %2 = vector.load %arg2[%c0_2, %c0_3] : memref<288x64xbf16, #tpu.memory_space<vmem>>, vector<288x64xbf16>
    %cst = arith.constant dense<0.000000e+00> : vector<25x64xf32>
    %3 = tpu.matmul %1, %2, %cst {dimension_numbers = #tpu.dot_dimension_numbers<[1], [0], [0], [1], [0, 0, 1, 1], [], []>} : vector<25x288xbf16>, vector<288x64xbf16>, vector<25x64xf32> -> vector<25x64xf32>
    %c0_4 = arith.constant 0 : index
    %c0_5 = arith.constant 0 : index
    %4 = vector.load %arg3[%c0_4, %c0_5] : memref<1x64xf32, #tpu.memory_space<vmem>>, vector<1x64xf32>
    %5 = vector.broadcast %4 : vector<1x64xf32> to vector<25x64xf32>
    %6 = arith.addf %3, %5 : vector<25x64xf32>
    %cst_6 = arith.constant 0.000000e+00 : f32
    %7 = vector.broadcast %cst_6 : f32 to vector<25x64xf32>
    %8 = arith.maximumf %6, %7 : vector<25x64xf32>
    %9 = arith.truncf %8 : vector<25x64xf32> to vector<25x64xbf16>
    %c0_7 = arith.constant 0 : index
    %c0_8 = arith.constant 0 : index
    %c0_9 = arith.constant 0 : index
    %10 = vector.load %arg4[%c0_7, %c0_8, %c0_9] : memref<1x25x64xbf16, #tpu.memory_space<vmem>>, vector<1x25x64xbf16>
    %11 = vector.shape_cast %10 : vector<1x25x64xbf16> to vector<25x64xbf16>
    %12 = vector.shape_cast %9 : vector<25x64xbf16> to vector<1x25x64xbf16>
    tpu.vector_store %arg4[%c0_7, %c0_8, %c0_9], %12 {strides = array<i32>} : memref<1x25x64xbf16, #tpu.memory_space<vmem>>, vector<1x25x64xbf16>,
    return
  }
  func.func @transform_0(%arg0: i32) -> (i32, i32, i32) {
    %c0_i32 = arith.constant 0 : i32
    %c0_i32_0 = arith.constant 0 : i32
    %c0_i32_1 = arith.constant 0 : i32
    return %arg0, %c0_i32, %c0_i32_0 : i32, i32, i32
  }
  func.func @transform_1(%arg0: i32) -> (i32, i32) {
    %c0_i32 = arith.constant 0 : i32
    %c0_i32_0 = arith.constant 0 : i32
    %c0_i32_1 = arith.constant 0 : i32
    return %c0_i32, %c0_i32_0 : i32, i32
  }
  func.func @transform_2(%arg0: i32) -> (i32, i32) {
    %c0_i32 = arith.constant 0 : i32
    %c0_i32_0 = arith.constant 0 : i32
    %c0_i32_1 = arith.constant 0 : i32
    return %c0_i32, %c0_i32_0 : i32, i32
  }
  func.func @transform_3(%arg0: i32) -> (i32, i32, i32) {
    %c0_i32 = arith.constant 0 : i32
    %c0_i32_0 = arith.constant 0 : i32
    %c0_i32_1 = arith.constant 0 : i32
    return %arg0, %c0_i32, %c0_i32_0 : i32, i32, i32
  }
}

module attributes {stable_mosaic.version = 11 : i64} {
  func.func @_tail_kernel(%arg0: i32, %arg1: memref<1x9x576xbf16, #tpu.memory_space<vmem>>, %arg2: memref<576x128xbf16, #tpu.memory_space<vmem>>, %arg3: memref<1x128xf32, #tpu.memory_space<vmem>>, %arg4: memref<1152x256xbf16, #tpu.memory_space<vmem>>, %arg5: memref<1x256xf32, #tpu.memory_space<vmem>>, %arg6: memref<256x100xbf16, #tpu.memory_space<vmem>>, %arg7: memref<1x100xf32, #tpu.memory_space<vmem>>, %arg8: memref<100x1xbf16, #tpu.memory_space<vmem>>, %arg9: memref<1x1xf32, #tpu.memory_space<vmem>>, %arg10: memref<256x100xbf16, #tpu.memory_space<vmem>>, %arg11: memref<1x100xf32, #tpu.memory_space<vmem>>, %arg12: memref<100x3xbf16, #tpu.memory_space<vmem>>, %arg13: memref<1x3xf32, #tpu.memory_space<vmem>>, %arg14: memref<100x3xbf16, #tpu.memory_space<vmem>>, %arg15: memref<1x3xf32, #tpu.memory_space<vmem>>, %arg16: memref<1x1x128xf32, #tpu.memory_space<vmem>>) attributes {dimension_semantics = [#tpu.dimension_semantics<parallel>], iteration_bounds = array<i64: 2>, scalar_prefetch = 0 : i64, scratch_operands = 0 : i64, tpu.core_type = #tpu.core_type<tc>, window_params = [{transform_indices = @transform_0, window_bounds = array<i64: 1, 9, 576>}, {pipeline_mode = #tpu.pipeline_mode<synchronous>, transform_indices = @transform_1, window_bounds = array<i64: 576, 128>}, {pipeline_mode = #tpu.pipeline_mode<synchronous>, transform_indices = @transform_2, window_bounds = array<i64: 1, 128>}, {pipeline_mode = #tpu.pipeline_mode<synchronous>, transform_indices = @transform_3, window_bounds = array<i64: 1152, 256>}, {pipeline_mode = #tpu.pipeline_mode<synchronous>, transform_indices = @transform_4, window_bounds = array<i64: 1, 256>}, {pipeline_mode = #tpu.pipeline_mode<synchronous>, transform_indices = @transform_5, window_bounds = array<i64: 256, 100>}, {pipeline_mode = #tpu.pipeline_mode<synchronous>, transform_indices = @transform_6, window_bounds = array<i64: 1, 100>}, {pipeline_mode = #tpu.pipeline_mode<synchronous>, transform_indices = @transform_7, window_bounds = array<i64: 100, 1>}, {pipeline_mode = #tpu.pipeline_mode<synchronous>, transform_indices = @transform_8, window_bounds = array<i64: 1, 1>}, {pipeline_mode = #tpu.pipeline_mode<synchronous>, transform_indices = @transform_9, window_bounds = array<i64: 256, 100>}, {pipeline_mode = #tpu.pipeline_mode<synchronous>, transform_indices = @transform_10, window_bounds = array<i64: 1, 100>}, {pipeline_mode = #tpu.pipeline_mode<synchronous>, transform_indices = @transform_11, window_bounds = array<i64: 100, 3>}, {pipeline_mode = #tpu.pipeline_mode<synchronous>, transform_indices = @transform_12, window_bounds = array<i64: 1, 3>}, {pipeline_mode = #tpu.pipeline_mode<synchronous>, transform_indices = @transform_13, window_bounds = array<i64: 100, 3>}, {pipeline_mode = #tpu.pipeline_mode<synchronous>, transform_indices = @transform_14, window_bounds = array<i64: 1, 3>}, {transform_indices = @transform_15, window_bounds = array<i64: 1, 1, 128>}]} {
    %c0 = arith.constant 0 : index
    %c0_0 = arith.constant 0 : index
    %c0_1 = arith.constant 0 : index
    %0 = vector.load %arg1[%c0, %c0_0, %c0_1] : memref<1x9x576xbf16, #tpu.memory_space<vmem>>, vector<1x9x576xbf16>
    %1 = vector.shape_cast %0 : vector<1x9x576xbf16> to vector<9x576xbf16>
    %c0_2 = arith.constant 0 : index
    %c0_3 = arith.constant 0 : index
    %2 = vector.load %arg2[%c0_2, %c0_3] : memref<576x128xbf16, #tpu.memory_space<vmem>>, vector<576x128xbf16>
    %cst = arith.constant dense<0.000000e+00> : vector<9x128xf32>
    %3 = tpu.matmul %1, %2, %cst {dimension_numbers = #tpu.dot_dimension_numbers<[1], [0], [0], [1], [0, 0, 1, 1], [], []>} : vector<9x576xbf16>, vector<576x128xbf16>, vector<9x128xf32> -> vector<9x128xf32>
    %c0_4 = arith.constant 0 : index
    %c0_5 = arith.constant 0 : index
    %4 = vector.load %arg3[%c0_4, %c0_5] : memref<1x128xf32, #tpu.memory_space<vmem>>, vector<1x128xf32>
    %5 = vector.broadcast %4 : vector<1x128xf32> to vector<9x128xf32>
    %6 = arith.addf %3, %5 : vector<9x128xf32>
    %cst_6 = arith.constant 0.000000e+00 : f32
    %7 = vector.broadcast %cst_6 : f32 to vector<9x128xf32>
    %8 = arith.maximumf %6, %7 : vector<9x128xf32>
    %c0_7 = arith.constant 0 : index
    %c0_8 = arith.constant 0 : index
    %9 = vector.load %arg5[%c0_7, %c0_8] : memref<1x256xf32, #tpu.memory_space<vmem>>, vector<1x256xf32>
    %10 = vector.extract_strided_slice %8 {offsets = [0, 0], sizes = [1, 128], strides = [1, 1]} : vector<9x128xf32> to vector<1x128xf32>
    %11 = arith.truncf %10 : vector<1x128xf32> to vector<1x128xbf16>
    %c0_9 = arith.constant 0 : index
    %c0_10 = arith.constant 0 : index
    %12 = vector.load %arg4[%c0_9, %c0_10] : memref<1152x256xbf16, #tpu.memory_space<vmem>>, vector<128x256xbf16>
    %cst_11 = arith.constant dense<0.000000e+00> : vector<1x256xf32>
    %13 = tpu.matmul %11, %12, %cst_11 {dimension_numbers = #tpu.dot_dimension_numbers<[1], [0], [0], [1], [0, 0, 1, 1], [], []>} : vector<1x128xbf16>, vector<128x256xbf16>, vector<1x256xf32> -> vector<1x256xf32>
    %14 = arith.addf %9, %13 : vector<1x256xf32>
    %15 = vector.extract_strided_slice %8 {offsets = [1, 0], sizes = [1, 128], strides = [1, 1]} : vector<9x128xf32> to vector<1x128xf32>
    %16 = arith.truncf %15 : vector<1x128xf32> to vector<1x128xbf16>
    %c128 = arith.constant 128 : index
    %c0_12 = arith.constant 0 : index
    %17 = vector.load %arg4[%c128, %c0_12] : memref<1152x256xbf16, #tpu.memory_space<vmem>>, vector<128x256xbf16>
    %cst_13 = arith.constant dense<0.000000e+00> : vector<1x256xf32>
    %18 = tpu.matmul %16, %17, %cst_13 {dimension_numbers = #tpu.dot_dimension_numbers<[1], [0], [0], [1], [0, 0, 1, 1], [], []>} : vector<1x128xbf16>, vector<128x256xbf16>, vector<1x256xf32> -> vector<1x256xf32>
    %19 = arith.addf %14, %18 : vector<1x256xf32>
    %20 = vector.extract_strided_slice %8 {offsets = [2, 0], sizes = [1, 128], strides = [1, 1]} : vector<9x128xf32> to vector<1x128xf32>
    %21 = arith.truncf %20 : vector<1x128xf32> to vector<1x128xbf16>
    %c256 = arith.constant 256 : index
    %c0_14 = arith.constant 0 : index
    %22 = vector.load %arg4[%c256, %c0_14] : memref<1152x256xbf16, #tpu.memory_space<vmem>>, vector<128x256xbf16>
    %cst_15 = arith.constant dense<0.000000e+00> : vector<1x256xf32>
    %23 = tpu.matmul %21, %22, %cst_15 {dimension_numbers = #tpu.dot_dimension_numbers<[1], [0], [0], [1], [0, 0, 1, 1], [], []>} : vector<1x128xbf16>, vector<128x256xbf16>, vector<1x256xf32> -> vector<1x256xf32>
    %24 = arith.addf %19, %23 : vector<1x256xf32>
    %25 = vector.extract_strided_slice %8 {offsets = [3, 0], sizes = [1, 128], strides = [1, 1]} : vector<9x128xf32> to vector<1x128xf32>
    %26 = arith.truncf %25 : vector<1x128xf32> to vector<1x128xbf16>
    %c384 = arith.constant 384 : index
    %c0_16 = arith.constant 0 : index
    %27 = vector.load %arg4[%c384, %c0_16] : memref<1152x256xbf16, #tpu.memory_space<vmem>>, vector<128x256xbf16>
    %cst_17 = arith.constant dense<0.000000e+00> : vector<1x256xf32>
    %28 = tpu.matmul %26, %27, %cst_17 {dimension_numbers = #tpu.dot_dimension_numbers<[1], [0], [0], [1], [0, 0, 1, 1], [], []>} : vector<1x128xbf16>, vector<128x256xbf16>, vector<1x256xf32> -> vector<1x256xf32>
    %29 = arith.addf %24, %28 : vector<1x256xf32>
    %30 = vector.extract_strided_slice %8 {offsets = [4, 0], sizes = [1, 128], strides = [1, 1]} : vector<9x128xf32> to vector<1x128xf32>
    %31 = arith.truncf %30 : vector<1x128xf32> to vector<1x128xbf16>
    %c512 = arith.constant 512 : index
    %c0_18 = arith.constant 0 : index
    %32 = vector.load %arg4[%c512, %c0_18] : memref<1152x256xbf16, #tpu.memory_space<vmem>>, vector<128x256xbf16>
    %cst_19 = arith.constant dense<0.000000e+00> : vector<1x256xf32>
    %33 = tpu.matmul %31, %32, %cst_19 {dimension_numbers = #tpu.dot_dimension_numbers<[1], [0], [0], [1], [0, 0, 1, 1], [], []>} : vector<1x128xbf16>, vector<128x256xbf16>, vector<1x256xf32> -> vector<1x256xf32>
    %34 = arith.addf %29, %33 : vector<1x256xf32>
    %35 = vector.extract_strided_slice %8 {offsets = [5, 0], sizes = [1, 128], strides = [1, 1]} : vector<9x128xf32> to vector<1x128xf32>
    %36 = arith.truncf %35 : vector<1x128xf32> to vector<1x128xbf16>
    %c640 = arith.constant 640 : index
    %c0_20 = arith.constant 0 : index
    %37 = vector.load %arg4[%c640, %c0_20] : memref<1152x256xbf16, #tpu.memory_space<vmem>>, vector<128x256xbf16>
    %cst_21 = arith.constant dense<0.000000e+00> : vector<1x256xf32>
    %38 = tpu.matmul %36, %37, %cst_21 {dimension_numbers = #tpu.dot_dimension_numbers<[1], [0], [0], [1], [0, 0, 1, 1], [], []>} : vector<1x128xbf16>, vector<128x256xbf16>, vector<1x256xf32> -> vector<1x256xf32>
    %39 = arith.addf %34, %38 : vector<1x256xf32>
    %40 = vector.extract_strided_slice %8 {offsets = [6, 0], sizes = [1, 128], strides = [1, 1]} : vector<9x128xf32> to vector<1x128xf32>
    %41 = arith.truncf %40 : vector<1x128xf32> to vector<1x128xbf16>
    %c768 = arith.constant 768 : index
    %c0_22 = arith.constant 0 : index
    %42 = vector.load %arg4[%c768, %c0_22] : memref<1152x256xbf16, #tpu.memory_space<vmem>>, vector<128x256xbf16>
    %cst_23 = arith.constant dense<0.000000e+00> : vector<1x256xf32>
    %43 = tpu.matmul %41, %42, %cst_23 {dimension_numbers = #tpu.dot_dimension_numbers<[1], [0], [0], [1], [0, 0, 1, 1], [], []>} : vector<1x128xbf16>, vector<128x256xbf16>, vector<1x256xf32> -> vector<1x256xf32>
    %44 = arith.addf %39, %43 : vector<1x256xf32>
    %45 = vector.extract_strided_slice %8 {offsets = [7, 0], sizes = [1, 128], strides = [1, 1]} : vector<9x128xf32> to vector<1x128xf32>
    %46 = arith.truncf %45 : vector<1x128xf32> to vector<1x128xbf16>
    %c896 = arith.constant 896 : index
    %c0_24 = arith.constant 0 : index
    %47 = vector.load %arg4[%c896, %c0_24] : memref<1152x256xbf16, #tpu.memory_space<vmem>>, vector<128x256xbf16>
    %cst_25 = arith.constant dense<0.000000e+00> : vector<1x256xf32>
    %48 = tpu.matmul %46, %47, %cst_25 {dimension_numbers = #tpu.dot_dimension_numbers<[1], [0], [0], [1], [0, 0, 1, 1], [], []>} : vector<1x128xbf16>, vector<128x256xbf16>, vector<1x256xf32> -> vector<1x256xf32>
    %49 = arith.addf %44, %48 : vector<1x256xf32>
    %50 = vector.extract_strided_slice %8 {offsets = [8, 0], sizes = [1, 128], strides = [1, 1]} : vector<9x128xf32> to vector<1x128xf32>
    %51 = arith.truncf %50 : vector<1x128xf32> to vector<1x128xbf16>
    %c1024 = arith.constant 1024 : index
    %c0_26 = arith.constant 0 : index
    %52 = vector.load %arg4[%c1024, %c0_26] : memref<1152x256xbf16, #tpu.memory_space<vmem>>, vector<128x256xbf16>
    %cst_27 = arith.constant dense<0.000000e+00> : vector<1x256xf32>
    %53 = tpu.matmul %51, %52, %cst_27 {dimension_numbers = #tpu.dot_dimension_numbers<[1], [0], [0], [1], [0, 0, 1, 1], [], []>} : vector<1x128xbf16>, vector<128x256xbf16>, vector<1x256xf32> -> vector<1x256xf32>
    %54 = arith.addf %49, %53 : vector<1x256xf32>
    %cst_28 = arith.constant 0.000000e+00 : f32
    %55 = vector.broadcast %cst_28 : f32 to vector<1x256xf32>
    %56 = arith.maximumf %54, %55 : vector<1x256xf32>
    %57 = arith.truncf %56 : vector<1x256xf32> to vector<1x256xbf16>
    %c0_29 = arith.constant 0 : index
    %c0_30 = arith.constant 0 : index
    %58 = vector.load %arg6[%c0_29, %c0_30] : memref<256x100xbf16, #tpu.memory_space<vmem>>, vector<256x100xbf16>
    %cst_31 = arith.constant dense<0.000000e+00> : vector<1x100xf32>
    %59 = tpu.matmul %57, %58, %cst_31 {dimension_numbers = #tpu.dot_dimension_numbers<[1], [0], [0], [1], [0, 0, 1, 1], [], []>} : vector<1x256xbf16>, vector<256x100xbf16>, vector<1x100xf32> -> vector<1x100xf32>
    %c0_32 = arith.constant 0 : index
    %c0_33 = arith.constant 0 : index
    %60 = vector.load %arg7[%c0_32, %c0_33] : memref<1x100xf32, #tpu.memory_space<vmem>>, vector<1x100xf32>
    %61 = arith.addf %59, %60 : vector<1x100xf32>
    %cst_34 = arith.constant 0.000000e+00 : f32
    %62 = vector.broadcast %cst_34 : f32 to vector<1x100xf32>
    %63 = arith.maximumf %61, %62 : vector<1x100xf32>
    %64 = arith.truncf %63 : vector<1x100xf32> to vector<1x100xbf16>
    %c0_35 = arith.constant 0 : index
    %c0_36 = arith.constant 0 : index
    %65 = vector.load %arg8[%c0_35, %c0_36] : memref<100x1xbf16, #tpu.memory_space<vmem>>, vector<100x1xbf16>
    %cst_37 = arith.constant dense<0.000000e+00> : vector<1x1xf32>
    %66 = tpu.matmul %64, %65, %cst_37 {dimension_numbers = #tpu.dot_dimension_numbers<[1], [0], [0], [1], [0, 0, 1, 1], [], []>} : vector<1x100xbf16>, vector<100x1xbf16>, vector<1x1xf32> -> vector<1x1xf32>
    %c0_38 = arith.constant 0 : index
    %c0_39 = arith.constant 0 : index
    %67 = vector.load %arg9[%c0_38, %c0_39] : memref<1x1xf32, #tpu.memory_space<vmem>>, vector<1x1xf32>
    %68 = arith.addf %66, %67 : vector<1x1xf32>
    %c0_40 = arith.constant 0 : index
    %c0_41 = arith.constant 0 : index
    %69 = vector.load %arg10[%c0_40, %c0_41] : memref<256x100xbf16, #tpu.memory_space<vmem>>, vector<256x100xbf16>
    %cst_42 = arith.constant dense<0.000000e+00> : vector<1x100xf32>
    %70 = tpu.matmul %57, %69, %cst_42 {dimension_numbers = #tpu.dot_dimension_numbers<[1], [0], [0], [1], [0, 0, 1, 1], [], []>} : vector<1x256xbf16>, vector<256x100xbf16>, vector<1x100xf32> -> vector<1x100xf32>
    %c0_43 = arith.constant 0 : index
    %c0_44 = arith.constant 0 : index
    %71 = vector.load %arg11[%c0_43, %c0_44] : memref<1x100xf32, #tpu.memory_space<vmem>>, vector<1x100xf32>
    %72 = arith.addf %70, %71 : vector<1x100xf32>
    %cst_45 = arith.constant 0.000000e+00 : f32
    %73 = vector.broadcast %cst_45 : f32 to vector<1x100xf32>
    %74 = arith.maximumf %72, %73 : vector<1x100xf32>
    %75 = arith.truncf %74 : vector<1x100xf32> to vector<1x100xbf16>
    %c0_46 = arith.constant 0 : index
    %c0_47 = arith.constant 0 : index
    %76 = vector.load %arg12[%c0_46, %c0_47] : memref<100x3xbf16, #tpu.memory_space<vmem>>, vector<100x3xbf16>
    %cst_48 = arith.constant dense<0.000000e+00> : vector<1x3xf32>
    %77 = tpu.matmul %75, %76, %cst_48 {dimension_numbers = #tpu.dot_dimension_numbers<[1], [0], [0], [1], [0, 0, 1, 1], [], []>} : vector<1x100xbf16>, vector<100x3xbf16>, vector<1x3xf32> -> vector<1x3xf32>
    %c0_49 = arith.constant 0 : index
    %c0_50 = arith.constant 0 : index
    %78 = vector.load %arg13[%c0_49, %c0_50] : memref<1x3xf32, #tpu.memory_space<vmem>>, vector<1x3xf32>
    %79 = arith.addf %77, %78 : vector<1x3xf32>
    %c0_51 = arith.constant 0 : index
    %c0_52 = arith.constant 0 : index
    %80 = vector.load %arg14[%c0_51, %c0_52] : memref<100x3xbf16, #tpu.memory_space<vmem>>, vector<100x3xbf16>
    %cst_53 = arith.constant dense<0.000000e+00> : vector<1x3xf32>
    %81 = tpu.matmul %75, %80, %cst_53 {dimension_numbers = #tpu.dot_dimension_numbers<[1], [0], [0], [1], [0, 0, 1, 1], [], []>} : vector<1x100xbf16>, vector<100x3xbf16>, vector<1x3xf32> -> vector<1x3xf32>
    %c0_54 = arith.constant 0 : index
    %c0_55 = arith.constant 0 : index
    %82 = vector.load %arg15[%c0_54, %c0_55] : memref<1x3xf32, #tpu.memory_space<vmem>>, vector<1x3xf32>
    %83 = arith.addf %81, %82 : vector<1x3xf32>
    %cst_56 = arith.constant 2.000000e+01 : f32
    %84 = vector.broadcast %cst_56 : f32 to vector<1x3xf32>
    %85 = arith.minimumf %79, %84 : vector<1x3xf32>
    %cst_57 = arith.constant 2.000000e+01 : f32
    %86 = vector.broadcast %cst_57 : f32 to vector<1x3xf32>
    %87 = arith.cmpf ogt, %79, %86 : vector<1x3xf32>
    %88 = math.exp %85 : vector<1x3xf32>
    %cst_58 = arith.constant 1.000000e+00 : f32
    %89 = vector.broadcast %cst_58 : f32 to vector<1x3xf32>
    %90 = arith.addf %89, %88 : vector<1x3xf32>
    %91 = math.log %90 : vector<1x3xf32>
    %92 = arith.select %87, %79, %91 : vector<1x3xi1>, vector<1x3xf32>
    %cst_59 = arith.constant 1.000000e+00 : f32
    %93 = vector.broadcast %cst_59 : f32 to vector<1x3xf32>
    %94 = arith.addf %92, %93 : vector<1x3xf32>
    %cst_60 = arith.constant 2.000000e+01 : f32
    %95 = vector.broadcast %cst_60 : f32 to vector<1x3xf32>
    %96 = arith.minimumf %83, %95 : vector<1x3xf32>
    %cst_61 = arith.constant 2.000000e+01 : f32
    %97 = vector.broadcast %cst_61 : f32 to vector<1x3xf32>
    %98 = arith.cmpf ogt, %83, %97 : vector<1x3xf32>
    %99 = math.exp %96 : vector<1x3xf32>
    %cst_62 = arith.constant 1.000000e+00 : f32
    %100 = vector.broadcast %cst_62 : f32 to vector<1x3xf32>
    %101 = arith.addf %100, %99 : vector<1x3xf32>
    %102 = math.log %101 : vector<1x3xf32>
    %103 = arith.select %98, %83, %102 : vector<1x3xi1>, vector<1x3xf32>
    %cst_63 = arith.constant 1.000000e+00 : f32
    %104 = vector.broadcast %cst_63 : f32 to vector<1x3xf32>
    %105 = arith.addf %103, %104 : vector<1x3xf32>
    %cst_64 = arith.constant 0.000000e+00 : f32
    %106 = vector.broadcast %cst_64 : f32 to vector<1x121xf32>
    %107 = tpu.concatenate %94, %105, %68, %106 in 1 : vector<1x3xf32>, vector<1x3xf32>, vector<1x1xf32>, vector<1x121xf32> -> vector<1x128xf32>
    %c0_65 = arith.constant 0 : index
    %c0_66 = arith.constant 0 : index
    %c0_67 = arith.constant 0 : index
    %108 = vector.load %arg16[%c0_65, %c0_66, %c0_67] : memref<1x1x128xf32, #tpu.memory_space<vmem>>, vector<1x1x128xf32>
    %109 = vector.shape_cast %108 : vector<1x1x128xf32> to vector<1x128xf32>
    %110 = vector.shape_cast %107 : vector<1x128xf32> to vector<1x1x128xf32>
    tpu.vector_store %arg16[%c0_65, %c0_66, %c0_67], %110 {strides = array<i32>} : memref<1x1x128xf32, #tpu.memory_space<vmem>>, vector<1x1x128xf32>,
    return
  }
  func.func @transform_0(%arg0: i32) -> (i32, i32, i32) {
    %c0_i32 = arith.constant 0 : i32
    %c0_i32_0 = arith.constant 0 : i32
    %c0_i32_1 = arith.constant 0 : i32
    return %arg0, %c0_i32, %c0_i32_0 : i32, i32, i32
  }
  func.func @transform_1(%arg0: i32) -> (i32, i32) {
    %c0_i32 = arith.constant 0 : i32
    %c0_i32_0 = arith.constant 0 : i32
    %c0_i32_1 = arith.constant 0 : i32
    return %c0_i32, %c0_i32_0 : i32, i32
  }
  func.func @transform_2(%arg0: i32) -> (i32, i32) {
    %c0_i32 = arith.constant 0 : i32
    %c0_i32_0 = arith.constant 0 : i32
    %c0_i32_1 = arith.constant 0 : i32
    return %c0_i32, %c0_i32_0 : i32, i32
  }
  func.func @transform_3(%arg0: i32) -> (i32, i32) {
    %c0_i32 = arith.constant 0 : i32
    %c0_i32_0 = arith.constant 0 : i32
    %c0_i32_1 = arith.constant 0 : i32
    return %c0_i32, %c0_i32_0 : i32, i32
  }
  func.func @transform_4(%arg0: i32) -> (i32, i32) {
    %c0_i32 = arith.constant 0 : i32
    %c0_i32_0 = arith.constant 0 : i32
    %c0_i32_1 = arith.constant 0 : i32
    return %c0_i32, %c0_i32_0 : i32, i32
  }
  func.func @transform_5(%arg0: i32) -> (i32, i32) {
    %c0_i32 = arith.constant 0 : i32
    %c0_i32_0 = arith.constant 0 : i32
    %c0_i32_1 = arith.constant 0 : i32
    return %c0_i32, %c0_i32_0 : i32, i32
  }
  func.func @transform_6(%arg0: i32) -> (i32, i32) {
    %c0_i32 = arith.constant 0 : i32
    %c0_i32_0 = arith.constant 0 : i32
    %c0_i32_1 = arith.constant 0 : i32
    return %c0_i32, %c0_i32_0 : i32, i32
  }
  func.func @transform_7(%arg0: i32) -> (i32, i32) {
    %c0_i32 = arith.constant 0 : i32
    %c0_i32_0 = arith.constant 0 : i32
    %c0_i32_1 = arith.constant 0 : i32
    return %c0_i32, %c0_i32_0 : i32, i32
  }
  func.func @transform_8(%arg0: i32) -> (i32, i32) {
    %c0_i32 = arith.constant 0 : i32
    %c0_i32_0 = arith.constant 0 : i32
    %c0_i32_1 = arith.constant 0 : i32
    return %c0_i32, %c0_i32_0 : i32, i32
  }
  func.func @transform_9(%arg0: i32) -> (i32, i32) {
    %c0_i32 = arith.constant 0 : i32
    %c0_i32_0 = arith.constant 0 : i32
    %c0_i32_1 = arith.constant 0 : i32
    return %c0_i32, %c0_i32_0 : i32, i32
  }
  func.func @transform_10(%arg0: i32) -> (i32, i32) {
    %c0_i32 = arith.constant 0 : i32
    %c0_i32_0 = arith.constant 0 : i32
    %c0_i32_1 = arith.constant 0 : i32
    return %c0_i32, %c0_i32_0 : i32, i32
  }
  func.func @transform_11(%arg0: i32) -> (i32, i32) {
    %c0_i32 = arith.constant 0 : i32
    %c0_i32_0 = arith.constant 0 : i32
    %c0_i32_1 = arith.constant 0 : i32
    return %c0_i32, %c0_i32_0 : i32, i32
  }
  func.func @transform_12(%arg0: i32) -> (i32, i32) {
    %c0_i32 = arith.constant 0 : i32
    %c0_i32_0 = arith.constant 0 : i32
    %c0_i32_1 = arith.constant 0 : i32
    return %c0_i32, %c0_i32_0 : i32, i32
  }
  func.func @transform_13(%arg0: i32) -> (i32, i32) {
    %c0_i32 = arith.constant 0 : i32
    %c0_i32_0 = arith.constant 0 : i32
    %c0_i32_1 = arith.constant 0 : i32
    return %c0_i32, %c0_i32_0 : i32, i32
  }
  func.func @transform_14(%arg0: i32) -> (i32, i32) {
    %c0_i32 = arith.constant 0 : i32
    %c0_i32_0 = arith.constant 0 : i32
    %c0_i32_1 = arith.constant 0 : i32
    return %c0_i32, %c0_i32_0 : i32, i32
  }
  func.func @transform_15(%arg0: i32) -> (i32, i32, i32) {
    %c0_i32 = arith.constant 0 : i32
    %c0_i32_0 = arith.constant 0 : i32
    %c0_i32_1 = arith.constant 0 : i32
    return %arg0, %c0_i32, %c0_i32_0 : i32, i32, i32
  }
}

</mosaic_0001>

<bundles_post_ra>
// kernel: net_forward.5
= control target key start
LH: loop header
LB: loop body
LE: loop exit
PB: predicated region body
PF: predicated region fallthrough
CT: control target
= control target key end

     0   :  { %s6215_s12 = smov 0   ;;  %s7670_s0 = inlined_call_operand.vmem [shape: bf16[2,2209,64], index: 0, kind: input, shape index: {}]   ;;  %s7671_s1 = inlined_call_operand.vmem [shape: bf16[64,8], index: 1, kind: input, shape index: {}]   ;;  %s7672_s2 = inlined_call_operand.vmem [shape: f32[1,8], index: 2, kind: input, shape index: {}]   ;;  %s7673_s3 = inlined_call_operand.vmem [shape: bf16[2,2209,8], index: 3, kind: output, shape index: {}]  }
   0x1 LB: > { %s4467_s13 = sadd.s32 4294967295, %s6191_s12   ;;  %p4471_p0 = scmp.ge.s32.totalorder %s6191_s12, 1  ;;  %s6191_s12 = sphi %s6215_s12, %s13_s12  }
   0x2   : > { %p137_p1 = scmp.lt.s32.totalorder %s6191_s12, 3 }
   0x4   : > { %p138_p2 = pnand %p4471_p0, %p137_p1 }
   0x5   : > { %p161_p3 = scmp.lt.s32.totalorder (!%p138_p2), %s4467_s13, 1 }
   0x6   : > { %141 = sbr.rel (%p138_p2) target bundleno = 784 (0x310), region = 32 }
   0xb   : > { %v6039_v0 = vld [vmem:[%s7671_s1 + $0x18] sm:$0xff]   ;;  %v6193_v1 = vmov 0.0   ;;  %v6040_v2 = vld [vmem:[%s7671_s1 + $0x10] sm:$0xff]   ;;  %vm6194_vm0 = vmmov 0   ;;  %s7675_s13 = smov (!%p161_p3, %s4467_s13), 1  ;;  %v6041_v3 = vld [vmem:[%s7671_s1 + $0x8] sm:$0xff]  }
   0xc   : > { %5456 = vmatprep.subr.bf16.mxu0 %v6193_v1  ;;  %6020 = vmatprep.subr.bf16.mxu1 %v6193_v1  ;;  %s6028_s20 = smul.u32 1108, %s7675_s13  ;;  %v6042_v4 = vld [vmem:[%s7671_s1] sm:$0xff]   ;;  %vm1181_vm1 = vcmask 523264   ;;  %vm4129_vm2 = vcmask 60416   ;;  %vm4406_vm3 = vcmask 57344  }
   0xd   : > { %5457 = vmatpush3.bf16.msra.mxu0 %v6039_v0  ;;  %6024 = vmatpush3.bf16.msra.mxu1 %v6039_v0  ;;  %v6454_v55 = vld [vmem:[%s7672_s2] ss:$0 sm:$0xff]  ;;  %vm4407_vm4 = vsmask.f32 256 }
   0xe   : > { %5458 = vmatprep.subr.bf16.mxu0 %v6193_v1  ;;  %6021 = vmatprep.subr.bf16.mxu1 %v6193_v1  ;;  %s6250_s23 = scalar_lea.vmem %s7670_s0, %s6028_s20  ;;  %s6469_s30 = scalar_lea.vmem %s7673_s3, %s6028_s20  ;;  %vm4408_vm5 = vmand %vm4406_vm3, %vm4407_vm4 }
   0xf   : > { %5464 = vmatprep.mubr.msk.bf16.mxu0 %vm6194_vm0, %v6193_v1  ;;  %5744 = vmatprep.mubr.msk.bf16.mxu1 %vm6194_vm0, %v6193_v1  ;;  %v6043_v5 = vld [vmem:[%s6250_s23] sm:$0xff]   ;;  %v6044_v6 = vld [vmem:[%s6250_s23 + $0x230] sm:$0xff]   ;;  %v6045_v7 = vld [vmem:[%s6250_s23 + $0x8] sm:$0xff]  }
  0x10   : > { %v6046_v8 = vld [vmem:[%s6250_s23 + $0x238] sm:$0xff]   ;;  %v6047_v9 = vld [vmem:[%s6250_s23 + $0x10] sm:$0xff]   ;;  %v6048_v10 = vld [vmem:[%s6250_s23 + $0x240] sm:$0xff]  }
  0x11   : > { %5459 = vmatpush3.bf16.msra.mxu0 %v6040_v2  ;;  %6025 = vmatpush3.bf16.msra.mxu1 %v6040_v2  ;;  %v6049_v11 = vld [vmem:[%s6250_s23 + $0x18] sm:$0xff]   ;;  %v6050_v12 = vld [vmem:[%s6250_s23 + $0x248] sm:$0xff]   ;;  %v6051_v13 = vld [vmem:[%s6250_s23 + $0x20] sm:$0xff]  }
  0x12   : > { %5460 = vmatprep.subr.bf16.mxu0 %v6193_v1  ;;  %6022 = vmatprep.subr.bf16.mxu1 %v6193_v1  ;;  %v6052_v14 = vld [vmem:[%s6250_s23 + $0x250] sm:$0xff]   ;;  %v6053_v15 = vld [vmem:[%s6250_s23 + $0x28] sm:$0xff]   ;;  %v6054_v16 = vld [vmem:[%s6250_s23 + $0x258] sm:$0xff]  }
  0x13   : > { %v6055_v17 = vld [vmem:[%s6250_s23 + $0x30] sm:$0xff]   ;;  %v6056_v18 = vld [vmem:[%s6250_s23 + $0x260] sm:$0xff]   ;;  %v6057_v19 = vld [vmem:[%s6250_s23 + $0x38] sm:$0xff]  }
  0x14   : > { %v6058_v20 = vld [vmem:[%s6250_s23 + $0x268] sm:$0xff]   ;;  %v6059_v21 = vld [vmem:[%s6250_s23 + $0x40] sm:$0xff]   ;;  %v6060_v22 = vld [vmem:[%s6250_s23 + $0x270] sm:$0xff]  }
  0x15   : > { %5461 = vmatpush3.bf16.msra.mxu0 %v6041_v3  ;;  %6026 = vmatpush3.bf16.msra.mxu1 %v6041_v3  ;;  %v6061_v23 = vld [vmem:[%s6250_s23 + $0x48] sm:$0xff]   ;;  %v6062_v24 = vld [vmem:[%s6250_s23 + $0x278] sm:$0xff]   ;;  %v6063_v25 = vld [vmem:[%s6250_s23 + $0x50] sm:$0xff]  }
  0x16   : > { %5462 = vmatprep.subr.bf16.mxu0 %v6193_v1  ;;  %6023 = vmatprep.subr.bf16.mxu1 %v6193_v1  ;;  %v6064_v26 = vld [vmem:[%s6250_s23 + $0x280] sm:$0xff]   ;;  %v6065_v27 = vld [vmem:[%s6250_s23 + $0x58] sm:$0xff]   ;;  %v6066_v28 = vld [vmem:[%s6250_s23 + $0x288] sm:$0xff]  }
  0x17   : > { %v6067_v29 = vld [vmem:[%s6250_s23 + $0x60] sm:$0xff]   ;;  %v6068_v30 = vld [vmem:[%s6250_s23 + $0x290] sm:$0xff]   ;;  %v6069_v31 = vld [vmem:[%s6250_s23 + $0x68] sm:$0xff]  }
  0x18   : > { %v6070_v32 = vld [vmem:[%s6250_s23 + $0x298] sm:$0xff]   ;;  %v6071_v33 = vld [vmem:[%s6250_s23 + $0x70] sm:$0xff]   ;;  %v6072_v34 = vld [vmem:[%s6250_s23 + $0x2a0] sm:$0xff]  }
  0x19   : > { %5463 = vmatpush3.bf16.msra.mxu0 %v6042_v4  ;;  %6027 = vmatpush3.bf16.msra.mxu1 %v6042_v4  ;;  %v6073_v35 = vld [vmem:[%s6250_s23 + $0x78] sm:$0xff]   ;;  %v6074_v36 = vld [vmem:[%s6250_s23 + $0x2a8] sm:$0xff]   ;;  %v6075_v37 = vld [vmem:[%s6250_s23 + $0x80] sm:$0xff]  }
  0x1a   : > { %v6076_v38 = vld [vmem:[%s6250_s23 + $0x2b0] sm:$0xff]   ;;  %v6077_v39 = vld [vmem:[%s6250_s23 + $0x88] sm:$0xff]   ;;  %v6078_v40 = vld [vmem:[%s6250_s23 + $0x2b8] sm:$0xff]  }
  0x1b   : > { %v6079_v41 = vld [vmem:[%s6250_s23 + $0x90] sm:$0xff]   ;;  %v6080_v42 = vld [vmem:[%s6250_s23 + $0x2c0] sm:$0xff]   ;;  %v6081_v43 = vld [vmem:[%s6250_s23 + $0x98] sm:$0xff]  }
  0x1c   : > { %5465 = vmatmul.mubr.msk.bf16.vlgmr.msra.gmra.mxu0 %vm1181_vm1, %v6043_v5  ;;  %5745 = vmatmul.mubr.msk.bf16.vlgmr.msra.gmra.mxu1 %vm1181_vm1, %v6044_v6  ;;  %v6082_v44 = vld [vmem:[%s6250_s23 + $0x2c8] sm:$0xff]   ;;  %v6083_v45 = vld [vmem:[%s6250_s23 + $0xa0] sm:$0xff]   ;;  %v6084_v46 = vld [vmem:[%s6250_s23 + $0x2d0] sm:$0xff]  }
  0x1d   : > { %5468 = vmatprep.mubr.msk.bf16.mxu0 %vm6194_vm0, %v6193_v1  ;;  %5748 = vmatprep.mubr.msk.bf16.mxu1 %vm6194_vm0, %v6193_v1  ;;  %v6085_v47 = vld [vmem:[%s6250_s23 + $0xa8] sm:$0xff]   ;;  %v6086_v48 = vld [vmem:[%s6250_s23 + $0x2d8] sm:$0xff]   ;;  %v6087_v49 = vld [vmem:[%s6250_s23 + $0xb0] sm:$0xff]  }
  0x1e   : > { %v6088_v50 = vld [vmem:[%s6250_s23 + $0x2e0] sm:$0xff]   ;;  %v6089_v51 = vld [vmem:[%s6250_s23 + $0xb8] sm:$0xff]   ;;  %v6090_v52 = vld [vmem:[%s6250_s23 + $0x2e8] sm:$0xff]  }
  0x1f   : > { %v6091_v53 = vld [vmem:[%s6250_s23 + $0xc0] sm:$0xff]   ;;  %v6092_v54 = vld [vmem:[%s6250_s23 + $0x2f0] sm:$0xff]   ;;  %v6093_v2 = vld [vmem:[%s6250_s23 + $0xc8] sm:$0xff]  }
  0x20   : > { %v6094_v4 = vld [vmem:[%s6250_s23 + $0x2f8] sm:$0xff]  }
  0x24   : > { %5469 = vmatmul.mubr.msk.bf16.gmra.mxu0 %vm1181_vm1, %v6045_v7  ;;  %5749 = vmatmul.mubr.msk.bf16.gmra.mxu1 %vm1181_vm1, %v6046_v8 }
  0x25   : > { %5472 = vmatprep.mubr.msk.bf16.mxu0 %vm6194_vm0, %v6193_v1  ;;  %5752 = vmatprep.mubr.msk.bf16.mxu1 %vm6194_vm0, %v6193_v1 }
  0x2c   : > { %5473 = vmatmul.mubr.msk.bf16.gmra.mxu0 %vm1181_vm1, %v6047_v9  ;;  %5753 = vmatmul.mubr.msk.bf16.gmra.mxu1 %vm1181_vm1, %v6048_v10 }
  0x2d   : > { %5476 = vmatprep.mubr.msk.bf16.mxu0 %vm6194_vm0, %v6193_v1  ;;  %5756 = vmatprep.mubr.msk.bf16.mxu1 %vm6194_vm0, %v6193_v1 }
  0x34   : > { %5477 = vmatmul.mubr.msk.bf16.gmra.mxu0 %vm1181_vm1, %v6049_v11  ;;  %5757 = vmatmul.mubr.msk.bf16.gmra.mxu1 %vm1181_vm1, %v6050_v12 }
  0x35   : > { %5480 = vmatprep.mubr.msk.bf16.mxu0 %vm6194_vm0, %v6193_v1  ;;  %5760 = vmatprep.mubr.msk.bf16.mxu1 %vm6194_vm0, %v6193_v1 }
  0x3c   : > { %5481 = vmatmul.mubr.msk.bf16.gmra.mxu0 %vm1181_vm1, %v6051_v13  ;;  %5761 = vmatmul.mubr.msk.bf16.gmra.mxu1 %vm1181_vm1, %v6052_v14 }
  0x3d   : > { %5484 = vmatprep.mubr.msk.bf16.mxu0 %vm6194_vm0, %v6193_v1  ;;  %5764 = vmatprep.mubr.msk.bf16.mxu1 %vm6194_vm0, %v6193_v1 }
  0x44   : > { %5485 = vmatmul.mubr.msk.bf16.gmra.mxu0 %vm1181_vm1, %v6053_v15  ;;  %5765 = vmatmul.mubr.msk.bf16.gmra.mxu1 %vm1181_vm1, %v6054_v16 }
  0x45   : > { %5488 = vmatprep.mubr.msk.bf16.mxu0 %vm6194_vm0, %v6193_v1  ;;  %5768 = vmatprep.mubr.msk.bf16.mxu1 %vm6194_vm0, %v6193_v1 }
  0x4c   : > { %5489 = vmatmul.mubr.msk.bf16.gmra.mxu0 %vm1181_vm1, %v6055_v17  ;;  %5769 = vmatmul.mubr.msk.bf16.gmra.mxu1 %vm1181_vm1, %v6056_v18 }
  0x4d   : > { %5492 = vmatprep.mubr.msk.bf16.mxu0 %vm6194_vm0, %v6193_v1  ;;  %5772 = vmatprep.mubr.msk.bf16.mxu1 %vm6194_vm0, %v6193_v1 }
  0x54   : > { %5493 = vmatmul.mubr.msk.bf16.gmra.mxu0 %vm1181_vm1, %v6057_v19  ;;  %5773 = vmatmul.mubr.msk.bf16.gmra.mxu1 %vm1181_vm1, %v6058_v20 }
  0x55   : > { %5496 = vmatprep.mubr.msk.bf16.mxu0 %vm6194_vm0, %v6193_v1  ;;  %5776 = vmatprep.mubr.msk.bf16.mxu1 %vm6194_vm0, %v6193_v1 }
  0x5c   : > { %5497 = vmatmul.mubr.msk.bf16.gmra.mxu0 %vm1181_vm1, %v6059_v21  ;;  %5777 = vmatmul.mubr.msk.bf16.gmra.mxu1 %vm1181_vm1, %v6060_v22 }
  0x5d   : > { %5500 = vmatprep.mubr.msk.bf16.mxu0 %vm6194_vm0, %v6193_v1  ;;  %5780 = vmatprep.mubr.msk.bf16.mxu1 %vm6194_vm0, %v6193_v1 }
  0x64   : > { %5501 = vmatmul.mubr.msk.bf16.gmra.mxu0 %vm1181_vm1, %v6061_v23  ;;  %5781 = vmatmul.mubr.msk.bf16.gmra.mxu1 %vm1181_vm1, %v6062_v24  ;;  %v6095_v24 = vld [vmem:[%s6250_s23 + $0xd0] sm:$0xff]  }
  0x65   : > { %5504 = vmatprep.mubr.msk.bf16.mxu0 %vm6194_vm0, %v6193_v1  ;;  %5784 = vmatprep.mubr.msk.bf16.mxu1 %vm6194_vm0, %v6193_v1 }
  0x6c   : > { %5505 = vmatmul.mubr.msk.bf16.gmra.mxu0 %vm1181_vm1, %v6063_v25  ;;  %5785 = vmatmul.mubr.msk.bf16.gmra.mxu1 %vm1181_vm1, %v6064_v26  ;;  %v6096_v26 = vld [vmem:[%s6250_s23 + $0x300] sm:$0xff]  }
  0x6d   : > { %5508 = vmatprep.mubr.msk.bf16.mxu0 %vm6194_vm0, %v6193_v1  ;;  %5788 = vmatprep.mubr.msk.bf16.mxu1 %vm6194_vm0, %v6193_v1 }
  0x74   : > { %5509 = vmatmul.mubr.msk.bf16.gmra.mxu0 %vm1181_vm1, %v6065_v27  ;;  %5789 = vmatmul.mubr.msk.bf16.gmra.mxu1 %vm1181_vm1, %v6066_v28 }
  0x75   : > { %5512 = vmatprep.mubr.msk.bf16.mxu0 %vm6194_vm0, %v6193_v1  ;;  %5792 = vmatprep.mubr.msk.bf16.mxu1 %vm6194_vm0, %v6193_v1 }
  0x7c   : > { %5513 = vmatmul.mubr.msk.bf16.gmra.mxu0 %vm1181_vm1, %v6067_v29  ;;  %5793 = vmatmul.mubr.msk.bf16.gmra.mxu1 %vm1181_vm1, %v6068_v30 }
  0x7d   : > { %5516 = vmatprep.mubr.msk.bf16.mxu0 %vm6194_vm0, %v6193_v1  ;;  %5796 = vmatprep.mubr.msk.bf16.mxu1 %vm6194_vm0, %v6193_v1 }
  0x84   : > { %5517 = vmatmul.mubr.msk.bf16.gmra.mxu0 %vm1181_vm1, %v6069_v31  ;;  %5797 = vmatmul.mubr.msk.bf16.gmra.mxu1 %vm1181_vm1, %v6070_v32 }
  0x85   : > { %5520 = vmatprep.mubr.msk.bf16.mxu0 %vm6194_vm0, %v6193_v1  ;;  %5800 = vmatprep.mubr.msk.bf16.mxu1 %vm6194_vm0, %v6193_v1 }
  0x8c   : > { %5521 = vmatmul.mubr.msk.bf16.gmra.mxu0 %vm1181_vm1, %v6071_v33  ;;  %5801 = vmatmul.mubr.msk.bf16.gmra.mxu1 %vm1181_vm1, %v6072_v34 }
  0x8d   : > { %5524 = vmatprep.mubr.msk.bf16.mxu0 %vm6194_vm0, %v6193_v1  ;;  %5804 = vmatprep.mubr.msk.bf16.mxu1 %vm6194_vm0, %v6193_v1 }
  0x94   : > { %5525 = vmatmul.mubr.msk.bf16.gmra.mxu0 %vm1181_vm1, %v6073_v35  ;;  %5805 = vmatmul.mubr.msk.bf16.gmra.mxu1 %vm1181_vm1, %v6074_v36 }
  0x95   : > { %5528 = vmatprep.mubr.msk.bf16.mxu0 %vm6194_vm0, %v6193_v1  ;;  %5808 = vmatprep.mubr.msk.bf16.mxu1 %vm6194_vm0, %v6193_v1 }
  0x9c   : > { %5529 = vmatmul.mubr.msk.bf16.gmra.mxu0 %vm1181_vm1, %v6075_v37  ;;  %5809 = vmatmul.mubr.msk.bf16.gmra.mxu1 %vm1181_vm1, %v6076_v38 }
  0x9d   : > { %5532 = vmatprep.mubr.msk.bf16.mxu0 %vm6194_vm0, %v6193_v1  ;;  %5812 = vmatprep.mubr.msk.bf16.mxu1 %vm6194_vm0, %v6193_v1 }
  0xa4   : > { %5533 = vmatmul.mubr.msk.bf16.gmra.mxu0 %vm1181_vm1, %v6077_v39  ;;  %5813 = vmatmul.mubr.msk.bf16.gmra.mxu1 %vm1181_vm1, %v6078_v40 }
  0xa5   : > { %5536 = vmatprep.mubr.msk.bf16.mxu0 %vm6194_vm0, %v6193_v1  ;;  %5816 = vmatprep.mubr.msk.bf16.mxu1 %vm6194_vm0, %v6193_v1 }
  0xac   : > { %5537 = vmatmul.mubr.msk.bf16.gmra.mxu0 %vm1181_vm1, %v6079_v41  ;;  %5817 = vmatmul.mubr.msk.bf16.gmra.mxu1 %vm1181_vm1, %v6080_v42 }
  0xad   : > { %5540 = vmatprep.mubr.msk.bf16.mxu0 %vm6194_vm0, %v6193_v1  ;;  %5820 = vmatprep.mubr.msk.bf16.mxu1 %vm6194_vm0, %v6193_v1 }
  0xb4   : > { %5541 = vmatmul.mubr.msk.bf16.gmra.mxu0 %vm1181_vm1, %v6081_v43  ;;  %5821 = vmatmul.mubr.msk.bf16.gmra.mxu1 %vm1181_vm1, %v6082_v44 }
  0xb5   : > { %5544 = vmatprep.mubr.msk.bf16.mxu0 %vm6194_vm0, %v6193_v1  ;;  %5824 = vmatprep.mubr.msk.bf16.mxu1 %vm6194_vm0, %v6193_v1 }
  0xbc   : > { %5545 = vmatmul.mubr.msk.bf16.gmra.mxu0 %vm1181_vm1, %v6083_v45  ;;  %5825 = vmatmul.mubr.msk.bf16.gmra.mxu1 %vm1181_vm1, %v6084_v46  ;;  %v6097_v46 = vld [vmem:[%s6250_s23 + $0xd8] sm:$0xff]  }
  0xbd   : > { %5548 = vmatprep.mubr.msk.bf16.mxu0 %vm6194_vm0, %v6193_v1  ;;  %5828 = vmatprep.mubr.msk.bf16.mxu1 %vm6194_vm0, %v6193_v1 }
  0xc4   : > { %5549 = vmatmul.mubr.msk.bf16.gmra.mxu0 %vm1181_vm1, %v6085_v47  ;;  %5829 = vmatmul.mubr.msk.bf16.gmra.mxu1 %vm1181_vm1, %v6086_v48  ;;  %v6098_v48 = vld [vmem:[%s6250_s23 + $0x308] sm:$0xff]  }
  0xc5   : > { %5552 = vmatprep.mubr.msk.bf16.mxu0 %vm6194_vm0, %v6193_v1  ;;  %5832 = vmatprep.mubr.msk.bf16.mxu1 %vm6194_vm0, %v6193_v1 }
  0xcc   : > { %5553 = vmatmul.mubr.msk.bf16.gmra.mxu0 %vm1181_vm1, %v6087_v49  ;;  %5833 = vmatmul.mubr.msk.bf16.gmra.mxu1 %vm1181_vm1, %v6088_v50 }
  0xcd   : > { %5556 = vmatprep.mubr.msk.bf16.mxu0 %vm6194_vm0, %v6193_v1  ;;  %5836 = vmatprep.mubr.msk.bf16.mxu1 %vm6194_vm0, %v6193_v1 }
  0xd4   : > { %5557 = vmatmul.mubr.msk.bf16.gmra.mxu0 %vm1181_vm1, %v6089_v51  ;;  %5837 = vmatmul.mubr.msk.bf16.gmra.mxu1 %vm1181_vm1, %v6090_v52 }
  0xd5   : > { %5560 = vmatprep.mubr.msk.bf16.mxu0 %vm6194_vm0, %v6193_v1  ;;  %5840 = vmatprep.mubr.msk.bf16.mxu1 %vm6194_vm0, %v6193_v1 }
  0xdc   : > { %v1633_v56 = vpop.f32.mrf.mxu0  ;;  %5561 = vmatmul.mubr.msk.bf16.gmra.mxu0 %vm1181_vm1, %v6091_v53  ;;  %v2193_v57 = vpop.f32.mrf.mxu1  ;;  %5841 = vmatmul.mubr.msk.bf16.gmra.mxu1 %vm1181_vm1, %v6092_v54 }
  0xdd   : > { %v1634_v58 = vadd.f32 %v6454_v55, %v1633_v56  ;;  %v2194_v59 = vadd.f32 %v6454_v55, %v2193_v57  ;;  %5564 = vmatprep.mubr.msk.bf16.mxu0 %vm6194_vm0, %v6193_v1  ;;  %5844 = vmatprep.mubr.msk.bf16.mxu1 %vm6194_vm0, %v6193_v1 }
  0xde   : > { %v5466_v60 = vpop.f32.mrf.mxu0  ;;  %v5746_v61 = vpop.f32.mrf.mxu1 }
  0xdf   : > { %v2743_v62 = vmax.f32 %v1634_v58, 0.0  ;;  %v2883_v63 = vmax.f32 %v2194_v59, 0.0 }
  0xe0   : > { %v1636_v0 = vpop.f32.mrf.mxu0  ;;  %v2196_v3 = vpop.f32.mrf.mxu1 }
  0xe1   : > { %v5036_v5 = vpack.c.bf16 %v2743_v62, %v2743_v62  ;;  %v1637_v6 = vadd.f32 %v6454_v55, %v1636_v0  ;;  %v5176_v7 = vpack.c.bf16 %v2883_v63, %v2883_v63  ;;  %v2197_v8 = vadd.f32 %v6454_v55, %v2196_v3 }
  0xe2   : > { %v5467_v9 = vpop.f32.mrf.mxu0  ;;  %v5747_v10 = vpop.f32.mrf.mxu1 }
  0xe3   : > { %4130 = vst.msk [vmem:[%s6469_s30] sm:$0xf] %vm4129_vm2, %v5036_v5  ;;  %v2744_v11 = vmax.f32 %v1637_v6, 0.0  ;;  %4270 = vst.msk [vmem:[%s6469_s30 + $0x230] sm:$0xf] %vm4129_vm2, %v5176_v7  ;;  %v2884_v12 = vmax.f32 %v2197_v8, 0.0 }
  0xe4   : > { %v1641_v13 = vpop.f32.mrf.mxu0  ;;  %5565 = vmatmul.mubr.msk.bf16.gmra.mxu0 %vm1181_vm1, %v6093_v2  ;;  %v2201_v14 = vpop.f32.mrf.mxu1  ;;  %5845 = vmatmul.mubr.msk.bf16.gmra.mxu1 %vm1181_vm1, %v6094_v4  ;;  %v6099_v6 = vld [vmem:[%s6250_s23 + $0xe0] sm:$0xff]   ;;  %v6100_v8 = vld [vmem:[%s6250_s23 + $0x310] sm:$0xff]  }
  0xe5   : > { %v5037_v15 = vpack.c.bf16 %v2744_v11, %v2744_v11  ;;  %v1642_v16 = vadd.f32 %v6454_v55, %v1641_v13  ;;  %v5177_v17 = vpack.c.bf16 %v2884_v12, %v2884_v12  ;;  %v2202_v18 = vadd.f32 %v6454_v55, %v2201_v14  ;;  %5568 = vmatprep.mubr.msk.bf16.mxu0 %vm6194_vm0, %v6193_v1 }
  0xe6   : > { %v5470_v19 = vpop.f32.mrf.mxu0  ;;  %v5750_v20 = vpop.f32.mrf.mxu1  ;;  %5848 = vmatprep.mubr.msk.bf16.mxu1 %vm6194_vm0, %v6193_v1 }
  0xe7   : > { %4131 = vst.msk [vmem:[%s6469_s30 + $0x4] sm:$0xf] %vm4129_vm2, %v5037_v15  ;;  %v2745_v21 = vmax.f32 %v1642_v16, 0.0  ;;  %4271 = vst.msk [vmem:[%s6469_s30 + $0x234] sm:$0xf] %vm4129_vm2, %v5177_v17  ;;  %v2885_v22 = vmax.f32 %v2202_v18, 0.0 }
  0xe8   : > { %v1644_v23 = vpop.f32.mrf.mxu0  ;;  %v2204_v25 = vpop.f32.mrf.mxu1 }
  0xe9   : > { %v5038_v27 = vpack.c.bf16 %v2745_v21, %v2745_v21  ;;  %v1645_v28 = vadd.f32 %v6454_v55, %v1644_v23  ;;  %v5178_v29 = vpack.c.bf16 %v2885_v22, %v2885_v22  ;;  %v2205_v30 = vadd.f32 %v6454_v55, %v2204_v25 }
  0xea   : > { %v5471_v31 = vpop.f32.mrf.mxu0  ;;  %v5751_v32 = vpop.f32.mrf.mxu1 }
  0xeb   : > { %4132 = vst.msk [vmem:[%s6469_s30 + $0x8] sm:$0xf] %vm4129_vm2, %v5038_v27  ;;  %v2746_v33 = vmax.f32 %v1645_v28, 0.0  ;;  %4272 = vst.msk [vmem:[%s6469_s30 + $0x238] sm:$0xf] %vm4129_vm2, %v5178_v29  ;;  %v2886_v34 = vmax.f32 %v2205_v30, 0.0 }
  0xec   : > { %v1649_v35 = vpop.f32.mrf.mxu0  ;;  %5569 = vmatmul.mubr.msk.bf16.gmra.mxu0 %vm1181_vm1, %v6095_v24  ;;  %v2209_v36 = vpop.f32.mrf.mxu1  ;;  %5849 = vmatmul.mubr.msk.bf16.gmra.mxu1 %vm1181_vm1, %v6096_v26  ;;  %v6101_v28 = vld [vmem:[%s6250_s23 + $0xe8] sm:$0xff]   ;;  %v6102_v30 = vld [vmem:[%s6250_s23 + $0x318] sm:$0xff]  }
  0xed   : > { %v5039_v37 = vpack.c.bf16 %v2746_v33, %v2746_v33  ;;  %v1650_v38 = vadd.f32 %v6454_v55, %v1649_v35  ;;  %v5179_v39 = vpack.c.bf16 %v2886_v34, %v2886_v34  ;;  %v2210_v40 = vadd.f32 %v6454_v55, %v2209_v36  ;;  %5572 = vmatprep.mubr.msk.bf16.mxu0 %vm6194_vm0, %v6193_v1 }
  0xee   : > { %v5474_v41 = vpop.f32.mrf.mxu0  ;;  %v5754_v42 = vpop.f32.mrf.mxu1  ;;  %5852 = vmatprep.mubr.msk.bf16.mxu1 %vm6194_vm0, %v6193_v1 }
  0xef   : > { %4133 = vst.msk [vmem:[%s6469_s30 + $0xc] sm:$0xf] %vm4129_vm2, %v5039_v37  ;;  %v2747_v43 = vmax.f32 %v1650_v38, 0.0  ;;  %4273 = vst.msk [vmem:[%s6469_s30 + $0x23c] sm:$0xf] %vm4129_vm2, %v5179_v39  ;;  %v2887_v44 = vmax.f32 %v2210_v40, 0.0 }
  0xf0   : > { %v1652_v45 = vpop.f32.mrf.mxu0  ;;  %v2212_v47 = vpop.f32.mrf.mxu1 }
  0xf1   : > { %v5040_v49 = vpack.c.bf16 %v2747_v43, %v2747_v43  ;;  %v1653_v50 = vadd.f32 %v6454_v55, %v1652_v45  ;;  %v5180_v51 = vpack.c.bf16 %v2887_v44, %v2887_v44  ;;  %v2213_v52 = vadd.f32 %v6454_v55, %v2212_v47 }
  0xf2   : > { %v5475_v53 = vpop.f32.mrf.mxu0  ;;  %v5755_v54 = vpop.f32.mrf.mxu1 }
  0xf3   : > { %4134 = vst.msk [vmem:[%s6469_s30 + $0x10] sm:$0xf] %vm4129_vm2, %v5040_v49  ;;  %v2748_v56 = vmax.f32 %v1653_v50, 0.0  ;;  %4274 = vst.msk [vmem:[%s6469_s30 + $0x240] sm:$0xf] %vm4129_vm2, %v5180_v51  ;;  %v2888_v57 = vmax.f32 %v2213_v52, 0.0 }
  0xf4   : > { %v1657_v58 = vpop.f32.mrf.mxu0  ;;  %5573 = vmatmul.mubr.msk.bf16.gmra.mxu0 %vm1181_vm1, %v6097_v46  ;;  %v2217_v59 = vpop.f32.mrf.mxu1  ;;  %5853 = vmatmul.mubr.msk.bf16.gmra.mxu1 %vm1181_vm1, %v6098_v48  ;;  %v6103_v50 = vld [vmem:[%s6250_s23 + $0xf0] sm:$0xff]   ;;  %v6104_v52 = vld [vmem:[%s6250_s23 + $0x320] sm:$0xff]  }
  0xf5   : > { %v5041_v60 = vpack.c.bf16 %v2748_v56, %v2748_v56  ;;  %v1658_v61 = vadd.f32 %v6454_v55, %v1657_v58  ;;  %v5181_v62 = vpack.c.bf16 %v2888_v57, %v2888_v57  ;;  %v2218_v63 = vadd.f32 %v6454_v55, %v2217_v59  ;;  %5576 = vmatprep.mubr.msk.bf16.mxu0 %vm6194_vm0, %v6193_v1 }
  0xf6   : > { %v5478_v0 = vpop.f32.mrf.mxu0  ;;  %v5758_v2 = vpop.f32.mrf.mxu1  ;;  %5856 = vmatprep.mubr.msk.bf16.mxu1 %vm6194_vm0, %v6193_v1 }
  0xf7   : > { %4135 = vst.msk [vmem:[%s6469_s30 + $0x14] sm:$0xf] %vm4129_vm2, %v5041_v60  ;;  %v2749_v3 = vmax.f32 %v1658_v61, 0.0  ;;  %4275 = vst.msk [vmem:[%s6469_s30 + $0x244] sm:$0xf] %vm4129_vm2, %v5181_v62  ;;  %v2889_v4 = vmax.f32 %v2218_v63, 0.0 }
  0xf8   : > { %v1660_v5 = vpop.f32.mrf.mxu0  ;;  %v2220_v7 = vpop.f32.mrf.mxu1 }
  0xf9   : > { %v5042_v9 = vpack.c.bf16 %v2749_v3, %v2749_v3  ;;  %v1661_v10 = vadd.f32 %v6454_v55, %v1660_v5  ;;  %v5182_v11 = vpack.c.bf16 %v2889_v4, %v2889_v4  ;;  %v2221_v12 = vadd.f32 %v6454_v55, %v2220_v7 }
  0xfa   : > { %v5479_v13 = vpop.f32.mrf.mxu0  ;;  %v5759_v14 = vpop.f32.mrf.mxu1 }
  0xfb   : > { %4136 = vst.msk [vmem:[%s6469_s30 + $0x18] sm:$0xf] %vm4129_vm2, %v5042_v9  ;;  %v2750_v15 = vmax.f32 %v1661_v10, 0.0  ;;  %4276 = vst.msk [vmem:[%s6469_s30 + $0x248] sm:$0xf] %vm4129_vm2, %v5182_v11  ;;  %v2890_v16 = vmax.f32 %v2221_v12, 0.0 }
  0xfc   : > { %v1665_v17 = vpop.f32.mrf.mxu0  ;;  %5577 = vmatmul.mubr.msk.bf16.gmra.mxu0 %vm1181_vm1, %v6099_v6  ;;  %v2225_v18 = vpop.f32.mrf.mxu1  ;;  %5857 = vmatmul.mubr.msk.bf16.gmra.mxu1 %vm1181_vm1, %v6100_v8  ;;  %v6105_v10 = vld [vmem:[%s6250_s23 + $0xf8] sm:$0xff]   ;;  %v6106_v12 = vld [vmem:[%s6250_s23 + $0x328] sm:$0xff]  }
  0xfd   : > { %v5043_v19 = vpack.c.bf16 %v2750_v15, %v2750_v15  ;;  %v1666_v20 = vadd.f32 %v6454_v55, %v1665_v17  ;;  %v5183_v21 = vpack.c.bf16 %v2890_v16, %v2890_v16  ;;  %v2226_v22 = vadd.f32 %v6454_v55, %v2225_v18  ;;  %5580 = vmatprep.mubr.msk.bf16.mxu0 %vm6194_vm0, %v6193_v1 }
  0xfe   : > { %v5482_v23 = vpop.f32.mrf.mxu0  ;;  %v5762_v24 = vpop.f32.mrf.mxu1  ;;  %5860 = vmatprep.mubr.msk.bf16.mxu1 %vm6194_vm0, %v6193_v1 }
  0xff   : > { %4137 = vst.msk [vmem:[%s6469_s30 + $0x1c] sm:$0xf] %vm4129_vm2, %v5043_v19  ;;  %v2751_v25 = vmax.f32 %v1666_v20, 0.0  ;;  %4277 = vst.msk [vmem:[%s6469_s30 + $0x24c] sm:$0xf] %vm4129_vm2, %v5183_v21  ;;  %v2891_v26 = vmax.f32 %v2226_v22, 0.0 }
 0x100   : > { %v1668_v27 = vpop.f32.mrf.mxu0  ;;  %v2228_v29 = vpop.f32.mrf.mxu1 }
 0x101   : > { %v5044_v31 = vpack.c.bf16 %v2751_v25, %v2751_v25  ;;  %v1669_v32 = vadd.f32 %v6454_v55, %v1668_v27  ;;  %v5184_v33 = vpack.c.bf16 %v2891_v26, %v2891_v26  ;;  %v2229_v34 = vadd.f32 %v6454_v55, %v2228_v29 }
 0x102   : > { %v5483_v35 = vpop.f32.mrf.mxu0  ;;  %v5763_v36 = vpop.f32.mrf.mxu1 }
 0x103   : > { %4138 = vst.msk [vmem:[%s6469_s30 + $0x20] sm:$0xf] %vm4129_vm2, %v5044_v31  ;;  %v2752_v37 = vmax.f32 %v1669_v32, 0.0  ;;  %4278 = vst.msk [vmem:[%s6469_s30 + $0x250] sm:$0xf] %vm4129_vm2, %v5184_v33  ;;  %v2892_v38 = vmax.f32 %v2229_v34, 0.0 }
 0x104   : > { %v1673_v39 = vpop.f32.mrf.mxu0  ;;  %5581 = vmatmul.mubr.msk.bf16.gmra.mxu0 %vm1181_vm1, %v6101_v28  ;;  %v2233_v40 = vpop.f32.mrf.mxu1  ;;  %5861 = vmatmul.mubr.msk.bf16.gmra.mxu1 %vm1181_vm1, %v6102_v30  ;;  %v6107_v32 = vld [vmem:[%s6250_s23 + $0x100] sm:$0xff]   ;;  %v6108_v34 = vld [vmem:[%s6250_s23 + $0x330] sm:$0xff]  }
 0x105   : > { %v5045_v41 = vpack.c.bf16 %v2752_v37, %v2752_v37  ;;  %v1674_v42 = vadd.f32 %v6454_v55, %v1673_v39  ;;  %v5185_v43 = vpack.c.bf16 %v2892_v38, %v2892_v38  ;;  %v2234_v44 = vadd.f32 %v6454_v55, %v2233_v40  ;;  %5584 = vmatprep.mubr.msk.bf16.mxu0 %vm6194_vm0, %v6193_v1 }
 0x106   : > { %v5486_v45 = vpop.f32.mrf.mxu0  ;;  %v5766_v46 = vpop.f32.mrf.mxu1  ;;  %5864 = vmatprep.mubr.msk.bf16.mxu1 %vm6194_vm0, %v6193_v1 }
 0x107   : > { %4139 = vst.msk [vmem:[%s6469_s30 + $0x24] sm:$0xf] %vm4129_vm2, %v5045_v41  ;;  %v2753_v47 = vmax.f32 %v1674_v42, 0.0  ;;  %4279 = vst.msk [vmem:[%s6469_s30 + $0x254] sm:$0xf] %vm4129_vm2, %v5185_v43  ;;  %v2893_v48 = vmax.f32 %v2234_v44, 0.0 }
 0x108   : > { %v1676_v49 = vpop.f32.mrf.mxu0  ;;  %v2236_v51 = vpop.f32.mrf.mxu1 }
 0x109   : > { %v5046_v53 = vpack.c.bf16 %v2753_v47, %v2753_v47  ;;  %v1677_v54 = vadd.f32 %v6454_v55, %v1676_v49  ;;  %v5186_v56 = vpack.c.bf16 %v2893_v48, %v2893_v48  ;;  %v2237_v57 = vadd.f32 %v6454_v55, %v2236_v51 }
 0x10a   : > { %v5487_v58 = vpop.f32.mrf.mxu0  ;;  %v5767_v59 = vpop.f32.mrf.mxu1 }
 0x10b   : > { %4140 = vst.msk [vmem:[%s6469_s30 + $0x28] sm:$0xf] %vm4129_vm2, %v5046_v53  ;;  %v2754_v60 = vmax.f32 %v1677_v54, 0.0  ;;  %4280 = vst.msk [vmem:[%s6469_s30 + $0x258] sm:$0xf] %vm4129_vm2, %v5186_v56  ;;  %v2894_v61 = vmax.f32 %v2237_v57, 0.0 }
 0x10c   : > { %v1681_v62 = vpop.f32.mrf.mxu0  ;;  %5585 = vmatmul.mubr.msk.bf16.gmra.mxu0 %vm1181_vm1, %v6103_v50  ;;  %v2241_v63 = vpop.f32.mrf.mxu1  ;;  %5865 = vmatmul.mubr.msk.bf16.gmra.mxu1 %vm1181_vm1, %v6104_v52  ;;  %v6109_v54 = vld [vmem:[%s6250_s23 + $0x108] sm:$0xff]   ;;  %v6110_v57 = vld [vmem:[%s6250_s23 + $0x338] sm:$0xff]  }
 0x10d   : > { %v5047_v0 = vpack.c.bf16 %v2754_v60, %v2754_v60  ;;  %v1682_v2 = vadd.f32 %v6454_v55, %v1681_v62  ;;  %v5187_v3 = vpack.c.bf16 %v2894_v61, %v2894_v61  ;;  %v2242_v4 = vadd.f32 %v6454_v55, %v2241_v63  ;;  %5588 = vmatprep.mubr.msk.bf16.mxu0 %vm6194_vm0, %v6193_v1 }
 0x10e   : > { %v5490_v5 = vpop.f32.mrf.mxu0  ;;  %v5770_v6 = vpop.f32.mrf.mxu1  ;;  %5868 = vmatprep.mubr.msk.bf16.mxu1 %vm6194_vm0, %v6193_v1 }
 0x10f   : > { %4141 = vst.msk [vmem:[%s6469_s30 + $0x2c] sm:$0xf] %vm4129_vm2, %v5047_v0  ;;  %v2755_v7 = vmax.f32 %v1682_v2, 0.0  ;;  %4281 = vst.msk [vmem:[%s6469_s30 + $0x25c] sm:$0xf] %vm4129_vm2, %v5187_v3  ;;  %v2895_v8 = vmax.f32 %v2242_v4, 0.0 }
 0x110   : > { %v1684_v9 = vpop.f32.mrf.mxu0  ;;  %v2244_v11 = vpop.f32.mrf.mxu1 }
 0x111   : > { %v5048_v13 = vpack.c.bf16 %v2755_v7, %v2755_v7  ;;  %v1685_v14 = vadd.f32 %v6454_v55, %v1684_v9  ;;  %v5188_v15 = vpack.c.bf16 %v2895_v8, %v2895_v8  ;;  %v2245_v16 = vadd.f32 %v6454_v55, %v2244_v11 }
 0x112   : > { %v5491_v17 = vpop.f32.mrf.mxu0  ;;  %v5771_v18 = vpop.f32.mrf.mxu1 }
 0x113   : > { %4142 = vst.msk [vmem:[%s6469_s30 + $0x30] sm:$0xf] %vm4129_vm2, %v5048_v13  ;;  %v2756_v19 = vmax.f32 %v1685_v14, 0.0  ;;  %4282 = vst.msk [vmem:[%s6469_s30 + $0x260] sm:$0xf] %vm4129_vm2, %v5188_v15  ;;  %v2896_v20 = vmax.f32 %v2245_v16, 0.0 }
 0x114   : > { %v1689_v21 = vpop.f32.mrf.mxu0  ;;  %5589 = vmatmul.mubr.msk.bf16.gmra.mxu0 %vm1181_vm1, %v6105_v10  ;;  %v2249_v22 = vpop.f32.mrf.mxu1  ;;  %5869 = vmatmul.mubr.msk.bf16.gmra.mxu1 %vm1181_vm1, %v6106_v12  ;;  %v6111_v14 = vld [vmem:[%s6250_s23 + $0x110] sm:$0xff]   ;;  %v6112_v16 = vld [vmem:[%s6250_s23 + $0x340] sm:$0xff]  }
 0x115   : > { %v5049_v23 = vpack.c.bf16 %v2756_v19, %v2756_v19  ;;  %v1690_v24 = vadd.f32 %v6454_v55, %v1689_v21  ;;  %v5189_v25 = vpack.c.bf16 %v2896_v20, %v2896_v20  ;;  %v2250_v26 = vadd.f32 %v6454_v55, %v2249_v22  ;;  %5592 = vmatprep.mubr.msk.bf16.mxu0 %vm6194_vm0, %v6193_v1 }
 0x116   : > { %v5494_v27 = vpop.f32.mrf.mxu0  ;;  %v5774_v28 = vpop.f32.mrf.mxu1  ;;  %5872 = vmatprep.mubr.msk.bf16.mxu1 %vm6194_vm0, %v6193_v1 }
 0x117   : > { %4143 = vst.msk [vmem:[%s6469_s30 + $0x34] sm:$0xf] %vm4129_vm2, %v5049_v23  ;;  %v2757_v29 = vmax.f32 %v1690_v24, 0.0  ;;  %4283 = vst.msk [vmem:[%s6469_s30 + $0x264] sm:$0xf] %vm4129_vm2, %v5189_v25  ;;  %v2897_v30 = vmax.f32 %v2250_v26, 0.0 }
 0x118   : > { %v1692_v31 = vpop.f32.mrf.mxu0  ;;  %v2252_v33 = vpop.f32.mrf.mxu1 }
 0x119   : > { %v5050_v35 = vpack.c.bf16 %v2757_v29, %v2757_v29  ;;  %v1693_v36 = vadd.f32 %v6454_v55, %v1692_v31  ;;  %v5190_v37 = vpack.c.bf16 %v2897_v30, %v2897_v30  ;;  %v2253_v38 = vadd.f32 %v6454_v55, %v2252_v33 }
 0x11a   : > { %v5495_v39 = vpop.f32.mrf.mxu0  ;;  %v5775_v40 = vpop.f32.mrf.mxu1 }
 0x11b   : > { %4144 = vst.msk [vmem:[%s6469_s30 + $0x38] sm:$0xf] %vm4129_vm2, %v5050_v35  ;;  %v2758_v41 = vmax.f32 %v1693_v36, 0.0  ;;  %4284 = vst.msk [vmem:[%s6469_s30 + $0x268] sm:$0xf] %vm4129_vm2, %v5190_v37  ;;  %v2898_v42 = vmax.f32 %v2253_v38, 0.0 }
 0x11c   : > { %v1697_v43 = vpop.f32.mrf.mxu0  ;;  %5593 = vmatmul.mubr.msk.bf16.gmra.mxu0 %vm1181_vm1, %v6107_v32  ;;  %v2257_v44 = vpop.f32.mrf.mxu1  ;;  %5873 = vmatmul.mubr.msk.bf16.gmra.mxu1 %vm1181_vm1, %v6108_v34  ;;  %v6113_v36 = vld [vmem:[%s6250_s23 + $0x118] sm:$0xff]   ;;  %v6114_v38 = vld [vmem:[%s6250_s23 + $0x348] sm:$0xff]  }
 0x11d   : > { %v5051_v45 = vpack.c.bf16 %v2758_v41, %v2758_v41  ;;  %v1698_v46 = vadd.f32 %v6454_v55, %v1697_v43  ;;  %v5191_v47 = vpack.c.bf16 %v2898_v42, %v2898_v42  ;;  %v2258_v48 = vadd.f32 %v6454_v55, %v2257_v44  ;;  %5596 = vmatprep.mubr.msk.bf16.mxu0 %vm6194_vm0, %v6193_v1 }
 0x11e   : > { %v5498_v49 = vpop.f32.mrf.mxu0  ;;  %v5778_v50 = vpop.f32.mrf.mxu1  ;;  %5876 = vmatprep.mubr.msk.bf16.mxu1 %vm6194_vm0, %v6193_v1 }
 0x11f   : > { %4145 = vst.msk [vmem:[%s6469_s30 + $0x3c] sm:$0xf] %vm4129_vm2, %v5051_v45  ;;  %v2759_v51 = vmax.f32 %v1698_v46, 0.0  ;;  %4285 = vst.msk [vmem:[%s6469_s30 + $0x26c] sm:$0xf] %vm4129_vm2, %v5191_v47  ;;  %v2899_v52 = vmax.f32 %v2258_v48, 0.0 }
 0x120   : > { %v1700_v53 = vpop.f32.mrf.mxu0  ;;  %v2260_v56 = vpop.f32.mrf.mxu1 }
 0x121   : > { %v5052_v58 = vpack.c.bf16 %v2759_v51, %v2759_v51  ;;  %v1701_v59 = vadd.f32 %v6454_v55, %v1700_v53  ;;  %v5192_v60 = vpack.c.bf16 %v2899_v52, %v2899_v52  ;;  %v2261_v61 = vadd.f32 %v6454_v55, %v2260_v56 }
 0x122   : > { %v5499_v62 = vpop.f32.mrf.mxu0  ;;  %v5779_v63 = vpop.f32.mrf.mxu1 }
 0x123   : > { %4146 = vst.msk [vmem:[%s6469_s30 + $0x40] sm:$0xf] %vm4129_vm2, %v5052_v58  ;;  %v2760_v0 = vmax.f32 %v1701_v59, 0.0  ;;  %4286 = vst.msk [vmem:[%s6469_s30 + $0x270] sm:$0xf] %vm4129_vm2, %v5192_v60  ;;  %v2900_v2 = vmax.f32 %v2261_v61, 0.0 }
 0x124   : > { %v1705_v3 = vpop.f32.mrf.mxu0  ;;  %5597 = vmatmul.mubr.msk.bf16.gmra.mxu0 %vm1181_vm1, %v6109_v54  ;;  %v2265_v4 = vpop.f32.mrf.mxu1  ;;  %5877 = vmatmul.mubr.msk.bf16.gmra.mxu1 %vm1181_vm1, %v6110_v57  ;;  %v6115_v59 = vld [vmem:[%s6250_s23 + $0x120] sm:$0xff]   ;;  %v6116_v61 = vld [vmem:[%s6250_s23 + $0x350] sm:$0xff]  }
 0x125   : > { %v5053_v5 = vpack.c.bf16 %v2760_v0, %v2760_v0  ;;  %v1706_v6 = vadd.f32 %v6454_v55, %v1705_v3  ;;  %v5193_v7 = vpack.c.bf16 %v2900_v2, %v2900_v2  ;;  %v2266_v8 = vadd.f32 %v6454_v55, %v2265_v4  ;;  %5600 = vmatprep.mubr.msk.bf16.mxu0 %vm6194_vm0, %v6193_v1 }
 0x126   : > { %v5502_v9 = vpop.f32.mrf.mxu0  ;;  %v5782_v10 = vpop.f32.mrf.mxu1  ;;  %5880 = vmatprep.mubr.msk.bf16.mxu1 %vm6194_vm0, %v6193_v1 }
 0x127   : > { %4147 = vst.msk [vmem:[%s6469_s30 + $0x44] sm:$0xf] %vm4129_vm2, %v5053_v5  ;;  %v2761_v11 = vmax.f32 %v1706_v6, 0.0  ;;  %4287 = vst.msk [vmem:[%s6469_s30 + $0x274] sm:$0xf] %vm4129_vm2, %v5193_v7  ;;  %v2901_v12 = vmax.f32 %v2266_v8, 0.0 }
 0x128   : > { %v1708_v13 = vpop.f32.mrf.mxu0  ;;  %v2268_v15 = vpop.f32.mrf.mxu1 }
 0x129   : > { %v5054_v17 = vpack.c.bf16 %v2761_v11, %v2761_v11  ;;  %v1709_v18 = vadd.f32 %v6454_v55, %v1708_v13  ;;  %v5194_v19 = vpack.c.bf16 %v2901_v12, %v2901_v12  ;;  %v2269_v20 = vadd.f32 %v6454_v55, %v2268_v15 }
 0x12a   : > { %v5503_v21 = vpop.f32.mrf.mxu0  ;;  %v5783_v22 = vpop.f32.mrf.mxu1 }
 0x12b   : > { %4148 = vst.msk [vmem:[%s6469_s30 + $0x48] sm:$0xf] %vm4129_vm2, %v5054_v17  ;;  %v2762_v23 = vmax.f32 %v1709_v18, 0.0  ;;  %4288 = vst.msk [vmem:[%s6469_s30 + $0x278] sm:$0xf] %vm4129_vm2, %v5194_v19  ;;  %v2902_v24 = vmax.f32 %v2269_v20, 0.0 }
 0x12c   : > { %v1713_v25 = vpop.f32.mrf.mxu0  ;;  %5601 = vmatmul.mubr.msk.bf16.gmra.mxu0 %vm1181_vm1, %v6111_v14  ;;  %v2273_v26 = vpop.f32.mrf.mxu1  ;;  %5881 = vmatmul.mubr.msk.bf16.gmra.mxu1 %vm1181_vm1, %v6112_v16  ;;  %v6117_v18 = vld [vmem:[%s6250_s23 + $0x128] sm:$0xff]   ;;  %v6118_v20 = vld [vmem:[%s6250_s23 + $0x358] sm:$0xff]  }
 0x12d   : > { %v5055_v27 = vpack.c.bf16 %v2762_v23, %v2762_v23  ;;  %v1714_v28 = vadd.f32 %v6454_v55, %v1713_v25  ;;  %v5195_v29 = vpack.c.bf16 %v2902_v24, %v2902_v24  ;;  %v2274_v30 = vadd.f32 %v6454_v55, %v2273_v26  ;;  %5604 = vmatprep.mubr.msk.bf16.mxu0 %vm6194_vm0, %v6193_v1 }
 0x12e   : > { %v5506_v31 = vpop.f32.mrf.mxu0  ;;  %v5786_v32 = vpop.f32.mrf.mxu1  ;;  %5884 = vmatprep.mubr.msk.bf16.mxu1 %vm6194_vm0, %v6193_v1 }
 0x12f   : > { %4149 = vst.msk [vmem:[%s6469_s30 + $0x4c] sm:$0xf] %vm4129_vm2, %v5055_v27  ;;  %v2763_v33 = vmax.f32 %v1714_v28, 0.0  ;;  %4289 = vst.msk [vmem:[%s6469_s30 + $0x27c] sm:$0xf] %vm4129_vm2, %v5195_v29  ;;  %v2903_v34 = vmax.f32 %v2274_v30, 0.0 }
 0x130   : > { %v1716_v35 = vpop.f32.mrf.mxu0  ;;  %v2276_v37 = vpop.f32.mrf.mxu1 }
 0x131   : > { %v5056_v39 = vpack.c.bf16 %v2763_v33, %v2763_v33  ;;  %v1717_v40 = vadd.f32 %v6454_v55, %v1716_v35  ;;  %v5196_v41 = vpack.c.bf16 %v2903_v34, %v2903_v34  ;;  %v2277_v42 = vadd.f32 %v6454_v55, %v2276_v37 }
 0x132   : > { %v5507_v43 = vpop.f32.mrf.mxu0  ;;  %v5787_v44 = vpop.f32.mrf.mxu1 }
 0x133   : > { %4150 = vst.msk [vmem:[%s6469_s30 + $0x50] sm:$0xf] %vm4129_vm2, %v5056_v39  ;;  %v2764_v45 = vmax.f32 %v1717_v40, 0.0  ;;  %4290 = vst.msk [vmem:[%s6469_s30 + $0x280] sm:$0xf] %vm4129_vm2, %v5196_v41  ;;  %v2904_v46 = vmax.f32 %v2277_v42, 0.0 }
 0x134   : > { %v1721_v47 = vpop.f32.mrf.mxu0  ;;  %5605 = vmatmul.mubr.msk.bf16.gmra.mxu0 %vm1181_vm1, %v6113_v36  ;;  %v2281_v48 = vpop.f32.mrf.mxu1  ;;  %5885 = vmatmul.mubr.msk.bf16.gmra.mxu1 %vm1181_vm1, %v6114_v38  ;;  %v6119_v40 = vld [vmem:[%s6250_s23 + $0x130] sm:$0xff]   ;;  %v6120_v42 = vld [vmem:[%s6250_s23 + $0x360] sm:$0xff]  }
 0x135   : > { %v5057_v49 = vpack.c.bf16 %v2764_v45, %v2764_v45  ;;  %v1722_v50 = vadd.f32 %v6454_v55, %v1721_v47  ;;  %v5197_v51 = vpack.c.bf16 %v2904_v46, %v2904_v46  ;;  %v2282_v52 = vadd.f32 %v6454_v55, %v2281_v48  ;;  %5608 = vmatprep.mubr.msk.bf16.mxu0 %vm6194_vm0, %v6193_v1 }
 0x136   : > { %v5510_v53 = vpop.f32.mrf.mxu0  ;;  %v5790_v54 = vpop.f32.mrf.mxu1  ;;  %5888 = vmatprep.mubr.msk.bf16.mxu1 %vm6194_vm0, %v6193_v1 }
 0x137   : > { %4151 = vst.msk [vmem:[%s6469_s30 + $0x54] sm:$0xf] %vm4129_vm2, %v5057_v49  ;;  %v2765_v56 = vmax.f32 %v1722_v50, 0.0  ;;  %4291 = vst.msk [vmem:[%s6469_s30 + $0x284] sm:$0xf] %vm4129_vm2, %v5197_v51  ;;  %v2905_v57 = vmax.f32 %v2282_v52, 0.0 }
 0x138   : > { %v1724_v58 = vpop.f32.mrf.mxu0  ;;  %v2284_v60 = vpop.f32.mrf.mxu1 }
 0x139   : > { %v5058_v62 = vpack.c.bf16 %v2765_v56, %v2765_v56  ;;  %v1725_v63 = vadd.f32 %v6454_v55, %v1724_v58  ;;  %v5198_v0 = vpack.c.bf16 %v2905_v57, %v2905_v57  ;;  %v2285_v2 = vadd.f32 %v6454_v55, %v2284_v60 }
 0x13a   : > { %v5511_v3 = vpop.f32.mrf.mxu0  ;;  %v5791_v4 = vpop.f32.mrf.mxu1 }
 0x13b   : > { %4152 = vst.msk [vmem:[%s6469_s30 + $0x58] sm:$0xf] %vm4129_vm2, %v5058_v62  ;;  %v2766_v5 = vmax.f32 %v1725_v63, 0.0  ;;  %4292 = vst.msk [vmem:[%s6469_s30 + $0x288] sm:$0xf] %vm4129_vm2, %v5198_v0  ;;  %v2906_v6 = vmax.f32 %v2285_v2, 0.0 }
 0x13c   : > { %v1729_v7 = vpop.f32.mrf.mxu0  ;;  %5609 = vmatmul.mubr.msk.bf16.gmra.mxu0 %vm1181_vm1, %v6115_v59  ;;  %v2289_v8 = vpop.f32.mrf.mxu1  ;;  %5889 = vmatmul.mubr.msk.bf16.gmra.mxu1 %vm1181_vm1, %v6116_v61  ;;  %v6121_v63 = vld [vmem:[%s6250_s23 + $0x138] sm:$0xff]   ;;  %v6122_v2 = vld [vmem:[%s6250_s23 + $0x368] sm:$0xff]  }
 0x13d   : > { %v5059_v9 = vpack.c.bf16 %v2766_v5, %v2766_v5  ;;  %v1730_v10 = vadd.f32 %v6454_v55, %v1729_v7  ;;  %v5199_v11 = vpack.c.bf16 %v2906_v6, %v2906_v6  ;;  %v2290_v12 = vadd.f32 %v6454_v55, %v2289_v8  ;;  %5612 = vmatprep.mubr.msk.bf16.mxu0 %vm6194_vm0, %v6193_v1 }
 0x13e   : > { %v5514_v13 = vpop.f32.mrf.mxu0  ;;  %v5794_v14 = vpop.f32.mrf.mxu1  ;;  %5892 = vmatprep.mubr.msk.bf16.mxu1 %vm6194_vm0, %v6193_v1 }
 0x13f   : > { %4153 = vst.msk [vmem:[%s6469_s30 + $0x5c] sm:$0xf] %vm4129_vm2, %v5059_v9  ;;  %v2767_v15 = vmax.f32 %v1730_v10, 0.0  ;;  %4293 = vst.msk [vmem:[%s6469_s30 + $0x28c] sm:$0xf] %vm4129_vm2, %v5199_v11  ;;  %v2907_v16 = vmax.f32 %v2290_v12, 0.0 }
 0x140   : > { %v1732_v17 = vpop.f32.mrf.mxu0  ;;  %v2292_v19 = vpop.f32.mrf.mxu1 }
 0x141   : > { %v5060_v21 = vpack.c.bf16 %v2767_v15, %v2767_v15  ;;  %v1733_v22 = vadd.f32 %v6454_v55, %v1732_v17  ;;  %v5200_v23 = vpack.c.bf16 %v2907_v16, %v2907_v16  ;;  %v2293_v24 = vadd.f32 %v6454_v55, %v2292_v19 }
 0x142   : > { %v5515_v25 = vpop.f32.mrf.mxu0  ;;  %v5795_v26 = vpop.f32.mrf.mxu1 }
 0x143   : > { %4154 = vst.msk [vmem:[%s6469_s30 + $0x60] sm:$0xf] %vm4129_vm2, %v5060_v21  ;;  %v2768_v27 = vmax.f32 %v1733_v22, 0.0  ;;  %4294 = vst.msk [vmem:[%s6469_s30 + $0x290] sm:$0xf] %vm4129_vm2, %v5200_v23  ;;  %v2908_v28 = vmax.f32 %v2293_v24, 0.0 }
 0x144   : > { %v1737_v29 = vpop.f32.mrf.mxu0  ;;  %5613 = vmatmul.mubr.msk.bf16.gmra.mxu0 %vm1181_vm1, %v6117_v18  ;;  %v2297_v30 = vpop.f32.mrf.mxu1  ;;  %5893 = vmatmul.mubr.msk.bf16.gmra.mxu1 %vm1181_vm1, %v6118_v20  ;;  %v6123_v22 = vld [vmem:[%s6250_s23 + $0x140] sm:$0xff]   ;;  %v6124_v24 = vld [vmem:[%s6250_s23 + $0x370] sm:$0xff]  }
 0x145   : > { %v5061_v31 = vpack.c.bf16 %v2768_v27, %v2768_v27  ;;  %v1738_v32 = vadd.f32 %v6454_v55, %v1737_v29  ;;  %v5201_v33 = vpack.c.bf16 %v2908_v28, %v2908_v28  ;;  %v2298_v34 = vadd.f32 %v6454_v55, %v2297_v30  ;;  %5616 = vmatprep.mubr.msk.bf16.mxu0 %vm6194_vm0, %v6193_v1 }
 0x146   : > { %v5518_v35 = vpop.f32.mrf.mxu0  ;;  %v5798_v36 = vpop.f32.mrf.mxu1  ;;  %5896 = vmatprep.mubr.msk.bf16.mxu1 %vm6194_vm0, %v6193_v1 }
 0x147   : > { %4155 = vst.msk [vmem:[%s6469_s30 + $0x64] sm:$0xf] %vm4129_vm2, %v5061_v31  ;;  %v2769_v37 = vmax.f32 %v1738_v32, 0.0  ;;  %4295 = vst.msk [vmem:[%s6469_s30 + $0x294] sm:$0xf] %vm4129_vm2, %v5201_v33  ;;  %v2909_v38 = vmax.f32 %v2298_v34, 0.0 }
 0x148   : > { %v1740_v39 = vpop.f32.mrf.mxu0  ;;  %v2300_v41 = vpop.f32.mrf.mxu1 }
 0x149   : > { %v5062_v43 = vpack.c.bf16 %v2769_v37, %v2769_v37  ;;  %v1741_v44 = vadd.f32 %v6454_v55, %v1740_v39  ;;  %v5202_v45 = vpack.c.bf16 %v2909_v38, %v2909_v38  ;;  %v2301_v46 = vadd.f32 %v6454_v55, %v2300_v41 }
 0x14a   : > { %v5519_v47 = vpop.f32.mrf.mxu0  ;;  %v5799_v48 = vpop.f32.mrf.mxu1 }
 0x14b   : > { %4156 = vst.msk [vmem:[%s6469_s30 + $0x68] sm:$0xf] %vm4129_vm2, %v5062_v43  ;;  %v2770_v49 = vmax.f32 %v1741_v44, 0.0  ;;  %4296 = vst.msk [vmem:[%s6469_s30 + $0x298] sm:$0xf] %vm4129_vm2, %v5202_v45  ;;  %v2910_v50 = vmax.f32 %v2301_v46, 0.0 }
 0x14c   : > { %v1745_v51 = vpop.f32.mrf.mxu0  ;;  %5617 = vmatmul.mubr.msk.bf16.gmra.mxu0 %vm1181_vm1, %v6119_v40  ;;  %v2305_v52 = vpop.f32.mrf.mxu1  ;;  %5897 = vmatmul.mubr.msk.bf16.gmra.mxu1 %vm1181_vm1, %v6120_v42  ;;  %v6125_v44 = vld [vmem:[%s6250_s23 + $0x148] sm:$0xff]   ;;  %v6126_v46 = vld [vmem:[%s6250_s23 + $0x378] sm:$0xff]  }
 0x14d   : > { %v5063_v53 = vpack.c.bf16 %v2770_v49, %v2770_v49  ;;  %v1746_v54 = vadd.f32 %v6454_v55, %v1745_v51  ;;  %v5203_v56 = vpack.c.bf16 %v2910_v50, %v2910_v50  ;;  %v2306_v57 = vadd.f32 %v6454_v55, %v2305_v52  ;;  %5620 = vmatprep.mubr.msk.bf16.mxu0 %vm6194_vm0, %v6193_v1 }
 0x14e   : > { %v5522_v58 = vpop.f32.mrf.mxu0  ;;  %v5802_v59 = vpop.f32.mrf.mxu1  ;;  %5900 = vmatprep.mubr.msk.bf16.mxu1 %vm6194_vm0, %v6193_v1 }
 0x14f   : > { %4157 = vst.msk [vmem:[%s6469_s30 + $0x6c] sm:$0xf] %vm4129_vm2, %v5063_v53  ;;  %v2771_v60 = vmax.f32 %v1746_v54, 0.0  ;;  %4297 = vst.msk [vmem:[%s6469_s30 + $0x29c] sm:$0xf] %vm4129_vm2, %v5203_v56  ;;  %v2911_v61 = vmax.f32 %v2306_v57, 0.0 }
 0x150   : > { %v1748_v62 = vpop.f32.mrf.mxu0  ;;  %v2308_v0 = vpop.f32.mrf.mxu1 }
 0x151   : > { %v5064_v3 = vpack.c.bf16 %v2771_v60, %v2771_v60  ;;  %v1749_v4 = vadd.f32 %v6454_v55, %v1748_v62  ;;  %v5204_v5 = vpack.c.bf16 %v2911_v61, %v2911_v61  ;;  %v2309_v6 = vadd.f32 %v6454_v55, %v2308_v0 }
 0x152   : > { %v5523_v7 = vpop.f32.mrf.mxu0  ;;  %v5803_v8 = vpop.f32.mrf.mxu1 }
 0x153   : > { %4158 = vst.msk [vmem:[%s6469_s30 + $0x70] sm:$0xf] %vm4129_vm2, %v5064_v3  ;;  %v2772_v9 = vmax.f32 %v1749_v4, 0.0  ;;  %4298 = vst.msk [vmem:[%s6469_s30 + $0x2a0] sm:$0xf] %vm4129_vm2, %v5204_v5  ;;  %v2912_v10 = vmax.f32 %v2309_v6, 0.0 }
 0x154   : > { %v1753_v11 = vpop.f32.mrf.mxu0  ;;  %5621 = vmatmul.mubr.msk.bf16.gmra.mxu0 %vm1181_vm1, %v6121_v63  ;;  %v2313_v12 = vpop.f32.mrf.mxu1  ;;  %5901 = vmatmul.mubr.msk.bf16.gmra.mxu1 %vm1181_vm1, %v6122_v2  ;;  %v6127_v4 = vld [vmem:[%s6250_s23 + $0x150] sm:$0xff]   ;;  %v6128_v6 = vld [vmem:[%s6250_s23 + $0x380] sm:$0xff]  }
 0x155   : > { %v5065_v13 = vpack.c.bf16 %v2772_v9, %v2772_v9  ;;  %v1754_v14 = vadd.f32 %v6454_v55, %v1753_v11  ;;  %v5205_v15 = vpack.c.bf16 %v2912_v10, %v2912_v10  ;;  %v2314_v16 = vadd.f32 %v6454_v55, %v2313_v12  ;;  %5624 = vmatprep.mubr.msk.bf16.mxu0 %vm6194_vm0, %v6193_v1 }
 0x156   : > { %v5526_v17 = vpop.f32.mrf.mxu0  ;;  %v5806_v18 = vpop.f32.mrf.mxu1  ;;  %5904 = vmatprep.mubr.msk.bf16.mxu1 %vm6194_vm0, %v6193_v1 }
 0x157   : > { %4159 = vst.msk [vmem:[%s6469_s30 + $0x74] sm:$0xf] %vm4129_vm2, %v5065_v13  ;;  %v2773_v19 = vmax.f32 %v1754_v14, 0.0  ;;  %4299 = vst.msk [vmem:[%s6469_s30 + $0x2a4] sm:$0xf] %vm4129_vm2, %v5205_v15  ;;  %v2913_v20 = vmax.f32 %v2314_v16, 0.0 }
 0x158   : > { %v1756_v21 = vpop.f32.mrf.mxu0  ;;  %v2316_v23 = vpop.f32.mrf.mxu1 }
 0x159   : > { %v5066_v25 = vpack.c.bf16 %v2773_v19, %v2773_v19  ;;  %v1757_v26 = vadd.f32 %v6454_v55, %v1756_v21  ;;  %v5206_v27 = vpack.c.bf16 %v2913_v20, %v2913_v20  ;;  %v2317_v28 = vadd.f32 %v6454_v55, %v2316_v23 }
 0x15a   : > { %v5527_v29 = vpop.f32.mrf.mxu0  ;;  %v5807_v30 = vpop.f32.mrf.mxu1 }
 0x15b   : > { %4160 = vst.msk [vmem:[%s6469_s30 + $0x78] sm:$0xf] %vm4129_vm2, %v5066_v25  ;;  %v2774_v31 = vmax.f32 %v1757_v26, 0.0  ;;  %4300 = vst.msk [vmem:[%s6469_s30 + $0x2a8] sm:$0xf] %vm4129_vm2, %v5206_v27  ;;  %v2914_v32 = vmax.f32 %v2317_v28, 0.0 }
 0x15c   : > { %v1761_v33 = vpop.f32.mrf.mxu0  ;;  %5625 = vmatmul.mubr.msk.bf16.gmra.mxu0 %vm1181_vm1, %v6123_v22  ;;  %v2321_v34 = vpop.f32.mrf.mxu1  ;;  %5905 = vmatmul.mubr.msk.bf16.gmra.mxu1 %vm1181_vm1, %v6124_v24  ;;  %v6129_v26 = vld [vmem:[%s6250_s23 + $0x158] sm:$0xff]   ;;  %v6130_v28 = vld [vmem:[%s6250_s23 + $0x388] sm:$0xff]  }
 0x15d   : > { %v5067_v35 = vpack.c.bf16 %v2774_v31, %v2774_v31  ;;  %v1762_v36 = vadd.f32 %v6454_v55, %v1761_v33  ;;  %v5207_v37 = vpack.c.bf16 %v2914_v32, %v2914_v32  ;;  %v2322_v38 = vadd.f32 %v6454_v55, %v2321_v34  ;;  %5628 = vmatprep.mubr.msk.bf16.mxu0 %vm6194_vm0, %v6193_v1 }
 0x15e   : > { %v5530_v39 = vpop.f32.mrf.mxu0  ;;  %v5810_v40 = vpop.f32.mrf.mxu1  ;;  %5908 = vmatprep.mubr.msk.bf16.mxu1 %vm6194_vm0, %v6193_v1 }
 0x15f   : > { %4161 = vst.msk [vmem:[%s6469_s30 + $0x7c] sm:$0xf] %vm4129_vm2, %v5067_v35  ;;  %v2775_v41 = vmax.f32 %v1762_v36, 0.0  ;;  %4301 = vst.msk [vmem:[%s6469_s30 + $0x2ac] sm:$0xf] %vm4129_vm2, %v5207_v37  ;;  %v2915_v42 = vmax.f32 %v2322_v38, 0.0 }
 0x160   : > { %v1764_v43 = vpop.f32.mrf.mxu0  ;;  %v2324_v45 = vpop.f32.mrf.mxu1 }
 0x161   : > { %v5068_v47 = vpack.c.bf16 %v2775_v41, %v2775_v41  ;;  %v1765_v48 = vadd.f32 %v6454_v55, %v1764_v43  ;;  %v5208_v49 = vpack.c.bf16 %v2915_v42, %v2915_v42  ;;  %v2325_v50 = vadd.f32 %v6454_v55, %v2324_v45  ;;  %v6804_v55 = vld [vmem:[%s7672_s2] ss:$0 sm:$0xff] }
 0x162   : > { %v5531_v51 = vpop.f32.mrf.mxu0  ;;  %v5811_v52 = vpop.f32.mrf.mxu1 }
 0x163   : > { %4162 = vst.msk [vmem:[%s6469_s30 + $0x80] sm:$0xf] %vm4129_vm2, %v5068_v47  ;;  %v2776_v53 = vmax.f32 %v1765_v48, 0.0  ;;  %4302 = vst.msk [vmem:[%s6469_s30 + $0x2b0] sm:$0xf] %vm4129_vm2, %v5208_v49  ;;  %v2916_v54 = vmax.f32 %v2325_v50, 0.0 }
 0x164   : > { %v1769_v56 = vpop.f32.mrf.mxu0  ;;  %5629 = vmatmul.mubr.msk.bf16.gmra.mxu0 %vm1181_vm1, %v6125_v44  ;;  %v2329_v57 = vpop.f32.mrf.mxu1  ;;  %5909 = vmatmul.mubr.msk.bf16.gmra.mxu1 %vm1181_vm1, %v6126_v46  ;;  %v6131_v48 = vld [vmem:[%s6250_s23 + $0x160] sm:$0xff]   ;;  %v6132_v50 = vld [vmem:[%s6250_s23 + $0x390] sm:$0xff]  }
 0x165   : > { %v5069_v58 = vpack.c.bf16 %v2776_v53, %v2776_v53  ;;  %v1770_v59 = vadd.f32 %v6804_v55, %v1769_v56  ;;  %v5209_v60 = vpack.c.bf16 %v2916_v54, %v2916_v54  ;;  %v2330_v61 = vadd.f32 %v6804_v55, %v2329_v57  ;;  %5632 = vmatprep.mubr.msk.bf16.mxu0 %vm6194_vm0, %v6193_v1 }
 0x166   : > { %v5534_v62 = vpop.f32.mrf.mxu0  ;;  %v5814_v63 = vpop.f32.mrf.mxu1  ;;  %5912 = vmatprep.mubr.msk.bf16.mxu1 %vm6194_vm0, %v6193_v1 }
 0x167   : > { %4163 = vst.msk [vmem:[%s6469_s30 + $0x84] sm:$0xf] %vm4129_vm2, %v5069_v58  ;;  %v2777_v0 = vmax.f32 %v1770_v59, 0.0  ;;  %4303 = vst.msk [vmem:[%s6469_s30 + $0x2b4] sm:$0xf] %vm4129_vm2, %v5209_v60  ;;  %v2917_v2 = vmax.f32 %v2330_v61, 0.0 }
 0x168   : > { %v1772_v3 = vpop.f32.mrf.mxu0  ;;  %v2332_v5 = vpop.f32.mrf.mxu1 }
 0x169   : > { %v5070_v7 = vpack.c.bf16 %v2777_v0, %v2777_v0  ;;  %v1773_v8 = vadd.f32 %v6804_v55, %v1772_v3  ;;  %v5210_v9 = vpack.c.bf16 %v2917_v2, %v2917_v2  ;;  %v2333_v10 = vadd.f32 %v6804_v55, %v2332_v5 }
 0x16a   : > { %v5535_v11 = vpop.f32.mrf.mxu0  ;;  %v5815_v12 = vpop.f32.mrf.mxu1 }
 0x16b   : > { %4164 = vst.msk [vmem:[%s6469_s30 + $0x88] sm:$0xf] %vm4129_vm2, %v5070_v7  ;;  %v2778_v13 = vmax.f32 %v1773_v8, 0.0  ;;  %4304 = vst.msk [vmem:[%s6469_s30 + $0x2b8] sm:$0xf] %vm4129_vm2, %v5210_v9  ;;  %v2918_v14 = vmax.f32 %v2333_v10, 0.0 }
 0x16c   : > { %v1777_v15 = vpop.f32.mrf.mxu0  ;;  %5633 = vmatmul.mubr.msk.bf16.gmra.mxu0 %vm1181_vm1, %v6127_v4  ;;  %v2337_v16 = vpop.f32.mrf.mxu1  ;;  %5913 = vmatmul.mubr.msk.bf16.gmra.mxu1 %vm1181_vm1, %v6128_v6  ;;  %v6133_v8 = vld [vmem:[%s6250_s23 + $0x168] sm:$0xff]   ;;  %v6134_v10 = vld [vmem:[%s6250_s23 + $0x398] sm:$0xff]  }
 0x16d   : > { %v5071_v17 = vpack.c.bf16 %v2778_v13, %v2778_v13  ;;  %v1778_v18 = vadd.f32 %v6804_v55, %v1777_v15  ;;  %v5211_v19 = vpack.c.bf16 %v2918_v14, %v2918_v14  ;;  %v2338_v20 = vadd.f32 %v6804_v55, %v2337_v16  ;;  %5636 = vmatprep.mubr.msk.bf16.mxu0 %vm6194_vm0, %v6193_v1 }
 0x16e   : > { %v5538_v21 = vpop.f32.mrf.mxu0  ;;  %v5818_v22 = vpop.f32.mrf.mxu1  ;;  %5916 = vmatprep.mubr.msk.bf16.mxu1 %vm6194_vm0, %v6193_v1 }
 0x16f   : > { %4165 = vst.msk [vmem:[%s6469_s30 + $0x8c] sm:$0xf] %vm4129_vm2, %v5071_v17  ;;  %v2779_v23 = vmax.f32 %v1778_v18, 0.0  ;;  %4305 = vst.msk [vmem:[%s6469_s30 + $0x2bc] sm:$0xf] %vm4129_vm2, %v5211_v19  ;;  %v2919_v24 = vmax.f32 %v2338_v20, 0.0 }
 0x170   : > { %v1780_v25 = vpop.f32.mrf.mxu0  ;;  %v2340_v27 = vpop.f32.mrf.mxu1 }
 0x171   : > { %v5072_v29 = vpack.c.bf16 %v2779_v23, %v2779_v23  ;;  %v1781_v30 = vadd.f32 %v6804_v55, %v1780_v25  ;;  %v5212_v31 = vpack.c.bf16 %v2919_v24, %v2919_v24  ;;  %v2341_v32 = vadd.f32 %v6804_v55, %v2340_v27 }
 0x172   : > { %v5539_v33 = vpop.f32.mrf.mxu0  ;;  %v5819_v34 = vpop.f32.mrf.mxu1 }
 0x173   : > { %4166 = vst.msk [vmem:[%s6469_s30 + $0x90] sm:$0xf] %vm4129_vm2, %v5072_v29  ;;  %v2780_v35 = vmax.f32 %v1781_v30, 0.0  ;;  %4306 = vst.msk [vmem:[%s6469_s30 + $0x2c0] sm:$0xf] %vm4129_vm2, %v5212_v31  ;;  %v2920_v36 = vmax.f32 %v2341_v32, 0.0 }
 0x174   : > { %v1785_v37 = vpop.f32.mrf.mxu0  ;;  %5637 = vmatmul.mubr.msk.bf16.gmra.mxu0 %vm1181_vm1, %v6129_v26  ;;  %v2345_v38 = vpop.f32.mrf.mxu1  ;;  %5917 = vmatmul.mubr.msk.bf16.gmra.mxu1 %vm1181_vm1, %v6130_v28  ;;  %v6135_v30 = vld [vmem:[%s6250_s23 + $0x170] sm:$0xff]   ;;  %v6136_v32 = vld [vmem:[%s6250_s23 + $0x3a0] sm:$0xff]  }
 0x175   : > { %v5073_v39 = vpack.c.bf16 %v2780_v35, %v2780_v35  ;;  %v1786_v40 = vadd.f32 %v6804_v55, %v1785_v37  ;;  %v5213_v41 = vpack.c.bf16 %v2920_v36, %v2920_v36  ;;  %v2346_v42 = vadd.f32 %v6804_v55, %v2345_v38  ;;  %5640 = vmatprep.mubr.msk.bf16.mxu0 %vm6194_vm0, %v6193_v1 }
 0x176   : > { %v5542_v43 = vpop.f32.mrf.mxu0  ;;  %v5822_v44 = vpop.f32.mrf.mxu1  ;;  %5920 = vmatprep.mubr.msk.bf16.mxu1 %vm6194_vm0, %v6193_v1 }
 0x177   : > { %4167 = vst.msk [vmem:[%s6469_s30 + $0x94] sm:$0xf] %vm4129_vm2, %v5073_v39  ;;  %v2781_v45 = vmax.f32 %v1786_v40, 0.0  ;;  %4307 = vst.msk [vmem:[%s6469_s30 + $0x2c4] sm:$0xf] %vm4129_vm2, %v5213_v41  ;;  %v2921_v46 = vmax.f32 %v2346_v42, 0.0 }
 0x178   : > { %v1788_v47 = vpop.f32.mrf.mxu0  ;;  %v2348_v49 = vpop.f32.mrf.mxu1 }
 0x179   : > { %v5074_v51 = vpack.c.bf16 %v2781_v45, %v2781_v45  ;;  %v1789_v52 = vadd.f32 %v6804_v55, %v1788_v47  ;;  %v5214_v53 = vpack.c.bf16 %v2921_v46, %v2921_v46  ;;  %v2349_v54 = vadd.f32 %v6804_v55, %v2348_v49 }
 0x17a   : > { %v5543_v56 = vpop.f32.mrf.mxu0  ;;  %v5823_v57 = vpop.f32.mrf.mxu1 }
 0x17b   : > { %4168 = vst.msk [vmem:[%s6469_s30 + $0x98] sm:$0xf] %vm4129_vm2, %v5074_v51  ;;  %v2782_v58 = vmax.f32 %v1789_v52, 0.0  ;;  %4308 = vst.msk [vmem:[%s6469_s30 + $0x2c8] sm:$0xf] %vm4129_vm2, %v5214_v53  ;;  %v2922_v59 = vmax.f32 %v2349_v54, 0.0 }
 0x17c   : > { %v1793_v60 = vpop.f32.mrf.mxu0  ;;  %5641 = vmatmul.mubr.msk.bf16.gmra.mxu0 %vm1181_vm1, %v6131_v48  ;;  %v2353_v61 = vpop.f32.mrf.mxu1  ;;  %5921 = vmatmul.mubr.msk.bf16.gmra.mxu1 %vm1181_vm1, %v6132_v50  ;;  %v6137_v52 = vld [vmem:[%s6250_s23 + $0x178] sm:$0xff]   ;;  %v6138_v54 = vld [vmem:[%s6250_s23 + $0x3a8] sm:$0xff]  }
 0x17d   : > { %v5075_v62 = vpack.c.bf16 %v2782_v58, %v2782_v58  ;;  %v1794_v63 = vadd.f32 %v6804_v55, %v1793_v60  ;;  %v5215_v0 = vpack.c.bf16 %v2922_v59, %v2922_v59  ;;  %v2354_v2 = vadd.f32 %v6804_v55, %v2353_v61  ;;  %5644 = vmatprep.mubr.msk.bf16.mxu0 %vm6194_vm0, %v6193_v1 }
 0x17e   : > { %v5546_v3 = vpop.f32.mrf.mxu0  ;;  %v5826_v4 = vpop.f32.mrf.mxu1  ;;  %5924 = vmatprep.mubr.msk.bf16.mxu1 %vm6194_vm0, %v6193_v1 }
 0x17f   : > { %4169 = vst.msk [vmem:[%s6469_s30 + $0x9c] sm:$0xf] %vm4129_vm2, %v5075_v62  ;;  %v2783_v5 = vmax.f32 %v1794_v63, 0.0  ;;  %4309 = vst.msk [vmem:[%s6469_s30 + $0x2cc] sm:$0xf] %vm4129_vm2, %v5215_v0  ;;  %v2923_v6 = vmax.f32 %v2354_v2, 0.0 }
 0x180   : > { %v1796_v7 = vpop.f32.mrf.mxu0  ;;  %v2356_v9 = vpop.f32.mrf.mxu1 }
 0x181   : > { %v5076_v11 = vpack.c.bf16 %v2783_v5, %v2783_v5  ;;  %v1797_v12 = vadd.f32 %v6804_v55, %v1796_v7  ;;  %v5216_v13 = vpack.c.bf16 %v2923_v6, %v2923_v6  ;;  %v2357_v14 = vadd.f32 %v6804_v55, %v2356_v9 }
 0x182   : > { %v5547_v15 = vpop.f32.mrf.mxu0  ;;  %v5827_v16 = vpop.f32.mrf.mxu1 }
 0x183   : > { %4170 = vst.msk [vmem:[%s6469_s30 + $0xa0] sm:$0xf] %vm4129_vm2, %v5076_v11  ;;  %v2784_v17 = vmax.f32 %v1797_v12, 0.0  ;;  %4310 = vst.msk [vmem:[%s6469_s30 + $0x2d0] sm:$0xf] %vm4129_vm2, %v5216_v13  ;;  %v2924_v18 = vmax.f32 %v2357_v14, 0.0 }
 0x184   : > { %v1801_v19 = vpop.f32.mrf.mxu0  ;;  %5645 = vmatmul.mubr.msk.bf16.gmra.mxu0 %vm1181_vm1, %v6133_v8  ;;  %v2361_v20 = vpop.f32.mrf.mxu1  ;;  %5925 = vmatmul.mubr.msk.bf16.gmra.mxu1 %vm1181_vm1, %v6134_v10  ;;  %v6139_v12 = vld [vmem:[%s6250_s23 + $0x180] sm:$0xff]   ;;  %v6140_v14 = vld [vmem:[%s6250_s23 + $0x3b0] sm:$0xff]  }
 0x185   : > { %v5077_v21 = vpack.c.bf16 %v2784_v17, %v2784_v17  ;;  %v1802_v22 = vadd.f32 %v6804_v55, %v1801_v19  ;;  %v5217_v23 = vpack.c.bf16 %v2924_v18, %v2924_v18  ;;  %v2362_v24 = vadd.f32 %v6804_v55, %v2361_v20  ;;  %5648 = vmatprep.mubr.msk.bf16.mxu0 %vm6194_vm0, %v6193_v1 }
 0x186   : > { %v5550_v25 = vpop.f32.mrf.mxu0  ;;  %v5830_v26 = vpop.f32.mrf.mxu1  ;;  %5928 = vmatprep.mubr.msk.bf16.mxu1 %vm6194_vm0, %v6193_v1 }
 0x187   : > { %4171 = vst.msk [vmem:[%s6469_s30 + $0xa4] sm:$0xf] %vm4129_vm2, %v5077_v21  ;;  %v2785_v27 = vmax.f32 %v1802_v22, 0.0  ;;  %4311 = vst.msk [vmem:[%s6469_s30 + $0x2d4] sm:$0xf] %vm4129_vm2, %v5217_v23  ;;  %v2925_v28 = vmax.f32 %v2362_v24, 0.0 }
 0x188   : > { %v1804_v29 = vpop.f32.mrf.mxu0  ;;  %v2364_v31 = vpop.f32.mrf.mxu1 }
 0x189   : > { %v5078_v33 = vpack.c.bf16 %v2785_v27, %v2785_v27  ;;  %v1805_v34 = vadd.f32 %v6804_v55, %v1804_v29  ;;  %v5218_v35 = vpack.c.bf16 %v2925_v28, %v2925_v28  ;;  %v2365_v36 = vadd.f32 %v6804_v55, %v2364_v31 }
 0x18a   : > { %v5551_v37 = vpop.f32.mrf.mxu0  ;;  %v5831_v38 = vpop.f32.mrf.mxu1 }
 0x18b   : > { %4172 = vst.msk [vmem:[%s6469_s30 + $0xa8] sm:$0xf] %vm4129_vm2, %v5078_v33  ;;  %v2786_v39 = vmax.f32 %v1805_v34, 0.0  ;;  %4312 = vst.msk [vmem:[%s6469_s30 + $0x2d8] sm:$0xf] %vm4129_vm2, %v5218_v35  ;;  %v2926_v40 = vmax.f32 %v2365_v36, 0.0 }
 0x18c   : > { %v1809_v41 = vpop.f32.mrf.mxu0  ;;  %5649 = vmatmul.mubr.msk.bf16.gmra.mxu0 %vm1181_vm1, %v6135_v30  ;;  %v2369_v42 = vpop.f32.mrf.mxu1  ;;  %5929 = vmatmul.mubr.msk.bf16.gmra.mxu1 %vm1181_vm1, %v6136_v32  ;;  %v6141_v34 = vld [vmem:[%s6250_s23 + $0x188] sm:$0xff]   ;;  %v6142_v36 = vld [vmem:[%s6250_s23 + $0x3b8] sm:$0xff]  }
 0x18d   : > { %v5079_v43 = vpack.c.bf16 %v2786_v39, %v2786_v39  ;;  %v1810_v44 = vadd.f32 %v6804_v55, %v1809_v41  ;;  %v5219_v45 = vpack.c.bf16 %v2926_v40, %v2926_v40  ;;  %v2370_v46 = vadd.f32 %v6804_v55, %v2369_v42  ;;  %5652 = vmatprep.mubr.msk.bf16.mxu0 %vm6194_vm0, %v6193_v1 }
 0x18e   : > { %v5554_v47 = vpop.f32.mrf.mxu0  ;;  %v5834_v48 = vpop.f32.mrf.mxu1  ;;  %5932 = vmatprep.mubr.msk.bf16.mxu1 %vm6194_vm0, %v6193_v1 }
 0x18f   : > { %4173 = vst.msk [vmem:[%s6469_s30 + $0xac] sm:$0xf] %vm4129_vm2, %v5079_v43  ;;  %v2787_v49 = vmax.f32 %v1810_v44, 0.0  ;;  %4313 = vst.msk [vmem:[%s6469_s30 + $0x2dc] sm:$0xf] %vm4129_vm2, %v5219_v45  ;;  %v2927_v50 = vmax.f32 %v2370_v46, 0.0 }
 0x190   : > { %v1812_v51 = vpop.f32.mrf.mxu0  ;;  %v2372_v53 = vpop.f32.mrf.mxu1 }
 0x191   : > { %v5080_v56 = vpack.c.bf16 %v2787_v49, %v2787_v49  ;;  %v1813_v57 = vadd.f32 %v6804_v55, %v1812_v51  ;;  %v5220_v58 = vpack.c.bf16 %v2927_v50, %v2927_v50  ;;  %v2373_v59 = vadd.f32 %v6804_v55, %v2372_v53 }
 0x192   : > { %v5555_v60 = vpop.f32.mrf.mxu0  ;;  %v5835_v61 = vpop.f32.mrf.mxu1 }
 0x193   : > { %4174 = vst.msk [vmem:[%s6469_s30 + $0xb0] sm:$0xf] %vm4129_vm2, %v5080_v56  ;;  %v2788_v62 = vmax.f32 %v1813_v57, 0.0  ;;  %4314 = vst.msk [vmem:[%s6469_s30 + $0x2e0] sm:$0xf] %vm4129_vm2, %v5220_v58  ;;  %v2928_v63 = vmax.f32 %v2373_v59, 0.0 }
 0x194   : > { %v1817_v0 = vpop.f32.mrf.mxu0  ;;  %5653 = vmatmul.mubr.msk.bf16.gmra.mxu0 %vm1181_vm1, %v6137_v52  ;;  %v2377_v2 = vpop.f32.mrf.mxu1  ;;  %5933 = vmatmul.mubr.msk.bf16.gmra.mxu1 %vm1181_vm1, %v6138_v54  ;;  %v6143_v57 = vld [vmem:[%s6250_s23 + $0x190] sm:$0xff]   ;;  %v6144_v59 = vld [vmem:[%s6250_s23 + $0x3c0] sm:$0xff]  }
 0x195   : > { %v5081_v3 = vpack.c.bf16 %v2788_v62, %v2788_v62  ;;  %v1818_v4 = vadd.f32 %v6804_v55, %v1817_v0  ;;  %v5221_v5 = vpack.c.bf16 %v2928_v63, %v2928_v63  ;;  %v2378_v6 = vadd.f32 %v6804_v55, %v2377_v2  ;;  %5656 = vmatprep.mubr.msk.bf16.mxu0 %vm6194_vm0, %v6193_v1 }
 0x196   : > { %v5558_v7 = vpop.f32.mrf.mxu0  ;;  %v5838_v8 = vpop.f32.mrf.mxu1  ;;  %5936 = vmatprep.mubr.msk.bf16.mxu1 %vm6194_vm0, %v6193_v1 }
 0x197   : > { %4175 = vst.msk [vmem:[%s6469_s30 + $0xb4] sm:$0xf] %vm4129_vm2, %v5081_v3  ;;  %v2789_v9 = vmax.f32 %v1818_v4, 0.0  ;;  %4315 = vst.msk [vmem:[%s6469_s30 + $0x2e4] sm:$0xf] %vm4129_vm2, %v5221_v5  ;;  %v2929_v10 = vmax.f32 %v2378_v6, 0.0 }
 0x198   : > { %v1820_v11 = vpop.f32.mrf.mxu0  ;;  %v2380_v13 = vpop.f32.mrf.mxu1 }
 0x199   : > { %v5082_v15 = vpack.c.bf16 %v2789_v9, %v2789_v9  ;;  %v1821_v16 = vadd.f32 %v6804_v55, %v1820_v11  ;;  %v5222_v17 = vpack.c.bf16 %v2929_v10, %v2929_v10  ;;  %v2381_v18 = vadd.f32 %v6804_v55, %v2380_v13 }
 0x19a   : > { %v5559_v19 = vpop.f32.mrf.mxu0  ;;  %v5839_v20 = vpop.f32.mrf.mxu1 }
 0x19b   : > { %4176 = vst.msk [vmem:[%s6469_s30 + $0xb8] sm:$0xf] %vm4129_vm2, %v5082_v15  ;;  %v2790_v21 = vmax.f32 %v1821_v16, 0.0  ;;  %4316 = vst.msk [vmem:[%s6469_s30 + $0x2e8] sm:$0xf] %vm4129_vm2, %v5222_v17  ;;  %v2930_v22 = vmax.f32 %v2381_v18, 0.0 }
 0x19c   : > { %v1825_v23 = vpop.f32.mrf.mxu0  ;;  %5657 = vmatmul.mubr.msk.bf16.gmra.mxu0 %vm1181_vm1, %v6139_v12  ;;  %v2385_v24 = vpop.f32.mrf.mxu1  ;;  %5937 = vmatmul.mubr.msk.bf16.gmra.mxu1 %vm1181_vm1, %v6140_v14  ;;  %v6145_v16 = vld [vmem:[%s6250_s23 + $0x198] sm:$0xff]   ;;  %v6146_v18 = vld [vmem:[%s6250_s23 + $0x3c8] sm:$0xff]  }
 0x19d   : > { %v5083_v25 = vpack.c.bf16 %v2790_v21, %v2790_v21  ;;  %v1826_v26 = vadd.f32 %v6804_v55, %v1825_v23  ;;  %v5223_v27 = vpack.c.bf16 %v2930_v22, %v2930_v22  ;;  %v2386_v28 = vadd.f32 %v6804_v55, %v2385_v24  ;;  %5660 = vmatprep.mubr.msk.bf16.mxu0 %vm6194_vm0, %v6193_v1 }
 0x19e   : > { %v5562_v29 = vpop.f32.mrf.mxu0  ;;  %v5842_v30 = vpop.f32.mrf.mxu1  ;;  %5940 = vmatprep.mubr.msk.bf16.mxu1 %vm6194_vm0, %v6193_v1 }
 0x19f   : > { %4177 = vst.msk [vmem:[%s6469_s30 + $0xbc] sm:$0xf] %vm4129_vm2, %v5083_v25  ;;  %v2791_v31 = vmax.f32 %v1826_v26, 0.0  ;;  %4317 = vst.msk [vmem:[%s6469_s30 + $0x2ec] sm:$0xf] %vm4129_vm2, %v5223_v27  ;;  %v2931_v32 = vmax.f32 %v2386_v28, 0.0 }
 0x1a0   : > { %v1828_v33 = vpop.f32.mrf.mxu0  ;;  %v2388_v35 = vpop.f32.mrf.mxu1 }
 0x1a1   : > { %v5084_v37 = vpack.c.bf16 %v2791_v31, %v2791_v31  ;;  %v1829_v38 = vadd.f32 %v6804_v55, %v1828_v33  ;;  %v5224_v39 = vpack.c.bf16 %v2931_v32, %v2931_v32  ;;  %v2389_v40 = vadd.f32 %v6804_v55, %v2388_v35 }
 0x1a2   : > { %v5563_v41 = vpop.f32.mrf.mxu0  ;;  %v5843_v42 = vpop.f32.mrf.mxu1 }
 0x1a3   : > { %4178 = vst.msk [vmem:[%s6469_s30 + $0xc0] sm:$0xf] %vm4129_vm2, %v5084_v37  ;;  %v2792_v43 = vmax.f32 %v1829_v38, 0.0  ;;  %4318 = vst.msk [vmem:[%s6469_s30 + $0x2f0] sm:$0xf] %vm4129_vm2, %v5224_v39  ;;  %v2932_v44 = vmax.f32 %v2389_v40, 0.0 }
 0x1a4   : > { %v1833_v45 = vpop.f32.mrf.mxu0  ;;  %5661 = vmatmul.mubr.msk.bf16.gmra.mxu0 %vm1181_vm1, %v6141_v34  ;;  %v2393_v46 = vpop.f32.mrf.mxu1  ;;  %5941 = vmatmul.mubr.msk.bf16.gmra.mxu1 %vm1181_vm1, %v6142_v36  ;;  %v6147_v38 = vld [vmem:[%s6250_s23 + $0x1a0] sm:$0xff]   ;;  %v6148_v40 = vld [vmem:[%s6250_s23 + $0x3d0] sm:$0xff]  }
 0x1a5   : > { %v5085_v47 = vpack.c.bf16 %v2792_v43, %v2792_v43  ;;  %v1834_v48 = vadd.f32 %v6804_v55, %v1833_v45  ;;  %v5225_v49 = vpack.c.bf16 %v2932_v44, %v2932_v44  ;;  %v2394_v50 = vadd.f32 %v6804_v55, %v2393_v46  ;;  %5664 = vmatprep.mubr.msk.bf16.mxu0 %vm6194_vm0, %v6193_v1 }
 0x1a6   : > { %v5566_v51 = vpop.f32.mrf.mxu0  ;;  %v5846_v52 = vpop.f32.mrf.mxu1  ;;  %5944 = vmatprep.mubr.msk.bf16.mxu1 %vm6194_vm0, %v6193_v1 }
 0x1a7   : > { %4179 = vst.msk [vmem:[%s6469_s30 + $0xc4] sm:$0xf] %vm4129_vm2, %v5085_v47  ;;  %v2793_v53 = vmax.f32 %v1834_v48, 0.0  ;;  %4319 = vst.msk [vmem:[%s6469_s30 + $0x2f4] sm:$0xf] %vm4129_vm2, %v5225_v49  ;;  %v2933_v54 = vmax.f32 %v2394_v50, 0.0 }
 0x1a8   : > { %v1836_v56 = vpop.f32.mrf.mxu0  ;;  %v2396_v58 = vpop.f32.mrf.mxu1 }
 0x1a9   : > { %v5086_v60 = vpack.c.bf16 %v2793_v53, %v2793_v53  ;;  %v1837_v61 = vadd.f32 %v6804_v55, %v1836_v56  ;;  %v5226_v62 = vpack.c.bf16 %v2933_v54, %v2933_v54  ;;  %v2397_v63 = vadd.f32 %v6804_v55, %v2396_v58 }
 0x1aa   : > { %v5567_v0 = vpop.f32.mrf.mxu0  ;;  %v5847_v2 = vpop.f32.mrf.mxu1 }
 0x1ab   : > { %4180 = vst.msk [vmem:[%s6469_s30 + $0xc8] sm:$0xf] %vm4129_vm2, %v5086_v60  ;;  %v2794_v3 = vmax.f32 %v1837_v61, 0.0  ;;  %4320 = vst.msk [vmem:[%s6469_s30 + $0x2f8] sm:$0xf] %vm4129_vm2, %v5226_v62  ;;  %v2934_v4 = vmax.f32 %v2397_v63, 0.0 }
 0x1ac   : > { %v1841_v5 = vpop.f32.mrf.mxu0  ;;  %5665 = vmatmul.mubr.msk.bf16.gmra.mxu0 %vm1181_vm1, %v6143_v57  ;;  %v2401_v6 = vpop.f32.mrf.mxu1  ;;  %5945 = vmatmul.mubr.msk.bf16.gmra.mxu1 %vm1181_vm1, %v6144_v59  ;;  %v6149_v61 = vld [vmem:[%s6250_s23 + $0x1a8] sm:$0xff]   ;;  %v6150_v63 = vld [vmem:[%s6250_s23 + $0x3d8] sm:$0xff]  }
 0x1ad   : > { %v5087_v7 = vpack.c.bf16 %v2794_v3, %v2794_v3  ;;  %v1842_v8 = vadd.f32 %v6804_v55, %v1841_v5  ;;  %v5227_v9 = vpack.c.bf16 %v2934_v4, %v2934_v4  ;;  %v2402_v10 = vadd.f32 %v6804_v55, %v2401_v6  ;;  %5668 = vmatprep.mubr.msk.bf16.mxu0 %vm6194_vm0, %v6193_v1 }
 0x1ae   : > { %v5570_v11 = vpop.f32.mrf.mxu0  ;;  %v5850_v12 = vpop.f32.mrf.mxu1  ;;  %5948 = vmatprep.mubr.msk.bf16.mxu1 %vm6194_vm0, %v6193_v1 }
 0x1af   : > { %4181 = vst.msk [vmem:[%s6469_s30 + $0xcc] sm:$0xf] %vm4129_vm2, %v5087_v7  ;;  %v2795_v13 = vmax.f32 %v1842_v8, 0.0  ;;  %4321 = vst.msk [vmem:[%s6469_s30 + $0x2fc] sm:$0xf] %vm4129_vm2, %v5227_v9  ;;  %v2935_v14 = vmax.f32 %v2402_v10, 0.0 }
 0x1b0   : > { %v1844_v15 = vpop.f32.mrf.mxu0  ;;  %v2404_v17 = vpop.f32.mrf.mxu1 }
 0x1b1   : > { %v5088_v19 = vpack.c.bf16 %v2795_v13, %v2795_v13  ;;  %v1845_v20 = vadd.f32 %v6804_v55, %v1844_v15  ;;  %v5228_v21 = vpack.c.bf16 %v2935_v14, %v2935_v14  ;;  %v2405_v22 = vadd.f32 %v6804_v55, %v2404_v17 }
 0x1b2   : > { %v5571_v23 = vpop.f32.mrf.mxu0  ;;  %v5851_v24 = vpop.f32.mrf.mxu1 }
 0x1b3   : > { %4182 = vst.msk [vmem:[%s6469_s30 + $0xd0] sm:$0xf] %vm4129_vm2, %v5088_v19  ;;  %v2796_v25 = vmax.f32 %v1845_v20, 0.0  ;;  %4322 = vst.msk [vmem:[%s6469_s30 + $0x300] sm:$0xf] %vm4129_vm2, %v5228_v21  ;;  %v2936_v26 = vmax.f32 %v2405_v22, 0.0 }
 0x1b4   : > { %v1849_v27 = vpop.f32.mrf.mxu0  ;;  %5669 = vmatmul.mubr.msk.bf16.gmra.mxu0 %vm1181_vm1, %v6145_v16  ;;  %v2409_v28 = vpop.f32.mrf.mxu1  ;;  %5949 = vmatmul.mubr.msk.bf16.gmra.mxu1 %vm1181_vm1, %v6146_v18  ;;  %v6151_v20 = vld [vmem:[%s6250_s23 + $0x1b0] sm:$0xff]   ;;  %v6152_v22 = vld [vmem:[%s6250_s23 + $0x3e0] sm:$0xff]  }
 0x1b5   : > { %v5089_v29 = vpack.c.bf16 %v2796_v25, %v2796_v25  ;;  %v1850_v30 = vadd.f32 %v6804_v55, %v1849_v27  ;;  %v5229_v31 = vpack.c.bf16 %v2936_v26, %v2936_v26  ;;  %v2410_v32 = vadd.f32 %v6804_v55, %v2409_v28  ;;  %5672 = vmatprep.mubr.msk.bf16.mxu0 %vm6194_vm0, %v6193_v1 }
 0x1b6   : > { %v5574_v33 = vpop.f32.mrf.mxu0  ;;  %v5854_v34 = vpop.f32.mrf.mxu1  ;;  %5952 = vmatprep.mubr.msk.bf16.mxu1 %vm6194_vm0, %v6193_v1 }
 0x1b7   : > { %4183 = vst.msk [vmem:[%s6469_s30 + $0xd4] sm:$0xf] %vm4129_vm2, %v5089_v29  ;;  %v2797_v35 = vmax.f32 %v1850_v30, 0.0  ;;  %4323 = vst.msk [vmem:[%s6469_s30 + $0x304] sm:$0xf] %vm4129_vm2, %v5229_v31  ;;  %v2937_v36 = vmax.f32 %v2410_v32, 0.0 }
 0x1b8   : > { %v1852_v37 = vpop.f32.mrf.mxu0  ;;  %v2412_v39 = vpop.f32.mrf.mxu1 }
 0x1b9   : > { %v5090_v41 = vpack.c.bf16 %v2797_v35, %v2797_v35  ;;  %v1853_v42 = vadd.f32 %v6804_v55, %v1852_v37  ;;  %v5230_v43 = vpack.c.bf16 %v2937_v36, %v2937_v36  ;;  %v2413_v44 = vadd.f32 %v6804_v55, %v2412_v39 }
 0x1ba   : > { %v5575_v45 = vpop.f32.mrf.mxu0  ;;  %v5855_v46 = vpop.f32.mrf.mxu1 }
 0x1bb   : > { %4184 = vst.msk [vmem:[%s6469_s30 + $0xd8] sm:$0xf] %vm4129_vm2, %v5090_v41  ;;  %v2798_v47 = vmax.f32 %v1853_v42, 0.0  ;;  %4324 = vst.msk [vmem:[%s6469_s30 + $0x308] sm:$0xf] %vm4129_vm2, %v5230_v43  ;;  %v2938_v48 = vmax.f32 %v2413_v44, 0.0 }
 0x1bc   : > { %v1857_v49 = vpop.f32.mrf.mxu0  ;;  %5673 = vmatmul.mubr.msk.bf16.gmra.mxu0 %vm1181_vm1, %v6147_v38  ;;  %v2417_v50 = vpop.f32.mrf.mxu1  ;;  %5953 = vmatmul.mubr.msk.bf16.gmra.mxu1 %vm1181_vm1, %v6148_v40  ;;  %v6153_v42 = vld [vmem:[%s6250_s23 + $0x1b8] sm:$0xff]   ;;  %v6154_v44 = vld [vmem:[%s6250_s23 + $0x3e8] sm:$0xff]  }
 0x1bd   : > { %v5091_v51 = vpack.c.bf16 %v2798_v47, %v2798_v47  ;;  %v1858_v52 = vadd.f32 %v6804_v55, %v1857_v49  ;;  %v5231_v53 = vpack.c.bf16 %v2938_v48, %v2938_v48  ;;  %v2418_v54 = vadd.f32 %v6804_v55, %v2417_v50  ;;  %5676 = vmatprep.mubr.msk.bf16.mxu0 %vm6194_vm0, %v6193_v1 }
 0x1be   : > { %v5578_v56 = vpop.f32.mrf.mxu0  ;;  %v5858_v57 = vpop.f32.mrf.mxu1  ;;  %5956 = vmatprep.mubr.msk.bf16.mxu1 %vm6194_vm0, %v6193_v1 }
 0x1bf   : > { %4185 = vst.msk [vmem:[%s6469_s30 + $0xdc] sm:$0xf] %vm4129_vm2, %v5091_v51  ;;  %v2799_v58 = vmax.f32 %v1858_v52, 0.0  ;;  %4325 = vst.msk [vmem:[%s6469_s30 + $0x30c] sm:$0xf] %vm4129_vm2, %v5231_v53  ;;  %v2939_v59 = vmax.f32 %v2418_v54, 0.0 }
 0x1c0   : > { %v1860_v60 = vpop.f32.mrf.mxu0  ;;  %v2420_v62 = vpop.f32.mrf.mxu1 }
 0x1c1   : > { %v5092_v0 = vpack.c.bf16 %v2799_v58, %v2799_v58  ;;  %v1861_v2 = vadd.f32 %v6804_v55, %v1860_v60  ;;  %v5232_v3 = vpack.c.bf16 %v2939_v59, %v2939_v59  ;;  %v2421_v4 = vadd.f32 %v6804_v55, %v2420_v62 }
 0x1c2   : > { %v5579_v5 = vpop.f32.mrf.mxu0  ;;  %v5859_v6 = vpop.f32.mrf.mxu1 }
 0x1c3   : > { %4186 = vst.msk [vmem:[%s6469_s30 + $0xe0] sm:$0xf] %vm4129_vm2, %v5092_v0  ;;  %v2800_v7 = vmax.f32 %v1861_v2, 0.0  ;;  %4326 = vst.msk [vmem:[%s6469_s30 + $0x310] sm:$0xf] %vm4129_vm2, %v5232_v3  ;;  %v2940_v8 = vmax.f32 %v2421_v4, 0.0 }
 0x1c4   : > { %v1865_v9 = vpop.f32.mrf.mxu0  ;;  %5677 = vmatmul.mubr.msk.bf16.gmra.mxu0 %vm1181_vm1, %v6149_v61  ;;  %v2425_v10 = vpop.f32.mrf.mxu1  ;;  %5957 = vmatmul.mubr.msk.bf16.gmra.mxu1 %vm1181_vm1, %v6150_v63  ;;  %v6155_v2 = vld [vmem:[%s6250_s23 + $0x1c0] sm:$0xff]   ;;  %v6156_v4 = vld [vmem:[%s6250_s23 + $0x3f0] sm:$0xff]  }
 0x1c5   : > { %v5093_v11 = vpack.c.bf16 %v2800_v7, %v2800_v7  ;;  %v1866_v12 = vadd.f32 %v6804_v55, %v1865_v9  ;;  %v5233_v13 = vpack.c.bf16 %v2940_v8, %v2940_v8  ;;  %v2426_v14 = vadd.f32 %v6804_v55, %v2425_v10  ;;  %5680 = vmatprep.mubr.msk.bf16.mxu0 %vm6194_vm0, %v6193_v1 }
 0x1c6   : > { %v5582_v15 = vpop.f32.mrf.mxu0  ;;  %v5862_v16 = vpop.f32.mrf.mxu1  ;;  %5960 = vmatprep.mubr.msk.bf16.mxu1 %vm6194_vm0, %v6193_v1 }
 0x1c7   : > { %4187 = vst.msk [vmem:[%s6469_s30 + $0xe4] sm:$0xf] %vm4129_vm2, %v5093_v11  ;;  %v2801_v17 = vmax.f32 %v1866_v12, 0.0  ;;  %4327 = vst.msk [vmem:[%s6469_s30 + $0x314] sm:$0xf] %vm4129_vm2, %v5233_v13  ;;  %v2941_v18 = vmax.f32 %v2426_v14, 0.0 }
 0x1c8   : > { %v1868_v19 = vpop.f32.mrf.mxu0  ;;  %v2428_v21 = vpop.f32.mrf.mxu1 }
 0x1c9   : > { %v5094_v23 = vpack.c.bf16 %v2801_v17, %v2801_v17  ;;  %v1869_v24 = vadd.f32 %v6804_v55, %v1868_v19  ;;  %v5234_v25 = vpack.c.bf16 %v2941_v18, %v2941_v18  ;;  %v2429_v26 = vadd.f32 %v6804_v55, %v2428_v21 }
 0x1ca   : > { %v5583_v27 = vpop.f32.mrf.mxu0  ;;  %v5863_v28 = vpop.f32.mrf.mxu1 }
 0x1cb   : > { %4188 = vst.msk [vmem:[%s6469_s30 + $0xe8] sm:$0xf] %vm4129_vm2, %v5094_v23  ;;  %v2802_v29 = vmax.f32 %v1869_v24, 0.0  ;;  %4328 = vst.msk [vmem:[%s6469_s30 + $0x318] sm:$0xf] %vm4129_vm2, %v5234_v25  ;;  %v2942_v30 = vmax.f32 %v2429_v26, 0.0 }
 0x1cc   : > { %v1873_v31 = vpop.f32.mrf.mxu0  ;;  %5681 = vmatmul.mubr.msk.bf16.gmra.mxu0 %vm1181_vm1, %v6151_v20  ;;  %v2433_v32 = vpop.f32.mrf.mxu1  ;;  %5961 = vmatmul.mubr.msk.bf16.gmra.mxu1 %vm1181_vm1, %v6152_v22  ;;  %v6157_v24 = vld [vmem:[%s6250_s23 + $0x1c8] sm:$0xff]   ;;  %v6158_v26 = vld [vmem:[%s6250_s23 + $0x3f8] sm:$0xff]  }
 0x1cd   : > { %v5095_v33 = vpack.c.bf16 %v2802_v29, %v2802_v29  ;;  %v1874_v34 = vadd.f32 %v6804_v55, %v1873_v31  ;;  %v5235_v35 = vpack.c.bf16 %v2942_v30, %v2942_v30  ;;  %v2434_v36 = vadd.f32 %v6804_v55, %v2433_v32  ;;  %5684 = vmatprep.mubr.msk.bf16.mxu0 %vm6194_vm0, %v6193_v1 }
 0x1ce   : > { %v5586_v37 = vpop.f32.mrf.mxu0  ;;  %v5866_v38 = vpop.f32.mrf.mxu1  ;;  %5964 = vmatprep.mubr.msk.bf16.mxu1 %vm6194_vm0, %v6193_v1 }
 0x1cf   : > { %4189 = vst.msk [vmem:[%s6469_s30 + $0xec] sm:$0xf] %vm4129_vm2, %v5095_v33  ;;  %v2803_v39 = vmax.f32 %v1874_v34, 0.0  ;;  %4329 = vst.msk [vmem:[%s6469_s30 + $0x31c] sm:$0xf] %vm4129_vm2, %v5235_v35  ;;  %v2943_v40 = vmax.f32 %v2434_v36, 0.0 }
 0x1d0   : > { %v1876_v41 = vpop.f32.mrf.mxu0  ;;  %v2436_v43 = vpop.f32.mrf.mxu1 }
 0x1d1   : > { %v5096_v45 = vpack.c.bf16 %v2803_v39, %v2803_v39  ;;  %v1877_v46 = vadd.f32 %v6804_v55, %v1876_v41  ;;  %v5236_v47 = vpack.c.bf16 %v2943_v40, %v2943_v40  ;;  %v2437_v48 = vadd.f32 %v6804_v55, %v2436_v43 }
 0x1d2   : > { %v5587_v49 = vpop.f32.mrf.mxu0  ;;  %v5867_v50 = vpop.f32.mrf.mxu1 }
 0x1d3   : > { %4190 = vst.msk [vmem:[%s6469_s30 + $0xf0] sm:$0xf] %vm4129_vm2, %v5096_v45  ;;  %v2804_v51 = vmax.f32 %v1877_v46, 0.0  ;;  %4330 = vst.msk [vmem:[%s6469_s30 + $0x320] sm:$0xf] %vm4129_vm2, %v5236_v47  ;;  %v2944_v52 = vmax.f32 %v2437_v48, 0.0 }
 0x1d4   : > { %v1881_v53 = vpop.f32.mrf.mxu0  ;;  %5685 = vmatmul.mubr.msk.bf16.gmra.mxu0 %vm1181_vm1, %v6153_v42  ;;  %v2441_v54 = vpop.f32.mrf.mxu1  ;;  %5965 = vmatmul.mubr.msk.bf16.gmra.mxu1 %vm1181_vm1, %v6154_v44  ;;  %v6159_v46 = vld [vmem:[%s6250_s23 + $0x1d0] sm:$0xff]   ;;  %v6160_v48 = vld [vmem:[%s6250_s23 + $0x400] sm:$0xff]  }
 0x1d5   : > { %v5097_v56 = vpack.c.bf16 %v2804_v51, %v2804_v51  ;;  %v1882_v57 = vadd.f32 %v6804_v55, %v1881_v53  ;;  %v5237_v58 = vpack.c.bf16 %v2944_v52, %v2944_v52  ;;  %v2442_v59 = vadd.f32 %v6804_v55, %v2441_v54  ;;  %5688 = vmatprep.mubr.msk.bf16.mxu0 %vm6194_vm0, %v6193_v1 }
 0x1d6   : > { %v5590_v60 = vpop.f32.mrf.mxu0  ;;  %v5870_v61 = vpop.f32.mrf.mxu1  ;;  %5968 = vmatprep.mubr.msk.bf16.mxu1 %vm6194_vm0, %v6193_v1 }
 0x1d7   : > { %4191 = vst.msk [vmem:[%s6469_s30 + $0xf4] sm:$0xf] %vm4129_vm2, %v5097_v56  ;;  %v2805_v62 = vmax.f32 %v1882_v57, 0.0  ;;  %4331 = vst.msk [vmem:[%s6469_s30 + $0x324] sm:$0xf] %vm4129_vm2, %v5237_v58  ;;  %v2945_v63 = vmax.f32 %v2442_v59, 0.0 }
 0x1d8   : > { %v1884_v0 = vpop.f32.mrf.mxu0  ;;  %v2444_v3 = vpop.f32.mrf.mxu1 }
 0x1d9   : > { %v5098_v5 = vpack.c.bf16 %v2805_v62, %v2805_v62  ;;  %v1885_v6 = vadd.f32 %v6804_v55, %v1884_v0  ;;  %v5238_v7 = vpack.c.bf16 %v2945_v63, %v2945_v63  ;;  %v2445_v8 = vadd.f32 %v6804_v55, %v2444_v3  ;;  %v7150_v63 = vld [vmem:[%s7672_s2] ss:$0 sm:$0xff] }
 0x1da   : > { %v5591_v9 = vpop.f32.mrf.mxu0  ;;  %v5871_v10 = vpop.f32.mrf.mxu1 }
 0x1db   : > { %4192 = vst.msk [vmem:[%s6469_s30 + $0xf8] sm:$0xf] %vm4129_vm2, %v5098_v5  ;;  %v2806_v11 = vmax.f32 %v1885_v6, 0.0  ;;  %4332 = vst.msk [vmem:[%s6469_s30 + $0x328] sm:$0xf] %vm4129_vm2, %v5238_v7  ;;  %v2946_v12 = vmax.f32 %v2445_v8, 0.0 }
 0x1dc   : > { %v1889_v13 = vpop.f32.mrf.mxu0  ;;  %5689 = vmatmul.mubr.msk.bf16.gmra.mxu0 %vm1181_vm1, %v6155_v2  ;;  %v2449_v14 = vpop.f32.mrf.mxu1  ;;  %5969 = vmatmul.mubr.msk.bf16.gmra.mxu1 %vm1181_vm1, %v6156_v4  ;;  %v6161_v6 = vld [vmem:[%s6250_s23 + $0x1d8] sm:$0xff]   ;;  %v6162_v8 = vld [vmem:[%s6250_s23 + $0x408] sm:$0xff]  }
 0x1dd   : > { %v5099_v15 = vpack.c.bf16 %v2806_v11, %v2806_v11  ;;  %v1890_v16 = vadd.f32 %v6804_v55, %v1889_v13  ;;  %v5239_v17 = vpack.c.bf16 %v2946_v12, %v2946_v12  ;;  %v2450_v18 = vadd.f32 %v6804_v55, %v2449_v14  ;;  %5692 = vmatprep.mubr.msk.bf16.mxu0 %vm6194_vm0, %v6193_v1 }
 0x1de   : > { %v5594_v19 = vpop.f32.mrf.mxu0  ;;  %v5874_v20 = vpop.f32.mrf.mxu1  ;;  %5972 = vmatprep.mubr.msk.bf16.mxu1 %vm6194_vm0, %v6193_v1 }
 0x1df   : > { %4193 = vst.msk [vmem:[%s6469_s30 + $0xfc] sm:$0xf] %vm4129_vm2, %v5099_v15  ;;  %v2807_v21 = vmax.f32 %v1890_v16, 0.0  ;;  %4333 = vst.msk [vmem:[%s6469_s30 + $0x32c] sm:$0xf] %vm4129_vm2, %v5239_v17  ;;  %v2947_v22 = vmax.f32 %v2450_v18, 0.0 }
 0x1e0   : > { %v1892_v23 = vpop.f32.mrf.mxu0  ;;  %v2452_v25 = vpop.f32.mrf.mxu1 }
 0x1e1   : > { %v5100_v27 = vpack.c.bf16 %v2807_v21, %v2807_v21  ;;  %v1893_v28 = vadd.f32 %v6804_v55, %v1892_v23  ;;  %v5240_v29 = vpack.c.bf16 %v2947_v22, %v2947_v22  ;;  %v2453_v30 = vadd.f32 %v6804_v55, %v2452_v25 }
 0x1e2   : > { %v5595_v31 = vpop.f32.mrf.mxu0  ;;  %v5875_v32 = vpop.f32.mrf.mxu1 }
 0x1e3   : > { %4194 = vst.msk [vmem:[%s6469_s30 + $0x100] sm:$0xf] %vm4129_vm2, %v5100_v27  ;;  %v2808_v33 = vmax.f32 %v1893_v28, 0.0  ;;  %4334 = vst.msk [vmem:[%s6469_s30 + $0x330] sm:$0xf] %vm4129_vm2, %v5240_v29  ;;  %v2948_v34 = vmax.f32 %v2453_v30, 0.0 }
 0x1e4   : > { %v1897_v35 = vpop.f32.mrf.mxu0  ;;  %5693 = vmatmul.mubr.msk.bf16.gmra.mxu0 %vm1181_vm1, %v6157_v24  ;;  %v2457_v36 = vpop.f32.mrf.mxu1  ;;  %5973 = vmatmul.mubr.msk.bf16.gmra.mxu1 %vm1181_vm1, %v6158_v26  ;;  %v6163_v28 = vld [vmem:[%s6250_s23 + $0x1e0] sm:$0xff]   ;;  %v6164_v30 = vld [vmem:[%s6250_s23 + $0x410] sm:$0xff]  }
 0x1e5   : > { %v5101_v37 = vpack.c.bf16 %v2808_v33, %v2808_v33  ;;  %v1898_v38 = vadd.f32 %v6804_v55, %v1897_v35  ;;  %v5241_v39 = vpack.c.bf16 %v2948_v34, %v2948_v34  ;;  %v2458_v40 = vadd.f32 %v6804_v55, %v2457_v36  ;;  %5696 = vmatprep.mubr.msk.bf16.mxu0 %vm6194_vm0, %v6193_v1 }
 0x1e6   : > { %v5598_v41 = vpop.f32.mrf.mxu0  ;;  %v5878_v42 = vpop.f32.mrf.mxu1  ;;  %5976 = vmatprep.mubr.msk.bf16.mxu1 %vm6194_vm0, %v6193_v1 }
 0x1e7   : > { %4195 = vst.msk [vmem:[%s6469_s30 + $0x104] sm:$0xf] %vm4129_vm2, %v5101_v37  ;;  %v2809_v43 = vmax.f32 %v1898_v38, 0.0  ;;  %4335 = vst.msk [vmem:[%s6469_s30 + $0x334] sm:$0xf] %vm4129_vm2, %v5241_v39  ;;  %v2949_v44 = vmax.f32 %v2458_v40, 0.0 }
 0x1e8   : > { %v1900_v45 = vpop.f32.mrf.mxu0  ;;  %v2460_v47 = vpop.f32.mrf.mxu1 }
 0x1e9   : > { %v5102_v49 = vpack.c.bf16 %v2809_v43, %v2809_v43  ;;  %v1901_v50 = vadd.f32 %v6804_v55, %v1900_v45  ;;  %v5242_v51 = vpack.c.bf16 %v2949_v44, %v2949_v44  ;;  %v2461_v52 = vadd.f32 %v6804_v55, %v2460_v47 }
 0x1ea   : > { %v5599_v53 = vpop.f32.mrf.mxu0  ;;  %v5879_v54 = vpop.f32.mrf.mxu1 }
 0x1eb   : > { %4196 = vst.msk [vmem:[%s6469_s30 + $0x108] sm:$0xf] %vm4129_vm2, %v5102_v49  ;;  %v2810_v56 = vmax.f32 %v1901_v50, 0.0  ;;  %4336 = vst.msk [vmem:[%s6469_s30 + $0x338] sm:$0xf] %vm4129_vm2, %v5242_v51  ;;  %v2950_v57 = vmax.f32 %v2461_v52, 0.0 }
 0x1ec   : > { %v1905_v58 = vpop.f32.mrf.mxu0  ;;  %5697 = vmatmul.mubr.msk.bf16.gmra.mxu0 %vm1181_vm1, %v6159_v46  ;;  %v2465_v59 = vpop.f32.mrf.mxu1  ;;  %5977 = vmatmul.mubr.msk.bf16.gmra.mxu1 %vm1181_vm1, %v6160_v48  ;;  %v6165_v50 = vld [vmem:[%s6250_s23 + $0x1e8] sm:$0xff]   ;;  %v6166_v52 = vld [vmem:[%s6250_s23 + $0x418] sm:$0xff]  }
 0x1ed   : > { %v5103_v60 = vpack.c.bf16 %v2810_v56, %v2810_v56  ;;  %v1906_v61 = vadd.f32 %v6804_v55, %v1905_v58  ;;  %v5243_v62 = vpack.c.bf16 %v2950_v57, %v2950_v57  ;;  %v2466_v0 = vadd.f32 %v7150_v63, %v2465_v59  ;;  %5700 = vmatprep.mubr.msk.bf16.mxu0 %vm6194_vm0, %v6193_v1 }
 0x1ee   : > { %v5602_v2 = vpop.f32.mrf.mxu0  ;;  %v5882_v3 = vpop.f32.mrf.mxu1  ;;  %5980 = vmatprep.mubr.msk.bf16.mxu1 %vm6194_vm0, %v6193_v1 }
 0x1ef   : > { %4197 = vst.msk [vmem:[%s6469_s30 + $0x10c] sm:$0xf] %vm4129_vm2, %v5103_v60  ;;  %v2811_v55 = vmax.f32 %v1906_v61, 0.0  ;;  %4337 = vst.msk [vmem:[%s6469_s30 + $0x33c] sm:$0xf] %vm4129_vm2, %v5243_v62  ;;  %v2951_v4 = vmax.f32 %v2466_v0, 0.0 }
 0x1f0   : > { %v1908_v5 = vpop.f32.mrf.mxu0  ;;  %v2468_v7 = vpop.f32.mrf.mxu1 }
 0x1f1   : > { %v5104_v9 = vpack.c.bf16 %v2811_v55, %v2811_v55  ;;  %v1909_v10 = vadd.f32 %v7150_v63, %v1908_v5  ;;  %v5244_v11 = vpack.c.bf16 %v2951_v4, %v2951_v4  ;;  %v2469_v12 = vadd.f32 %v7150_v63, %v2468_v7 }
 0x1f2   : > { %v5603_v13 = vpop.f32.mrf.mxu0  ;;  %v5883_v14 = vpop.f32.mrf.mxu1 }
 0x1f3   : > { %4198 = vst.msk [vmem:[%s6469_s30 + $0x110] sm:$0xf] %vm4129_vm2, %v5104_v9  ;;  %v2812_v15 = vmax.f32 %v1909_v10, 0.0  ;;  %4338 = vst.msk [vmem:[%s6469_s30 + $0x340] sm:$0xf] %vm4129_vm2, %v5244_v11  ;;  %v2952_v16 = vmax.f32 %v2469_v12, 0.0 }
 0x1f4   : > { %v1913_v17 = vpop.f32.mrf.mxu0  ;;  %5701 = vmatmul.mubr.msk.bf16.gmra.mxu0 %vm1181_vm1, %v6161_v6  ;;  %v2473_v18 = vpop.f32.mrf.mxu1  ;;  %5981 = vmatmul.mubr.msk.bf16.gmra.mxu1 %vm1181_vm1, %v6162_v8  ;;  %v6167_v10 = vld [vmem:[%s6250_s23 + $0x1f0] sm:$0xff]   ;;  %v6168_v12 = vld [vmem:[%s6250_s23 + $0x420] sm:$0xff]  }
 0x1f5   : > { %v5105_v19 = vpack.c.bf16 %v2812_v15, %v2812_v15  ;;  %v1914_v20 = vadd.f32 %v7150_v63, %v1913_v17  ;;  %v5245_v21 = vpack.c.bf16 %v2952_v16, %v2952_v16  ;;  %v2474_v22 = vadd.f32 %v7150_v63, %v2473_v18  ;;  %5704 = vmatprep.mubr.msk.bf16.mxu0 %vm6194_vm0, %v6193_v1 }
 0x1f6   : > { %v5606_v23 = vpop.f32.mrf.mxu0  ;;  %v5886_v24 = vpop.f32.mrf.mxu1  ;;  %5984 = vmatprep.mubr.msk.bf16.mxu1 %vm6194_vm0, %v6193_v1 }
 0x1f7   : > { %4199 = vst.msk [vmem:[%s6469_s30 + $0x114] sm:$0xf] %vm4129_vm2, %v5105_v19  ;;  %v2813_v25 = vmax.f32 %v1914_v20, 0.0  ;;  %4339 = vst.msk [vmem:[%s6469_s30 + $0x344] sm:$0xf] %vm4129_vm2, %v5245_v21  ;;  %v2953_v26 = vmax.f32 %v2474_v22, 0.0 }
 0x1f8   : > { %v1916_v27 = vpop.f32.mrf.mxu0  ;;  %v2476_v29 = vpop.f32.mrf.mxu1 }
 0x1f9   : > { %v5106_v31 = vpack.c.bf16 %v2813_v25, %v2813_v25  ;;  %v1917_v32 = vadd.f32 %v7150_v63, %v1916_v27  ;;  %v5246_v33 = vpack.c.bf16 %v2953_v26, %v2953_v26  ;;  %v2477_v34 = vadd.f32 %v7150_v63, %v2476_v29 }
 0x1fa   : > { %v5607_v35 = vpop.f32.mrf.mxu0  ;;  %v5887_v36 = vpop.f32.mrf.mxu1 }
 0x1fb   : > { %4200 = vst.msk [vmem:[%s6469_s30 + $0x118] sm:$0xf] %vm4129_vm2, %v5106_v31  ;;  %v2814_v37 = vmax.f32 %v1917_v32, 0.0  ;;  %4340 = vst.msk [vmem:[%s6469_s30 + $0x348] sm:$0xf] %vm4129_vm2, %v5246_v33  ;;  %v2954_v38 = vmax.f32 %v2477_v34, 0.0 }
 0x1fc   : > { %v1921_v39 = vpop.f32.mrf.mxu0  ;;  %5705 = vmatmul.mubr.msk.bf16.gmra.mxu0 %vm1181_vm1, %v6163_v28  ;;  %v2481_v40 = vpop.f32.mrf.mxu1  ;;  %5985 = vmatmul.mubr.msk.bf16.gmra.mxu1 %vm1181_vm1, %v6164_v30  ;;  %v6169_v32 = vld [vmem:[%s6250_s23 + $0x1f8] sm:$0xff]   ;;  %v6170_v34 = vld [vmem:[%s6250_s23 + $0x428] sm:$0xff]  }
 0x1fd   : > { %v5107_v41 = vpack.c.bf16 %v2814_v37, %v2814_v37  ;;  %v1922_v42 = vadd.f32 %v7150_v63, %v1921_v39  ;;  %v5247_v43 = vpack.c.bf16 %v2954_v38, %v2954_v38  ;;  %v2482_v44 = vadd.f32 %v7150_v63, %v2481_v40  ;;  %5708 = vmatprep.mubr.msk.bf16.mxu0 %vm6194_vm0, %v6193_v1 }
 0x1fe   : > { %v5610_v45 = vpop.f32.mrf.mxu0  ;;  %v5890_v46 = vpop.f32.mrf.mxu1  ;;  %5988 = vmatprep.mubr.msk.bf16.mxu1 %vm6194_vm0, %v6193_v1 }
 0x1ff   : > { %4201 = vst.msk [vmem:[%s6469_s30 + $0x11c] sm:$0xf] %vm4129_vm2, %v5107_v41  ;;  %v2815_v47 = vmax.f32 %v1922_v42, 0.0  ;;  %4341 = vst.msk [vmem:[%s6469_s30 + $0x34c] sm:$0xf] %vm4129_vm2, %v5247_v43  ;;  %v2955_v48 = vmax.f32 %v2482_v44, 0.0 }
 0x200   : > { %v1924_v49 = vpop.f32.mrf.mxu0  ;;  %v2484_v51 = vpop.f32.mrf.mxu1 }
 0x201   : > { %v5108_v53 = vpack.c.bf16 %v2815_v47, %v2815_v47  ;;  %v1925_v54 = vadd.f32 %v7150_v63, %v1924_v49  ;;  %v5248_v56 = vpack.c.bf16 %v2955_v48, %v2955_v48  ;;  %v2485_v57 = vadd.f32 %v7150_v63, %v2484_v51 }
 0x202   : > { %v5611_v58 = vpop.f32.mrf.mxu0  ;;  %v5891_v59 = vpop.f32.mrf.mxu1 }
 0x203   : > { %4202 = vst.msk [vmem:[%s6469_s30 + $0x120] sm:$0xf] %vm4129_vm2, %v5108_v53  ;;  %v2816_v60 = vmax.f32 %v1925_v54, 0.0  ;;  %4342 = vst.msk [vmem:[%s6469_s30 + $0x350] sm:$0xf] %vm4129_vm2, %v5248_v56  ;;  %v2956_v61 = vmax.f32 %v2485_v57, 0.0 }
 0x204   : > { %v1929_v62 = vpop.f32.mrf.mxu0  ;;  %5709 = vmatmul.mubr.msk.bf16.gmra.mxu0 %vm1181_vm1, %v6165_v50  ;;  %v2489_v0 = vpop.f32.mrf.mxu1  ;;  %5989 = vmatmul.mubr.msk.bf16.gmra.mxu1 %vm1181_vm1, %v6166_v52  ;;  %v6171_v54 = vld [vmem:[%s6250_s23 + $0x200] sm:$0xff]   ;;  %v6172_v57 = vld [vmem:[%s6250_s23 + $0x430] sm:$0xff]  }
 0x205   : > { %v5109_v2 = vpack.c.bf16 %v2816_v60, %v2816_v60  ;;  %v1930_v3 = vadd.f32 %v7150_v63, %v1929_v62  ;;  %v5249_v55 = vpack.c.bf16 %v2956_v61, %v2956_v61  ;;  %v2490_v4 = vadd.f32 %v7150_v63, %v2489_v0  ;;  %5712 = vmatprep.mubr.msk.bf16.mxu0 %vm6194_vm0, %v6193_v1 }
 0x206   : > { %v5614_v5 = vpop.f32.mrf.mxu0  ;;  %v5894_v6 = vpop.f32.mrf.mxu1  ;;  %5992 = vmatprep.mubr.msk.bf16.mxu1 %vm6194_vm0, %v6193_v1 }
 0x207   : > { %4203 = vst.msk [vmem:[%s6469_s30 + $0x124] sm:$0xf] %vm4129_vm2, %v5109_v2  ;;  %v2817_v7 = vmax.f32 %v1930_v3, 0.0  ;;  %4343 = vst.msk [vmem:[%s6469_s30 + $0x354] sm:$0xf] %vm4129_vm2, %v5249_v55  ;;  %v2957_v8 = vmax.f32 %v2490_v4, 0.0 }
 0x208   : > { %v1932_v9 = vpop.f32.mrf.mxu0  ;;  %v2492_v11 = vpop.f32.mrf.mxu1 }
 0x209   : > { %v5110_v13 = vpack.c.bf16 %v2817_v7, %v2817_v7  ;;  %v1933_v14 = vadd.f32 %v7150_v63, %v1932_v9  ;;  %v5250_v15 = vpack.c.bf16 %v2957_v8, %v2957_v8  ;;  %v2493_v16 = vadd.f32 %v7150_v63, %v2492_v11 }
 0x20a   : > { %v5615_v17 = vpop.f32.mrf.mxu0  ;;  %v5895_v18 = vpop.f32.mrf.mxu1 }
 0x20b   : > { %4204 = vst.msk [vmem:[%s6469_s30 + $0x128] sm:$0xf] %vm4129_vm2, %v5110_v13  ;;  %v2818_v19 = vmax.f32 %v1933_v14, 0.0  ;;  %4344 = vst.msk [vmem:[%s6469_s30 + $0x358] sm:$0xf] %vm4129_vm2, %v5250_v15  ;;  %v2958_v20 = vmax.f32 %v2493_v16, 0.0 }
 0x20c   : > { %v1937_v21 = vpop.f32.mrf.mxu0  ;;  %5713 = vmatmul.mubr.msk.bf16.gmra.mxu0 %vm1181_vm1, %v6167_v10  ;;  %v2497_v22 = vpop.f32.mrf.mxu1  ;;  %5993 = vmatmul.mubr.msk.bf16.gmra.mxu1 %vm1181_vm1, %v6168_v12  ;;  %v6173_v14 = vld [vmem:[%s6250_s23 + $0x208] sm:$0xff]   ;;  %v6174_v16 = vld [vmem:[%s6250_s23 + $0x438] sm:$0xff]  }
 0x20d   : > { %v5111_v23 = vpack.c.bf16 %v2818_v19, %v2818_v19  ;;  %v1938_v24 = vadd.f32 %v7150_v63, %v1937_v21  ;;  %v5251_v25 = vpack.c.bf16 %v2958_v20, %v2958_v20  ;;  %v2498_v26 = vadd.f32 %v7150_v63, %v2497_v22  ;;  %5716 = vmatprep.mubr.msk.bf16.mxu0 %vm6194_vm0, %v6193_v1 }
 0x20e   : > { %v5618_v27 = vpop.f32.mrf.mxu0  ;;  %v5898_v28 = vpop.f32.mrf.mxu1  ;;  %5996 = vmatprep.mubr.msk.bf16.mxu1 %vm6194_vm0, %v6193_v1 }
 0x20f   : > { %4205 = vst.msk [vmem:[%s6469_s30 + $0x12c] sm:$0xf] %vm4129_vm2, %v5111_v23  ;;  %v2819_v29 = vmax.f32 %v1938_v24, 0.0  ;;  %4345 = vst.msk [vmem:[%s6469_s30 + $0x35c] sm:$0xf] %vm4129_vm2, %v5251_v25  ;;  %v2959_v30 = vmax.f32 %v2498_v26, 0.0 }
 0x210   : > { %v1940_v31 = vpop.f32.mrf.mxu0  ;;  %v2500_v33 = vpop.f32.mrf.mxu1 }
 0x211   : > { %v5112_v35 = vpack.c.bf16 %v2819_v29, %v2819_v29  ;;  %v1941_v36 = vadd.f32 %v7150_v63, %v1940_v31  ;;  %v5252_v37 = vpack.c.bf16 %v2959_v30, %v2959_v30  ;;  %v2501_v38 = vadd.f32 %v7150_v63, %v2500_v33 }
 0x212   : > { %v5619_v39 = vpop.f32.mrf.mxu0  ;;  %v5899_v40 = vpop.f32.mrf.mxu1 }
 0x213   : > { %4206 = vst.msk [vmem:[%s6469_s30 + $0x130] sm:$0xf] %vm4129_vm2, %v5112_v35  ;;  %v2820_v41 = vmax.f32 %v1941_v36, 0.0  ;;  %4346 = vst.msk [vmem:[%s6469_s30 + $0x360] sm:$0xf] %vm4129_vm2, %v5252_v37  ;;  %v2960_v42 = vmax.f32 %v2501_v38, 0.0 }
 0x214   : > { %v1945_v43 = vpop.f32.mrf.mxu0  ;;  %5717 = vmatmul.mubr.msk.bf16.gmra.mxu0 %vm1181_vm1, %v6169_v32  ;;  %v2505_v44 = vpop.f32.mrf.mxu1  ;;  %5997 = vmatmul.mubr.msk.bf16.gmra.mxu1 %vm1181_vm1, %v6170_v34  ;;  %v6175_v36 = vld [vmem:[%s6250_s23 + $0x210] sm:$0xff]   ;;  %v6176_v38 = vld [vmem:[%s6250_s23 + $0x440] sm:$0xff]  }
 0x215   : > { %v5113_v45 = vpack.c.bf16 %v2820_v41, %v2820_v41  ;;  %v1946_v46 = vadd.f32 %v7150_v63, %v1945_v43  ;;  %v5253_v47 = vpack.c.bf16 %v2960_v42, %v2960_v42  ;;  %v2506_v48 = vadd.f32 %v7150_v63, %v2505_v44  ;;  %5720 = vmatprep.mubr.msk.bf16.mxu0 %vm6194_vm0, %v6193_v1 }
 0x216   : > { %v5622_v49 = vpop.f32.mrf.mxu0  ;;  %v5902_v50 = vpop.f32.mrf.mxu1  ;;  %6000 = vmatprep.mubr.msk.bf16.mxu1 %vm6194_vm0, %v6193_v1 }
 0x217   : > { %4207 = vst.msk [vmem:[%s6469_s30 + $0x134] sm:$0xf] %vm4129_vm2, %v5113_v45  ;;  %v2821_v51 = vmax.f32 %v1946_v46, 0.0  ;;  %4347 = vst.msk [vmem:[%s6469_s30 + $0x364] sm:$0xf] %vm4129_vm2, %v5253_v47  ;;  %v2961_v52 = vmax.f32 %v2506_v48, 0.0 }
 0x218   : > { %v1948_v53 = vpop.f32.mrf.mxu0  ;;  %v2508_v56 = vpop.f32.mrf.mxu1 }
 0x219   : > { %v5114_v58 = vpack.c.bf16 %v2821_v51, %v2821_v51  ;;  %v1949_v59 = vadd.f32 %v7150_v63, %v1948_v53  ;;  %v5254_v60 = vpack.c.bf16 %v2961_v52, %v2961_v52  ;;  %v2509_v61 = vadd.f32 %v7150_v63, %v2508_v56 }
 0x21a   : > { %v5623_v62 = vpop.f32.mrf.mxu0  ;;  %v5903_v0 = vpop.f32.mrf.mxu1 }
 0x21b   : > { %4208 = vst.msk [vmem:[%s6469_s30 + $0x138] sm:$0xf] %vm4129_vm2, %v5114_v58  ;;  %v2822_v2 = vmax.f32 %v1949_v59, 0.0  ;;  %4348 = vst.msk [vmem:[%s6469_s30 + $0x368] sm:$0xf] %vm4129_vm2, %v5254_v60  ;;  %v2962_v3 = vmax.f32 %v2509_v61, 0.0 }
 0x21c   : > { %v1953_v55 = vpop.f32.mrf.mxu0  ;;  %5721 = vmatmul.mubr.msk.bf16.gmra.mxu0 %vm1181_vm1, %v6171_v54  ;;  %v2513_v4 = vpop.f32.mrf.mxu1  ;;  %6001 = vmatmul.mubr.msk.bf16.gmra.mxu1 %vm1181_vm1, %v6172_v57  ;;  %v6177_v59 = vld [vmem:[%s6250_s23 + $0x218] sm:$0xff]   ;;  %v6178_v61 = vld [vmem:[%s6250_s23 + $0x448] sm:$0xff]  }
 0x21d   : > { %v5115_v5 = vpack.c.bf16 %v2822_v2, %v2822_v2  ;;  %v1954_v6 = vadd.f32 %v7150_v63, %v1953_v55  ;;  %v5255_v7 = vpack.c.bf16 %v2962_v3, %v2962_v3  ;;  %v2514_v8 = vadd.f32 %v7150_v63, %v2513_v4  ;;  %5724 = vmatprep.mubr.msk.bf16.mxu0 %vm6194_vm0, %v6193_v1 }
 0x21e   : > { %v5626_v9 = vpop.f32.mrf.mxu0  ;;  %v5906_v10 = vpop.f32.mrf.mxu1  ;;  %6004 = vmatprep.mubr.msk.bf16.mxu1 %vm6194_vm0, %v6193_v1 }
 0x21f   : > { %4209 = vst.msk [vmem:[%s6469_s30 + $0x13c] sm:$0xf] %vm4129_vm2, %v5115_v5  ;;  %v2823_v11 = vmax.f32 %v1954_v6, 0.0  ;;  %4349 = vst.msk [vmem:[%s6469_s30 + $0x36c] sm:$0xf] %vm4129_vm2, %v5255_v7  ;;  %v2963_v12 = vmax.f32 %v2514_v8, 0.0 }
 0x220   : > { %v1956_v13 = vpop.f32.mrf.mxu0  ;;  %v2516_v15 = vpop.f32.mrf.mxu1 }
 0x221   : > { %v5116_v17 = vpack.c.bf16 %v2823_v11, %v2823_v11  ;;  %v1957_v18 = vadd.f32 %v7150_v63, %v1956_v13  ;;  %v5256_v19 = vpack.c.bf16 %v2963_v12, %v2963_v12  ;;  %v2517_v20 = vadd.f32 %v7150_v63, %v2516_v15 }
 0x222   : > { %v5627_v21 = vpop.f32.mrf.mxu0  ;;  %v5907_v22 = vpop.f32.mrf.mxu1 }
 0x223   : > { %4210 = vst.msk [vmem:[%s6469_s30 + $0x140] sm:$0xf] %vm4129_vm2, %v5116_v17  ;;  %v2824_v23 = vmax.f32 %v1957_v18, 0.0  ;;  %4350 = vst.msk [vmem:[%s6469_s30 + $0x370] sm:$0xf] %vm4129_vm2, %v5256_v19  ;;  %v2964_v24 = vmax.f32 %v2517_v20, 0.0 }
 0x224   : > { %v1961_v25 = vpop.f32.mrf.mxu0  ;;  %5725 = vmatmul.mubr.msk.bf16.gmra.mxu0 %vm1181_vm1, %v6173_v14  ;;  %v2521_v26 = vpop.f32.mrf.mxu1  ;;  %6005 = vmatmul.mubr.msk.bf16.gmra.mxu1 %vm1181_vm1, %v6174_v16  ;;  %v6179_v18 = vld [vmem:[%s6250_s23 + $0x220] sm:$0xff]   ;;  %v6180_v20 = vld [vmem:[%s6250_s23 + $0x450] ss:$0 sps:$4 sm:$0x11]  }
 0x225   : > { %v5117_v27 = vpack.c.bf16 %v2824_v23, %v2824_v23  ;;  %v1962_v28 = vadd.f32 %v7150_v63, %v1961_v25  ;;  %v5257_v29 = vpack.c.bf16 %v2964_v24, %v2964_v24  ;;  %v2522_v30 = vadd.f32 %v7150_v63, %v2521_v26  ;;  %5728 = vmatprep.mubr.msk.bf16.mxu0 %vm6194_vm0, %v6193_v1 }
 0x226   : > { %v5630_v31 = vpop.f32.mrf.mxu0  ;;  %v5910_v32 = vpop.f32.mrf.mxu1  ;;  %6008 = vmatprep.mubr.msk.bf16.mxu1 %vm6194_vm0, %v6193_v1 }
 0x227   : > { %4211 = vst.msk [vmem:[%s6469_s30 + $0x144] sm:$0xf] %vm4129_vm2, %v5117_v27  ;;  %v2825_v33 = vmax.f32 %v1962_v28, 0.0  ;;  %4351 = vst.msk [vmem:[%s6469_s30 + $0x374] sm:$0xf] %vm4129_vm2, %v5257_v29  ;;  %v2965_v34 = vmax.f32 %v2522_v30, 0.0 }
 0x228   : > { %v1964_v35 = vpop.f32.mrf.mxu0  ;;  %v2524_v37 = vpop.f32.mrf.mxu1 }
 0x229   : > { %v5118_v39 = vpack.c.bf16 %v2825_v33, %v2825_v33  ;;  %v1965_v40 = vadd.f32 %v7150_v63, %v1964_v35  ;;  %v5258_v41 = vpack.c.bf16 %v2965_v34, %v2965_v34  ;;  %v2525_v42 = vadd.f32 %v7150_v63, %v2524_v37 }
 0x22a   : > { %v5631_v43 = vpop.f32.mrf.mxu0  ;;  %v5911_v44 = vpop.f32.mrf.mxu1 }
 0x22b   : > { %4212 = vst.msk [vmem:[%s6469_s30 + $0x148] sm:$0xf] %vm4129_vm2, %v5118_v39  ;;  %v2826_v45 = vmax.f32 %v1965_v40, 0.0  ;;  %4352 = vst.msk [vmem:[%s6469_s30 + $0x378] sm:$0xf] %vm4129_vm2, %v5258_v41  ;;  %v2966_v46 = vmax.f32 %v2525_v42, 0.0 }
 0x22c   : > { %v1969_v47 = vpop.f32.mrf.mxu0  ;;  %5729 = vmatmul.mubr.msk.bf16.gmra.mxu0 %vm1181_vm1, %v6175_v36  ;;  %v2529_v48 = vpop.f32.mrf.mxu1  ;;  %6009 = vmatmul.mubr.msk.bf16.gmra.mxu1 %vm1181_vm1, %v6176_v38  ;;  %v6181_v40 = vld [vmem:[%s6250_s23 + $0x228] sm:$0xff]  }
 0x22d   : > { %v5119_v49 = vpack.c.bf16 %v2826_v45, %v2826_v45  ;;  %v1970_v50 = vadd.f32 %v7150_v63, %v1969_v47  ;;  %v5259_v51 = vpack.c.bf16 %v2966_v46, %v2966_v46  ;;  %v2530_v52 = vadd.f32 %v7150_v63, %v2529_v48  ;;  %5732 = vmatprep.mubr.msk.bf16.mxu0 %vm6194_vm0, %v6193_v1 }
 0x22e   : > { %v5634_v53 = vpop.f32.mrf.mxu0  ;;  %v5914_v54 = vpop.f32.mrf.mxu1  ;;  %6012 = vmatprep.mubr.msk.bf16.mxu1 %vm6194_vm0, %v6193_v1 }
 0x22f   : > { %4213 = vst.msk [vmem:[%s6469_s30 + $0x14c] sm:$0xf] %vm4129_vm2, %v5119_v49  ;;  %v2827_v56 = vmax.f32 %v1970_v50, 0.0  ;;  %4353 = vst.msk [vmem:[%s6469_s30 + $0x37c] sm:$0xf] %vm4129_vm2, %v5259_v51  ;;  %v2967_v57 = vmax.f32 %v2530_v52, 0.0 }
 0x230   : > { %v1972_v58 = vpop.f32.mrf.mxu0  ;;  %v2532_v60 = vpop.f32.mrf.mxu1 }
 0x231   : > { %v5120_v62 = vpack.c.bf16 %v2827_v56, %v2827_v56  ;;  %v1973_v0 = vadd.f32 %v7150_v63, %v1972_v58  ;;  %v5260_v2 = vpack.c.bf16 %v2967_v57, %v2967_v57  ;;  %v2533_v3 = vadd.f32 %v7150_v63, %v2532_v60 }
 0x232   : > { %v5635_v55 = vpop.f32.mrf.mxu0  ;;  %v5915_v4 = vpop.f32.mrf.mxu1 }
 0x233   : > { %4214 = vst.msk [vmem:[%s6469_s30 + $0x150] sm:$0xf] %vm4129_vm2, %v5120_v62  ;;  %v2828_v5 = vmax.f32 %v1973_v0, 0.0  ;;  %4354 = vst.msk [vmem:[%s6469_s30 + $0x380] sm:$0xf] %vm4129_vm2, %v5260_v2  ;;  %v2968_v6 = vmax.f32 %v2533_v3, 0.0 }
 0x234   : > { %v1977_v7 = vpop.f32.mrf.mxu0  ;;  %5733 = vmatmul.mubr.msk.bf16.gmra.mxu0 %vm1181_vm1, %v6177_v59  ;;  %v2537_v8 = vpop.f32.mrf.mxu1  ;;  %6013 = vmatmul.mubr.msk.bf16.gmra.mxu1 %vm1181_vm1, %v6178_v61 }
 0x235   : > { %v5121_v9 = vpack.c.bf16 %v2828_v5, %v2828_v5  ;;  %v1978_v10 = vadd.f32 %v7150_v63, %v1977_v7  ;;  %v5261_v11 = vpack.c.bf16 %v2968_v6, %v2968_v6  ;;  %v2538_v12 = vadd.f32 %v7150_v63, %v2537_v8  ;;  %5736 = vmatprep.mubr.msk.bf16.mxu0 %vm6194_vm0, %v6193_v1 }
 0x236   : > { %v5638_v13 = vpop.f32.mrf.mxu0  ;;  %v5918_v14 = vpop.f32.mrf.mxu1  ;;  %6016 = vmatprep.mubr.msk.bf16.mxu1 %vm6194_vm0, %v6193_v1 }
 0x237   : > { %4215 = vst.msk [vmem:[%s6469_s30 + $0x154] sm:$0xf] %vm4129_vm2, %v5121_v9  ;;  %v2829_v15 = vmax.f32 %v1978_v10, 0.0  ;;  %4355 = vst.msk [vmem:[%s6469_s30 + $0x384] sm:$0xf] %vm4129_vm2, %v5261_v11  ;;  %v2969_v16 = vmax.f32 %v2538_v12, 0.0 }
 0x238   : > { %v1980_v17 = vpop.f32.mrf.mxu0  ;;  %v2540_v19 = vpop.f32.mrf.mxu1 }
 0x239   : > { %v5122_v21 = vpack.c.bf16 %v2829_v15, %v2829_v15  ;;  %v1981_v22 = vadd.f32 %v7150_v63, %v1980_v17  ;;  %v5262_v23 = vpack.c.bf16 %v2969_v16, %v2969_v16  ;;  %v2541_v24 = vadd.f32 %v7150_v63, %v2540_v19 }
 0x23a   : > { %v5639_v25 = vpop.f32.mrf.mxu0  ;;  %v5919_v26 = vpop.f32.mrf.mxu1 }
 0x23b   : > { %4216 = vst.msk [vmem:[%s6469_s30 + $0x158] sm:$0xf] %vm4129_vm2, %v5122_v21  ;;  %v2830_v27 = vmax.f32 %v1981_v22, 0.0  ;;  %4356 = vst.msk [vmem:[%s6469_s30 + $0x388] sm:$0xf] %vm4129_vm2, %v5262_v23  ;;  %v2970_v28 = vmax.f32 %v2541_v24, 0.0 }
 0x23c   : > { %v1985_v29 = vpop.f32.mrf.mxu0  ;;  %5737 = vmatmul.mubr.msk.bf16.gmra.mxu0 %vm1181_vm1, %v6179_v18  ;;  %v2545_v30 = vpop.f32.mrf.mxu1  ;;  %6017 = vmatmul.mubr.msk.bf16.gmra.mxu1 %vm1181_vm1, %v6180_v20 }
 0x23d   : > { %v5123_v31 = vpack.c.bf16 %v2830_v27, %v2830_v27  ;;  %v1986_v32 = vadd.f32 %v7150_v63, %v1985_v29  ;;  %v5263_v33 = vpack.c.bf16 %v2970_v28, %v2970_v28  ;;  %v2546_v34 = vadd.f32 %v7150_v63, %v2545_v30  ;;  %5740 = vmatprep.mubr.msk.bf16.mxu0 %vm6194_vm0, %v6193_v1 }
 0x23e   : > { %v5642_v35 = vpop.f32.mrf.mxu0  ;;  %v5922_v36 = vpop.f32.mrf.mxu1 }
 0x23f   : > { %4217 = vst.msk [vmem:[%s6469_s30 + $0x15c] sm:$0xf] %vm4129_vm2, %v5123_v31  ;;  %v2831_v37 = vmax.f32 %v1986_v32, 0.0  ;;  %4357 = vst.msk [vmem:[%s6469_s30 + $0x38c] sm:$0xf] %vm4129_vm2, %v5263_v33  ;;  %v2971_v38 = vmax.f32 %v2546_v34, 0.0 }
 0x240   : > { %v1988_v39 = vpop.f32.mrf.mxu0  ;;  %v2548_v41 = vpop.f32.mrf.mxu1 }
 0x241   : > { %v5124_v42 = vpack.c.bf16 %v2831_v37, %v2831_v37  ;;  %v1989_v43 = vadd.f32 %v7150_v63, %v1988_v39  ;;  %v5264_v44 = vpack.c.bf16 %v2971_v38, %v2971_v38  ;;  %v2549_v45 = vadd.f32 %v7150_v63, %v2548_v41 }
 0x242   : > { %v5643_v1 = vpop.f32.mrf.mxu0  ;;  %v5923_v46 = vpop.f32.mrf.mxu1 }
 0x243   : > { %4218 = vst.msk [vmem:[%s6469_s30 + $0x160] sm:$0xf] %vm4129_vm2, %v5124_v42  ;;  %v2832_v47 = vmax.f32 %v1989_v43, 0.0  ;;  %4358 = vst.msk [vmem:[%s6469_s30 + $0x390] sm:$0xf] %vm4129_vm2, %v5264_v44  ;;  %v2972_v48 = vmax.f32 %v2549_v45, 0.0 }
 0x244   : > { %v1993_v49 = vpop.f32.mrf.mxu0  ;;  %5741 = vmatmul.mubr.msk.bf16.gmra.mxu0 %vm1181_vm1, %v6181_v40  ;;  %v2553_v50 = vpop.f32.mrf.mxu1 }
 0x245   : > { %v5125_v51 = vpack.c.bf16 %v2832_v47, %v2832_v47  ;;  %v1994_v52 = vadd.f32 %v7150_v63, %v1993_v49  ;;  %v5265_v53 = vpack.c.bf16 %v2972_v48, %v2972_v48  ;;  %v2554_v54 = vadd.f32 %v7150_v63, %v2553_v50 }
 0x246   : > { %v5646_v56 = vpop.f32.mrf.mxu0  ;;  %v5926_v57 = vpop.f32.mrf.mxu1 }
 0x247   : > { %4219 = vst.msk [vmem:[%s6469_s30 + $0x164] sm:$0xf] %vm4129_vm2, %v5125_v51  ;;  %v2833_v58 = vmax.f32 %v1994_v52, 0.0  ;;  %4359 = vst.msk [vmem:[%s6469_s30 + $0x394] sm:$0xf] %vm4129_vm2, %v5265_v53  ;;  %v2973_v59 = vmax.f32 %v2554_v54, 0.0 }
 0x248   : > { %v1996_v60 = vpop.f32.mrf.mxu0  ;;  %v2556_v61 = vpop.f32.mrf.mxu1 }
 0x249   : > { %v5126_v62 = vpack.c.bf16 %v2833_v58, %v2833_v58  ;;  %v1997_v0 = vadd.f32 %v7150_v63, %v1996_v60  ;;  %v5266_v2 = vpack.c.bf16 %v2973_v59, %v2973_v59  ;;  %v2557_v3 = vadd.f32 %v7150_v63, %v2556_v61 }
 0x24a   : > { %v5647_v55 = vpop.f32.mrf.mxu0  ;;  %v5927_v4 = vpop.f32.mrf.mxu1 }
 0x24b   : > { %4220 = vst.msk [vmem:[%s6469_s30 + $0x168] sm:$0xf] %vm4129_vm2, %v5126_v62  ;;  %v2834_v5 = vmax.f32 %v1997_v0, 0.0  ;;  %4360 = vst.msk [vmem:[%s6469_s30 + $0x398] sm:$0xf] %vm4129_vm2, %v5266_v2  ;;  %v2974_v6 = vmax.f32 %v2557_v3, 0.0 }
 0x24c   : > { %v2001_v7 = vpop.f32.mrf.mxu0  ;;  %v2561_v8 = vpop.f32.mrf.mxu1 }
 0x24d   : > { %v5127_v9 = vpack.c.bf16 %v2834_v5, %v2834_v5  ;;  %v2002_v10 = vadd.f32 %v7150_v63, %v2001_v7  ;;  %v5267_v11 = vpack.c.bf16 %v2974_v6, %v2974_v6  ;;  %v2562_v12 = vadd.f32 %v7150_v63, %v2561_v8 }
 0x24e   : > { %v5650_v13 = vpop.f32.mrf.mxu0  ;;  %v5930_v14 = vpop.f32.mrf.mxu1 }
 0x24f   : > { %4221 = vst.msk [vmem:[%s6469_s30 + $0x16c] sm:$0xf] %vm4129_vm2, %v5127_v9  ;;  %v2835_v15 = vmax.f32 %v2002_v10, 0.0  ;;  %4361 = vst.msk [vmem:[%s6469_s30 + $0x39c] sm:$0xf] %vm4129_vm2, %v5267_v11  ;;  %v2975_v16 = vmax.f32 %v2562_v12, 0.0 }
 0x250   : > { %v2004_v17 = vpop.f32.mrf.mxu0  ;;  %v2564_v18 = vpop.f32.mrf.mxu1 }
 0x251   : > { %v5128_v19 = vpack.c.bf16 %v2835_v15, %v2835_v15  ;;  %v2005_v20 = vadd.f32 %v7150_v63, %v2004_v17  ;;  %v5268_v21 = vpack.c.bf16 %v2975_v16, %v2975_v16  ;;  %v2565_v22 = vadd.f32 %v7150_v63, %v2564_v18 }
 0x252   : > { %v5651_v23 = vpop.f32.mrf.mxu0  ;;  %v5931_v24 = vpop.f32.mrf.mxu1 }
 0x253   : > { %4222 = vst.msk [vmem:[%s6469_s30 + $0x170] sm:$0xf] %vm4129_vm2, %v5128_v19  ;;  %v2836_v25 = vmax.f32 %v2005_v20, 0.0  ;;  %4362 = vst.msk [vmem:[%s6469_s30 + $0x3a0] sm:$0xf] %vm4129_vm2, %v5268_v21  ;;  %v2976_v26 = vmax.f32 %v2565_v22, 0.0 }
 0x254   : > { %v2009_v27 = vpop.f32.mrf.mxu0  ;;  %v2569_v28 = vpop.f32.mrf.mxu1 }
 0x255   : > { %v5129_v29 = vpack.c.bf16 %v2836_v25, %v2836_v25  ;;  %v2010_v30 = vadd.f32 %v7150_v63, %v2009_v27  ;;  %v5269_v31 = vpack.c.bf16 %v2976_v26, %v2976_v26  ;;  %v2570_v32 = vadd.f32 %v7150_v63, %v2569_v28 }
 0x256   : > { %v5654_v33 = vpop.f32.mrf.mxu0  ;;  %v5934_v34 = vpop.f32.mrf.mxu1 }
 0x257   : > { %4223 = vst.msk [vmem:[%s6469_s30 + $0x174] sm:$0xf] %vm4129_vm2, %v5129_v29  ;;  %v2837_v35 = vmax.f32 %v2010_v30, 0.0  ;;  %4363 = vst.msk [vmem:[%s6469_s30 + $0x3a4] sm:$0xf] %vm4129_vm2, %v5269_v31  ;;  %v2977_v36 = vmax.f32 %v2570_v32, 0.0 }
 0x258   : > { %v2012_v37 = vpop.f32.mrf.mxu0  ;;  %v2572_v38 = vpop.f32.mrf.mxu1 }
 0x259   : > { %v5130_v39 = vpack.c.bf16 %v2837_v35, %v2837_v35  ;;  %v2013_v40 = vadd.f32 %v7150_v63, %v2012_v37  ;;  %v5270_v41 = vpack.c.bf16 %v2977_v36, %v2977_v36  ;;  %v2573_v42 = vadd.f32 %v7150_v63, %v2572_v38 }
 0x25a   : > { %v5655_v43 = vpop.f32.mrf.mxu0  ;;  %v5935_v44 = vpop.f32.mrf.mxu1 }
 0x25b   : > { %4224 = vst.msk [vmem:[%s6469_s30 + $0x178] sm:$0xf] %vm4129_vm2, %v5130_v39  ;;  %v2838_v45 = vmax.f32 %v2013_v40, 0.0  ;;  %4364 = vst.msk [vmem:[%s6469_s30 + $0x3a8] sm:$0xf] %vm4129_vm2, %v5270_v41  ;;  %v2978_v1 = vmax.f32 %v2573_v42, 0.0 }
 0x25c   : > { %v2017_v46 = vpop.f32.mrf.mxu0  ;;  %v2577_v47 = vpop.f32.mrf.mxu1 }
 0x25d   : > { %v5131_v48 = vpack.c.bf16 %v2838_v45, %v2838_v45  ;;  %v2018_v49 = vadd.f32 %v7150_v63, %v2017_v46  ;;  %v5271_v50 = vpack.c.bf16 %v2978_v1, %v2978_v1  ;;  %v2578_v51 = vadd.f32 %v7150_v63, %v2577_v47 }
 0x25e   : > { %v5658_v52 = vpop.f32.mrf.mxu0  ;;  %v5938_v53 = vpop.f32.mrf.mxu1 }
 0x25f   : > { %4225 = vst.msk [vmem:[%s6469_s30 + $0x17c] sm:$0xf] %vm4129_vm2, %v5131_v48  ;;  %v2839_v54 = vmax.f32 %v2018_v49, 0.0  ;;  %4365 = vst.msk [vmem:[%s6469_s30 + $0x3ac] sm:$0xf] %vm4129_vm2, %v5271_v50  ;;  %v2979_v56 = vmax.f32 %v2578_v51, 0.0 }
 0x260   : > { %v2020_v57 = vpop.f32.mrf.mxu0  ;;  %v2580_v58 = vpop.f32.mrf.mxu1 }
 0x261   : > { %v5132_v59 = vpack.c.bf16 %v2839_v54, %v2839_v54  ;;  %v2021_v60 = vadd.f32 %v7150_v63, %v2020_v57  ;;  %v5272_v61 = vpack.c.bf16 %v2979_v56, %v2979_v56  ;;  %v2581_v62 = vadd.f32 %v7150_v63, %v2580_v58 }
 0x262   : > { %v5659_v0 = vpop.f32.mrf.mxu0  ;;  %v5939_v2 = vpop.f32.mrf.mxu1 }
 0x263   : > { %4226 = vst.msk [vmem:[%s6469_s30 + $0x180] sm:$0xf] %vm4129_vm2, %v5132_v59  ;;  %v2840_v3 = vmax.f32 %v2021_v60, 0.0  ;;  %4366 = vst.msk [vmem:[%s6469_s30 + $0x3b0] sm:$0xf] %vm4129_vm2, %v5272_v61  ;;  %v2980_v55 = vmax.f32 %v2581_v62, 0.0 }
 0x264   : > { %v2025_v4 = vpop.f32.mrf.mxu0  ;;  %v2585_v5 = vpop.f32.mrf.mxu1 }
 0x265   : > { %v5133_v6 = vpack.c.bf16 %v2840_v3, %v2840_v3  ;;  %v2026_v7 = vadd.f32 %v7150_v63, %v2025_v4  ;;  %v5273_v8 = vpack.c.bf16 %v2980_v55, %v2980_v55  ;;  %v2586_v9 = vadd.f32 %v7150_v63, %v2585_v5 }
 0x266   : > { %v5662_v10 = vpop.f32.mrf.mxu0  ;;  %v5942_v11 = vpop.f32.mrf.mxu1 }
 0x267   : > { %4227 = vst.msk [vmem:[%s6469_s30 + $0x184] sm:$0xf] %vm4129_vm2, %v5133_v6  ;;  %v2841_v12 = vmax.f32 %v2026_v7, 0.0  ;;  %4367 = vst.msk [vmem:[%s6469_s30 + $0x3b4] sm:$0xf] %vm4129_vm2, %v5273_v8  ;;  %v2981_v13 = vmax.f32 %v2586_v9, 0.0 }
 0x268   : > { %v2028_v14 = vpop.f32.mrf.mxu0  ;;  %v2588_v15 = vpop.f32.mrf.mxu1 }
 0x269   : > { %v5134_v16 = vpack.c.bf16 %v2841_v12, %v2841_v12  ;;  %v2029_v17 = vadd.f32 %v7150_v63, %v2028_v14  ;;  %v5274_v18 = vpack.c.bf16 %v2981_v13, %v2981_v13  ;;  %v2589_v19 = vadd.f32 %v7150_v63, %v2588_v15 }
 0x26a   : > { %v5663_v20 = vpop.f32.mrf.mxu0  ;;  %v5943_v21 = vpop.f32.mrf.mxu1 }
 0x26b   : > { %4228 = vst.msk [vmem:[%s6469_s30 + $0x188] sm:$0xf] %vm4129_vm2, %v5134_v16  ;;  %v2842_v22 = vmax.f32 %v2029_v17, 0.0  ;;  %4368 = vst.msk [vmem:[%s6469_s30 + $0x3b8] sm:$0xf] %vm4129_vm2, %v5274_v18  ;;  %v2982_v23 = vmax.f32 %v2589_v19, 0.0 }
 0x26c   : > { %v2033_v24 = vpop.f32.mrf.mxu0  ;;  %v2593_v25 = vpop.f32.mrf.mxu1 }
 0x26d   : > { %v5135_v26 = vpack.c.bf16 %v2842_v22, %v2842_v22  ;;  %v2034_v27 = vadd.f32 %v7150_v63, %v2033_v24  ;;  %v5275_v28 = vpack.c.bf16 %v2982_v23, %v2982_v23  ;;  %v2594_v29 = vadd.f32 %v7150_v63, %v2593_v25  ;;  %v7466_v24 = vld [vmem:[%s7672_s2] ss:$0 sm:$0xff] }
 0x26e   : > { %v5666_v30 = vpop.f32.mrf.mxu0  ;;  %v5946_v31 = vpop.f32.mrf.mxu1 }
 0x26f   : > { %4229 = vst.msk [vmem:[%s6469_s30 + $0x18c] sm:$0xf] %vm4129_vm2, %v5135_v26  ;;  %v2843_v32 = vmax.f32 %v2034_v27, 0.0  ;;  %4369 = vst.msk [vmem:[%s6469_s30 + $0x3bc] sm:$0xf] %vm4129_vm2, %v5275_v28  ;;  %v2983_v33 = vmax.f32 %v2594_v29, 0.0 }
 0x270   : > { %v2036_v34 = vpop.f32.mrf.mxu0  ;;  %v2596_v35 = vpop.f32.mrf.mxu1 }
 0x271   : > { %v5136_v36 = vpack.c.bf16 %v2843_v32, %v2843_v32  ;;  %v2037_v37 = vadd.f32 %v7150_v63, %v2036_v34  ;;  %v5276_v38 = vpack.c.bf16 %v2983_v33, %v2983_v33  ;;  %v2597_v39 = vadd.f32 %v7150_v63, %v2596_v35 }
 0x272   : > { %v5667_v40 = vpop.f32.mrf.mxu0  ;;  %v5947_v41 = vpop.f32.mrf.mxu1 }
 0x273   : > { %4230 = vst.msk [vmem:[%s6469_s30 + $0x190] sm:$0xf] %vm4129_vm2, %v5136_v36  ;;  %v2844_v42 = vmax.f32 %v2037_v37, 0.0  ;;  %4370 = vst.msk [vmem:[%s6469_s30 + $0x3c0] sm:$0xf] %vm4129_vm2, %v5276_v38  ;;  %v2984_v43 = vmax.f32 %v2597_v39, 0.0 }
 0x274   : > { %v2041_v44 = vpop.f32.mrf.mxu0  ;;  %v2601_v45 = vpop.f32.mrf.mxu1 }
 0x275   : > { %v5137_v1 = vpack.c.bf16 %v2844_v42, %v2844_v42  ;;  %v2042_v46 = vadd.f32 %v7150_v63, %v2041_v44  ;;  %v5277_v47 = vpack.c.bf16 %v2984_v43, %v2984_v43  ;;  %v2602_v48 = vadd.f32 %v7150_v63, %v2601_v45 }
 0x276   : > { %v5670_v49 = vpop.f32.mrf.mxu0  ;;  %v5950_v50 = vpop.f32.mrf.mxu1 }
 0x277   : > { %4231 = vst.msk [vmem:[%s6469_s30 + $0x194] sm:$0xf] %vm4129_vm2, %v5137_v1  ;;  %v2845_v51 = vmax.f32 %v2042_v46, 0.0  ;;  %4371 = vst.msk [vmem:[%s6469_s30 + $0x3c4] sm:$0xf] %vm4129_vm2, %v5277_v47  ;;  %v2985_v52 = vmax.f32 %v2602_v48, 0.0 }
 0x278   : > { %v2044_v53 = vpop.f32.mrf.mxu0  ;;  %v2604_v54 = vpop.f32.mrf.mxu1 }
 0x279   : > { %v5138_v56 = vpack.c.bf16 %v2845_v51, %v2845_v51  ;;  %v2045_v57 = vadd.f32 %v7150_v63, %v2044_v53  ;;  %v5278_v58 = vpack.c.bf16 %v2985_v52, %v2985_v52  ;;  %v2605_v59 = vadd.f32 %v7150_v63, %v2604_v54 }
 0x27a   : > { %v5671_v60 = vpop.f32.mrf.mxu0  ;;  %v5951_v61 = vpop.f32.mrf.mxu1 }
 0x27b   : > { %4232 = vst.msk [vmem:[%s6469_s30 + $0x198] sm:$0xf] %vm4129_vm2, %v5138_v56  ;;  %v2846_v62 = vmax.f32 %v2045_v57, 0.0  ;;  %4372 = vst.msk [vmem:[%s6469_s30 + $0x3c8] sm:$0xf] %vm4129_vm2, %v5278_v58  ;;  %v2986_v0 = vmax.f32 %v2605_v59, 0.0 }
 0x27c   : > { %v2049_v2 = vpop.f32.mrf.mxu0  ;;  %v2609_v3 = vpop.f32.mrf.mxu1 }
 0x27d   : > { %v5139_v55 = vpack.c.bf16 %v2846_v62, %v2846_v62  ;;  %v2050_v4 = vadd.f32 %v7150_v63, %v2049_v2  ;;  %v5279_v5 = vpack.c.bf16 %v2986_v0, %v2986_v0  ;;  %v2610_v6 = vadd.f32 %v7150_v63, %v2609_v3 }
 0x27e   : > { %v5674_v7 = vpop.f32.mrf.mxu0  ;;  %v5954_v8 = vpop.f32.mrf.mxu1 }
 0x27f   : > { %4233 = vst.msk [vmem:[%s6469_s30 + $0x19c] sm:$0xf] %vm4129_vm2, %v5139_v55  ;;  %v2847_v9 = vmax.f32 %v2050_v4, 0.0  ;;  %4373 = vst.msk [vmem:[%s6469_s30 + $0x3cc] sm:$0xf] %vm4129_vm2, %v5279_v5  ;;  %v2987_v10 = vmax.f32 %v2610_v6, 0.0 }
 0x280   : > { %v2052_v11 = vpop.f32.mrf.mxu0  ;;  %v2612_v12 = vpop.f32.mrf.mxu1 }
 0x281   : > { %v5140_v13 = vpack.c.bf16 %v2847_v9, %v2847_v9  ;;  %v2053_v14 = vadd.f32 %v7150_v63, %v2052_v11  ;;  %v5280_v15 = vpack.c.bf16 %v2987_v10, %v2987_v10  ;;  %v2613_v16 = vadd.f32 %v7150_v63, %v2612_v12 }
 0x282   : > { %v5675_v17 = vpop.f32.mrf.mxu0  ;;  %v5955_v18 = vpop.f32.mrf.mxu1 }
 0x283   : > { %4234 = vst.msk [vmem:[%s6469_s30 + $0x1a0] sm:$0xf] %vm4129_vm2, %v5140_v13  ;;  %v2848_v19 = vmax.f32 %v2053_v14, 0.0  ;;  %4374 = vst.msk [vmem:[%s6469_s30 + $0x3d0] sm:$0xf] %vm4129_vm2, %v5280_v15  ;;  %v2988_v20 = vmax.f32 %v2613_v16, 0.0 }
 0x284   : > { %v2057_v21 = vpop.f32.mrf.mxu0  ;;  %v2617_v22 = vpop.f32.mrf.mxu1 }
 0x285   : > { %v5141_v23 = vpack.c.bf16 %v2848_v19, %v2848_v19  ;;  %v2058_v63 = vadd.f32 %v7466_v24, %v2057_v21  ;;  %v5281_v25 = vpack.c.bf16 %v2988_v20, %v2988_v20  ;;  %v2618_v26 = vadd.f32 %v7466_v24, %v2617_v22 }
 0x286   : > { %v5678_v27 = vpop.f32.mrf.mxu0  ;;  %v5958_v28 = vpop.f32.mrf.mxu1 }
 0x287   : > { %4235 = vst.msk [vmem:[%s6469_s30 + $0x1a4] sm:$0xf] %vm4129_vm2, %v5141_v23  ;;  %v2849_v29 = vmax.f32 %v2058_v63, 0.0  ;;  %4375 = vst.msk [vmem:[%s6469_s30 + $0x3d4] sm:$0xf] %vm4129_vm2, %v5281_v25  ;;  %v2989_v30 = vmax.f32 %v2618_v26, 0.0 }
 0x288   : > { %v2060_v31 = vpop.f32.mrf.mxu0  ;;  %v2620_v32 = vpop.f32.mrf.mxu1 }
 0x289   : > { %v5142_v33 = vpack.c.bf16 %v2849_v29, %v2849_v29  ;;  %v2061_v34 = vadd.f32 %v7466_v24, %v2060_v31  ;;  %v5282_v35 = vpack.c.bf16 %v2989_v30, %v2989_v30  ;;  %v2621_v36 = vadd.f32 %v7466_v24, %v2620_v32 }
 0x28a   : > { %v5679_v37 = vpop.f32.mrf.mxu0  ;;  %v5959_v38 = vpop.f32.mrf.mxu1 }
 0x28b   : > { %4236 = vst.msk [vmem:[%s6469_s30 + $0x1a8] sm:$0xf] %vm4129_vm2, %v5142_v33  ;;  %v2850_v39 = vmax.f32 %v2061_v34, 0.0  ;;  %4376 = vst.msk [vmem:[%s6469_s30 + $0x3d8] sm:$0xf] %vm4129_vm2, %v5282_v35  ;;  %v2990_v40 = vmax.f32 %v2621_v36, 0.0 }
 0x28c   : > { %v2065_v41 = vpop.f32.mrf.mxu0  ;;  %v2625_v42 = vpop.f32.mrf.mxu1 }
 0x28d   : > { %v5143_v43 = vpack.c.bf16 %v2850_v39, %v2850_v39  ;;  %v2066_v44 = vadd.f32 %v7466_v24, %v2065_v41  ;;  %v5283_v45 = vpack.c.bf16 %v2990_v40, %v2990_v40  ;;  %v2626_v1 = vadd.f32 %v7466_v24, %v2625_v42 }
 0x28e   : > { %v5682_v46 = vpop.f32.mrf.mxu0  ;;  %v5962_v47 = vpop.f32.mrf.mxu1 }
 0x28f   : > { %4237 = vst.msk [vmem:[%s6469_s30 + $0x1ac] sm:$0xf] %vm4129_vm2, %v5143_v43  ;;  %v2851_v48 = vmax.f32 %v2066_v44, 0.0  ;;  %4377 = vst.msk [vmem:[%s6469_s30 + $0x3dc] sm:$0xf] %vm4129_vm2, %v5283_v45  ;;  %v2991_v49 = vmax.f32 %v2626_v1, 0.0 }
 0x290   : > { %v2068_v50 = vpop.f32.mrf.mxu0  ;;  %v2628_v51 = vpop.f32.mrf.mxu1 }
 0x291   : > { %v5144_v52 = vpack.c.bf16 %v2851_v48, %v2851_v48  ;;  %v2069_v53 = vadd.f32 %v7466_v24, %v2068_v50  ;;  %v5284_v54 = vpack.c.bf16 %v2991_v49, %v2991_v49  ;;  %v2629_v56 = vadd.f32 %v7466_v24, %v2628_v51 }
 0x292   : > { %v5683_v57 = vpop.f32.mrf.mxu0  ;;  %v5963_v58 = vpop.f32.mrf.mxu1 }
 0x293   : > { %4238 = vst.msk [vmem:[%s6469_s30 + $0x1b0] sm:$0xf] %vm4129_vm2, %v5144_v52  ;;  %v2852_v59 = vmax.f32 %v2069_v53, 0.0  ;;  %4378 = vst.msk [vmem:[%s6469_s30 + $0x3e0] sm:$0xf] %vm4129_vm2, %v5284_v54  ;;  %v2992_v60 = vmax.f32 %v2629_v56, 0.0 }
 0x294   : > { %v2073_v61 = vpop.f32.mrf.mxu0  ;;  %v2633_v62 = vpop.f32.mrf.mxu1 }
 0x295   : > { %v5145_v0 = vpack.c.bf16 %v2852_v59, %v2852_v59  ;;  %v2074_v2 = vadd.f32 %v7466_v24, %v2073_v61  ;;  %v5285_v3 = vpack.c.bf16 %v2992_v60, %v2992_v60  ;;  %v2634_v55 = vadd.f32 %v7466_v24, %v2633_v62 }
 0x296   : > { %v5686_v4 = vpop.f32.mrf.mxu0  ;;  %v5966_v5 = vpop.f32.mrf.mxu1 }
 0x297   : > { %4239 = vst.msk [vmem:[%s6469_s30 + $0x1b4] sm:$0xf] %vm4129_vm2, %v5145_v0  ;;  %v2853_v6 = vmax.f32 %v2074_v2, 0.0  ;;  %4379 = vst.msk [vmem:[%s6469_s30 + $0x3e4] sm:$0xf] %vm4129_vm2, %v5285_v3  ;;  %v2993_v7 = vmax.f32 %v2634_v55, 0.0 }
 0x298   : > { %v2076_v8 = vpop.f32.mrf.mxu0  ;;  %v2636_v9 = vpop.f32.mrf.mxu1 }
 0x299   : > { %v5146_v10 = vpack.c.bf16 %v2853_v6, %v2853_v6  ;;  %v2077_v11 = vadd.f32 %v7466_v24, %v2076_v8  ;;  %v5286_v12 = vpack.c.bf16 %v2993_v7, %v2993_v7  ;;  %v2637_v13 = vadd.f32 %v7466_v24, %v2636_v9 }
 0x29a   : > { %v5687_v14 = vpop.f32.mrf.mxu0  ;;  %v5967_v15 = vpop.f32.mrf.mxu1 }
 0x29b   : > { %4240 = vst.msk [vmem:[%s6469_s30 + $0x1b8] sm:$0xf] %vm4129_vm2, %v5146_v10  ;;  %v2854_v16 = vmax.f32 %v2077_v11, 0.0  ;;  %4380 = vst.msk [vmem:[%s6469_s30 + $0x3e8] sm:$0xf] %vm4129_vm2, %v5286_v12  ;;  %v2994_v17 = vmax.f32 %v2637_v13, 0.0 }
 0x29c   : > { %v2081_v18 = vpop.f32.mrf.mxu0  ;;  %v2641_v19 = vpop.f32.mrf.mxu1 }
 0x29d   : > { %v5147_v20 = vpack.c.bf16 %v2854_v16, %v2854_v16  ;;  %v2082_v21 = vadd.f32 %v7466_v24, %v2081_v18  ;;  %v5287_v22 = vpack.c.bf16 %v2994_v17, %v2994_v17  ;;  %v2642_v23 = vadd.f32 %v7466_v24, %v2641_v19 }
 0x29e   : > { %v5690_v63 = vpop.f32.mrf.mxu0  ;;  %v5970_v25 = vpop.f32.mrf.mxu1 }
 0x29f   : > { %4241 = vst.msk [vmem:[%s6469_s30 + $0x1bc] sm:$0xf] %vm4129_vm2, %v5147_v20  ;;  %v2855_v26 = vmax.f32 %v2082_v21, 0.0  ;;  %4381 = vst.msk [vmem:[%s6469_s30 + $0x3ec] sm:$0xf] %vm4129_vm2, %v5287_v22  ;;  %v2995_v27 = vmax.f32 %v2642_v23, 0.0 }
 0x2a0   : > { %v2084_v28 = vpop.f32.mrf.mxu0  ;;  %v2644_v29 = vpop.f32.mrf.mxu1 }
 0x2a1   : > { %v5148_v30 = vpack.c.bf16 %v2855_v26, %v2855_v26  ;;  %v2085_v31 = vadd.f32 %v7466_v24, %v2084_v28  ;;  %v5288_v32 = vpack.c.bf16 %v2995_v27, %v2995_v27  ;;  %v2645_v33 = vadd.f32 %v7466_v24, %v2644_v29 }
 0x2a2   : > { %v5691_v34 = vpop.f32.mrf.mxu0  ;;  %v5971_v35 = vpop.f32.mrf.mxu1 }
 0x2a3   : > { %4242 = vst.msk [vmem:[%s6469_s30 + $0x1c0] sm:$0xf] %vm4129_vm2, %v5148_v30  ;;  %v2856_v36 = vmax.f32 %v2085_v31, 0.0  ;;  %4382 = vst.msk [vmem:[%s6469_s30 + $0x3f0] sm:$0xf] %vm4129_vm2, %v5288_v32  ;;  %v2996_v37 = vmax.f32 %v2645_v33, 0.0 }
 0x2a4   : > { %v2089_v38 = vpop.f32.mrf.mxu0  ;;  %v2649_v39 = vpop.f32.mrf.mxu1 }
 0x2a5   : > { %v5149_v40 = vpack.c.bf16 %v2856_v36, %v2856_v36  ;;  %v2090_v41 = vadd.f32 %v7466_v24, %v2089_v38  ;;  %v5289_v42 = vpack.c.bf16 %v2996_v37, %v2996_v37  ;;  %v2650_v43 = vadd.f32 %v7466_v24, %v2649_v39 }
 0x2a6   : > { %v5694_v44 = vpop.f32.mrf.mxu0  ;;  %v5974_v45 = vpop.f32.mrf.mxu1 }
 0x2a7   : > { %4243 = vst.msk [vmem:[%s6469_s30 + $0x1c4] sm:$0xf] %vm4129_vm2, %v5149_v40  ;;  %v2857_v1 = vmax.f32 %v2090_v41, 0.0  ;;  %4383 = vst.msk [vmem:[%s6469_s30 + $0x3f4] sm:$0xf] %vm4129_vm2, %v5289_v42  ;;  %v2997_v46 = vmax.f32 %v2650_v43, 0.0 }
 0x2a8   : > { %v2092_v47 = vpop.f32.mrf.mxu0  ;;  %v2652_v48 = vpop.f32.mrf.mxu1 }
 0x2a9   : > { %v5150_v49 = vpack.c.bf16 %v2857_v1, %v2857_v1  ;;  %v2093_v50 = vadd.f32 %v7466_v24, %v2092_v47  ;;  %v5290_v51 = vpack.c.bf16 %v2997_v46, %v2997_v46  ;;  %v2653_v52 = vadd.f32 %v7466_v24, %v2652_v48 }
 0x2aa   : > { %v5695_v53 = vpop.f32.mrf.mxu0  ;;  %v5975_v54 = vpop.f32.mrf.mxu1 }
 0x2ab   : > { %4244 = vst.msk [vmem:[%s6469_s30 + $0x1c8] sm:$0xf] %vm4129_vm2, %v5150_v49  ;;  %v2858_v56 = vmax.f32 %v2093_v50, 0.0  ;;  %4384 = vst.msk [vmem:[%s6469_s30 + $0x3f8] sm:$0xf] %vm4129_vm2, %v5290_v51  ;;  %v2998_v57 = vmax.f32 %v2653_v52, 0.0 }
 0x2ac   : > { %v2097_v58 = vpop.f32.mrf.mxu0  ;;  %v2657_v59 = vpop.f32.mrf.mxu1 }
 0x2ad   : > { %v5151_v60 = vpack.c.bf16 %v2858_v56, %v2858_v56  ;;  %v2098_v61 = vadd.f32 %v7466_v24, %v2097_v58  ;;  %v5291_v62 = vpack.c.bf16 %v2998_v57, %v2998_v57  ;;  %v2658_v0 = vadd.f32 %v7466_v24, %v2657_v59 }
 0x2ae   : > { %v5698_v2 = vpop.f32.mrf.mxu0  ;;  %v5978_v3 = vpop.f32.mrf.mxu1 }
 0x2af   : > { %4245 = vst.msk [vmem:[%s6469_s30 + $0x1cc] sm:$0xf] %vm4129_vm2, %v5151_v60  ;;  %v2859_v55 = vmax.f32 %v2098_v61, 0.0  ;;  %4385 = vst.msk [vmem:[%s6469_s30 + $0x3fc] sm:$0xf] %vm4129_vm2, %v5291_v62  ;;  %v2999_v4 = vmax.f32 %v2658_v0, 0.0 }
 0x2b0   : > { %v2100_v5 = vpop.f32.mrf.mxu0  ;;  %v2660_v6 = vpop.f32.mrf.mxu1 }
 0x2b1   : > { %v5152_v7 = vpack.c.bf16 %v2859_v55, %v2859_v55  ;;  %v2101_v8 = vadd.f32 %v7466_v24, %v2100_v5  ;;  %v5292_v9 = vpack.c.bf16 %v2999_v4, %v2999_v4  ;;  %v2661_v10 = vadd.f32 %v7466_v24, %v2660_v6 }
 0x2b2   : > { %v5699_v11 = vpop.f32.mrf.mxu0  ;;  %v5979_v12 = vpop.f32.mrf.mxu1 }
 0x2b3   : > { %4246 = vst.msk [vmem:[%s6469_s30 + $0x1d0] sm:$0xf] %vm4129_vm2, %v5152_v7  ;;  %v2860_v13 = vmax.f32 %v2101_v8, 0.0  ;;  %4386 = vst.msk [vmem:[%s6469_s30 + $0x400] sm:$0xf] %vm4129_vm2, %v5292_v9  ;;  %v3000_v14 = vmax.f32 %v2661_v10, 0.0 }
 0x2b4   : > { %v2105_v15 = vpop.f32.mrf.mxu0  ;;  %v2665_v16 = vpop.f32.mrf.mxu1 }
 0x2b5   : > { %v5153_v17 = vpack.c.bf16 %v2860_v13, %v2860_v13  ;;  %v2106_v18 = vadd.f32 %v7466_v24, %v2105_v15  ;;  %v5293_v19 = vpack.c.bf16 %v3000_v14, %v3000_v14  ;;  %v2666_v20 = vadd.f32 %v7466_v24, %v2665_v16 }
 0x2b6   : > { %v5702_v21 = vpop.f32.mrf.mxu0  ;;  %v5982_v22 = vpop.f32.mrf.mxu1 }
 0x2b7   : > { %4247 = vst.msk [vmem:[%s6469_s30 + $0x1d4] sm:$0xf] %vm4129_vm2, %v5153_v17  ;;  %v2861_v23 = vmax.f32 %v2106_v18, 0.0  ;;  %4387 = vst.msk [vmem:[%s6469_s30 + $0x404] sm:$0xf] %vm4129_vm2, %v5293_v19  ;;  %v3001_v63 = vmax.f32 %v2666_v20, 0.0 }
 0x2b8   : > { %v2108_v25 = vpop.f32.mrf.mxu0  ;;  %v2668_v26 = vpop.f32.mrf.mxu1 }
 0x2b9   : > { %v5154_v27 = vpack.c.bf16 %v2861_v23, %v2861_v23  ;;  %v2109_v28 = vadd.f32 %v7466_v24, %v2108_v25  ;;  %v5294_v29 = vpack.c.bf16 %v3001_v63, %v3001_v63  ;;  %v2669_v30 = vadd.f32 %v7466_v24, %v2668_v26 }
 0x2ba   : > { %v5703_v31 = vpop.f32.mrf.mxu0  ;;  %v5983_v32 = vpop.f32.mrf.mxu1 }
 0x2bb   : > { %4248 = vst.msk [vmem:[%s6469_s30 + $0x1d8] sm:$0xf] %vm4129_vm2, %v5154_v27  ;;  %v2862_v33 = vmax.f32 %v2109_v28, 0.0  ;;  %4388 = vst.msk [vmem:[%s6469_s30 + $0x408] sm:$0xf] %vm4129_vm2, %v5294_v29  ;;  %v3002_v34 = vmax.f32 %v2669_v30, 0.0 }
 0x2bc   : > { %v2113_v35 = vpop.f32.mrf.mxu0  ;;  %v2673_v36 = vpop.f32.mrf.mxu1 }
 0x2bd   : > { %v5155_v37 = vpack.c.bf16 %v2862_v33, %v2862_v33  ;;  %v2114_v38 = vadd.f32 %v7466_v24, %v2113_v35  ;;  %v5295_v39 = vpack.c.bf16 %v3002_v34, %v3002_v34  ;;  %v2674_v40 = vadd.f32 %v7466_v24, %v2673_v36 }
 0x2be   : > { %v5706_v41 = vpop.f32.mrf.mxu0  ;;  %v5986_v42 = vpop.f32.mrf.mxu1 }
 0x2bf   : > { %4249 = vst.msk [vmem:[%s6469_s30 + $0x1dc] sm:$0xf] %vm4129_vm2, %v5155_v37  ;;  %v2863_v43 = vmax.f32 %v2114_v38, 0.0  ;;  %4389 = vst.msk [vmem:[%s6469_s30 + $0x40c] sm:$0xf] %vm4129_vm2, %v5295_v39  ;;  %v3003_v44 = vmax.f32 %v2674_v40, 0.0 }
 0x2c0   : > { %v2116_v45 = vpop.f32.mrf.mxu0  ;;  %v2676_v1 = vpop.f32.mrf.mxu1 }
 0x2c1   : > { %v5156_v46 = vpack.c.bf16 %v2863_v43, %v2863_v43  ;;  %v2117_v47 = vadd.f32 %v7466_v24, %v2116_v45  ;;  %v5296_v48 = vpack.c.bf16 %v3003_v44, %v3003_v44  ;;  %v2677_v49 = vadd.f32 %v7466_v24, %v2676_v1 }
 0x2c2   : > { %v5707_v50 = vpop.f32.mrf.mxu0  ;;  %v5987_v51 = vpop.f32.mrf.mxu1 }
 0x2c3   : > { %4250 = vst.msk [vmem:[%s6469_s30 + $0x1e0] sm:$0xf] %vm4129_vm2, %v5156_v46  ;;  %v2864_v52 = vmax.f32 %v2117_v47, 0.0  ;;  %4390 = vst.msk [vmem:[%s6469_s30 + $0x410] sm:$0xf] %vm4129_vm2, %v5296_v48  ;;  %v3004_v53 = vmax.f32 %v2677_v49, 0.0 }
 0x2c4   : > { %v2121_v54 = vpop.f32.mrf.mxu0  ;;  %v2681_v56 = vpop.f32.mrf.mxu1 }
 0x2c5   : > { %v5157_v57 = vpack.c.bf16 %v2864_v52, %v2864_v52  ;;  %v2122_v58 = vadd.f32 %v7466_v24, %v2121_v54  ;;  %v5297_v59 = vpack.c.bf16 %v3004_v53, %v3004_v53  ;;  %v2682_v60 = vadd.f32 %v7466_v24, %v2681_v56 }
 0x2c6   : > { %v5710_v61 = vpop.f32.mrf.mxu0  ;;  %v5990_v62 = vpop.f32.mrf.mxu1 }
 0x2c7   : > { %4251 = vst.msk [vmem:[%s6469_s30 + $0x1e4] sm:$0xf] %vm4129_vm2, %v5157_v57  ;;  %v2865_v0 = vmax.f32 %v2122_v58, 0.0  ;;  %4391 = vst.msk [vmem:[%s6469_s30 + $0x414] sm:$0xf] %vm4129_vm2, %v5297_v59  ;;  %v3005_v2 = vmax.f32 %v2682_v60, 0.0 }
 0x2c8   : > { %v2124_v3 = vpop.f32.mrf.mxu0  ;;  %v2684_v55 = vpop.f32.mrf.mxu1 }
 0x2c9   : > { %v5158_v4 = vpack.c.bf16 %v2865_v0, %v2865_v0  ;;  %v2125_v5 = vadd.f32 %v7466_v24, %v2124_v3  ;;  %v5298_v6 = vpack.c.bf16 %v3005_v2, %v3005_v2  ;;  %v2685_v7 = vadd.f32 %v7466_v24, %v2684_v55 }
 0x2ca   : > { %v5711_v8 = vpop.f32.mrf.mxu0  ;;  %v5991_v9 = vpop.f32.mrf.mxu1 }
 0x2cb   : > { %4252 = vst.msk [vmem:[%s6469_s30 + $0x1e8] sm:$0xf] %vm4129_vm2, %v5158_v4  ;;  %v2866_v10 = vmax.f32 %v2125_v5, 0.0  ;;  %4392 = vst.msk [vmem:[%s6469_s30 + $0x418] sm:$0xf] %vm4129_vm2, %v5298_v6  ;;  %v3006_v11 = vmax.f32 %v2685_v7, 0.0 }
 0x2cc   : > { %v2129_v12 = vpop.f32.mrf.mxu0  ;;  %v2689_v13 = vpop.f32.mrf.mxu1 }
 0x2cd   : > { %v5159_v14 = vpack.c.bf16 %v2866_v10, %v2866_v10  ;;  %v2130_v15 = vadd.f32 %v7466_v24, %v2129_v12  ;;  %v5299_v16 = vpack.c.bf16 %v3006_v11, %v3006_v11  ;;  %v2690_v17 = vadd.f32 %v7466_v24, %v2689_v13 }
 0x2ce   : > { %v5714_v18 = vpop.f32.mrf.mxu0  ;;  %v5994_v19 = vpop.f32.mrf.mxu1 }
 0x2cf   : > { %4253 = vst.msk [vmem:[%s6469_s30 + $0x1ec] sm:$0xf] %vm4129_vm2, %v5159_v14  ;;  %v2867_v20 = vmax.f32 %v2130_v15, 0.0  ;;  %4393 = vst.msk [vmem:[%s6469_s30 + $0x41c] sm:$0xf] %vm4129_vm2, %v5299_v16  ;;  %v3007_v21 = vmax.f32 %v2690_v17, 0.0 }
 0x2d0   : > { %v2132_v22 = vpop.f32.mrf.mxu0  ;;  %v2692_v23 = vpop.f32.mrf.mxu1 }
 0x2d1   : > { %v5160_v63 = vpack.c.bf16 %v2867_v20, %v2867_v20  ;;  %v2133_v25 = vadd.f32 %v7466_v24, %v2132_v22  ;;  %v5300_v26 = vpack.c.bf16 %v3007_v21, %v3007_v21  ;;  %v2693_v27 = vadd.f32 %v7466_v24, %v2692_v23 }
 0x2d2   : > { %v5715_v28 = vpop.f32.mrf.mxu0  ;;  %v5995_v29 = vpop.f32.mrf.mxu1 }
 0x2d3   : > { %4254 = vst.msk [vmem:[%s6469_s30 + $0x1f0] sm:$0xf] %vm4129_vm2, %v5160_v63  ;;  %v2868_v30 = vmax.f32 %v2133_v25, 0.0  ;;  %4394 = vst.msk [vmem:[%s6469_s30 + $0x420] sm:$0xf] %vm4129_vm2, %v5300_v26  ;;  %v3008_v31 = vmax.f32 %v2693_v27, 0.0 }
 0x2d4   : > { %v2137_v32 = vpop.f32.mrf.mxu0  ;;  %v2697_v33 = vpop.f32.mrf.mxu1 }
 0x2d5   : > { %v5161_v34 = vpack.c.bf16 %v2868_v30, %v2868_v30  ;;  %v2138_v35 = vadd.f32 %v7466_v24, %v2137_v32  ;;  %v5301_v36 = vpack.c.bf16 %v3008_v31, %v3008_v31  ;;  %v2698_v37 = vadd.f32 %v7466_v24, %v2697_v33 }
 0x2d6   : > { %v5718_v38 = vpop.f32.mrf.mxu0  ;;  %v5998_v39 = vpop.f32.mrf.mxu1 }
 0x2d7   : > { %4255 = vst.msk [vmem:[%s6469_s30 + $0x1f4] sm:$0xf] %vm4129_vm2, %v5161_v34  ;;  %v2869_v40 = vmax.f32 %v2138_v35, 0.0  ;;  %4395 = vst.msk [vmem:[%s6469_s30 + $0x424] sm:$0xf] %vm4129_vm2, %v5301_v36  ;;  %v3009_v41 = vmax.f32 %v2698_v37, 0.0 }
 0x2d8   : > { %v2140_v42 = vpop.f32.mrf.mxu0  ;;  %v2700_v43 = vpop.f32.mrf.mxu1 }
 0x2d9   : > { %v5162_v44 = vpack.c.bf16 %v2869_v40, %v2869_v40  ;;  %v2141_v45 = vadd.f32 %v7466_v24, %v2140_v42  ;;  %v5302_v1 = vpack.c.bf16 %v3009_v41, %v3009_v41  ;;  %v2701_v46 = vadd.f32 %v7466_v24, %v2700_v43 }
 0x2da   : > { %v5719_v47 = vpop.f32.mrf.mxu0  ;;  %v5999_v48 = vpop.f32.mrf.mxu1 }
 0x2db   : > { %4256 = vst.msk [vmem:[%s6469_s30 + $0x1f8] sm:$0xf] %vm4129_vm2, %v5162_v44  ;;  %v2870_v49 = vmax.f32 %v2141_v45, 0.0  ;;  %4396 = vst.msk [vmem:[%s6469_s30 + $0x428] sm:$0xf] %vm4129_vm2, %v5302_v1  ;;  %v3010_v50 = vmax.f32 %v2701_v46, 0.0 }
 0x2dc   : > { %v2145_v51 = vpop.f32.mrf.mxu0  ;;  %v2705_v52 = vpop.f32.mrf.mxu1 }
 0x2dd   : > { %v5163_v53 = vpack.c.bf16 %v2870_v49, %v2870_v49  ;;  %v2146_v54 = vadd.f32 %v7466_v24, %v2145_v51  ;;  %v5303_v56 = vpack.c.bf16 %v3010_v50, %v3010_v50  ;;  %v2706_v57 = vadd.f32 %v7466_v24, %v2705_v52 }
 0x2de   : > { %v5722_v58 = vpop.f32.mrf.mxu0  ;;  %v6002_v59 = vpop.f32.mrf.mxu1 }
 0x2df   : > { %4257 = vst.msk [vmem:[%s6469_s30 + $0x1fc] sm:$0xf] %vm4129_vm2, %v5163_v53  ;;  %v2871_v60 = vmax.f32 %v2146_v54, 0.0  ;;  %4397 = vst.msk [vmem:[%s6469_s30 + $0x42c] sm:$0xf] %vm4129_vm2, %v5303_v56  ;;  %v3011_v61 = vmax.f32 %v2706_v57, 0.0 }
 0x2e0   : > { %v2148_v62 = vpop.f32.mrf.mxu0  ;;  %v2708_v0 = vpop.f32.mrf.mxu1 }
 0x2e1   : > { %v5164_v2 = vpack.c.bf16 %v2871_v60, %v2871_v60  ;;  %v2149_v3 = vadd.f32 %v7466_v24, %v2148_v62  ;;  %v5304_v55 = vpack.c.bf16 %v3011_v61, %v3011_v61  ;;  %v2709_v4 = vadd.f32 %v7466_v24, %v2708_v0 }
 0x2e2   : > { %v5723_v5 = vpop.f32.mrf.mxu0  ;;  %v6003_v6 = vpop.f32.mrf.mxu1 }
 0x2e3   : > { %4258 = vst.msk [vmem:[%s6469_s30 + $0x200] sm:$0xf] %vm4129_vm2, %v5164_v2  ;;  %v2872_v7 = vmax.f32 %v2149_v3, 0.0  ;;  %4398 = vst.msk [vmem:[%s6469_s30 + $0x430] sm:$0xf] %vm4129_vm2, %v5304_v55  ;;  %v3012_v8 = vmax.f32 %v2709_v4, 0.0 }
 0x2e4   : > { %v2153_v9 = vpop.f32.mrf.mxu0  ;;  %v2713_v10 = vpop.f32.mrf.mxu1 }
 0x2e5   : > { %v5165_v11 = vpack.c.bf16 %v2872_v7, %v2872_v7  ;;  %v2154_v12 = vadd.f32 %v7466_v24, %v2153_v9  ;;  %v5305_v13 = vpack.c.bf16 %v3012_v8, %v3012_v8  ;;  %v2714_v14 = vadd.f32 %v7466_v24, %v2713_v10 }
 0x2e6   : > { %v5726_v15 = vpop.f32.mrf.mxu0  ;;  %v6006_v16 = vpop.f32.mrf.mxu1 }
 0x2e7   : > { %4259 = vst.msk [vmem:[%s6469_s30 + $0x204] sm:$0xf] %vm4129_vm2, %v5165_v11  ;;  %v2873_v17 = vmax.f32 %v2154_v12, 0.0  ;;  %4399 = vst.msk [vmem:[%s6469_s30 + $0x434] sm:$0xf] %vm4129_vm2, %v5305_v13  ;;  %v3013_v18 = vmax.f32 %v2714_v14, 0.0 }
 0x2e8   : > { %v2156_v19 = vpop.f32.mrf.mxu0  ;;  %v2716_v20 = vpop.f32.mrf.mxu1 }
 0x2e9   : > { %v5166_v21 = vpack.c.bf16 %v2873_v17, %v2873_v17  ;;  %v2157_v22 = vadd.f32 %v7466_v24, %v2156_v19  ;;  %v5306_v23 = vpack.c.bf16 %v3013_v18, %v3013_v18  ;;  %v2717_v63 = vadd.f32 %v7466_v24, %v2716_v20  ;;  %v4409_v17 = vld [vmem:[%s6469_s30 + $0x450] sm:$0x1] }
 0x2ea   : > { %v5727_v25 = vpop.f32.mrf.mxu0  ;;  %v6007_v26 = vpop.f32.mrf.mxu1 }
 0x2eb   : > { %4260 = vst.msk [vmem:[%s6469_s30 + $0x208] sm:$0xf] %vm4129_vm2, %v5166_v21  ;;  %v2874_v27 = vmax.f32 %v2157_v22, 0.0  ;;  %4400 = vst.msk [vmem:[%s6469_s30 + $0x438] sm:$0xf] %vm4129_vm2, %v5306_v23  ;;  %v3014_v28 = vmax.f32 %v2717_v63, 0.0 }
 0x2ec   : > { %v2161_v29 = vpop.f32.mrf.mxu0  ;;  %v2721_v30 = vpop.f32.mrf.mxu1 }
 0x2ed   : > { %v5167_v31 = vpack.c.bf16 %v2874_v27, %v2874_v27  ;;  %v2162_v32 = vadd.f32 %v7466_v24, %v2161_v29  ;;  %v5307_v33 = vpack.c.bf16 %v3014_v28, %v3014_v28  ;;  %v2722_v34 = vadd.f32 %v7466_v24, %v2721_v30 }
 0x2ee   : > { %v5730_v35 = vpop.f32.mrf.mxu0  ;;  %v6010_v36 = vpop.f32.mrf.mxu1 }
 0x2ef   : > { %4261 = vst.msk [vmem:[%s6469_s30 + $0x20c] sm:$0xf] %vm4129_vm2, %v5167_v31  ;;  %v2875_v37 = vmax.f32 %v2162_v32, 0.0  ;;  %4401 = vst.msk [vmem:[%s6469_s30 + $0x43c] sm:$0xf] %vm4129_vm2, %v5307_v33  ;;  %v3015_v38 = vmax.f32 %v2722_v34, 0.0 }
 0x2f0   : > { %v2164_v39 = vpop.f32.mrf.mxu0  ;;  %v2724_v40 = vpop.f32.mrf.mxu1 }
 0x2f1   : > { %v5168_v41 = vpack.c.bf16 %v2875_v37, %v2875_v37  ;;  %v2165_v42 = vadd.f32 %v7466_v24, %v2164_v39  ;;  %v5308_v43 = vpack.c.bf16 %v3015_v38, %v3015_v38  ;;  %v2725_v44 = vadd.f32 %v7466_v24, %v2724_v40 }
 0x2f2   : > { %v5731_v45 = vpop.f32.mrf.mxu0  ;;  %v6011_v1 = vpop.f32.mrf.mxu1 }
 0x2f3   : > { %4262 = vst.msk [vmem:[%s6469_s30 + $0x210] sm:$0xf] %vm4129_vm2, %v5168_v41  ;;  %v2876_v46 = vmax.f32 %v2165_v42, 0.0  ;;  %4402 = vst.msk [vmem:[%s6469_s30 + $0x440] sm:$0xf] %vm4129_vm2, %v5308_v43  ;;  %v3016_v47 = vmax.f32 %v2725_v44, 0.0 }
 0x2f4   : > { %v2169_v48 = vpop.f32.mrf.mxu0  ;;  %v2729_v49 = vpop.f32.mrf.mxu1 }
 0x2f5   : > { %v5169_v50 = vpack.c.bf16 %v2876_v46, %v2876_v46  ;;  %v2170_v51 = vadd.f32 %v7466_v24, %v2169_v48  ;;  %v5309_v52 = vpack.c.bf16 %v3016_v47, %v3016_v47  ;;  %v2730_v53 = vadd.f32 %v7466_v24, %v2729_v49 }
 0x2f6   : > { %v5734_v54 = vpop.f32.mrf.mxu0  ;;  %v6014_v56 = vpop.f32.mrf.mxu1 }
 0x2f7   : > { %4263 = vst.msk [vmem:[%s6469_s30 + $0x214] sm:$0xf] %vm4129_vm2, %v5169_v50  ;;  %v2877_v57 = vmax.f32 %v2170_v51, 0.0  ;;  %4403 = vst.msk [vmem:[%s6469_s30 + $0x444] sm:$0xf] %vm4129_vm2, %v5309_v52  ;;  %v3017_v58 = vmax.f32 %v2730_v53, 0.0 }
 0x2f8   : > { %v2172_v59 = vpop.f32.mrf.mxu0  ;;  %v2732_v60 = vpop.f32.mrf.mxu1 }
 0x2f9   : > { %v5170_v61 = vpack.c.bf16 %v2877_v57, %v2877_v57  ;;  %v2173_v62 = vadd.f32 %v7466_v24, %v2172_v59  ;;  %v5310_v0 = vpack.c.bf16 %v3017_v58, %v3017_v58  ;;  %v2733_v2 = vadd.f32 %v7466_v24, %v2732_v60 }
 0x2fa   : > { %v5735_v3 = vpop.f32.mrf.mxu0  ;;  %v6015_v55 = vpop.f32.mrf.mxu1 }
 0x2fb   : > { %4264 = vst.msk [vmem:[%s6469_s30 + $0x218] sm:$0xf] %vm4129_vm2, %v5170_v61  ;;  %v2878_v4 = vmax.f32 %v2173_v62, 0.0  ;;  %4404 = vst.msk [vmem:[%s6469_s30 + $0x448] sm:$0xf] %vm4129_vm2, %v5310_v0  ;;  %v3018_v5 = vmax.f32 %v2733_v2, 0.0 }
 0x2fc   : > { %v2177_v6 = vpop.f32.mrf.mxu0  ;;  %v2737_v7 = vpop.f32.mrf.mxu1 }
 0x2fd   : > { %v5171_v8 = vpack.c.bf16 %v2878_v4, %v2878_v4  ;;  %v2178_v9 = vadd.f32 %v7466_v24, %v2177_v6  ;;  %v5311_v10 = vpack.c.bf16 %v3018_v5, %v3018_v5  ;;  %v2738_v11 = vadd.f32 %v7466_v24, %v2737_v7 }
 0x2fe   : > { %v5738_v12 = vpop.f32.mrf.mxu0  ;;  %v6018_v13 = vpop.f32.mrf.mxu1 }
 0x2ff   : > { %4265 = vst.msk [vmem:[%s6469_s30 + $0x21c] sm:$0xf] %vm4129_vm2, %v5171_v8  ;;  %v2879_v14 = vmax.f32 %v2178_v9, 0.0  ;;  %4405 = vst.msk [vmem:[%s6469_s30 + $0x44c] sm:$0xf] %vm4129_vm2, %v5311_v10  ;;  %v3019_v15 = vmax.f32 %v2738_v11, 0.0 }
 0x300   : > { %v2180_v16 = vpop.f32.mrf.mxu0  ;;  %v2740_v18 = vpop.f32.mrf.mxu1 }
 0x301   : > { %v5172_v19 = vpack.c.bf16 %v2879_v14, %v2879_v14  ;;  %v2181_v20 = vadd.f32 %v7466_v24, %v2180_v16  ;;  %v5312_v21 = vpack.c.bf16 %v3019_v15, %v3019_v15 }
 0x302   : > { %v5739_v22 = vpop.f32.mrf.mxu0  ;;  %v6019_v23 = vpop.f32.mrf.mxu1 }
 0x303   : > { %4266 = vst.msk [vmem:[%s6469_s30 + $0x220] sm:$0xf] %vm4129_vm2, %v5172_v19  ;;  %v2880_v63 = vmax.f32 %v2181_v20, 0.0  ;;  %v4410_v25 = vsel %vm4408_vm5, %v5312_v21, %v4409_v17 }
 0x304   : > { %4411 = vst [vmem:[%s6469_s30 + $0x450] sm:$0x1] %v4410_v25  ;;  %v2185_v26 = vpop.f32.mrf.mxu0 }
 0x305   : > { %v5173_v27 = vpack.c.bf16 %v2880_v63, %v2880_v63  ;;  %v2186_v28 = vadd.f32 %v7466_v24, %v2185_v26 }
 0x306   : > { %v5742_v29 = vpop.f32.mrf.mxu0 }
 0x307   : > { %4267 = vst.msk [vmem:[%s6469_s30 + $0x224] sm:$0xf] %vm4129_vm2, %v5173_v27  ;;  %v2881_v30 = vmax.f32 %v2186_v28, 0.0 }
 0x308   : > { %v2188_v31 = vpop.f32.mrf.mxu0 }
 0x309   : > { %v5174_v32 = vpack.c.bf16 %v2881_v30, %v2881_v30  ;;  %v2189_v33 = vadd.f32 %v7466_v24, %v2188_v31 }
 0x30a   : > { %v5743_v34 = vpop.f32.mrf.mxu0 }
 0x30b   : > { %4268 = vst.msk [vmem:[%s6469_s30 + $0x228] sm:$0xf] %vm4129_vm2, %v5174_v32  ;;  %v2882_v35 = vmax.f32 %v2189_v33, 0.0 }
 0x30d   : > { %v5175_v36 = vpack.c.bf16 %v2882_v35, %v2882_v35 }
 0x30f   : > { %4269 = vst.msk [vmem:[%s6469_s30 + $0x22c] sm:$0xf] %vm4129_vm2, %v5175_v36 }
 0x310 PF: > { %s13_s12 = sadd.s32 1, %s6191_s12  }
 0x311   : > { %p10_p4 = scmp.ge.s32.totalorder %s13_s12, 4  }
 0x313   :  { %12 = sbr.rel (!%p10_p4) target bundleno = 1 (0x1), region = 62 }

// kernel: net_forward.6
= control target key start
LH: loop header
LB: loop body
LE: loop exit
PB: predicated region body
PF: predicated region fallthrough
CT: control target
= control target key end

     0   :  { %s1747_s12 = smov 0   ;;  %s2072_s0 = inlined_call_operand.vmem [shape: bf16[2,529,72], index: 0, kind: input, shape index: {}]   ;;  %s2073_s1 = inlined_call_operand.vmem [shape: bf16[72,16], index: 1, kind: input, shape index: {}]   ;;  %s2074_s2 = inlined_call_operand.vmem [shape: f32[1,16], index: 2, kind: input, shape index: {}]   ;;  %s2075_s3 = inlined_call_operand.vmem [shape: bf16[2,529,16], index: 3, kind: output, shape index: {}]  }
   0x1 LB: > { %s1325_s13 = sadd.s32 4294967295, %s1725_s12   ;;  %p1329_p0 = scmp.ge.s32.totalorder %s1725_s12, 1  ;;  %s1725_s12 = sphi %s1747_s12, %s13_s12  }
   0x2   : > { %p137_p1 = scmp.lt.s32.totalorder %s1725_s12, 3 }
   0x4   : > { %p138_p2 = pnand %p1329_p0, %p137_p1 }
   0x5   : > { %p161_p3 = scmp.lt.s32.totalorder (!%p138_p2), %s1325_s13, 1 }
   0x6   : > { %141 = sbr.rel (%p138_p2) target bundleno = 302 (0x12e), region = 32 }
   0xb   : > { %v1680_v0 = vld [vmem:[%s2073_s1 + $0x20] ss:$0 sps:$4 sm:$0xff]   ;;  %vm553_vm0 = vcmask 1043456   ;;  %v1681_v1 = vld [vmem:[%s2073_s1 + $0x18] sm:$0xff]   ;;  %v1682_v3 = vld [vmem:[%s2073_s1 + $0x10] sm:$0xff]   ;;  %s2079_s13 = smov (!%p161_p3, %s1325_s13), 1 }
   0xc   : > { %1669 = vmatprep.subr.msk.bf16.mxu0 %vm553_vm0, %v1680_v0  ;;  %v555_v2 = vsel %vm553_vm0, %v1680_v0, 0  ;;  %1670 = vmatprep.subr.msk.bf16.mxu1 %vm553_vm0, %v1680_v0  ;;  %s1671_s20 = smul.u32 268, %s2079_s13  ;;  %v1683_v4 = vld [vmem:[%s2073_s1 + $0x8] sm:$0xff]   ;;  %vm450_vm1 = vcmask 588800   ;;  %v1684_v6 = vld [vmem:[%s2073_s1] sm:$0xff]   ;;  %vm1197_vm2 = vcmask 125952  }
   0xd   : > { %1582 = vmatpush3.bf16.msra.mxu0 %v555_v2  ;;  %1664 = vmatpush3.bf16.msra.mxu1 %v555_v2  ;;  %v1851_v40 = vld [vmem:[%s2074_s2] ss:$0 sm:$0xff]  ;;  %vm1264_vm3 = vcmask 122880   ;;  %vm1265_vm4 = vsmask.f32 256 }
   0xe   : > { %1583 = vmatprep.subr.bf16.mxu0 %v1681_v1  ;;  %1660 = vmatprep.subr.bf16.mxu1 %v1681_v1  ;;  %s1775_s25 = scalar_lea.vmem %s2072_s0, %s1671_s20  ;;  %s1862_s5 = scalar_lea.vmem %s2075_s3, %s1671_s20  ;;  %vm2034_vm5 = vmand %vm1264_vm3, %vm1265_vm4 }
   0xf   : > { %v1685_v5 = vld [vmem:[%s1775_s25] sm:$0xff]   ;;  %v1687_v7 = vld [vmem:[%s1775_s25 + $0x90] sm:$0xff]   ;;  %v1686_v8 = vld [vmem:[%s1775_s25 + $0x8] sm:$0xff]  }
  0x10   : > { %1591 = vmatprep.mubr.msk.bf16.mxu0 %vm450_vm1, %v1685_v5  ;;  %1627 = vmatprep.mubr.msk.bf16.mxu1 %vm450_vm1, %v1687_v7  ;;  %v1688_v9 = vld [vmem:[%s1775_s25 + $0x98] sm:$0xff]   ;;  %v1689_v10 = vld [vmem:[%s1775_s25 + $0x10] sm:$0xff]   ;;  %v1691_v11 = vld [vmem:[%s1775_s25 + $0xa0] sm:$0xff]  }
  0x11   : > { %1584 = vmatpush3.bf16.msra.mxu0 %v1681_v1  ;;  %1665 = vmatpush3.bf16.msra.mxu1 %v1681_v1  ;;  %v1690_v12 = vld [vmem:[%s1775_s25 + $0x18] sm:$0xff]   ;;  %v1692_v13 = vld [vmem:[%s1775_s25 + $0xa8] sm:$0xff]   ;;  %v1693_v14 = vld [vmem:[%s1775_s25 + $0x20] sm:$0xff]  }
  0x12   : > { %1585 = vmatprep.subr.bf16.mxu0 %v1682_v3  ;;  %1661 = vmatprep.subr.bf16.mxu1 %v1682_v3  ;;  %v1695_v15 = vld [vmem:[%s1775_s25 + $0xb0] sm:$0xff]   ;;  %v1694_v16 = vld [vmem:[%s1775_s25 + $0x28] sm:$0xff]   ;;  %v1696_v17 = vld [vmem:[%s1775_s25 + $0xb8] sm:$0xff]  }
  0x13   : > { %v1697_v18 = vld [vmem:[%s1775_s25 + $0x30] sm:$0xff]   ;;  %v1699_v19 = vld [vmem:[%s1775_s25 + $0xc0] sm:$0xff]   ;;  %v1698_v20 = vld [vmem:[%s1775_s25 + $0x38] sm:$0xff]  }
  0x14   : > { %v1700_v21 = vld [vmem:[%s1775_s25 + $0xc8] sm:$0xff]   ;;  %v1701_v22 = vld [vmem:[%s1775_s25 + $0x40] sm:$0xff]   ;;  %v1703_v23 = vld [vmem:[%s1775_s25 + $0xd0] sm:$0xff]  }
  0x15   : > { %1586 = vmatpush3.bf16.msra.mxu0 %v1682_v3  ;;  %1666 = vmatpush3.bf16.msra.mxu1 %v1682_v3  ;;  %v1702_v24 = vld [vmem:[%s1775_s25 + $0x48] sm:$0xff]   ;;  %v1704_v25 = vld [vmem:[%s1775_s25 + $0xd8] sm:$0xff]   ;;  %v1705_v26 = vld [vmem:[%s1775_s25 + $0x50] sm:$0xff]  }
  0x16   : > { %1587 = vmatprep.subr.bf16.mxu0 %v1683_v4  ;;  %1662 = vmatprep.subr.bf16.mxu1 %v1683_v4  ;;  %v1707_v27 = vld [vmem:[%s1775_s25 + $0xe0] sm:$0xff]   ;;  %v1706_v28 = vld [vmem:[%s1775_s25 + $0x58] sm:$0xff]   ;;  %v1708_v29 = vld [vmem:[%s1775_s25 + $0xe8] sm:$0xff]  }
  0x17   : > { %v1709_v30 = vld [vmem:[%s1775_s25 + $0x60] sm:$0xff]   ;;  %v1711_v31 = vld [vmem:[%s1775_s25 + $0xf0] sm:$0xff]   ;;  %v1710_v32 = vld [vmem:[%s1775_s25 + $0x68] sm:$0xff]  }
  0x18   : > { %v1712_v33 = vld [vmem:[%s1775_s25 + $0xf8] sm:$0xff]   ;;  %v1713_v34 = vld [vmem:[%s1775_s25 + $0x70] sm:$0xff]   ;;  %v1715_v35 = vld [vmem:[%s1775_s25 + $0x100] sm:$0xff]  }
  0x19   : > { %1588 = vmatpush3.bf16.msra.mxu0 %v1683_v4  ;;  %1667 = vmatpush3.bf16.msra.mxu1 %v1683_v4  ;;  %v1714_v36 = vld [vmem:[%s1775_s25 + $0x78] sm:$0xff]   ;;  %v1716_v37 = vld [vmem:[%s1775_s25 + $0x108] ss:$0 sps:$4 sm:$0x11]   ;;  %v1717_v38 = vld [vmem:[%s1775_s25 + $0x80] sm:$0xff]  }
  0x1a   : > { %1589 = vmatprep.subr.bf16.mxu0 %v1684_v6  ;;  %1663 = vmatprep.subr.bf16.mxu1 %v1684_v6  ;;  %v1718_v39 = vld [vmem:[%s1775_s25 + $0x88] sm:$0xff]  }
  0x1d   : > { %1590 = vmatpush3.bf16.msra.mxu0 %v1684_v6  ;;  %1668 = vmatpush3.bf16.msra.mxu1 %v1684_v6 }
  0x20   : > { %1592 = vmatmul.mubr.msk.bf16.vlgmr.msra.gmra.mxu0 %vm450_vm1, %v1686_v8  ;;  %1628 = vmatmul.mubr.msk.bf16.vlgmr.msra.gmra.mxu1 %vm450_vm1, %v1688_v9 }
  0x21   : > { %1595 = vmatprep.mubr.msk.bf16.mxu0 %vm450_vm1, %v1689_v10  ;;  %1631 = vmatprep.mubr.msk.bf16.mxu1 %vm450_vm1, %v1691_v11 }
  0x28   : > { %1596 = vmatmul.mubr.msk.bf16.gmra.mxu0 %vm450_vm1, %v1690_v12  ;;  %1632 = vmatmul.mubr.msk.bf16.gmra.mxu1 %vm450_vm1, %v1692_v13 }
  0x29   : > { %1599 = vmatprep.mubr.msk.bf16.mxu0 %vm450_vm1, %v1693_v14  ;;  %1635 = vmatprep.mubr.msk.bf16.mxu1 %vm450_vm1, %v1695_v15 }
  0x30   : > { %1600 = vmatmul.mubr.msk.bf16.gmra.mxu0 %vm450_vm1, %v1694_v16  ;;  %1636 = vmatmul.mubr.msk.bf16.gmra.mxu1 %vm450_vm1, %v1696_v17 }
  0x31   : > { %1603 = vmatprep.mubr.msk.bf16.mxu0 %vm450_vm1, %v1697_v18  ;;  %1639 = vmatprep.mubr.msk.bf16.mxu1 %vm450_vm1, %v1699_v19 }
  0x38   : > { %1604 = vmatmul.mubr.msk.bf16.gmra.mxu0 %vm450_vm1, %v1698_v20  ;;  %1640 = vmatmul.mubr.msk.bf16.gmra.mxu1 %vm450_vm1, %v1700_v21 }
  0x39   : > { %1607 = vmatprep.mubr.msk.bf16.mxu0 %vm450_vm1, %v1701_v22  ;;  %1643 = vmatprep.mubr.msk.bf16.mxu1 %vm450_vm1, %v1703_v23 }
  0x40   : > { %1608 = vmatmul.mubr.msk.bf16.gmra.mxu0 %vm450_vm1, %v1702_v24  ;;  %1644 = vmatmul.mubr.msk.bf16.gmra.mxu1 %vm450_vm1, %v1704_v25 }
  0x41   : > { %1611 = vmatprep.mubr.msk.bf16.mxu0 %vm450_vm1, %v1705_v26  ;;  %1647 = vmatprep.mubr.msk.bf16.mxu1 %vm450_vm1, %v1707_v27 }
  0x48   : > { %1612 = vmatmul.mubr.msk.bf16.gmra.mxu0 %vm450_vm1, %v1706_v28  ;;  %1648 = vmatmul.mubr.msk.bf16.gmra.mxu1 %vm450_vm1, %v1708_v29 }
  0x49   : > { %1615 = vmatprep.mubr.msk.bf16.mxu0 %vm450_vm1, %v1709_v30  ;;  %1651 = vmatprep.mubr.msk.bf16.mxu1 %vm450_vm1, %v1711_v31 }
  0x50   : > { %1616 = vmatmul.mubr.msk.bf16.gmra.mxu0 %vm450_vm1, %v1710_v32  ;;  %1652 = vmatmul.mubr.msk.bf16.gmra.mxu1 %vm450_vm1, %v1712_v33 }
  0x51   : > { %1619 = vmatprep.mubr.msk.bf16.mxu0 %vm450_vm1, %v1713_v34  ;;  %1655 = vmatprep.mubr.msk.bf16.mxu1 %vm450_vm1, %v1715_v35 }
  0x58   : > { %1620 = vmatmul.mubr.msk.bf16.gmra.mxu0 %vm450_vm1, %v1714_v36  ;;  %1656 = vmatmul.mubr.msk.bf16.gmra.mxu1 %vm450_vm1, %v1716_v37 }
  0x59   : > { %1623 = vmatprep.mubr.msk.bf16.mxu0 %vm450_vm1, %v1717_v38 }
  0x60   : > { %1624 = vmatmul.mubr.msk.bf16.gmra.mxu0 %vm450_vm1, %v1718_v39 }
  0xe0   : > { %v1593_v41 = vpop.f32.mrf.mxu0  ;;  %v1629_v42 = vpop.f32.mrf.mxu1 }
  0xe1   : > { %v600_v43 = vadd.f32 %v1593_v41, %v1851_v40  ;;  %v744_v44 = vadd.f32 %v1629_v42, %v1851_v40 }
  0xe2   : > { %v591_v45 = vpop.f32.mrf.mxu0  ;;  %v735_v46 = vpop.f32.mrf.mxu1 }
  0xe3   : > { %v863_v47 = vmax.f32 %v600_v43, 0.0  ;;  %v592_v48 = vadd.f32 %v1851_v40, %v591_v45  ;;  %v899_v49 = vmax.f32 %v744_v44, 0.0  ;;  %v736_v50 = vadd.f32 %v1851_v40, %v735_v46 }
  0xe4   : > { %v1594_v51 = vpop.f32.mrf.mxu0  ;;  %v1630_v52 = vpop.f32.mrf.mxu1 }
  0xe5   : > { %v1477_v53 = vpack.c.bf16 %v863_v47, %v863_v47  ;;  %v861_v54 = vmax.f32 %v592_v48, 0.0  ;;  %v1513_v55 = vpack.c.bf16 %v899_v49, %v899_v49  ;;  %v603_v56 = vadd.f32 %v1594_v51, %v1851_v40 }
  0xe6   : > { %v897_v57 = vmax.f32 %v736_v50, 0.0  ;;  %v594_v58 = vpop.f32.mrf.mxu0  ;;  %v747_v59 = vadd.f32 %v1630_v52, %v1851_v40  ;;  %v738_v60 = vpop.f32.mrf.mxu1 }
  0xe7   : > { %1200 = vst.msk [vmem:[%s1862_s5 + $0x8] sm:$0xf] %vm1197_vm2, %v1477_v53  ;;  %v1475_v61 = vpack.c.bf16 %v861_v54, %v861_v54  ;;  %1236 = vst.msk [vmem:[%s1862_s5 + $0x98] sm:$0xf] %vm1197_vm2, %v1513_v55  ;;  %v864_v62 = vmax.f32 %v603_v56, 0.0  ;;  %v595_v63 = vadd.f32 %v1851_v40, %v594_v58  ;;  %v739_v0 = vadd.f32 %v1851_v40, %v738_v60 }
  0xe8   : > { %v1511_v1 = vpack.c.bf16 %v897_v57, %v897_v57  ;;  %v900_v2 = vmax.f32 %v747_v59, 0.0  ;;  %v1597_v3 = vpop.f32.mrf.mxu0  ;;  %v1633_v4 = vpop.f32.mrf.mxu1 }
  0xe9   : > { %1198 = vst.msk [vmem:[%s1862_s5] sm:$0xf] %vm1197_vm2, %v1475_v61  ;;  %v1478_v5 = vpack.c.bf16 %v864_v62, %v864_v62  ;;  %v862_v6 = vmax.f32 %v595_v63, 0.0  ;;  %v616_v7 = vadd.f32 %v1597_v3, %v1851_v40  ;;  %v898_v8 = vmax.f32 %v739_v0, 0.0 }
  0xea   : > { %1234 = vst.msk [vmem:[%s1862_s5 + $0x90] sm:$0xf] %vm1197_vm2, %v1511_v1  ;;  %v1514_v9 = vpack.c.bf16 %v900_v2, %v900_v2  ;;  %v607_v10 = vpop.f32.mrf.mxu0  ;;  %v760_v11 = vadd.f32 %v1633_v4, %v1851_v40  ;;  %v751_v12 = vpop.f32.mrf.mxu1 }
  0xeb   : > { %1201 = vst.msk [vmem:[%s1862_s5 + $0xc] sm:$0xf] %vm1197_vm2, %v1478_v5  ;;  %v1476_v13 = vpack.c.bf16 %v862_v6, %v862_v6  ;;  %v867_v14 = vmax.f32 %v616_v7, 0.0  ;;  %v1512_v15 = vpack.c.bf16 %v898_v8, %v898_v8  ;;  %v608_v16 = vadd.f32 %v1851_v40, %v607_v10 }
  0xec   : > { %1237 = vst.msk [vmem:[%s1862_s5 + $0x9c] sm:$0xf] %vm1197_vm2, %v1514_v9  ;;  %v903_v17 = vmax.f32 %v760_v11, 0.0  ;;  %v1598_v18 = vpop.f32.mrf.mxu0  ;;  %v752_v19 = vadd.f32 %v1851_v40, %v751_v12  ;;  %v1634_v20 = vpop.f32.mrf.mxu1 }
  0xed   : > { %1199 = vst.msk [vmem:[%s1862_s5 + $0x4] sm:$0xf] %vm1197_vm2, %v1476_v13  ;;  %v1481_v21 = vpack.c.bf16 %v867_v14, %v867_v14  ;;  %1235 = vst.msk [vmem:[%s1862_s5 + $0x94] sm:$0xf] %vm1197_vm2, %v1512_v15  ;;  %v865_v22 = vmax.f32 %v608_v16, 0.0  ;;  %v619_v23 = vadd.f32 %v1598_v18, %v1851_v40  ;;  %v763_v24 = vadd.f32 %v1634_v20, %v1851_v40 }
  0xee   : > { %v1517_v25 = vpack.c.bf16 %v903_v17, %v903_v17  ;;  %v901_v26 = vmax.f32 %v752_v19, 0.0  ;;  %v610_v27 = vpop.f32.mrf.mxu0  ;;  %v754_v28 = vpop.f32.mrf.mxu1 }
  0xef   : > { %1204 = vst.msk [vmem:[%s1862_s5 + $0x18] sm:$0xf] %vm1197_vm2, %v1481_v21  ;;  %v1479_v29 = vpack.c.bf16 %v865_v22, %v865_v22  ;;  %v868_v30 = vmax.f32 %v619_v23, 0.0  ;;  %v611_v31 = vadd.f32 %v1851_v40, %v610_v27  ;;  %v904_v32 = vmax.f32 %v763_v24, 0.0 }
  0xf0   : > { %1240 = vst.msk [vmem:[%s1862_s5 + $0xa8] sm:$0xf] %vm1197_vm2, %v1517_v25  ;;  %v1515_v33 = vpack.c.bf16 %v901_v26, %v901_v26  ;;  %v1601_v34 = vpop.f32.mrf.mxu0  ;;  %v755_v35 = vadd.f32 %v1851_v40, %v754_v28  ;;  %v1637_v36 = vpop.f32.mrf.mxu1 }
  0xf1   : > { %1202 = vst.msk [vmem:[%s1862_s5 + $0x10] sm:$0xf] %vm1197_vm2, %v1479_v29  ;;  %v1482_v37 = vpack.c.bf16 %v868_v30, %v868_v30  ;;  %v866_v38 = vmax.f32 %v611_v31, 0.0  ;;  %v1518_v39 = vpack.c.bf16 %v904_v32, %v904_v32  ;;  %v632_v41 = vadd.f32 %v1601_v34, %v1851_v40 }
  0xf2   : > { %1238 = vst.msk [vmem:[%s1862_s5 + $0xa0] sm:$0xf] %vm1197_vm2, %v1515_v33  ;;  %v902_v42 = vmax.f32 %v755_v35, 0.0  ;;  %v623_v43 = vpop.f32.mrf.mxu0  ;;  %v776_v44 = vadd.f32 %v1637_v36, %v1851_v40  ;;  %v767_v45 = vpop.f32.mrf.mxu1 }
  0xf3   : > { %1205 = vst.msk [vmem:[%s1862_s5 + $0x1c] sm:$0xf] %vm1197_vm2, %v1482_v37  ;;  %v1480_v46 = vpack.c.bf16 %v866_v38, %v866_v38  ;;  %1241 = vst.msk [vmem:[%s1862_s5 + $0xac] sm:$0xf] %vm1197_vm2, %v1518_v39  ;;  %v871_v47 = vmax.f32 %v632_v41, 0.0  ;;  %v624_v48 = vadd.f32 %v1851_v40, %v623_v43  ;;  %v768_v49 = vadd.f32 %v1851_v40, %v767_v45 }
  0xf4   : > { %v1516_v50 = vpack.c.bf16 %v902_v42, %v902_v42  ;;  %v907_v51 = vmax.f32 %v776_v44, 0.0  ;;  %v1602_v52 = vpop.f32.mrf.mxu0  ;;  %v1638_v53 = vpop.f32.mrf.mxu1 }
  0xf5   : > { %1203 = vst.msk [vmem:[%s1862_s5 + $0x14] sm:$0xf] %vm1197_vm2, %v1480_v46  ;;  %v1485_v54 = vpack.c.bf16 %v871_v47, %v871_v47  ;;  %v869_v55 = vmax.f32 %v624_v48, 0.0  ;;  %v635_v56 = vadd.f32 %v1602_v52, %v1851_v40  ;;  %v905_v57 = vmax.f32 %v768_v49, 0.0 }
  0xf6   : > { %1239 = vst.msk [vmem:[%s1862_s5 + $0xa4] sm:$0xf] %vm1197_vm2, %v1516_v50  ;;  %v1521_v58 = vpack.c.bf16 %v907_v51, %v907_v51  ;;  %v626_v59 = vpop.f32.mrf.mxu0  ;;  %v779_v60 = vadd.f32 %v1638_v53, %v1851_v40  ;;  %v770_v61 = vpop.f32.mrf.mxu1 }
  0xf7   : > { %1208 = vst.msk [vmem:[%s1862_s5 + $0x28] sm:$0xf] %vm1197_vm2, %v1485_v54  ;;  %v1483_v62 = vpack.c.bf16 %v869_v55, %v869_v55  ;;  %v872_v63 = vmax.f32 %v635_v56, 0.0  ;;  %v1519_v0 = vpack.c.bf16 %v905_v57, %v905_v57  ;;  %v627_v1 = vadd.f32 %v1851_v40, %v626_v59 }
  0xf8   : > { %1244 = vst.msk [vmem:[%s1862_s5 + $0xb8] sm:$0xf] %vm1197_vm2, %v1521_v58  ;;  %v908_v2 = vmax.f32 %v779_v60, 0.0  ;;  %v1605_v3 = vpop.f32.mrf.mxu0  ;;  %v771_v4 = vadd.f32 %v1851_v40, %v770_v61  ;;  %v1641_v5 = vpop.f32.mrf.mxu1 }
  0xf9   : > { %1206 = vst.msk [vmem:[%s1862_s5 + $0x20] sm:$0xf] %vm1197_vm2, %v1483_v62  ;;  %v1486_v6 = vpack.c.bf16 %v872_v63, %v872_v63  ;;  %1242 = vst.msk [vmem:[%s1862_s5 + $0xb0] sm:$0xf] %vm1197_vm2, %v1519_v0  ;;  %v870_v7 = vmax.f32 %v627_v1, 0.0  ;;  %v648_v8 = vadd.f32 %v1605_v3, %v1851_v40  ;;  %v792_v9 = vadd.f32 %v1641_v5, %v1851_v40 }
  0xfa   : > { %v1522_v10 = vpack.c.bf16 %v908_v2, %v908_v2  ;;  %v906_v11 = vmax.f32 %v771_v4, 0.0  ;;  %v639_v12 = vpop.f32.mrf.mxu0  ;;  %v783_v13 = vpop.f32.mrf.mxu1 }
  0xfb   : > { %1209 = vst.msk [vmem:[%s1862_s5 + $0x2c] sm:$0xf] %vm1197_vm2, %v1486_v6  ;;  %v1484_v14 = vpack.c.bf16 %v870_v7, %v870_v7  ;;  %v875_v15 = vmax.f32 %v648_v8, 0.0  ;;  %v640_v16 = vadd.f32 %v1851_v40, %v639_v12  ;;  %v911_v17 = vmax.f32 %v792_v9, 0.0 }
  0xfc   : > { %1245 = vst.msk [vmem:[%s1862_s5 + $0xbc] sm:$0xf] %vm1197_vm2, %v1522_v10  ;;  %v1520_v18 = vpack.c.bf16 %v906_v11, %v906_v11  ;;  %v1606_v19 = vpop.f32.mrf.mxu0  ;;  %v784_v20 = vadd.f32 %v1851_v40, %v783_v13  ;;  %v1642_v21 = vpop.f32.mrf.mxu1 }
  0xfd   : > { %1207 = vst.msk [vmem:[%s1862_s5 + $0x24] sm:$0xf] %vm1197_vm2, %v1484_v14  ;;  %v1489_v22 = vpack.c.bf16 %v875_v15, %v875_v15  ;;  %v873_v23 = vmax.f32 %v640_v16, 0.0  ;;  %v1525_v24 = vpack.c.bf16 %v911_v17, %v911_v17  ;;  %v651_v25 = vadd.f32 %v1606_v19, %v1851_v40 }
  0xfe   : > { %1243 = vst.msk [vmem:[%s1862_s5 + $0xb4] sm:$0xf] %vm1197_vm2, %v1520_v18  ;;  %v909_v26 = vmax.f32 %v784_v20, 0.0  ;;  %v642_v27 = vpop.f32.mrf.mxu0  ;;  %v795_v28 = vadd.f32 %v1642_v21, %v1851_v40  ;;  %v786_v29 = vpop.f32.mrf.mxu1 }
  0xff   : > { %1212 = vst.msk [vmem:[%s1862_s5 + $0x38] sm:$0xf] %vm1197_vm2, %v1489_v22  ;;  %v1487_v30 = vpack.c.bf16 %v873_v23, %v873_v23  ;;  %1248 = vst.msk [vmem:[%s1862_s5 + $0xc8] sm:$0xf] %vm1197_vm2, %v1525_v24  ;;  %v876_v31 = vmax.f32 %v651_v25, 0.0  ;;  %v643_v32 = vadd.f32 %v1851_v40, %v642_v27  ;;  %v787_v33 = vadd.f32 %v1851_v40, %v786_v29 }
 0x100   : > { %v1523_v34 = vpack.c.bf16 %v909_v26, %v909_v26  ;;  %v912_v35 = vmax.f32 %v795_v28, 0.0  ;;  %v1609_v36 = vpop.f32.mrf.mxu0  ;;  %v1645_v37 = vpop.f32.mrf.mxu1 }
 0x101   : > { %1210 = vst.msk [vmem:[%s1862_s5 + $0x30] sm:$0xf] %vm1197_vm2, %v1487_v30  ;;  %v1490_v38 = vpack.c.bf16 %v876_v31, %v876_v31  ;;  %v874_v39 = vmax.f32 %v643_v32, 0.0  ;;  %v664_v41 = vadd.f32 %v1609_v36, %v1851_v40  ;;  %v910_v42 = vmax.f32 %v787_v33, 0.0 }
 0x102   : > { %1246 = vst.msk [vmem:[%s1862_s5 + $0xc0] sm:$0xf] %vm1197_vm2, %v1523_v34  ;;  %v1526_v43 = vpack.c.bf16 %v912_v35, %v912_v35  ;;  %v655_v44 = vpop.f32.mrf.mxu0  ;;  %v808_v45 = vadd.f32 %v1645_v37, %v1851_v40  ;;  %v799_v46 = vpop.f32.mrf.mxu1 }
 0x103   : > { %1213 = vst.msk [vmem:[%s1862_s5 + $0x3c] sm:$0xf] %vm1197_vm2, %v1490_v38  ;;  %v1488_v47 = vpack.c.bf16 %v874_v39, %v874_v39  ;;  %v879_v48 = vmax.f32 %v664_v41, 0.0  ;;  %v1524_v49 = vpack.c.bf16 %v910_v42, %v910_v42  ;;  %v656_v50 = vadd.f32 %v1851_v40, %v655_v44 }
 0x104   : > { %1249 = vst.msk [vmem:[%s1862_s5 + $0xcc] sm:$0xf] %vm1197_vm2, %v1526_v43  ;;  %v915_v51 = vmax.f32 %v808_v45, 0.0  ;;  %v1610_v52 = vpop.f32.mrf.mxu0  ;;  %v800_v53 = vadd.f32 %v1851_v40, %v799_v46  ;;  %v1646_v54 = vpop.f32.mrf.mxu1 }
 0x105   : > { %1211 = vst.msk [vmem:[%s1862_s5 + $0x34] sm:$0xf] %vm1197_vm2, %v1488_v47  ;;  %v1493_v55 = vpack.c.bf16 %v879_v48, %v879_v48  ;;  %1247 = vst.msk [vmem:[%s1862_s5 + $0xc4] sm:$0xf] %vm1197_vm2, %v1524_v49  ;;  %v877_v56 = vmax.f32 %v656_v50, 0.0  ;;  %v667_v57 = vadd.f32 %v1610_v52, %v1851_v40  ;;  %v811_v58 = vadd.f32 %v1646_v54, %v1851_v40 }
 0x106   : > { %v1529_v59 = vpack.c.bf16 %v915_v51, %v915_v51  ;;  %v913_v60 = vmax.f32 %v800_v53, 0.0  ;;  %v658_v61 = vpop.f32.mrf.mxu0  ;;  %v802_v62 = vpop.f32.mrf.mxu1 }
 0x107   : > { %1216 = vst.msk [vmem:[%s1862_s5 + $0x48] sm:$0xf] %vm1197_vm2, %v1493_v55  ;;  %v1491_v63 = vpack.c.bf16 %v877_v56, %v877_v56  ;;  %v880_v0 = vmax.f32 %v667_v57, 0.0  ;;  %v659_v1 = vadd.f32 %v1851_v40, %v658_v61  ;;  %v916_v2 = vmax.f32 %v811_v58, 0.0 }
 0x108   : > { %1252 = vst.msk [vmem:[%s1862_s5 + $0xd8] sm:$0xf] %vm1197_vm2, %v1529_v59  ;;  %v1527_v3 = vpack.c.bf16 %v913_v60, %v913_v60  ;;  %v1613_v4 = vpop.f32.mrf.mxu0  ;;  %v803_v5 = vadd.f32 %v1851_v40, %v802_v62  ;;  %v1649_v6 = vpop.f32.mrf.mxu1 }
 0x109   : > { %1214 = vst.msk [vmem:[%s1862_s5 + $0x40] sm:$0xf] %vm1197_vm2, %v1491_v63  ;;  %v1494_v7 = vpack.c.bf16 %v880_v0, %v880_v0  ;;  %v878_v8 = vmax.f32 %v659_v1, 0.0  ;;  %v1530_v9 = vpack.c.bf16 %v916_v2, %v916_v2  ;;  %v680_v10 = vadd.f32 %v1613_v4, %v1851_v40 }
 0x10a   : > { %1250 = vst.msk [vmem:[%s1862_s5 + $0xd0] sm:$0xf] %vm1197_vm2, %v1527_v3  ;;  %v914_v11 = vmax.f32 %v803_v5, 0.0  ;;  %v671_v12 = vpop.f32.mrf.mxu0  ;;  %v824_v13 = vadd.f32 %v1649_v6, %v1851_v40  ;;  %v815_v14 = vpop.f32.mrf.mxu1 }
 0x10b   : > { %1217 = vst.msk [vmem:[%s1862_s5 + $0x4c] sm:$0xf] %vm1197_vm2, %v1494_v7  ;;  %v1492_v15 = vpack.c.bf16 %v878_v8, %v878_v8  ;;  %1253 = vst.msk [vmem:[%s1862_s5 + $0xdc] sm:$0xf] %vm1197_vm2, %v1530_v9  ;;  %v883_v16 = vmax.f32 %v680_v10, 0.0  ;;  %v672_v17 = vadd.f32 %v1851_v40, %v671_v12  ;;  %v816_v18 = vadd.f32 %v1851_v40, %v815_v14 }
 0x10c   : > { %v1528_v19 = vpack.c.bf16 %v914_v11, %v914_v11  ;;  %v919_v20 = vmax.f32 %v824_v13, 0.0  ;;  %v1614_v21 = vpop.f32.mrf.mxu0  ;;  %v1650_v22 = vpop.f32.mrf.mxu1 }
 0x10d   : > { %1215 = vst.msk [vmem:[%s1862_s5 + $0x44] sm:$0xf] %vm1197_vm2, %v1492_v15  ;;  %v1497_v23 = vpack.c.bf16 %v883_v16, %v883_v16  ;;  %v881_v24 = vmax.f32 %v672_v17, 0.0  ;;  %v683_v25 = vadd.f32 %v1614_v21, %v1851_v40  ;;  %v917_v26 = vmax.f32 %v816_v18, 0.0 }
 0x10e   : > { %1251 = vst.msk [vmem:[%s1862_s5 + $0xd4] sm:$0xf] %vm1197_vm2, %v1528_v19  ;;  %v1533_v27 = vpack.c.bf16 %v919_v20, %v919_v20  ;;  %v674_v28 = vpop.f32.mrf.mxu0  ;;  %v827_v29 = vadd.f32 %v1650_v22, %v1851_v40  ;;  %v818_v30 = vpop.f32.mrf.mxu1 }
 0x10f   : > { %1220 = vst.msk [vmem:[%s1862_s5 + $0x58] sm:$0xf] %vm1197_vm2, %v1497_v23  ;;  %v1495_v31 = vpack.c.bf16 %v881_v24, %v881_v24  ;;  %v884_v32 = vmax.f32 %v683_v25, 0.0  ;;  %v1531_v33 = vpack.c.bf16 %v917_v26, %v917_v26  ;;  %v675_v34 = vadd.f32 %v1851_v40, %v674_v28 }
 0x110   : > { %1256 = vst.msk [vmem:[%s1862_s5 + $0xe8] sm:$0xf] %vm1197_vm2, %v1533_v27  ;;  %v920_v35 = vmax.f32 %v827_v29, 0.0  ;;  %v1617_v36 = vpop.f32.mrf.mxu0  ;;  %v819_v37 = vadd.f32 %v1851_v40, %v818_v30  ;;  %v1653_v38 = vpop.f32.mrf.mxu1  ;;  %v1267_v27 = vld [vmem:[%s1862_s5 + $0x108] sm:$0x1] }
 0x111   : > { %1218 = vst.msk [vmem:[%s1862_s5 + $0x50] sm:$0xf] %vm1197_vm2, %v1495_v31  ;;  %v1498_v39 = vpack.c.bf16 %v884_v32, %v884_v32  ;;  %1254 = vst.msk [vmem:[%s1862_s5 + $0xe0] sm:$0xf] %vm1197_vm2, %v1531_v33  ;;  %v882_v41 = vmax.f32 %v675_v34, 0.0  ;;  %v696_v42 = vadd.f32 %v1617_v36, %v1851_v40  ;;  %v840_v43 = vadd.f32 %v1653_v38, %v1851_v40 }
 0x112   : > { %v1534_v44 = vpack.c.bf16 %v920_v35, %v920_v35  ;;  %v918_v45 = vmax.f32 %v819_v37, 0.0  ;;  %v687_v46 = vpop.f32.mrf.mxu0  ;;  %v831_v47 = vpop.f32.mrf.mxu1 }
 0x113   : > { %1221 = vst.msk [vmem:[%s1862_s5 + $0x5c] sm:$0xf] %vm1197_vm2, %v1498_v39  ;;  %v1496_v48 = vpack.c.bf16 %v882_v41, %v882_v41  ;;  %v887_v49 = vmax.f32 %v696_v42, 0.0  ;;  %v688_v50 = vadd.f32 %v1851_v40, %v687_v46  ;;  %v923_v51 = vmax.f32 %v840_v43, 0.0 }
 0x114   : > { %1257 = vst.msk [vmem:[%s1862_s5 + $0xec] sm:$0xf] %vm1197_vm2, %v1534_v44  ;;  %v1532_v52 = vpack.c.bf16 %v918_v45, %v918_v45  ;;  %v1618_v53 = vpop.f32.mrf.mxu0  ;;  %v832_v54 = vadd.f32 %v1851_v40, %v831_v47  ;;  %v1654_v55 = vpop.f32.mrf.mxu1 }
 0x115   : > { %1219 = vst.msk [vmem:[%s1862_s5 + $0x54] sm:$0xf] %vm1197_vm2, %v1496_v48  ;;  %v1501_v56 = vpack.c.bf16 %v887_v49, %v887_v49  ;;  %v885_v57 = vmax.f32 %v688_v50, 0.0  ;;  %v1537_v58 = vpack.c.bf16 %v923_v51, %v923_v51  ;;  %v699_v59 = vadd.f32 %v1618_v53, %v1851_v40 }
 0x116   : > { %1255 = vst.msk [vmem:[%s1862_s5 + $0xe4] sm:$0xf] %vm1197_vm2, %v1532_v52  ;;  %v921_v60 = vmax.f32 %v832_v54, 0.0  ;;  %v690_v61 = vpop.f32.mrf.mxu0  ;;  %v843_v62 = vadd.f32 %v1654_v55, %v1851_v40  ;;  %v834_v63 = vpop.f32.mrf.mxu1 }
 0x117   : > { %1224 = vst.msk [vmem:[%s1862_s5 + $0x68] sm:$0xf] %vm1197_vm2, %v1501_v56  ;;  %v1499_v0 = vpack.c.bf16 %v885_v57, %v885_v57  ;;  %1260 = vst.msk [vmem:[%s1862_s5 + $0xf8] sm:$0xf] %vm1197_vm2, %v1537_v58  ;;  %v888_v1 = vmax.f32 %v699_v59, 0.0  ;;  %v691_v2 = vadd.f32 %v1851_v40, %v690_v61  ;;  %v835_v3 = vadd.f32 %v1851_v40, %v834_v63 }
 0x118   : > { %v1535_v4 = vpack.c.bf16 %v921_v60, %v921_v60  ;;  %v924_v5 = vmax.f32 %v843_v62, 0.0  ;;  %v1621_v6 = vpop.f32.mrf.mxu0  ;;  %v1657_v7 = vpop.f32.mrf.mxu1 }
 0x119   : > { %1222 = vst.msk [vmem:[%s1862_s5 + $0x60] sm:$0xf] %vm1197_vm2, %v1499_v0  ;;  %v1502_v8 = vpack.c.bf16 %v888_v1, %v888_v1  ;;  %v886_v9 = vmax.f32 %v691_v2, 0.0  ;;  %v712_v10 = vadd.f32 %v1621_v6, %v1851_v40  ;;  %v922_v11 = vmax.f32 %v835_v3, 0.0 }
 0x11a   : > { %1258 = vst.msk [vmem:[%s1862_s5 + $0xf0] sm:$0xf] %vm1197_vm2, %v1535_v4  ;;  %v1538_v12 = vpack.c.bf16 %v924_v5, %v924_v5  ;;  %v703_v13 = vpop.f32.mrf.mxu0  ;;  %v856_v14 = vadd.f32 %v1657_v7, %v1851_v40  ;;  %v847_v15 = vpop.f32.mrf.mxu1 }
 0x11b   : > { %1225 = vst.msk [vmem:[%s1862_s5 + $0x6c] sm:$0xf] %vm1197_vm2, %v1502_v8  ;;  %v1500_v16 = vpack.c.bf16 %v886_v9, %v886_v9  ;;  %v891_v17 = vmax.f32 %v712_v10, 0.0  ;;  %v1536_v18 = vpack.c.bf16 %v922_v11, %v922_v11  ;;  %v704_v19 = vadd.f32 %v1851_v40, %v703_v13 }
 0x11c   : > { %1261 = vst.msk [vmem:[%s1862_s5 + $0xfc] sm:$0xf] %vm1197_vm2, %v1538_v12  ;;  %v927_v20 = vmax.f32 %v856_v14, 0.0  ;;  %v1622_v21 = vpop.f32.mrf.mxu0  ;;  %v848_v22 = vadd.f32 %v1851_v40, %v847_v15  ;;  %v1658_v23 = vpop.f32.mrf.mxu1 }
 0x11d   : > { %1223 = vst.msk [vmem:[%s1862_s5 + $0x64] sm:$0xf] %vm1197_vm2, %v1500_v16  ;;  %v1505_v24 = vpack.c.bf16 %v891_v17, %v891_v17  ;;  %1259 = vst.msk [vmem:[%s1862_s5 + $0xf4] sm:$0xf] %vm1197_vm2, %v1536_v18  ;;  %v889_v25 = vmax.f32 %v704_v19, 0.0  ;;  %v715_v28 = vadd.f32 %v1622_v21, %v1851_v40 }
 0x11e   : > { %v1541_v29 = vpack.c.bf16 %v927_v20, %v927_v20  ;;  %v925_v30 = vmax.f32 %v848_v22, 0.0  ;;  %v706_v31 = vpop.f32.mrf.mxu0  ;;  %v850_v32 = vpop.f32.mrf.mxu1 }
 0x11f   : > { %1228 = vst.msk [vmem:[%s1862_s5 + $0x78] sm:$0xf] %vm1197_vm2, %v1505_v24  ;;  %v1503_v33 = vpack.c.bf16 %v889_v25, %v889_v25  ;;  %v892_v34 = vmax.f32 %v715_v28, 0.0  ;;  %v707_v35 = vadd.f32 %v1851_v40, %v706_v31  ;;  %v851_v36 = vadd.f32 %v1851_v40, %v850_v32 }
 0x120   : > { %v1268_v37 = vsel %vm2034_vm5, %v1541_v29, %v1267_v27  ;;  %v1539_v38 = vpack.c.bf16 %v925_v30, %v925_v30  ;;  %v1625_v39 = vpop.f32.mrf.mxu0 }
 0x121   : > { %1226 = vst.msk [vmem:[%s1862_s5 + $0x70] sm:$0xf] %vm1197_vm2, %v1503_v33  ;;  %1269 = vst [vmem:[%s1862_s5 + $0x108] sm:$0x1] %v1268_v37  ;;  %v1506_v41 = vpack.c.bf16 %v892_v34, %v892_v34  ;;  %v890_v42 = vmax.f32 %v707_v35, 0.0  ;;  %v728_v43 = vadd.f32 %v1625_v39, %v1851_v40  ;;  %v926_v44 = vmax.f32 %v851_v36, 0.0 }
 0x122   : > { %1262 = vst.msk [vmem:[%s1862_s5 + $0x100] sm:$0xf] %vm1197_vm2, %v1539_v38  ;;  %v719_v45 = vpop.f32.mrf.mxu0 }
 0x123   : > { %1229 = vst.msk [vmem:[%s1862_s5 + $0x7c] sm:$0xf] %vm1197_vm2, %v1506_v41  ;;  %v1504_v46 = vpack.c.bf16 %v890_v42, %v890_v42  ;;  %v895_v47 = vmax.f32 %v728_v43, 0.0  ;;  %v1540_v48 = vpack.c.bf16 %v926_v44, %v926_v44  ;;  %v720_v49 = vadd.f32 %v1851_v40, %v719_v45 }
 0x124   : > { %v1626_v50 = vpop.f32.mrf.mxu0 }
 0x125   : > { %1227 = vst.msk [vmem:[%s1862_s5 + $0x74] sm:$0xf] %vm1197_vm2, %v1504_v46  ;;  %v1509_v51 = vpack.c.bf16 %v895_v47, %v895_v47  ;;  %1263 = vst.msk [vmem:[%s1862_s5 + $0x104] sm:$0xf] %vm1197_vm2, %v1540_v48  ;;  %v893_v52 = vmax.f32 %v720_v49, 0.0  ;;  %v731_v53 = vadd.f32 %v1626_v50, %v1851_v40 }
 0x126   : > { %v722_v54 = vpop.f32.mrf.mxu0 }
 0x127   : > { %1232 = vst.msk [vmem:[%s1862_s5 + $0x88] sm:$0xf] %vm1197_vm2, %v1509_v51  ;;  %v1507_v55 = vpack.c.bf16 %v893_v52, %v893_v52  ;;  %v896_v56 = vmax.f32 %v731_v53, 0.0  ;;  %v723_v57 = vadd.f32 %v1851_v40, %v722_v54 }
 0x129   : > { %1230 = vst.msk [vmem:[%s1862_s5 + $0x80] sm:$0xf] %vm1197_vm2, %v1507_v55  ;;  %v1510_v58 = vpack.c.bf16 %v896_v56, %v896_v56  ;;  %v894_v59 = vmax.f32 %v723_v57, 0.0 }
 0x12b   : > { %1233 = vst.msk [vmem:[%s1862_s5 + $0x8c] sm:$0xf] %vm1197_vm2, %v1510_v58  ;;  %v1508_v60 = vpack.c.bf16 %v894_v59, %v894_v59 }
 0x12d   : > { %1231 = vst.msk [vmem:[%s1862_s5 + $0x84] sm:$0xf] %vm1197_vm2, %v1508_v60 }
 0x12e PF: > { %s13_s12 = sadd.s32 1, %s1725_s12  }
 0x12f   : > { %p10_p4 = scmp.ge.s32.totalorder %s13_s12, 4  }
 0x131   :  { %12 = sbr.rel (!%p10_p4) target bundleno = 1 (0x1), region = 62 }

// kernel: net_forward.7
= control target key start
LH: loop header
LB: loop body
LE: loop exit
PB: predicated region body
PF: predicated region fallthrough
CT: control target
= control target key end

     0   :  { %s786_s12 = smov 0   ;;  %s915_s0 = inlined_call_operand.vmem [shape: bf16[2,121,144], index: 0, kind: input, shape index: {}]   ;;  %s916_s1 = inlined_call_operand.vmem [shape: bf16[144,32], index: 1, kind: input, shape index: {}]   ;;  %s917_s2 = inlined_call_operand.vmem [shape: f32[1,32], index: 2, kind: input, shape index: {}]   ;;  %s918_s3 = inlined_call_operand.vmem [shape: bf16[2,121,32], index: 3, kind: output, shape index: {}]  }
   0x1 LB: > { %s618_s13 = sadd.s32 4294967295, %s763_s12   ;;  %p622_p0 = scmp.ge.s32.totalorder %s763_s12, 1  ;;  %s763_s12 = sphi %s786_s12, %s13_s12  }
   0x2   : > { %p137_p1 = scmp.lt.s32.totalorder %s763_s12, 3 }
   0x4   : > { %p138_p2 = pnand %p622_p0, %p137_p1 }
   0x5   : > { %p161_p3 = scmp.lt.s32.totalorder (!%p138_p2), %s618_s13, 1 }
   0x6   : > { %141 = sbr.rel (%p138_p2) target bundleno = 277 (0x115), region = 32 }
   0xb   : > { %v724_v0 = vld [vmem:[%s916_s1 + $0x38] sm:$0xff]   ;;  %v765_v1 = vmov 0   ;;  %v725_v2 = vld [vmem:[%s916_s1 + $0x30] sm:$0xff]   ;;  %s920_s13 = smov (!%p161_p3, %s618_s13), 1  ;;  %v726_v3 = vld [vmem:[%s916_s1 + $0x28] sm:$0xff]   ;;  %vm339_vm0 = vcmask 130048  }
   0xc   : > { %364 = vmatprep.subr.bf16.mxu0 %v765_v1  ;;  %697 = vmatprep.subr.bf16.mxu1 %v765_v1  ;;  %s679_s18 = sshll.u32 %s920_s13, 7  ;;  %v727_v4 = vld [vmem:[%s916_s1 + $0x20] sm:$0xff]   ;;  %v728_v7 = vld [vmem:[%s916_s1 + $0x18] sm:$0xff]   ;;  %v729_v8 = vld [vmem:[%s916_s1 + $0x10] sm:$0xff]   ;;  %s680_s11 = sshll.u32 %s920_s13, 6  ;;  %vm541_vm1 = vcmask 257024  }
   0xd   : > { %365 = vmatpush1.bf16.msra.mxu0 %v724_v0  ;;  %706 = vmatpush1.bf16.msra.mxu1 %v724_v0  ;;  %s809_s23 = scalar_lea.vmem %s915_s0, %s679_s18  ;;  %v730_v9 = vld [vmem:[%s916_s1 + $0x8] sm:$0xff]   ;;  %v731_v10 = vld [vmem:[%s916_s1] sm:$0xff]   ;;  %s864_s16 = scalar_lea.vmem %s918_s3, %s680_s11  ;;  %vm557_vm2 = vcmask 253952   ;;  %vm558_vm3 = vsmask.f32 256 }
   0xe   : > { %366 = vmatprep.subr.bf16.mxu0 %v765_v1  ;;  %698 = vmatprep.subr.bf16.mxu1 %v765_v1  ;;  %v735_v5 = vld [vmem:[%s809_s23 + $0x4] ss:$8 sps:$4 sm:$0xff]   ;;  %v733_v12 = vld [vmem:[%s809_s23] ss:$8 sps:$4 sm:$0xff]   ;;  %v739_v14 = vld [vmem:[%s809_s23 + $0x14] ss:$8 sps:$4 sm:$0xff]  }
   0xf   : > { %v738_v6 = vld [vmem:[%s809_s23 + $0x44] ss:$8 sps:$4 sm:$0xff]   ;;  %653 = vmatprep.mubr.msk.bf16.mxu0 %vm339_vm0, %v735_v5  ;;  %v736_v13 = vld [vmem:[%s809_s23 + $0x40] ss:$8 sps:$4 sm:$0xff]   ;;  %v741_v15 = vld [vmem:[%s809_s23 + $0x54] ss:$8 sps:$4 sm:$0xff]  }
  0x10   : > { %657 = vmatprep.mubr.msk.bf16.mxu1 %vm339_vm0, %v738_v6  ;;  %v732_v11 = vld [vmem:[%s916_s1 + $0x40] sm:$0xff]   ;;  %v743_v16 = vld [vmem:[%s809_s23 + $0x10] ss:$8 sps:$4 sm:$0xff]   ;;  %v751_v22 = vld [vmem:[%s809_s23 + $0x34] ss:$8 sps:$4 sm:$0xff]  }
  0x11   : > { %367 = vmatpush1.bf16.msra.mxu0 %v725_v2  ;;  %707 = vmatpush1.bf16.msra.mxu1 %v725_v2  ;;  %v744_v17 = vld [vmem:[%s809_s23 + $0x50] ss:$8 sps:$4 sm:$0xff]   ;;  %v745_v18 = vld [vmem:[%s809_s23 + $0x24] ss:$8 sps:$4 sm:$0xff]   ;;  %v749_v20 = vld [vmem:[%s809_s23 + $0x20] ss:$8 sps:$4 sm:$0xff]  }
  0x12   : > { %368 = vmatprep.subr.bf16.mxu0 %v765_v1  ;;  %699 = vmatprep.subr.bf16.mxu1 %v765_v1  ;;  %v747_v19 = vld [vmem:[%s809_s23 + $0x64] ss:$8 sps:$4 sm:$0xff]   ;;  %v750_v21 = vld [vmem:[%s809_s23 + $0x60] ss:$8 sps:$4 sm:$0xff]   ;;  %v755_v24 = vld [vmem:[%s809_s23 + $0x30] ss:$8 sps:$4 sm:$0xff]  }
  0x13   : > { %v753_v23 = vld [vmem:[%s809_s23 + $0x74] ss:$8 sps:$4 sm:$0x1f]   ;;  %v756_v25 = vld [vmem:[%s809_s23 + $0x70] ss:$8 sps:$4 sm:$0x1f]   ;;  %vm559_vm4 = vmand %vm557_vm2, %vm558_vm3 }
  0x14   : > { %v856_v26 = vld [vmem:[%s917_s2] ss:$0 sm:$0xff] }
  0x15   : > { %369 = vmatpush1.bf16.msra.mxu0 %v726_v3  ;;  %708 = vmatpush1.bf16.msra.mxu1 %v726_v3 }
  0x16   : > { %370 = vmatprep.subr.bf16.mxu0 %v765_v1  ;;  %700 = vmatprep.subr.bf16.mxu1 %v765_v1 }
  0x19   : > { %371 = vmatpush1.bf16.msra.mxu0 %v727_v4  ;;  %709 = vmatpush1.bf16.msra.mxu1 %v727_v4 }
  0x1a   : > { %372 = vmatprep.subr.bf16.mxu0 %v765_v1  ;;  %701 = vmatprep.subr.bf16.mxu1 %v765_v1 }
  0x1d   : > { %373 = vmatpush1.bf16.msra.mxu0 %v728_v7  ;;  %710 = vmatpush1.bf16.msra.mxu1 %v728_v7 }
  0x1e   : > { %374 = vmatprep.subr.bf16.mxu0 %v765_v1  ;;  %702 = vmatprep.subr.bf16.mxu1 %v765_v1 }
  0x21   : > { %375 = vmatpush1.bf16.msra.mxu0 %v729_v8  ;;  %711 = vmatpush1.bf16.msra.mxu1 %v729_v8 }
  0x22   : > { %376 = vmatprep.subr.bf16.mxu0 %v765_v1  ;;  %703 = vmatprep.subr.bf16.mxu1 %v765_v1 }
  0x25   : > { %377 = vmatpush1.bf16.msra.mxu0 %v730_v9  ;;  %712 = vmatpush1.bf16.msra.mxu1 %v730_v9 }
  0x26   : > { %378 = vmatprep.subr.bf16.mxu0 %v765_v1  ;;  %704 = vmatprep.subr.bf16.mxu1 %v765_v1 }
  0x29   : > { %379 = vmatpush1.bf16.msra.mxu0 %v731_v10  ;;  %713 = vmatpush1.bf16.msra.mxu1 %v731_v10 }
  0x2a   : > { %394 = vmatprep.subr.bf16.mxu0 %v765_v1  ;;  %705 = vmatprep.subr.bf16.mxu1 %v765_v1 }
  0x2d   : > { %395 = vmatpush2.bf16.msra.mxu0 %v732_v11  ;;  %714 = vmatpush2.bf16.msra.mxu1 %v732_v11 }
  0x30   : > { %397 = vmatmul.mubr.bf16.vlgmr.msra.gmra.mxu0 %v733_v12  ;;  %429 = vmatmul.mubr.bf16.vlgmr.msra.gmra.mxu1 %v736_v13 }
  0x31   : > { %654 = vmatprep.mubr.msk.bf16.mxu0 %vm339_vm0, %v739_v14  ;;  %658 = vmatprep.mubr.msk.bf16.mxu1 %vm339_vm0, %v741_v15 }
  0x38   : > { %405 = vmatmul.mubr.bf16.gmra.mxu0 %v743_v16  ;;  %437 = vmatmul.mubr.bf16.gmra.mxu1 %v744_v17 }
  0x39   : > { %655 = vmatprep.mubr.msk.bf16.mxu0 %vm339_vm0, %v745_v18  ;;  %659 = vmatprep.mubr.msk.bf16.mxu1 %vm339_vm0, %v747_v19 }
  0x40   : > { %413 = vmatmul.mubr.bf16.gmra.mxu0 %v749_v20  ;;  %445 = vmatmul.mubr.bf16.gmra.mxu1 %v750_v21 }
  0x41   : > { %656 = vmatprep.mubr.msk.bf16.mxu0 %vm339_vm0, %v751_v22  ;;  %660 = vmatprep.mubr.msk.bf16.mxu1 %vm339_vm0, %v753_v23 }
  0x48   : > { %421 = vmatmul.mubr.bf16.gmra.mxu0 %v755_v24  ;;  %453 = vmatmul.mubr.bf16.gmra.mxu1 %v756_v25 }
  0xf0   : > { %v398_v27 = vpop.f32.mrf.mxu0  ;;  %v430_v28 = vpop.f32.mrf.mxu1 }
  0xf1   : > { %v399_v29 = vadd.f32 %v856_v26, %v398_v27  ;;  %v431_v30 = vadd.f32 %v856_v26, %v430_v28 }
  0xf2   : > { %v400_v31 = vpop.f32.mrf.mxu0  ;;  %v432_v32 = vpop.f32.mrf.mxu1 }
  0xf3   : > { %v461_v33 = vmax.f32 %v399_v29, 0.0  ;;  %v469_v34 = vmax.f32 %v431_v30, 0.0 }
  0xf4   : > { %v401_v35 = vpop.f32.mrf.mxu0  ;;  %v433_v36 = vpop.f32.mrf.mxu1 }
  0xf5   : > { %v681_v37 = vpack.c.bf16 %v461_v33, %v461_v33  ;;  %v689_v38 = vpack.c.bf16 %v469_v34, %v469_v34  ;;  %v402_v39 = vadd.f32 %v856_v26, %v401_v35  ;;  %v434_v40 = vadd.f32 %v856_v26, %v433_v36 }
  0xf6   : > { %v403_v41 = vpop.f32.mrf.mxu0  ;;  %v435_v42 = vpop.f32.mrf.mxu1 }
  0xf7   : > { %542 = vst.msk [vmem:[%s864_s16] sm:$0xf] %vm541_vm1, %v681_v37  ;;  %550 = vst.msk [vmem:[%s864_s16 + $0x20] sm:$0xf] %vm541_vm1, %v689_v38  ;;  %v462_v43 = vmax.f32 %v402_v39, 0.0  ;;  %v470_v44 = vmax.f32 %v434_v40, 0.0 }
  0xf8   : > { %v406_v45 = vpop.f32.mrf.mxu0  ;;  %v438_v46 = vpop.f32.mrf.mxu1  ;;  %v560_v42 = vld [vmem:[%s864_s16 + $0x3c] sm:$0x1] }
  0xf9   : > { %v682_v47 = vpack.c.bf16 %v462_v43, %v462_v43  ;;  %v690_v48 = vpack.c.bf16 %v470_v44, %v470_v44  ;;  %v407_v49 = vadd.f32 %v856_v26, %v406_v45  ;;  %v439_v50 = vadd.f32 %v856_v26, %v438_v46 }
  0xfa   : > { %v408_v51 = vpop.f32.mrf.mxu0  ;;  %v440_v52 = vpop.f32.mrf.mxu1 }
  0xfb   : > { %543 = vst.msk [vmem:[%s864_s16 + $0x4] sm:$0xf] %vm541_vm1, %v682_v47  ;;  %551 = vst.msk [vmem:[%s864_s16 + $0x24] sm:$0xf] %vm541_vm1, %v690_v48  ;;  %v463_v53 = vmax.f32 %v407_v49, 0.0  ;;  %v471_v54 = vmax.f32 %v439_v50, 0.0 }
  0xfc   : > { %v409_v55 = vpop.f32.mrf.mxu0  ;;  %v441_v56 = vpop.f32.mrf.mxu1 }
  0xfd   : > { %v683_v57 = vpack.c.bf16 %v463_v53, %v463_v53  ;;  %v691_v58 = vpack.c.bf16 %v471_v54, %v471_v54  ;;  %v410_v59 = vadd.f32 %v856_v26, %v409_v55  ;;  %v442_v60 = vadd.f32 %v856_v26, %v441_v56 }
  0xfe   : > { %v411_v61 = vpop.f32.mrf.mxu0  ;;  %v443_v62 = vpop.f32.mrf.mxu1 }
  0xff   : > { %544 = vst.msk [vmem:[%s864_s16 + $0x8] sm:$0xf] %vm541_vm1, %v683_v57  ;;  %552 = vst.msk [vmem:[%s864_s16 + $0x28] sm:$0xf] %vm541_vm1, %v691_v58  ;;  %v464_v63 = vmax.f32 %v410_v59, 0.0  ;;  %v472_v0 = vmax.f32 %v442_v60, 0.0 }
 0x100   : > { %v414_v1 = vpop.f32.mrf.mxu0  ;;  %v446_v2 = vpop.f32.mrf.mxu1 }
 0x101   : > { %v684_v3 = vpack.c.bf16 %v464_v63, %v464_v63  ;;  %v692_v4 = vpack.c.bf16 %v472_v0, %v472_v0  ;;  %v415_v5 = vadd.f32 %v856_v26, %v414_v1  ;;  %v447_v6 = vadd.f32 %v856_v26, %v446_v2 }
 0x102   : > { %v416_v7 = vpop.f32.mrf.mxu0  ;;  %v448_v8 = vpop.f32.mrf.mxu1 }
 0x103   : > { %545 = vst.msk [vmem:[%s864_s16 + $0xc] sm:$0xf] %vm541_vm1, %v684_v3  ;;  %553 = vst.msk [vmem:[%s864_s16 + $0x2c] sm:$0xf] %vm541_vm1, %v692_v4  ;;  %v465_v9 = vmax.f32 %v415_v5, 0.0  ;;  %v473_v10 = vmax.f32 %v447_v6, 0.0 }
 0x104   : > { %v417_v11 = vpop.f32.mrf.mxu0  ;;  %v449_v12 = vpop.f32.mrf.mxu1 }
 0x105   : > { %v685_v13 = vpack.c.bf16 %v465_v9, %v465_v9  ;;  %v693_v14 = vpack.c.bf16 %v473_v10, %v473_v10  ;;  %v418_v15 = vadd.f32 %v856_v26, %v417_v11  ;;  %v450_v16 = vadd.f32 %v856_v26, %v449_v12 }
 0x106   : > { %v419_v17 = vpop.f32.mrf.mxu0  ;;  %v451_v18 = vpop.f32.mrf.mxu1 }
 0x107   : > { %546 = vst.msk [vmem:[%s864_s16 + $0x10] sm:$0xf] %vm541_vm1, %v685_v13  ;;  %554 = vst.msk [vmem:[%s864_s16 + $0x30] sm:$0xf] %vm541_vm1, %v693_v14  ;;  %v466_v19 = vmax.f32 %v418_v15, 0.0  ;;  %v474_v20 = vmax.f32 %v450_v16, 0.0 }
 0x108   : > { %v422_v21 = vpop.f32.mrf.mxu0  ;;  %v454_v22 = vpop.f32.mrf.mxu1 }
 0x109   : > { %v686_v23 = vpack.c.bf16 %v466_v19, %v466_v19  ;;  %v694_v24 = vpack.c.bf16 %v474_v20, %v474_v20  ;;  %v423_v25 = vadd.f32 %v856_v26, %v422_v21  ;;  %v455_v27 = vadd.f32 %v856_v26, %v454_v22 }
 0x10a   : > { %v424_v28 = vpop.f32.mrf.mxu0  ;;  %v456_v29 = vpop.f32.mrf.mxu1 }
 0x10b   : > { %547 = vst.msk [vmem:[%s864_s16 + $0x14] sm:$0xf] %vm541_vm1, %v686_v23  ;;  %555 = vst.msk [vmem:[%s864_s16 + $0x34] sm:$0xf] %vm541_vm1, %v694_v24  ;;  %v467_v30 = vmax.f32 %v423_v25, 0.0  ;;  %v475_v31 = vmax.f32 %v455_v27, 0.0 }
 0x10c   : > { %v425_v32 = vpop.f32.mrf.mxu0  ;;  %v457_v33 = vpop.f32.mrf.mxu1 }
 0x10d   : > { %v687_v34 = vpack.c.bf16 %v467_v30, %v467_v30  ;;  %v695_v35 = vpack.c.bf16 %v475_v31, %v475_v31  ;;  %v426_v36 = vadd.f32 %v856_v26, %v425_v32  ;;  %v458_v37 = vadd.f32 %v856_v26, %v457_v33 }
 0x10e   : > { %v427_v38 = vpop.f32.mrf.mxu0  ;;  %v459_v39 = vpop.f32.mrf.mxu1 }
 0x10f   : > { %548 = vst.msk [vmem:[%s864_s16 + $0x18] sm:$0xf] %vm541_vm1, %v687_v34  ;;  %556 = vst.msk [vmem:[%s864_s16 + $0x38] sm:$0xf] %vm541_vm1, %v695_v35  ;;  %v468_v40 = vmax.f32 %v426_v36, 0.0  ;;  %v476_v41 = vmax.f32 %v458_v37, 0.0 }
 0x111   : > { %v688_v43 = vpack.c.bf16 %v468_v40, %v468_v40  ;;  %v696_v44 = vpack.c.bf16 %v476_v41, %v476_v41 }
 0x113   : > { %549 = vst.msk [vmem:[%s864_s16 + $0x1c] sm:$0xf] %vm541_vm1, %v688_v43  ;;  %v561_v45 = vsel %vm559_vm4, %v696_v44, %v560_v42 }
 0x114   : > { %562 = vst [vmem:[%s864_s16 + $0x3c] sm:$0x1] %v561_v45 }
 0x115 PF: > { %s13_s12 = sadd.s32 1, %s763_s12  }
 0x116   : > { %p10_p4 = scmp.ge.s32.totalorder %s13_s12, 4  }
 0x118   :  { %12 = sbr.rel (!%p10_p4) target bundleno = 1 (0x1), region = 62 }

// kernel: net_forward.8
= control target key start
LH: loop header
LB: loop body
LE: loop exit
PB: predicated region body
PF: predicated region fallthrough
CT: control target
= control target key end

     0   :  { %s700_s12 = smov 0   ;;  %s789_s0 = inlined_call_operand.vmem [shape: bf16[2,25,288], index: 0, kind: input, shape index: {}]   ;;  %s790_s1 = inlined_call_operand.vmem [shape: bf16[288,64], index: 1, kind: input, shape index: {}]   ;;  %s791_s2 = inlined_call_operand.vmem [shape: f32[1,64], index: 2, kind: input, shape index: {}]   ;;  %s792_s3 = inlined_call_operand.vmem [shape: bf16[2,25,64], index: 3, kind: output, shape index: {}]  }
   0x1 LB: > { %s551_s13 = sadd.s32 4294967295, %s678_s12   ;;  %p555_p0 = scmp.ge.s32.totalorder %s678_s12, 1  ;;  %s678_s12 = sphi %s700_s12, %s13_s12  }
   0x2   : > { %p137_p1 = scmp.lt.s32.totalorder %s678_s12, 3 }
   0x4   : > { %p138_p2 = pnand %p555_p0, %p137_p1 }
   0x5   : > { %p161_p3 = scmp.lt.s32.totalorder (!%p138_p2), %s551_s13, 1 }
   0x6   : > { %141 = sbr.rel (%p138_p2) target bundleno = 263 (0x107), region = 32 }
   0xb   : > { %v646_v0 = vld [vmem:[%s790_s1 + $0x78] sm:$0xff]   ;;  %v648_v2 = vld [vmem:[%s790_s1 + $0x70] sm:$0xff]   ;;  %v650_v4 = vld [vmem:[%s790_s1 + $0x68] sm:$0xff]   ;;  %s794_s13 = smov (!%p161_p3, %s551_s13), 1  ;;  %vm361_vm0 = vcmask 261120   ;;  %vm486_vm1 = vcmask 519168  }
   0xc   : > { %v647_v1 = vld [vmem:[%s790_s1 + $0x38] sm:$0xff]   ;;  %597 = vmatprep.subr.bf16.mxu0 %v646_v0  ;;  %v649_v3 = vld [vmem:[%s790_s1 + $0x30] sm:$0xff]   ;;  %v651_v5 = vld [vmem:[%s790_s1 + $0x28] sm:$0xff]   ;;  %s637_s30 = smul.u32 48, %s794_s13  ;;  %s592_s4 = sshll.u32 %s794_s13, 4  ;;  %vm490_vm2 = vcmask 516096  }
   0xd   : > { %598 = vmatpush3.bf16.msra.mxu0 %v647_v1  ;;  %v652_v6 = vld [vmem:[%s790_s1 + $0x60] sm:$0xff]   ;;  %v654_v8 = vld [vmem:[%s790_s1 + $0x58] sm:$0xff]   ;;  %v661_v10 = vld [vmem:[%s790_s1 + $0x88] sm:$0xff]   ;;  %s170_s7 = scalar_lea.vmem %s792_s3, %s592_s4  ;;  %vm491_vm3 = vsmask.f32 256 }
   0xe   : > { %599 = vmatprep.subr.bf16.mxu0 %v648_v2  ;;  %v653_v7 = vld [vmem:[%s790_s1 + $0x20] sm:$0xff]   ;;  %v655_v9 = vld [vmem:[%s790_s1 + $0x18] sm:$0xff]   ;;  %s747_s14 = scalar_lea.vmem %s789_s0, %s637_s30  ;;  %v656_v11 = vld [vmem:[%s790_s1 + $0x50] sm:$0xff]   ;;  %629 = vmatprep.subr.bf16.mxu1 %v661_v10 }
   0xf   : > { %v657_v12 = vld [vmem:[%s790_s1 + $0x10] sm:$0xff]   ;;  %v658_v13 = vld [vmem:[%s790_s1 + $0x48] sm:$0xff]   ;;  %630 = vmatpush3.bf16.msra.mxu1 %v661_v10  ;;  %v666_v15 = vld [vmem:[%s790_s1 + $0x80] sm:$0xff]  }
  0x10   : > { %v665_v14 = vld [vmem:[%s747_s14 + $0x4] ss:$12 sps:$4 sm:$0xff]   ;;  %v667_v16 = vld [vmem:[%s747_s14 + $0x8] ss:$12 sps:$4 sm:$0xff]   ;;  %631 = vmatprep.subr.bf16.mxu1 %v666_v15  ;;  %v663_v21 = vld [vmem:[%s747_s14] ss:$12 sps:$4 sm:$0xff]  }
  0x11   : > { %600 = vmatpush3.bf16.msra.mxu0 %v649_v3  ;;  %400 = vmatprep.mubr.bf16.mxu0 %v665_v14  ;;  %v668_v17 = vld [vmem:[%s747_s14 + $0x20] ss:$12 sps:$4 sm:$0x1f]   ;;  %v669_v22 = vld [vmem:[%s747_s14 + $0x1c] ss:$12 sps:$4 sm:$0x1f]   ;;  %vm492_vm4 = vmand %vm490_vm2, %vm491_vm3 }
  0x12   : > { %601 = vmatprep.subr.bf16.mxu0 %v650_v4  ;;  %633 = vmatprep.mubr.msk.bf16.mxu1 %vm361_vm0, %v667_v16  ;;  %v659_v18 = vld [vmem:[%s790_s1 + $0x8] sm:$0xff]   ;;  %v660_v19 = vld [vmem:[%s790_s1 + $0x40] sm:$0xff]  }
  0x13   : > { %632 = vmatpush3.bf16.msra.mxu1 %v666_v15  ;;  %v662_v20 = vld [vmem:[%s790_s1] sm:$0xff]   ;;  %v493_v56 = vld [vmem:[%s170_s7 + $0xc] sm:$0x1] }
  0x14   : > { %v671_v23 = vld [vmem:[%s747_s14 + $0x18] ss:$12 sps:$4 sm:$0x1f]   ;;  %v559_v28 = vld [vmem:[%s791_s2] ss:$0 sm:$0xff] }
  0x15   : > { %602 = vmatpush3.bf16.msra.mxu0 %v651_v5 }
  0x16   : > { %603 = vmatprep.subr.bf16.mxu0 %v652_v6  ;;  %634 = vmatmul.mubr.msk.bf16.vlgmr.msra.gmra.mxu1 %vm361_vm0, %v668_v17 }
  0x19   : > { %604 = vmatpush3.bf16.msra.mxu0 %v653_v7 }
  0x1a   : > { %605 = vmatprep.subr.bf16.mxu0 %v654_v8 }
  0x1d   : > { %606 = vmatpush3.bf16.msra.mxu0 %v655_v9 }
  0x1e   : > { %607 = vmatprep.subr.bf16.mxu0 %v656_v11 }
  0x21   : > { %608 = vmatpush3.bf16.msra.mxu0 %v657_v12 }
  0x22   : > { %609 = vmatprep.subr.bf16.mxu0 %v658_v13 }
  0x25   : > { %610 = vmatpush3.bf16.msra.mxu0 %v659_v18 }
  0x26   : > { %611 = vmatprep.subr.bf16.mxu0 %v660_v19 }
  0x29   : > { %612 = vmatpush3.bf16.msra.mxu0 %v662_v20 }
  0x2c   : > { %401 = vmatmul.mubr.bf16.vlgmr.msra.gmra.mxu0 %v663_v21 }
  0x2d   : > { %408 = vmatprep.mubr.bf16.mxu0 %v669_v22 }
  0x34   : > { %409 = vmatmul.mubr.bf16.gmra.mxu0 %v671_v23 }
  0xd6   : > { %v635_v24 = vpop.f32.mrf.mxu1 }
  0xd8   : > { %v451_v26 = vpop.f32.mrf.mxu1 }
  0xda   : > { %v636_v31 = vpop.f32.mrf.mxu1 }
  0xdc   : > { %v454_v37 = vpop.f32.mrf.mxu1 }
  0xec   : > { %v613_v25 = vpop.f32.mrf.mxu0 }
  0xee   : > { %v614_v27 = vpop.f32.mrf.mxu0 }
  0xef   : > { %v615_v29 = vadd.f32 %v614_v27, %v613_v25 }
  0xf0   : > { %v616_v30 = vpop.f32.mrf.mxu0 }
  0xf1   : > { %v403_v32 = vadd.f32 %v615_v29, %v559_v28 }
  0xf2   : > { %v617_v33 = vpop.f32.mrf.mxu0 }
  0xf3   : > { %v618_v34 = vadd.f32 %v617_v33, %v616_v30  ;;  %v452_v35 = vadd.f32 %v451_v26, %v403_v32 }
  0xf4   : > { %v619_v36 = vpop.f32.mrf.mxu0 }
  0xf5   : > { %v466_v38 = vmax.f32 %v452_v35, 0.0  ;;  %v406_v39 = vadd.f32 %v618_v34, %v559_v28 }
  0xf6   : > { %v620_v40 = vpop.f32.mrf.mxu0 }
  0xf7   : > { %v593_v41 = vpack.c.bf16 %v466_v38, %v466_v38  ;;  %v621_v42 = vadd.f32 %v620_v40, %v619_v36  ;;  %v455_v43 = vadd.f32 %v454_v37, %v406_v39 }
  0xf8   : > { %v622_v44 = vpop.f32.mrf.mxu0 }
  0xf9   : > { %487 = vst.msk [vmem:[%s170_s7] sm:$0xf] %vm486_vm1, %v593_v41  ;;  %v411_v45 = vadd.f32 %v621_v42, %v559_v28  ;;  %v467_v46 = vmax.f32 %v455_v43, 0.0 }
  0xfa   : > { %v623_v47 = vpop.f32.mrf.mxu0 }
  0xfb   : > { %v460_v48 = vadd.f32 %v635_v24, %v411_v45  ;;  %v594_v49 = vpack.c.bf16 %v467_v46, %v467_v46  ;;  %v624_v50 = vadd.f32 %v623_v47, %v622_v44 }
  0xfd   : > { %v468_v51 = vmax.f32 %v460_v48, 0.0  ;;  %488 = vst.msk [vmem:[%s170_s7 + $0x4] sm:$0xf] %vm486_vm1, %v594_v49  ;;  %v414_v52 = vadd.f32 %v624_v50, %v559_v28 }
  0xff   : > { %v595_v53 = vpack.c.bf16 %v468_v51, %v468_v51  ;;  %v463_v54 = vadd.f32 %v636_v31, %v414_v52 }
 0x101   : > { %489 = vst.msk [vmem:[%s170_s7 + $0x8] sm:$0xf] %vm486_vm1, %v595_v53  ;;  %v469_v55 = vmax.f32 %v463_v54, 0.0 }
 0x103   : > { %v596_v57 = vpack.c.bf16 %v469_v55, %v469_v55 }
 0x105   : > { %v494_v58 = vsel %vm492_vm4, %v596_v57, %v493_v56 }
 0x106   : > { %495 = vst [vmem:[%s170_s7 + $0xc] sm:$0x1] %v494_v58 }
 0x107 PF: > { %s13_s12 = sadd.s32 1, %s678_s12  }
 0x108   : > { %p10_p4 = scmp.ge.s32.totalorder %s13_s12, 4  }
 0x10a   :  { %12 = sbr.rel (!%p10_p4) target bundleno = 1 (0x1), region = 62 }

// kernel: net_forward.9
= control target key start
LH: loop header
LB: loop body
LE: loop exit
PB: predicated region body
PF: predicated region fallthrough
CT: control target
= control target key end

     0   :  { %s3971_s20 = smov 0   ;;  %s4809_s0 = inlined_call_operand.vmem [shape: bf16[2,9,576], index: 0, kind: input, shape index: {}]   ;;  %s4810_s1 = inlined_call_operand.vmem [shape: bf16[576,128], index: 1, kind: input, shape index: {}]   ;;  %s4811_s2 = inlined_call_operand.vmem [shape: f32[1,128], index: 2, kind: input, shape index: {}]   ;;  %s4812_s3 = inlined_call_operand.vmem [shape: bf16[1152,256], index: 3, kind: input, shape index: {}]   ;;  %s4813_s4 = inlined_call_operand.vmem [shape: f32[1,256], index: 4, kind: input, shape index: {}]   ;;  %s4814_s5 = inlined_call_operand.vmem [shape: bf16[256,100], index: 5, kind: input, shape index: {}]   ;;  %s4815_s6 = inlined_call_operand.vmem [shape: f32[1,100], index: 6, kind: input, shape index: {}]   ;;  %s4816_s7 = inlined_call_operand.vmem [shape: bf16[100,1], index: 7, kind: input, shape index: {}]   ;;  %s4817_s8 = inlined_call_operand.<no memory space> [shape: f32[1,1], index: 8, kind: input, shape index: {}]   ;;  %s4818_s9 = inlined_call_operand.vmem [shape: bf16[256,100], index: 9, kind: input, shape index: {}]   ;;  %s4819_s10 = inlined_call_operand.vmem [shape: f32[1,100], index: 10, kind: input, shape index: {}]   ;;  %s4820_s11 = inlined_call_operand.vmem [shape: bf16[100,3], index: 11, kind: input, shape index: {}]   ;;  %s4821_s12 = inlined_call_operand.vmem [shape: f32[1,3], index: 12, kind: input, shape index: {}]   ;;  %s4822_s13 = inlined_call_operand.vmem [shape: bf16[100,3], index: 13, kind: input, shape index: {}]   ;;  %s4823_s14 = inlined_call_operand.vmem [shape: f32[1,3], index: 14, kind: input, shape index: {}]   ;;  %s4824_s15 = inlined_call_operand.vmem [shape: f32[2,1,128], index: 15, kind: output, shape index: {}]  }
   0x1   :  { %v20_v0 = vstv %s4817_s8 }
   0x2   :  { %21 = vst [vmem:[#allocation2] sm:$0x1] %v20_v0 }
   0x3 LB: > { %s3105_s21 = sadd.s32 4294967295, %s3880_s20   ;;  %p3109_p0 = scmp.ge.s32.totalorder %s3880_s20, 1  ;;  %s3880_s20 = sphi %s3971_s20, %s27_s20  }
   0x4   : > { %p439_p1 = scmp.lt.s32.totalorder %s3880_s20, 3 }
   0x6   : > { %p440_p2 = pnand %p3109_p0, %p439_p1 }
   0x7   : > { %p485_p3 = scmp.lt.s32.totalorder (!%p440_p2), %s3105_s21, 1  ;;  %s3886_s26 = smov (!%p440_p2), 3  }
   0x8   : > { %443 = sbr.rel (%p440_p2) target bundleno = 1192 (0x4a8), region = 80  ;;  %s3887_s27 = smov (!%p440_p2), 6  }
   0xd   : > { %v3554_v1 = vld [vmem:[%s4810_s1 + $0x78] sm:$0xff]   ;;  %v3558_v5 = vld [vmem:[%s4810_s1 + $0x70] sm:$0xff]   ;;  %v3562_v9 = vld [vmem:[%s4810_s1 + $0x68] sm:$0xff]   ;;  %s4826_s21 = smov (!%p485_p3, %s3105_s21), 1  ;;  %v3882_v37 = vmov 0.0   ;;  %vm3883_vm0 = vmmov 0  }
   0xe   : > { %v3555_v2 = vld [vmem:[%s4810_s1 + $0xf8] sm:$0xff]   ;;  %3356 = vmatprep.subr.bf16.mxu0 %v3554_v1  ;;  %v3559_v6 = vld [vmem:[%s4810_s1 + $0xf0] sm:$0xff]   ;;  %v3563_v10 = vld [vmem:[%s4810_s1 + $0xe8] sm:$0xff]   ;;  %s3539_s16 = smul.u32 40, %s4826_s21  ;;  %vm820_vm1 = vcmask 523264   ;;  %vm2615_vm2 = vcmask 1041408   ;;  %s492_s18 = scalar_lea.vmem %s4824_s15, %s4826_s21 }
   0xf   : > { %v3556_v3 = vld [vmem:[%s4810_s1 + $0x38] sm:$0xff]   ;;  %3378 = vmatprep.subr.bf16.mxu1 %v3555_v2  ;;  %v3560_v7 = vld [vmem:[%s4810_s1 + $0x30] sm:$0xff]   ;;  %v3564_v11 = vld [vmem:[%s4810_s1 + $0x28] sm:$0xff]   ;;  %vm2611_vm3 = vcmask 818176   ;;  %vm3051_vm6 = vcmask 23552   ;;  %vm3053_vm7 = vcmask 48128  }
  0x10   : > { %v3557_v4 = vld [vmem:[%s4810_s1 + $0xb8] sm:$0xff]   ;;  %3357 = vmatpush3.bf16.msra.mxu0 %v3556_v3  ;;  %v3561_v8 = vld [vmem:[%s4810_s1 + $0xb0] sm:$0xff]   ;;  %v3565_v12 = vld [vmem:[%s4810_s1 + $0xa8] sm:$0xff]   ;;  %s4079_s28 = scalar_lea.vmem %s4809_s0, %s3539_s16  ;;  %vm3055_vm8 = vcmask 56320  }
  0x11   : > { %3379 = vmatpush3.bf16.msra.mxu1 %v3557_v4  ;;  %3358 = vmatprep.subr.bf16.mxu0 %v3558_v5  ;;  %v3566_v13 = vld [vmem:[%s4810_s1 + $0x60] sm:$0xff]   ;;  %v3570_v17 = vld [vmem:[%s4810_s1 + $0x58] sm:$0xff]   ;;  %v3574_v21 = vld [vmem:[%s4810_s1 + $0x50] sm:$0xff]  }
  0x12   : > { %3380 = vmatprep.subr.bf16.mxu1 %v3559_v6  ;;  %v3567_v14 = vld [vmem:[%s4810_s1 + $0xe0] sm:$0xff]   ;;  %v3571_v18 = vld [vmem:[%s4810_s1 + $0xd8] sm:$0xff]   ;;  %v3575_v22 = vld [vmem:[%s4810_s1 + $0xd0] sm:$0xff]  }
  0x13   : > { %v3568_v15 = vld [vmem:[%s4810_s1 + $0x20] sm:$0xff]   ;;  %v3572_v19 = vld [vmem:[%s4810_s1 + $0x18] sm:$0xff]   ;;  %v3576_v23 = vld [vmem:[%s4810_s1 + $0x10] sm:$0xff]  }
  0x14   : > { %3359 = vmatpush3.bf16.msra.mxu0 %v3560_v7  ;;  %v3569_v16 = vld [vmem:[%s4810_s1 + $0xa0] sm:$0xff]   ;;  %v3573_v20 = vld [vmem:[%s4810_s1 + $0x98] sm:$0xff]   ;;  %v3577_v24 = vld [vmem:[%s4810_s1 + $0x90] sm:$0xff]  }
  0x15   : > { %3381 = vmatpush3.bf16.msra.mxu1 %v3561_v8  ;;  %3360 = vmatprep.subr.bf16.mxu0 %v3562_v9  ;;  %v3578_v25 = vld [vmem:[%s4810_s1 + $0x48] sm:$0xff]   ;;  %v3582_v29 = vld [vmem:[%s4810_s1 + $0x40] sm:$0xff]   ;;  %v3592_v38 = vld [vmem:[%s4810_s1 + $0x118] sm:$0xff]  }
  0x16   : > { %3382 = vmatprep.subr.bf16.mxu1 %v3563_v10  ;;  %v3579_v26 = vld [vmem:[%s4810_s1 + $0xc8] sm:$0xff]   ;;  %v3583_v30 = vld [vmem:[%s4810_s1 + $0xc0] sm:$0xff]   ;;  %v3593_v39 = vld [vmem:[%s4810_s1 + $0x110] sm:$0xff]  }
  0x17   : > { %v3580_v27 = vld [vmem:[%s4810_s1 + $0x8] sm:$0xff]   ;;  %v3584_v31 = vld [vmem:[%s4810_s1] sm:$0xff]   ;;  %v3600_v41 = vld [vmem:[%s4812_s3 + $0xf0] ss:$8 sps:$4 sm:$0xff]  }
  0x18   : > { %3361 = vmatpush3.bf16.msra.mxu0 %v3564_v11  ;;  %v3581_v28 = vld [vmem:[%s4810_s1 + $0x88] sm:$0xff]   ;;  %v3585_v32 = vld [vmem:[%s4810_s1 + $0x80] sm:$0xff]   ;;  %v3602_v42 = vld [vmem:[%s4812_s3 + $0xf4] ss:$8 sps:$4 sm:$0xff]  }
  0x19   : > { %3383 = vmatpush3.bf16.msra.mxu1 %v3565_v12  ;;  %3362 = vmatprep.subr.bf16.mxu0 %v3566_v13  ;;  %v3586_v33 = vld [vmem:[%s4079_s28] ss:$20 sps:$4 sm:$0x1f]   ;;  %v3588_v34 = vld [vmem:[%s4079_s28 + $0x4] ss:$20 sps:$4 sm:$0x1f]  }
  0x1a   : > { %3384 = vmatprep.subr.bf16.mxu1 %v3567_v14  ;;  %v3589_v35 = vld [vmem:[%s4079_s28 + $0x8] ss:$20 sps:$4 sm:$0x1f]   ;;  %v3591_v36 = vld [vmem:[%s4079_s28 + $0xc] ss:$20 sps:$4 sm:$0x1f]   ;;  %856 = vmatprep.mubr.bf16.mxu0 %v3588_v34 }
  0x1b   : > { %897 = vmatprep.mubr.bf16.mxu1 %v3591_v36  ;;  %v3594_v40 = vld [vmem:[%s4810_s1 + $0x108] sm:$0xff]   ;;  %v3595_v45 = vld [vmem:[%s4810_s1 + $0x100] sm:$0xff]   ;;  %v3599_v46 = vld [vmem:[%s4812_s3 + $0x74] ss:$8 sps:$4 sm:$0xff]   ;;  %v3884_v12 = vmov 0  }
  0x1c   : > { %3363 = vmatpush3.bf16.msra.mxu0 %v3568_v15  ;;  %v3606_v43 = vld [vmem:[%s4812_s3 + $0xe0] ss:$8 sps:$4 sm:$0xff]   ;;  %v3608_v44 = vld [vmem:[%s4812_s3 + $0xe4] ss:$8 sps:$4 sm:$0xff]   ;;  %v3597_v48 = vld [vmem:[%s4812_s3 + $0x70] ss:$8 sps:$4 sm:$0xff]  }
  0x1d   : > { %3385 = vmatpush3.bf16.msra.mxu1 %v3569_v16  ;;  %3364 = vmatprep.subr.bf16.mxu0 %v3570_v17  ;;  %v3596_v47 = vld [vmem:[%s4079_s28 + $0x10] ss:$20 sps:$4 sm:$0x1f]   ;;  %v3603_v50 = vld [vmem:[%s4812_s3 + $0x60] ss:$8 sps:$4 sm:$0xff]  }
  0x1e   : > { %3386 = vmatprep.subr.bf16.mxu1 %v3571_v18  ;;  %v3605_v49 = vld [vmem:[%s4812_s3 + $0x64] ss:$8 sps:$4 sm:$0xff]   ;;  %v3611_v51 = vld [vmem:[%s4812_s3 + $0x54] ss:$8 sps:$4 sm:$0xff]   ;;  %v3609_v52 = vld [vmem:[%s4812_s3 + $0x50] ss:$8 sps:$4 sm:$0xff]  }
  0x1f   : > { %v3614_v53 = vld [vmem:[%s4812_s3 + $0xd4] ss:$8 sps:$4 sm:$0xff]   ;;  %v3612_v54 = vld [vmem:[%s4812_s3 + $0xd0] ss:$8 sps:$4 sm:$0xff]   ;;  %v3617_v55 = vld [vmem:[%s4812_s3 + $0x44] ss:$8 sps:$4 sm:$0xff]  }
  0x20   : > { %3365 = vmatpush3.bf16.msra.mxu0 %v3572_v19  ;;  %v3615_v56 = vld [vmem:[%s4812_s3 + $0x40] ss:$8 sps:$4 sm:$0xff]   ;;  %v3620_v57 = vld [vmem:[%s4812_s3 + $0xc4] ss:$8 sps:$4 sm:$0xff]   ;;  %v3623_v59 = vld [vmem:[%s4812_s3 + $0x34] ss:$8 sps:$4 sm:$0xff]  }
  0x21   : > { %3387 = vmatpush3.bf16.msra.mxu1 %v3573_v20  ;;  %3366 = vmatprep.subr.bf16.mxu0 %v3574_v21  ;;  %v3618_v58 = vld [vmem:[%s4812_s3 + $0xc0] ss:$8 sps:$4 sm:$0xff]   ;;  %v3621_v60 = vld [vmem:[%s4812_s3 + $0x30] ss:$8 sps:$4 sm:$0xff]   ;;  %v3626_v61 = vld [vmem:[%s4812_s3 + $0xb4] ss:$8 sps:$4 sm:$0xff]  }
  0x22   : > { %3388 = vmatprep.subr.bf16.mxu1 %v3575_v22  ;;  %v3624_v62 = vld [vmem:[%s4812_s3 + $0xb0] ss:$8 sps:$4 sm:$0xff]   ;;  %v3627_v63 = vld [vmem:[%s4812_s3 + $0x20] ss:$8 sps:$4 sm:$0xff]   ;;  %v3629_v0 = vld [vmem:[%s4812_s3 + $0x24] ss:$8 sps:$4 sm:$0xff]  }
  0x23   : > { %v3630_v1 = vld [vmem:[%s4812_s3 + $0xa0] ss:$8 sps:$4 sm:$0xff]   ;;  %v3632_v2 = vld [vmem:[%s4812_s3 + $0xa4] ss:$8 sps:$4 sm:$0xff]   ;;  %v3633_v3 = vld [vmem:[%s4812_s3 + $0x10] ss:$8 sps:$4 sm:$0xff]  }
  0x24   : > { %3367 = vmatpush3.bf16.msra.mxu0 %v3576_v23  ;;  %v3635_v4 = vld [vmem:[%s4812_s3 + $0x14] ss:$8 sps:$4 sm:$0xff]   ;;  %v3636_v6 = vld [vmem:[%s4812_s3 + $0x90] ss:$8 sps:$4 sm:$0xff]   ;;  %v3641_v7 = vld [vmem:[%s4812_s3 + $0x4] ss:$8 sps:$4 sm:$0xff]  }
  0x25   : > { %3389 = vmatpush3.bf16.msra.mxu1 %v3577_v24  ;;  %3368 = vmatprep.subr.bf16.mxu0 %v3578_v25  ;;  %v3638_v5 = vld [vmem:[%s4812_s3 + $0x94] ss:$8 sps:$4 sm:$0xff]   ;;  %v3639_v8 = vld [vmem:[%s4812_s3] ss:$8 sps:$4 sm:$0xff]   ;;  %v3644_v9 = vld [vmem:[%s4812_s3 + $0x84] ss:$8 sps:$4 sm:$0xff]  }
  0x26   : > { %3390 = vmatprep.subr.bf16.mxu1 %v3579_v26  ;;  %v3642_v10 = vld [vmem:[%s4812_s3 + $0x80] ss:$8 sps:$4 sm:$0xff]   ;;  %v3647_v11 = vld [vmem:[%s4812_s3 + $0x174] ss:$8 sps:$4 sm:$0xff]   ;;  %v3645_v36 = vld [vmem:[%s4812_s3 + $0x170] ss:$8 sps:$4 sm:$0xff]  }
  0x27   : > { %v3650_v13 = vld [vmem:[%s4812_s3 + $0x1f4] ss:$8 sps:$4 sm:$0xff]   ;;  %v3111_v23 = vld [vmem:[%s4811_s2] ss:$0 sm:$0xff] }
  0x28   : > { %3369 = vmatpush3.bf16.msra.mxu0 %v3580_v27 }
  0x29   : > { %3391 = vmatpush3.bf16.msra.mxu1 %v3581_v28  ;;  %3370 = vmatprep.subr.bf16.mxu0 %v3582_v29 }
  0x2a   : > { %3392 = vmatprep.subr.bf16.mxu1 %v3583_v30 }
  0x2c   : > { %3371 = vmatpush3.bf16.msra.mxu0 %v3584_v31 }
  0x2d   : > { %3393 = vmatpush3.bf16.msra.mxu1 %v3585_v32  ;;  %1207 = vmatprep.subr.bf16.mxu0 %v3602_v42  ;;  %v3648_v42 = vld [vmem:[%s4812_s3 + $0x1f0] ss:$8 sps:$4 sm:$0xff]  }
  0x2e   : > { %3473 = vmatprep.subr.bf16.mxu1 %v3882_v37 }
  0x2f   : > { %857 = vmatmul.mubr.bf16.vlgmr.msra.gmra.mxu0 %v3586_v33 }
  0x30   : > { %898 = vmatmul.mubr.bf16.vlgmr.msra.gmra.mxu1 %v3589_v35  ;;  %1208 = vmatpush1.bf16.msra.mxu0 %v3600_v41 }
  0x31   : > { %3474 = vmatpush3.bf16.msra.mxu1 %v3592_v38  ;;  %3481 = vmatprep.mubr.msk.bf16.mxu1 %vm3883_vm0, %v3882_v37 }
  0x32   : > { %3475 = vmatprep.subr.bf16.mxu1 %v3882_v37  ;;  %1209 = vmatprep.subr.bf16.mxu0 %v3608_v44  ;;  %v3656_v44 = vld [vmem:[%s4812_s3 + $0x1e4] ss:$8 sps:$4 sm:$0xff]  }
  0x33   : > { %1239 = vmatprep.mubr.bf16.mxu0 %v3884_v12 }
  0x34   : > { %1210 = vmatpush1.bf16.msra.mxu0 %v3606_v43 }
  0x35   : > { %3476 = vmatpush3.bf16.msra.mxu1 %v3593_v39  ;;  %1211 = vmatprep.subr.bf16.mxu0 %v3614_v53  ;;  %v3663_v53 = vld [vmem:[%s4812_s3 + $0x140] ss:$8 sps:$4 sm:$0xff]  }
  0x36   : > { %3477 = vmatprep.subr.bf16.mxu1 %v3882_v37 }
  0x38   : > { %1212 = vmatpush1.bf16.msra.mxu0 %v3612_v54  ;;  %v3671_v54 = vld [vmem:[%s4812_s3 + $0x134] ss:$8 sps:$4 sm:$0xff]  }
  0x39   : > { %3478 = vmatpush3.bf16.msra.mxu1 %v3594_v40  ;;  %1213 = vmatprep.subr.bf16.mxu0 %v3620_v57  ;;  %v3653_v40 = vld [vmem:[%s4812_s3 + $0x164] ss:$8 sps:$4 sm:$0xff]   ;;  %v3669_v57 = vld [vmem:[%s4812_s3 + $0x130] ss:$8 sps:$4 sm:$0xff]  }
  0x3a   : > { %3479 = vmatprep.subr.bf16.mxu1 %v3882_v37 }
  0x3c   : > { %1214 = vmatpush1.bf16.msra.mxu0 %v3618_v58  ;;  %v3677_v58 = vld [vmem:[%s4812_s3 + $0x124] ss:$8 sps:$4 sm:$0xff]  }
  0x3d   : > { %3480 = vmatpush3.bf16.msra.mxu1 %v3595_v45  ;;  %1215 = vmatprep.subr.bf16.mxu0 %v3626_v61  ;;  %v3651_v45 = vld [vmem:[%s4812_s3 + $0x160] ss:$8 sps:$4 sm:$0xff]  }
  0x3e   : > { %1047 = vmatprep.subr.bf16.mxu1 %v3599_v46  ;;  %v3659_v46 = vld [vmem:[%s4812_s3 + $0x154] ss:$8 sps:$4 sm:$0xff]   ;;  %v3675_v61 = vld [vmem:[%s4812_s3 + $0x120] ss:$8 sps:$4 sm:$0xff]  }
  0x40   : > { %3482 = vmatmul.mubr.msk.bf16.vlgmr.msra.gmra.mxu1 %vm820_vm1, %v3596_v47  ;;  %1216 = vmatpush1.bf16.msra.mxu0 %v3624_v62  ;;  %v3654_v47 = vld [vmem:[%s4812_s3 + $0x1e0] ss:$8 sps:$4 sm:$0xff]   ;;  %v3683_v62 = vld [vmem:[%s4812_s3 + $0x114] ss:$8 sps:$4 sm:$0xff]  }
  0x41   : > { %1048 = vmatpush1.bf16.msra.mxu1 %v3597_v48  ;;  %1217 = vmatprep.subr.bf16.mxu0 %v3632_v2  ;;  %v3662_v48 = vld [vmem:[%s4812_s3 + $0x1d4] ss:$8 sps:$4 sm:$0xff]   ;;  %v3689_v2 = vld [vmem:[%s4812_s3 + $0x104] ss:$8 sps:$4 sm:$0xff]  }
  0x42   : > { %1049 = vmatprep.subr.bf16.mxu1 %v3605_v49  ;;  %1079 = vmatprep.mubr.bf16.mxu1 %v3884_v12  ;;  %v3657_v49 = vld [vmem:[%s4812_s3 + $0x150] ss:$8 sps:$4 sm:$0xff]  }
  0x44   : > { %1218 = vmatpush1.bf16.msra.mxu0 %v3630_v1  ;;  %v3681_v1 = vld [vmem:[%s4812_s3 + $0x110] ss:$8 sps:$4 sm:$0xff]  }
  0x45   : > { %1050 = vmatpush1.bf16.msra.mxu1 %v3603_v50  ;;  %1219 = vmatprep.subr.bf16.mxu0 %v3638_v5  ;;  %v3665_v50 = vld [vmem:[%s4812_s3 + $0x144] ss:$8 sps:$4 sm:$0xff]   ;;  %v3687_v5 = vld [vmem:[%s4812_s3 + $0x100] ss:$8 sps:$4 sm:$0xff]  }
  0x46   : > { %1051 = vmatprep.subr.bf16.mxu1 %v3611_v51  ;;  %v3660_v51 = vld [vmem:[%s4812_s3 + $0x1d0] ss:$8 sps:$4 sm:$0xff]  }
  0x48   : > { %1220 = vmatpush1.bf16.msra.mxu0 %v3636_v6  ;;  %v3695_v6 = vld [vmem:[%s4812_s3 + $0x274] ss:$8 sps:$4 sm:$0xff]  }
  0x49   : > { %1052 = vmatpush1.bf16.msra.mxu1 %v3609_v52  ;;  %1221 = vmatprep.subr.bf16.mxu0 %v3644_v9  ;;  %v3668_v52 = vld [vmem:[%s4812_s3 + $0x1c4] ss:$8 sps:$4 sm:$0xff]   ;;  %v3693_v9 = vld [vmem:[%s4812_s3 + $0x270] ss:$8 sps:$4 sm:$0xff]  }
  0x4a   : > { %1053 = vmatprep.subr.bf16.mxu1 %v3617_v55  ;;  %v3666_v55 = vld [vmem:[%s4812_s3 + $0x1c0] ss:$8 sps:$4 sm:$0xff]  }
  0x4c   : > { %1222 = vmatpush1.bf16.msra.mxu0 %v3642_v10 }
  0x4d   : > { %1054 = vmatpush1.bf16.msra.mxu1 %v3615_v56  ;;  %1524 = vmatprep.subr.bf16.mxu0 %v3650_v13  ;;  %v3674_v56 = vld [vmem:[%s4812_s3 + $0x1b4] ss:$8 sps:$4 sm:$0xff]   ;;  %v3696_v13 = vld [vmem:[%s4812_s3 + $0x2f0] ss:$8 sps:$4 sm:$0xff]  }
  0x4e   : > { %1055 = vmatprep.subr.bf16.mxu1 %v3623_v59  ;;  %v3672_v59 = vld [vmem:[%s4812_s3 + $0x1b0] ss:$8 sps:$4 sm:$0xff]  }
  0x51   : > { %1056 = vmatpush1.bf16.msra.mxu1 %v3621_v60  ;;  %v3680_v60 = vld [vmem:[%s4812_s3 + $0x1a4] ss:$8 sps:$4 sm:$0xff]  }
  0x52   : > { %1057 = vmatprep.subr.bf16.mxu1 %v3629_v0  ;;  %v3686_v0 = vld [vmem:[%s4812_s3 + $0x194] ss:$8 sps:$4 sm:$0xff]  }
  0x55   : > { %1058 = vmatpush1.bf16.msra.mxu1 %v3627_v63  ;;  %v3678_v63 = vld [vmem:[%s4812_s3 + $0x1a0] ss:$8 sps:$4 sm:$0xff]  }
  0x56   : > { %1059 = vmatprep.subr.bf16.mxu1 %v3635_v4  ;;  %v3692_v4 = vld [vmem:[%s4812_s3 + $0x184] ss:$8 sps:$4 sm:$0xff]  }
  0x59   : > { %1060 = vmatpush1.bf16.msra.mxu1 %v3633_v3  ;;  %v3684_v3 = vld [vmem:[%s4812_s3 + $0x190] ss:$8 sps:$4 sm:$0xff]  }
  0x5a   : > { %1061 = vmatprep.subr.bf16.mxu1 %v3641_v7  ;;  %v3690_v7 = vld [vmem:[%s4812_s3 + $0x180] ss:$8 sps:$4 sm:$0xff]  }
  0x5d   : > { %1062 = vmatpush1.bf16.msra.mxu1 %v3639_v8  ;;  %v3698_v8 = vld [vmem:[%s4812_s3 + $0x2f4] ss:$8 sps:$4 sm:$0xff]  }
  0x5e   : > { %1366 = vmatprep.subr.bf16.mxu1 %v3647_v11  ;;  %v3701_v11 = vld [vmem:[%s4812_s3 + $0x264] ss:$8 sps:$4 sm:$0xff]  }
  0xef   : > { %v3372_v14 = vpop.f32.mrf.mxu0 }
  0xf0   : > { %v3394_v15 = vpop.f32.mrf.mxu1 }
  0xf1   : > { %v3373_v16 = vpop.f32.mrf.mxu0 }
  0xf2   : > { %v3395_v17 = vpop.f32.mrf.mxu1  ;;  %v3374_v24 = vadd.f32 %v3373_v16, %v3372_v14  ;;  %v3699_v16 = vld [vmem:[%s4812_s3 + $0x260] ss:$8 sps:$4 sm:$0xff]  }
  0xf3   : > { %v3375_v18 = vpop.f32.mrf.mxu0  ;;  %v3396_v29 = vadd.f32 %v3395_v17, %v3394_v15  ;;  %v3704_v15 = vld [vmem:[%s4812_s3 + $0x2e4] ss:$8 sps:$4 sm:$0xff]   ;;  %v3707_v17 = vld [vmem:[%s4812_s3 + $0x254] ss:$8 sps:$4 sm:$0xff]  }
  0xf4   : > { %v3397_v19 = vpop.f32.mrf.mxu1  ;;  %v859_v28 = vadd.f32 %v3374_v24, %v3111_v23  ;;  %v3711_v24 = vld [vmem:[%s4812_s3 + $0x240] ss:$8 sps:$4 sm:$0xff]  }
  0xf5   : > { %v3376_v20 = vpop.f32.mrf.mxu0 }
  0xf6   : > { %v3377_v21 = vadd.f32 %v3376_v20, %v3375_v18  ;;  %v3398_v22 = vpop.f32.mrf.mxu1  ;;  %v900_v30 = vadd.f32 %v3396_v29, %v859_v28  ;;  %v3702_v18 = vld [vmem:[%s4812_s3 + $0x2e0] ss:$8 sps:$4 sm:$0xff]   ;;  %v3705_v20 = vld [vmem:[%s4812_s3 + $0x250] ss:$8 sps:$4 sm:$0xff]   ;;  %v3725_v29 = vld [vmem:[%s4812_s3 + $0x224] ss:$8 sps:$4 sm:$0xff]  }
  0xf7   : > { %v3399_v25 = vadd.f32 %v3398_v22, %v3397_v19  ;;  %v3710_v19 = vld [vmem:[%s4812_s3 + $0x2d4] ss:$8 sps:$4 sm:$0xff]   ;;  %v3708_v22 = vld [vmem:[%s4812_s3 + $0x2d0] ss:$8 sps:$4 sm:$0xff]  }
  0xf8   : > { %v862_v26 = vadd.f32 %v3377_v21, %v3111_v23  ;;  %v3713_v21 = vld [vmem:[%s4812_s3 + $0x244] ss:$8 sps:$4 sm:$0xff]   ;;  %v3717_v28 = vld [vmem:[%s4812_s3 + $0x230] ss:$8 sps:$4 sm:$0xff]  }
  0xf9   : > { %v3716_v23 = vld [vmem:[%s4812_s3 + $0x2c4] ss:$8 sps:$4 sm:$0xff]  }
  0xfa   : > { %v903_v27 = vadd.f32 %v3399_v25, %v862_v26  ;;  %v3719_v25 = vld [vmem:[%s4812_s3 + $0x234] ss:$8 sps:$4 sm:$0xff]   ;;  %v3714_v26 = vld [vmem:[%s4812_s3 + $0x2c0] ss:$8 sps:$4 sm:$0xff]  }
 0x100   : > { %v940_v31 = vpop.f32.mrf.mxu1 }
 0x101   : > { %v941_v32 = vadd.f32 %v940_v31, %v900_v30  ;;  %v3720_v30 = vld [vmem:[%s4812_s3 + $0x2b0] ss:$8 sps:$4 sm:$0xff]   ;;  %v3728_v31 = vld [vmem:[%s4812_s3 + $0x2a4] ss:$8 sps:$4 sm:$0xff]  }
 0x102   : > { %v3483_v33 = vpop.f32.mrf.mxu1 }
 0x103   : > { %v947_v34 = vmax.f32 %v941_v32, 0.0  ;;  %v3723_v32 = vld [vmem:[%s4812_s3 + $0x220] ss:$8 sps:$4 sm:$0xff]   ;;  %v3731_v33 = vld [vmem:[%s4812_s3 + $0x214] ss:$8 sps:$4 sm:$0xff]  }
 0x104   : > { %v943_v35 = vpop.f32.mrf.mxu1 }
 0x105   : > { %v4220_v38 = vpack.c.bf16 %v947_v34, %v947_v34  ;;  %v4222_v39 = vadd.f32 %v943_v35, %v903_v27  ;;  %v3722_v27 = vld [vmem:[%s4812_s3 + $0x2b4] ss:$8 sps:$4 sm:$0xff]   ;;  %v3726_v34 = vld [vmem:[%s4812_s3 + $0x2a0] ss:$8 sps:$4 sm:$0xff]  }
 0x106   : > { %v3484_v41 = vpop.f32.mrf.mxu1  ;;  %v3734_v35 = vld [vmem:[%s4812_s3 + $0x294] ss:$8 sps:$4 sm:$0xff]  }
 0x107   : > { %1080 = vmatmul.mubr.bf16.vlgmr.msra.gmra.mxu1 %v4220_v38  ;;  %v4232_v43 = vshrl.u32 %v4220_v38, 16  ;;  %v1284_v10 = vrot.slane %v4220_v38, 1  ;;  %v3732_v41 = vld [vmem:[%s4812_s3 + $0x290] ss:$8 sps:$4 sm:$0xff]  }
 0x108   : > { %1367 = vmatpush1.bf16.msra.mxu1 %v3645_v36  ;;  %1398 = vmatprep.mubr.bf16.mxu1 %v3884_v12  ;;  %v3729_v36 = vld [vmem:[%s4812_s3 + $0x210] ss:$8 sps:$4 sm:$0xff]  }
 0x109   : > { %1240 = vmatmul.mubr.bf16.vlgmr.msra.gmra.mxu0 %v4232_v43  ;;  %1368 = vmatprep.subr.bf16.mxu1 %v3653_v40  ;;  %v1442_v14 = vrot.slane %v4232_v43, 1  ;;  %v3737_v40 = vld [vmem:[%s4812_s3 + $0x204] ss:$8 sps:$4 sm:$0xff]  }
 0x10a   : > { %1525 = vmatpush1.bf16.msra.mxu0 %v3648_v42  ;;  %1556 = vmatprep.mubr.bf16.mxu0 %v3884_v12  ;;  %v3740_v42 = vld [vmem:[%s4812_s3 + $0x284] ss:$8 sps:$4 sm:$0xff]  }
 0x10b   : > { %1526 = vmatprep.subr.bf16.mxu0 %v3656_v44  ;;  %v3735_v44 = vld [vmem:[%s4812_s3 + $0x200] ss:$8 sps:$4 sm:$0xff]  }
 0x10c   : > { %1369 = vmatpush1.bf16.msra.mxu1 %v3651_v45  ;;  %v3743_v45 = vld [vmem:[%s4812_s3 + $0x374] ss:$8 sps:$4 sm:$0xff]  }
 0x10d   : > { %1370 = vmatprep.subr.bf16.mxu1 %v3659_v46  ;;  %v3738_v46 = vld [vmem:[%s4812_s3 + $0x280] ss:$8 sps:$4 sm:$0xff]  }
 0x10e   : > { %1527 = vmatpush1.bf16.msra.mxu0 %v3654_v47  ;;  %v3746_v47 = vld [vmem:[%s4812_s3 + $0x3f4] ss:$8 sps:$4 sm:$0xff]  }
 0x10f   : > { %1528 = vmatprep.subr.bf16.mxu0 %v3662_v48  ;;  %v3741_v48 = vld [vmem:[%s4812_s3 + $0x370] ss:$8 sps:$4 sm:$0xff]  }
 0x110   : > { %1371 = vmatpush1.bf16.msra.mxu1 %v3657_v49  ;;  %v1600_v49 = vrot.slane %v4220_v38, 2 }
 0x111   : > { %1372 = vmatprep.subr.bf16.mxu1 %v3665_v50  ;;  %v3749_v50 = vld [vmem:[%s4812_s3 + $0x364] ss:$8 sps:$4 sm:$0xff]  }
 0x112   : > { %1529 = vmatpush1.bf16.msra.mxu0 %v3660_v51  ;;  %v3744_v51 = vld [vmem:[%s4812_s3 + $0x3f0] ss:$8 sps:$4 sm:$0xff]  }
 0x113   : > { %1530 = vmatprep.subr.bf16.mxu0 %v3668_v52  ;;  %v1758_v52 = vrot.slane %v4232_v43, 2 }
 0x114   : > { %1373 = vmatpush1.bf16.msra.mxu1 %v3663_v53  ;;  %v3752_v53 = vld [vmem:[%s4812_s3 + $0x3e4] ss:$8 sps:$4 sm:$0xff]  }
 0x115   : > { %1374 = vmatprep.subr.bf16.mxu1 %v3671_v54  ;;  %v3747_v54 = vld [vmem:[%s4812_s3 + $0x360] ss:$8 sps:$4 sm:$0xff]  }
 0x116   : > { %1531 = vmatpush1.bf16.msra.mxu0 %v3666_v55  ;;  %v3755_v55 = vld [vmem:[%s4812_s3 + $0x354] ss:$8 sps:$4 sm:$0xff]  }
 0x117   : > { %1532 = vmatprep.subr.bf16.mxu0 %v3674_v56  ;;  %v3750_v56 = vld [vmem:[%s4812_s3 + $0x3e0] ss:$8 sps:$4 sm:$0xff]  }
 0x118   : > { %1375 = vmatpush1.bf16.msra.mxu1 %v3669_v57  ;;  %v3758_v57 = vld [vmem:[%s4812_s3 + $0x3d4] ss:$8 sps:$4 sm:$0xff]  }
 0x119   : > { %1376 = vmatprep.subr.bf16.mxu1 %v3677_v58  ;;  %v3753_v58 = vld [vmem:[%s4812_s3 + $0x350] ss:$8 sps:$4 sm:$0xff]  }
 0x11a   : > { %1533 = vmatpush1.bf16.msra.mxu0 %v3672_v59  ;;  %v3761_v59 = vld [vmem:[%s4812_s3 + $0x344] ss:$8 sps:$4 sm:$0xff]  }
 0x11b   : > { %1534 = vmatprep.subr.bf16.mxu0 %v3680_v60  ;;  %v3756_v60 = vld [vmem:[%s4812_s3 + $0x3d0] ss:$8 sps:$4 sm:$0xff]  }
 0x11c   : > { %1377 = vmatpush1.bf16.msra.mxu1 %v3675_v61  ;;  %v3764_v61 = vld [vmem:[%s4812_s3 + $0x3c4] ss:$8 sps:$4 sm:$0xff]  }
 0x11d   : > { %1378 = vmatprep.subr.bf16.mxu1 %v3683_v62  ;;  %v3759_v62 = vld [vmem:[%s4812_s3 + $0x340] ss:$8 sps:$4 sm:$0xff]  }
 0x11e   : > { %1535 = vmatpush1.bf16.msra.mxu0 %v3678_v63  ;;  %v3767_v63 = vld [vmem:[%s4812_s3 + $0x334] ss:$8 sps:$4 sm:$0xff]  }
 0x11f   : > { %1536 = vmatprep.subr.bf16.mxu0 %v3686_v0  ;;  %v3762_v0 = vld [vmem:[%s4812_s3 + $0x3c0] ss:$8 sps:$4 sm:$0xff]  }
 0x120   : > { %1379 = vmatpush1.bf16.msra.mxu1 %v3681_v1  ;;  %v3770_v1 = vld [vmem:[%s4812_s3 + $0x3b4] ss:$8 sps:$4 sm:$0xff]  }
 0x121   : > { %1380 = vmatprep.subr.bf16.mxu1 %v3689_v2  ;;  %v3765_v2 = vld [vmem:[%s4812_s3 + $0x330] ss:$8 sps:$4 sm:$0xff]  }
 0x122   : > { %1537 = vmatpush1.bf16.msra.mxu0 %v3684_v3  ;;  %v3773_v3 = vld [vmem:[%s4812_s3 + $0x324] ss:$8 sps:$4 sm:$0xff]  }
 0x123   : > { %1538 = vmatprep.subr.bf16.mxu0 %v3692_v4  ;;  %v3768_v4 = vld [vmem:[%s4812_s3 + $0x3b0] ss:$8 sps:$4 sm:$0xff]  }
 0x124   : > { %1381 = vmatpush1.bf16.msra.mxu1 %v3687_v5  ;;  %v3776_v5 = vld [vmem:[%s4812_s3 + $0x3a4] ss:$8 sps:$4 sm:$0xff]  }
 0x125   : > { %1682 = vmatprep.subr.bf16.mxu1 %v3695_v6  ;;  %v3771_v6 = vld [vmem:[%s4812_s3 + $0x320] ss:$8 sps:$4 sm:$0xff]  }
 0x126   : > { %1539 = vmatpush1.bf16.msra.mxu0 %v3690_v7  ;;  %v3779_v7 = vld [vmem:[%s4812_s3 + $0x314] ss:$8 sps:$4 sm:$0xff]  }
 0x127   : > { %1399 = vmatmul.mubr.bf16.vlgmr.msra.gmra.mxu1 %v1284_v10  ;;  %1840 = vmatprep.subr.bf16.mxu0 %v3698_v8  ;;  %v3774_v8 = vld [vmem:[%s4812_s3 + $0x3a0] ss:$8 sps:$4 sm:$0xff]   ;;  %v3777_v10 = vld [vmem:[%s4812_s3 + $0x310] ss:$8 sps:$4 sm:$0xff]  }
 0x128   : > { %1683 = vmatpush1.bf16.msra.mxu1 %v3693_v9  ;;  %1714 = vmatprep.mubr.bf16.mxu1 %v3884_v12  ;;  %v3782_v9 = vld [vmem:[%s4812_s3 + $0x394] ss:$8 sps:$4 sm:$0xff]  }
 0x129   : > { %1557 = vmatmul.mubr.bf16.vlgmr.msra.gmra.mxu0 %v1442_v14  ;;  %1684 = vmatprep.subr.bf16.mxu1 %v3701_v11  ;;  %v3785_v11 = vld [vmem:[%s4812_s3 + $0x304] ss:$8 sps:$4 sm:$0xff]  }
 0x12a   : > { %1841 = vmatpush1.bf16.msra.mxu0 %v3696_v13  ;;  %1872 = vmatprep.mubr.bf16.mxu0 %v3884_v12  ;;  %v3780_v13 = vld [vmem:[%s4812_s3 + $0x390] ss:$8 sps:$4 sm:$0xff]   ;;  %v3788_v14 = vld [vmem:[%s4812_s3 + $0x384] ss:$8 sps:$4 sm:$0xff]  }
 0x12b   : > { %1842 = vmatprep.subr.bf16.mxu0 %v3704_v15  ;;  %v3783_v15 = vld [vmem:[%s4812_s3 + $0x300] ss:$8 sps:$4 sm:$0xff]  }
 0x12c   : > { %1685 = vmatpush1.bf16.msra.mxu1 %v3699_v16  ;;  %v3791_v16 = vld [vmem:[%s4812_s3 + $0x474] ss:$8 sps:$4 sm:$0xff]  }
 0x12d   : > { %1686 = vmatprep.subr.bf16.mxu1 %v3707_v17  ;;  %v3786_v17 = vld [vmem:[%s4812_s3 + $0x380] ss:$8 sps:$4 sm:$0xff]  }
 0x12e   : > { %1843 = vmatpush1.bf16.msra.mxu0 %v3702_v18  ;;  %v3789_v18 = vld [vmem:[%s4812_s3 + $0x470] ss:$8 sps:$4 sm:$0xff]  }
 0x12f   : > { %1844 = vmatprep.subr.bf16.mxu0 %v3710_v19  ;;  %v1916_v19 = vrot.slane %v4220_v38, 3  ;;  %v3797_v38 = vld [vmem:[%s4812_s3 + $0x454] ss:$8 sps:$4 sm:$0xff]  }
 0x130   : > { %1687 = vmatpush1.bf16.msra.mxu1 %v3705_v20  ;;  %v3794_v20 = vld [vmem:[%s4812_s3 + $0x464] ss:$8 sps:$4 sm:$0xff]  }
 0x131   : > { %1688 = vmatprep.subr.bf16.mxu1 %v3713_v21  ;;  %v2074_v21 = vrot.slane %v4232_v43, 3  ;;  %v3800_v43 = vld [vmem:[%s4812_s3 + $0x444] ss:$8 sps:$4 sm:$0xff]  }
 0x132   : > { %1845 = vmatpush1.bf16.msra.mxu0 %v3708_v22  ;;  %v3792_v22 = vld [vmem:[%s4812_s3 + $0x460] ss:$8 sps:$4 sm:$0xff]  }
 0x133   : > { %1846 = vmatprep.subr.bf16.mxu0 %v3716_v23  ;;  %v3795_v23 = vld [vmem:[%s4812_s3 + $0x450] ss:$8 sps:$4 sm:$0xff]  }
 0x134   : > { %1689 = vmatpush1.bf16.msra.mxu1 %v3711_v24  ;;  %v3803_v24 = vld [vmem:[%s4812_s3 + $0x434] ss:$8 sps:$4 sm:$0xff]  }
 0x135   : > { %1690 = vmatprep.subr.bf16.mxu1 %v3719_v25  ;;  %v3801_v25 = vld [vmem:[%s4812_s3 + $0x430] ss:$8 sps:$4 sm:$0xff]  }
 0x136   : > { %1847 = vmatpush1.bf16.msra.mxu0 %v3714_v26  ;;  %v3806_v26 = vld [vmem:[%s4812_s3 + $0x424] ss:$8 sps:$4 sm:$0xff]  }
 0x137   : > { %1848 = vmatprep.subr.bf16.mxu0 %v3722_v27  ;;  %v3804_v27 = vld [vmem:[%s4812_s3 + $0x420] ss:$8 sps:$4 sm:$0xff]  }
 0x138   : > { %1691 = vmatpush1.bf16.msra.mxu1 %v3717_v28  ;;  %v3809_v28 = vld [vmem:[%s4812_s3 + $0x414] ss:$8 sps:$4 sm:$0xff]  }
 0x139   : > { %1692 = vmatprep.subr.bf16.mxu1 %v3725_v29  ;;  %v3807_v29 = vld [vmem:[%s4812_s3 + $0x410] ss:$8 sps:$4 sm:$0xff]  }
 0x13a   : > { %1849 = vmatpush1.bf16.msra.mxu0 %v3720_v30  ;;  %v3812_v30 = vld [vmem:[%s4812_s3 + $0x404] ss:$8 sps:$4 sm:$0xff]  }
 0x13b   : > { %1850 = vmatprep.subr.bf16.mxu0 %v3728_v31  ;;  %v3810_v31 = vld [vmem:[%s4812_s3 + $0x400] ss:$8 sps:$4 sm:$0xff]  }
 0x13c   : > { %1693 = vmatpush1.bf16.msra.mxu1 %v3723_v32  ;;  %v948_v32 = vmax.f32 %v4222_v39, 0.0  ;;  %v3815_v39 = vld [vmem:[%s4814_s5 + $0x70] sm:$0xff]  }
 0x13d   : > { %1694 = vmatprep.subr.bf16.mxu1 %v3731_v33 }
 0x13e   : > { %1851 = vmatpush1.bf16.msra.mxu0 %v3726_v34  ;;  %v2216_v33 = vpack.c.bf16 %v948_v32, %v948_v32  ;;  %v3813_v34 = vld [vmem:[%s4814_s5 + $0x78] sm:$0xff]  }
 0x13f   : > { %1852 = vmatprep.subr.bf16.mxu0 %v3734_v35  ;;  %v3814_v35 = vld [vmem:[%s4814_s5 + $0x38] sm:$0xff]  }
 0x140   : > { %1695 = vmatpush1.bf16.msra.mxu1 %v3729_v36  ;;  %v3816_v36 = vld [vmem:[%s4814_s5 + $0x30] sm:$0xff]  }
 0x141   : > { %1696 = vmatprep.subr.bf16.mxu1 %v3737_v40  ;;  %v3817_v40 = vld [vmem:[%s4814_s5 + $0x68] sm:$0xff]  }
 0x142   : > { %1853 = vmatpush1.bf16.msra.mxu0 %v3732_v41  ;;  %v3818_v41 = vld [vmem:[%s4814_s5 + $0x28] sm:$0xff]  }
 0x143   : > { %1854 = vmatprep.subr.bf16.mxu0 %v3740_v42  ;;  %v3819_v42 = vld [vmem:[%s4814_s5 + $0x60] sm:$0xff]  }
 0x144   : > { %1697 = vmatpush1.bf16.msra.mxu1 %v3735_v44  ;;  %v3820_v44 = vld [vmem:[%s4814_s5 + $0x20] sm:$0xff]  }
 0x145   : > { %1998 = vmatprep.subr.bf16.mxu1 %v3743_v45  ;;  %v3885_v45 = vmov 1966171168  }
 0x146   : > { %1855 = vmatpush1.bf16.msra.mxu0 %v3738_v46  ;;  %v1092_v46 = vunpack.c.l.s4 %v3885_v45 }
 0x147   : > { %1715 = vmatmul.mubr.bf16.vlgmr.msra.gmra.mxu1 %v1600_v49  ;;  %2156 = vmatprep.subr.bf16.mxu0 %v3746_v47  ;;  %v1094_v47 = vlaneseq }
 0x148   : > { %1999 = vmatpush1.bf16.msra.mxu1 %v3741_v48  ;;  %2030 = vmatprep.mubr.bf16.mxu1 %v3884_v12  ;;  %v1093_v48 = vunpack.c.0.s8 %v1092_v46 }
 0x149   : > { %1873 = vmatmul.mubr.bf16.vlgmr.msra.gmra.mxu0 %v1758_v52  ;;  %2000 = vmatprep.subr.bf16.mxu1 %v3749_v50  ;;  %v4597_v49 = vshrl.u32 %v1094_v47, 7  ;;  %v3821_v50 = vld [vmem:[%s4814_s5 + $0x58] sm:$0xff]  }
 0x14a   : > { %2157 = vmatpush1.bf16.msra.mxu0 %v3744_v51  ;;  %2188 = vmatprep.mubr.bf16.mxu0 %v3884_v12  ;;  %v3822_v52 = vld [vmem:[%s4814_s5 + $0x18] sm:$0xff]  }
 0x14b   : > { %2158 = vmatprep.subr.bf16.mxu0 %v3752_v53  ;;  %v4606_v53 = vsub.s32 %v1093_v48, %v4597_v49 }
 0x14c   : > { %2001 = vmatpush1.bf16.msra.mxu1 %v3747_v54 }
 0x14d   : > { %2002 = vmatprep.subr.bf16.mxu1 %v3755_v55 }
 0x14e   : > { %2159 = vmatpush1.bf16.msra.mxu0 %v3750_v56 }
 0x14f   : > { %2160 = vmatprep.subr.bf16.mxu0 %v3758_v57  ;;  %v3823_v57 = vld [vmem:[%s4814_s5 + $0x50] sm:$0xff]  }
 0x150   : > { %2003 = vmatpush1.bf16.msra.mxu1 %v3753_v58 }
 0x151   : > { %2004 = vmatprep.subr.bf16.mxu1 %v3761_v59 }
 0x152   : > { %2161 = vmatpush1.bf16.msra.mxu0 %v3756_v60  ;;  %v3824_v60 = vld [vmem:[%s4814_s5 + $0x10] sm:$0xff]  }
 0x153   : > { %2162 = vmatprep.subr.bf16.mxu0 %v3764_v61 }
 0x154   : > { %2005 = vmatpush1.bf16.msra.mxu1 %v3759_v62 }
 0x155   : > { %2006 = vmatprep.subr.bf16.mxu1 %v3767_v63  ;;  %v949_v63 = vld [vmem:[%s4813_s4] sm:$0x3] }
 0x156   : > { %2163 = vmatpush1.bf16.msra.mxu0 %v3762_v0 }
 0x157   : > { %2164 = vmatprep.subr.bf16.mxu0 %v3770_v1 }
 0x158   : > { %2007 = vmatpush1.bf16.msra.mxu1 %v3765_v2 }
 0x159   : > { %2008 = vmatprep.subr.bf16.mxu1 %v3773_v3 }
 0x15a   : > { %2165 = vmatpush1.bf16.msra.mxu0 %v3768_v4  ;;  %v3825_v4 = vld [vmem:[%s4814_s5 + $0x48] sm:$0xff]  }
 0x15b   : > { %2166 = vmatprep.subr.bf16.mxu0 %v3776_v5 }
 0x15c   : > { %2009 = vmatpush1.bf16.msra.mxu1 %v3771_v6  ;;  %v3826_v6 = vld [vmem:[%s4814_s5 + $0x8] sm:$0xff]  }
 0x15d   : > { %2010 = vmatprep.subr.bf16.mxu1 %v3779_v7 }
 0x15e   : > { %2167 = vmatpush1.bf16.msra.mxu0 %v3774_v8 }
 0x15f   : > { %2168 = vmatprep.subr.bf16.mxu0 %v3782_v9  ;;  %v3827_v9 = vld [vmem:[%s4814_s5 + $0x40] sm:$0xff]  }
 0x160   : > { %2011 = vmatpush1.bf16.msra.mxu1 %v3777_v10  ;;  %v3828_v10 = vld [vmem:[%s4814_s5] sm:$0xff]  }
 0x161   : > { %2012 = vmatprep.subr.bf16.mxu1 %v3785_v11 }
 0x162   : > { %2169 = vmatpush1.bf16.msra.mxu0 %v3780_v13  ;;  %v3829_v13 = vld [vmem:[%s4818_s9 + $0x78] sm:$0xff]  }
 0x163   : > { %2170 = vmatprep.subr.bf16.mxu0 %v3788_v14 }
 0x164   : > { %2013 = vmatpush1.bf16.msra.mxu1 %v3783_v15 }
 0x165   : > { %2313 = vmatprep.subr.bf16.mxu1 %v3791_v16 }
 0x166   : > { %2171 = vmatpush1.bf16.msra.mxu0 %v3786_v17 }
 0x167   : > { %2031 = vmatmul.mubr.bf16.vlgmr.msra.gmra.mxu1 %v1916_v19  ;;  %3405 = vmatprep.subr.bf16.mxu0 %v3813_v34 }
 0x168   : > { %2314 = vmatpush1.bf16.msra.mxu1 %v3789_v18  ;;  %2345 = vmatprep.mubr.bf16.mxu1 %v3884_v12  ;;  %v3798_v12 = vld [vmem:[%s4812_s3 + $0x440] ss:$8 sps:$4 sm:$0xff]  }
 0x169   : > { %2189 = vmatmul.mubr.bf16.vlgmr.msra.gmra.mxu0 %v2074_v21  ;;  %2315 = vmatprep.subr.bf16.mxu1 %v3794_v20 }
 0x16a   : > { %3406 = vmatpush3.bf16.msra.mxu0 %v3814_v35 }
 0x16b   : > { %3407 = vmatprep.subr.bf16.mxu0 %v3815_v39 }
 0x16c   : > { %2316 = vmatpush1.bf16.msra.mxu1 %v3792_v22 }
 0x16d   : > { %2317 = vmatprep.subr.bf16.mxu1 %v3797_v38 }
 0x16e   : > { %3408 = vmatpush3.bf16.msra.mxu0 %v3816_v36 }
 0x16f   : > { %3409 = vmatprep.subr.bf16.mxu0 %v3817_v40 }
 0x170   : > { %2318 = vmatpush1.bf16.msra.mxu1 %v3795_v23 }
 0x171   : > { %2319 = vmatprep.subr.bf16.mxu1 %v3800_v43 }
 0x172   : > { %3410 = vmatpush3.bf16.msra.mxu0 %v3818_v41 }
 0x173   : > { %3411 = vmatprep.subr.bf16.mxu0 %v3819_v42 }
 0x174   : > { %2320 = vmatpush1.bf16.msra.mxu1 %v3798_v12 }
 0x175   : > { %2321 = vmatprep.subr.bf16.mxu1 %v3803_v24 }
 0x176   : > { %3412 = vmatpush3.bf16.msra.mxu0 %v3820_v44 }
 0x177   : > { %3413 = vmatprep.subr.bf16.mxu0 %v3821_v50 }
 0x178   : > { %2322 = vmatpush1.bf16.msra.mxu1 %v3801_v25 }
 0x179   : > { %2323 = vmatprep.subr.bf16.mxu1 %v3806_v26 }
 0x17a   : > { %3414 = vmatpush3.bf16.msra.mxu0 %v3822_v52 }
 0x17b   : > { %3415 = vmatprep.subr.bf16.mxu0 %v3823_v57 }
 0x17c   : > { %2324 = vmatpush1.bf16.msra.mxu1 %v3804_v27  ;;  %v3845_v27 = vld [vmem:[%s4816_s7 + $0x30] ss:$0 sps:$4 sm:$0x33]  }
 0x17d   : > { %2325 = vmatprep.subr.bf16.mxu1 %v3809_v28  ;;  %v2617_v28 = vsel %vm2615_vm2, %v3845_v27, 0  ;;  %v3841_v27 = vld [vmem:[%s4818_s9 + $0x48] sm:$0xff]  }
 0x17e   : > { %3416 = vmatpush3.bf16.msra.mxu0 %v3824_v60 }
 0x17f   : > { %3417 = vmatprep.subr.bf16.mxu0 %v3825_v4 }
 0x180   : > { %2326 = vmatpush1.bf16.msra.mxu1 %v3807_v29  ;;  %v3846_v29 = vld [vmem:[%s4816_s7 + $0x28] sm:$0xff]  }
 0x181   : > { %2327 = vmatprep.subr.bf16.mxu1 %v3812_v30  ;;  %v3847_v30 = vld [vmem:[%s4816_s7 + $0x20] sm:$0xff]  }
 0x182   : > { %3418 = vmatpush3.bf16.msra.mxu0 %v3826_v6 }
 0x183   : > { %3419 = vmatprep.subr.bf16.mxu0 %v3827_v9 }
 0x184   : > { %2328 = vmatpush1.bf16.msra.mxu1 %v3810_v31  ;;  %v3848_v31 = vld [vmem:[%s4816_s7 + $0x18] sm:$0xff]  }
 0x185   : > { %3485 = vmatprep.subr.bf16.mxu1 %v3882_v37 }
 0x186   : > { %3420 = vmatpush3.bf16.msra.mxu0 %v3828_v10 }
 0x187   : > { %2346 = vmatmul.mubr.bf16.vlgmr.msra.gmra.mxu1 %v2216_v33  ;;  %3435 = vmatprep.subr.bf16.mxu0 %v3829_v13 }
 0x188   : > { %3499 = vmatprep.mubr.msk.bf16.mxu1 %vm3883_vm0, %v3882_v37  ;;  %3486 = vmatpush3.bf16.msra.mxu1 %v2617_v28  ;;  %v3842_v28 = vld [vmem:[%s4818_s9 + $0x8] sm:$0xff]  }
 0x189   : > { %3487 = vmatprep.subr.bf16.mxu1 %v3882_v37 }
 0x18c   : > { %3488 = vmatpush3.bf16.msra.mxu1 %v3846_v29  ;;  %v3843_v29 = vld [vmem:[%s4818_s9 + $0x40] sm:$0xff]  }
 0x18d   : > { %3489 = vmatprep.subr.bf16.mxu1 %v3882_v37 }
 0x190   : > { %3490 = vmatpush3.bf16.msra.mxu1 %v3847_v30  ;;  %v3844_v30 = vld [vmem:[%s4818_s9] sm:$0xff]  }
 0x191   : > { %3491 = vmatprep.subr.bf16.mxu1 %v3882_v37 }
 0x194   : > { %3492 = vmatpush3.bf16.msra.mxu1 %v3848_v31  ;;  %v3849_v31 = vld [vmem:[%s4816_s7 + $0x10] sm:$0xff]  }
 0x195   : > { %3493 = vmatprep.subr.bf16.mxu1 %v3882_v37 }
 0x198   : > { %3494 = vmatpush3.bf16.msra.mxu1 %v3849_v31 }
 0x199   : > { %3495 = vmatprep.subr.bf16.mxu1 %v3882_v37 }
 0x1c7   : > { %v1081_v51 = vpop.f32.mrf.mxu1 }
 0x1c9   : > { %v1083_v54 = vpop.f32.mrf.mxu1  ;;  %v1241_v55 = vpop.f32.mrf.mxu0 }
 0x1ca   : > { %v1090_v56 = vcombine.low %v1081_v51, %v1083_v54 }
 0x1cb   : > { %v1085_v58 = vpop.f32.mrf.mxu1  ;;  %v1243_v59 = vpop.f32.mrf.mxu0 }
 0x1cc   : > { %v1097_v61 = vrot.slane %v1090_v56, %v4606_v53  ;;  %v1250_v62 = vcombine.low %v1241_v55, %v1243_v59 }
 0x1cd   : > { %v1086_v0 = vpop.f32.mrf.mxu1  ;;  %v1245_v1 = vpop.f32.mrf.mxu0 }
 0x1ce   : > { %v1104_v2 = vrot.slane %v1097_v61, %v4606_v53  ;;  %v1257_v3 = vrot.slane %v1250_v62, %v4606_v53 }
 0x1cf   : > { %v1246_v5 = vpop.f32.mrf.mxu0 }
 0x1d0   : > { %v1106_v7 = vadd.f32 %v1104_v2, %v949_v63  ;;  %v1264_v8 = vrot.slane %v1257_v3, %v4606_v53 }
 0x1d2   : > { %v1266_v11 = vadd.f32 %v1264_v8, %v1106_v7 }
 0x1e7   : > { %v1400_v14 = vpop.f32.mrf.mxu1 }
 0x1e9   : > { %v1402_v15 = vpop.f32.mrf.mxu1  ;;  %v1558_v16 = vpop.f32.mrf.mxu0 }
 0x1ea   : > { %v1409_v17 = vcombine.low %v1400_v14, %v1402_v15  ;;  %v2381_v14 = vsub.s32 1, %v4597_v49  ;;  %v2377_v15 = vsub.s32 0, %v4597_v49  ;;  %v3832_v49 = vld [vmem:[%s4818_s9 + $0x30] sm:$0xff]  }
 0x1eb   : > { %v1404_v18 = vpop.f32.mrf.mxu1  ;;  %v1560_v19 = vpop.f32.mrf.mxu0 }
 0x1ec   : > { %v1416_v20 = vrot.slane %v1409_v17, %v4606_v53  ;;  %v1567_v21 = vcombine.low %v1558_v16, %v1560_v19 }
 0x1ed   : > { %v1405_v22 = vpop.f32.mrf.mxu1  ;;  %v1562_v38 = vpop.f32.mrf.mxu0 }
 0x1ee   : > { %v1423_v23 = vrot.slane %v1416_v20, %v4606_v53  ;;  %v1574_v43 = vrot.slane %v1567_v21, %v4606_v53  ;;  %v3830_v21 = vld [vmem:[%s4818_s9 + $0x38] sm:$0xff]   ;;  %v3831_v22 = vld [vmem:[%s4818_s9 + $0x70] sm:$0xff]   ;;  %v3834_v38 = vld [vmem:[%s4818_s9 + $0x28] sm:$0xff]  }
 0x1ef   : > { %v1563_v12 = vpop.f32.mrf.mxu0 }
 0x1f0   : > { %v1425_v24 = vadd.f32 %v1423_v23, %v1266_v11  ;;  %v1581_v25 = vrot.slane %v1574_v43, %v4606_v53  ;;  %v3835_v23 = vld [vmem:[%s4818_s9 + $0x60] sm:$0xff]   ;;  %v3837_v12 = vld [vmem:[%s4818_s9 + $0x58] sm:$0xff]  }
 0x1f1   : > { %v3836_v43 = vld [vmem:[%s4818_s9 + $0x20] sm:$0xff]  }
 0x1f2   : > { %v1583_v26 = vadd.f32 %v1581_v25, %v1425_v24  ;;  %v3838_v24 = vld [vmem:[%s4818_s9 + $0x18] sm:$0xff]   ;;  %v3839_v25 = vld [vmem:[%s4818_s9 + $0x50] sm:$0xff]  }
 0x207   : > { %v1716_v32 = vpop.f32.mrf.mxu1 }
 0x209   : > { %v1718_v33 = vpop.f32.mrf.mxu1  ;;  %v1874_v34 = vpop.f32.mrf.mxu0 }
 0x20a   : > { %v1725_v52 = vcombine.low %v1716_v32, %v1718_v33  ;;  %v3850_v32 = vld [vmem:[%s4816_s7 + $0x8] sm:$0xff]   ;;  %v3851_v33 = vld [vmem:[%s4816_s7] sm:$0xff]  }
 0x20b   : > { %v1720_v35 = vpop.f32.mrf.mxu1  ;;  %v1876_v39 = vpop.f32.mrf.mxu0  ;;  %3496 = vmatpush3.bf16.msra.mxu1 %v3850_v32 }
 0x20c   : > { %v1732_v54 = vrot.slane %v1725_v52, %v4606_v53  ;;  %v1883_v55 = vcombine.low %v1874_v34, %v1876_v39  ;;  %3497 = vmatprep.subr.bf16.mxu1 %v3882_v37  ;;  %v3853_v34 = vld [vmem:[%s4822_s13 + $0x30] ss:$0 sps:$4 sm:$0x33]   ;;  %v3855_v39 = vld [vmem:[%s4822_s13 + $0x28] sm:$0xff]  }
 0x20d   : > { %v1721_v36 = vpop.f32.mrf.mxu1  ;;  %v1878_v40 = vpop.f32.mrf.mxu0  ;;  %v2983_v35 = vsel %vm2615_vm2, %v3853_v34, 0  ;;  %v3852_v52 = vld [vmem:[%s4820_s11 + $0x30] ss:$0 sps:$4 sm:$0x33]  }
 0x20e   : > { %v1739_v57 = vrot.slane %v1732_v54, %v4606_v53  ;;  %v1890_v58 = vrot.slane %v1883_v55, %v4606_v53  ;;  %v3857_v36 = vld [vmem:[%s4822_s13 + $0x20] sm:$0xff]   ;;  %v3859_v40 = vld [vmem:[%s4822_s13 + $0x18] sm:$0xff]  }
 0x20f   : > { %v1879_v41 = vpop.f32.mrf.mxu0  ;;  %3498 = vmatpush3.bf16.msra.mxu1 %v3851_v33 }
 0x210   : > { %v1741_v61 = vadd.f32 %v1739_v57, %v1583_v26  ;;  %v1897_v62 = vrot.slane %v1890_v58, %v4606_v53  ;;  %v3840_v26 = vld [vmem:[%s4818_s9 + $0x10] sm:$0xff]   ;;  %3503 = vmatprep.subr.bf16.mxu1 %v3882_v37  ;;  %v2887_v57 = vsel %vm2615_vm2, %v3852_v52, 0  ;;  %v3854_v58 = vld [vmem:[%s4820_s11 + $0x28] sm:$0xff]  }
 0x211   : > { %v3861_v41 = vld [vmem:[%s4822_s13 + $0x10] sm:$0xff]  }
 0x212   : > { %v1899_v2 = vadd.f32 %v1897_v62, %v1741_v61  ;;  %v3860_v61 = vld [vmem:[%s4820_s11 + $0x10] sm:$0xff]   ;;  %v3862_v62 = vld [vmem:[%s4820_s11 + $0x8] sm:$0xff]  }
 0x227   : > { %v2032_v42 = vpop.f32.mrf.mxu1 }
 0x229   : > { %v2034_v44 = vpop.f32.mrf.mxu1  ;;  %v2190_v45 = vpop.f32.mrf.mxu0 }
 0x22a   : > { %v2041_v56 = vcombine.low %v2032_v42, %v2034_v44  ;;  %v3863_v42 = vld [vmem:[%s4822_s13 + $0x8] sm:$0xff]   ;;  %v3865_v44 = vld [vmem:[%s4822_s13] sm:$0xff]  }
 0x22b   : > { %v2036_v46 = vpop.f32.mrf.mxu1  ;;  %v2192_v47 = vpop.f32.mrf.mxu0 }
 0x22c   : > { %v2048_v59 = vrot.slane %v2041_v56, %v4606_v53  ;;  %v2199_v60 = vcombine.low %v2190_v45, %v2192_v47  ;;  %v2419_v46 = vld [vmem:[%s4815_s6] sm:$0x1] }
 0x22d   : > { %v2037_v48 = vpop.f32.mrf.mxu1  ;;  %v2194_v50 = vpop.f32.mrf.mxu0 }
 0x22e   : > { %v2055_v63 = vrot.slane %v2048_v59, %v4606_v53  ;;  %v2206_v0 = vrot.slane %v2199_v60, %v4606_v53  ;;  %v3856_v59 = vld [vmem:[%s4820_s11 + $0x20] sm:$0xff]   ;;  %v3858_v60 = vld [vmem:[%s4820_s11 + $0x18] sm:$0xff]  }
 0x22f   : > { %v2195_v51 = vpop.f32.mrf.mxu0 }
 0x230   : > { %v2057_v4 = vadd.f32 %v2055_v63, %v1899_v2  ;;  %v2213_v5 = vrot.slane %v2206_v0, %v4606_v53  ;;  %v3864_v0 = vld [vmem:[%s4820_s11] sm:$0xff]  }
 0x232   : > { %v2215_v10 = vadd.f32 %v2213_v5, %v2057_v4 }
 0x247   : > { %v2347_v1 = vpop.f32.mrf.mxu1 }
 0x249   : > { %v2349_v3 = vpop.f32.mrf.mxu1 }
 0x24a   : > { %v2356_v6 = vcombine.low %v2347_v1, %v2349_v3  ;;  %v2691_v1 = vld [vmem:[%s4819_s10] sm:$0x1] }
 0x24b   : > { %v2351_v7 = vpop.f32.mrf.mxu1 }
 0x24c   : > { %v2363_v8 = vrot.slane %v2356_v6, %v4606_v53 }
 0x24d   : > { %v2352_v9 = vpop.f32.mrf.mxu1 }
 0x24e   : > { %v2370_v11 = vrot.slane %v2363_v8, %v4606_v53  ;;  %v3833_v53 = vld [vmem:[%s4818_s9 + $0x68] sm:$0xff]  }
 0x250   : > { %v2372_v13 = vadd.f32 %v2370_v11, %v2215_v10 }
 0x252   : > { %v2373_v16 = vmax.f32 %v2372_v13, 0.0  ;;  %v2942_v13 = vld [vmem:[%s4823_s14] sm:$0x1] }
 0x254   : > { %v2382_v17 = vrot.slane %v2373_v16, %v2381_v14  ;;  %v2378_v18 = vrot.slane %v2373_v16, %v2377_v15 }
 0x256   : > { %v2386_v19 = vpack.c.bf16 %v2382_v17, %v2382_v17  ;;  %v2385_v20 = vpack.c.bf16 %v2378_v18, %v2378_v18 }
 0x258   : > { %2548 = vmatprep.mubr.bf16.mxu0 %v2386_v19 }
 0x259   : > { %2549 = vmatmul.mubr.bf16.vlgmr.msra.gmra.mxu0 %v2385_v20 }
 0x25a   : > { %3436 = vmatpush3.bf16.msra.mxu0 %v3830_v21  ;;  %2820 = vmatprep.mubr.bf16.mxu0 %v2386_v19 }
 0x25b   : > { %3437 = vmatprep.subr.bf16.mxu0 %v3831_v22 }
 0x25e   : > { %3438 = vmatpush3.bf16.msra.mxu0 %v3832_v49 }
 0x25f   : > { %3439 = vmatprep.subr.bf16.mxu0 %v3833_v53 }
 0x262   : > { %3440 = vmatpush3.bf16.msra.mxu0 %v3834_v38 }
 0x263   : > { %3441 = vmatprep.subr.bf16.mxu0 %v3835_v23 }
 0x266   : > { %3442 = vmatpush3.bf16.msra.mxu0 %v3836_v43 }
 0x267   : > { %3443 = vmatprep.subr.bf16.mxu0 %v3837_v12 }
 0x26a   : > { %3444 = vmatpush3.bf16.msra.mxu0 %v3838_v24 }
 0x26b   : > { %3445 = vmatprep.subr.bf16.mxu0 %v3839_v25 }
 0x26e   : > { %3446 = vmatpush3.bf16.msra.mxu0 %v3840_v26  ;;  %v2571_v26 = vld [vmem:[#allocation2] sm:$0x1] }
 0x26f   : > { %3447 = vmatprep.subr.bf16.mxu0 %v3841_v27 }
 0x272   : > { %3448 = vmatpush3.bf16.msra.mxu0 %v3842_v28  ;;  %v2843_v28 = vld [vmem:[%s4821_s12] sm:$0x1] }
 0x273   : > { %3449 = vmatprep.subr.bf16.mxu0 %v3843_v29 }
 0x276   : > { %3450 = vmatpush3.bf16.msra.mxu0 %v3844_v30 }
 0x277   : > { %3521 = vmatprep.subr.bf16.mxu0 %v3882_v37 }
 0x279   : > { %2821 = vmatmul.mubr.bf16.vlgmr.msra.gmra.mxu0 %v2385_v20 }
 0x27a   : > { %3535 = vmatprep.mubr.msk.bf16.mxu0 %vm3883_vm0, %v3882_v37  ;;  %3522 = vmatpush3.bf16.msra.mxu0 %v2983_v35 }
 0x27b   : > { %3523 = vmatprep.subr.bf16.mxu0 %v3882_v37 }
 0x27e   : > { %3524 = vmatpush3.bf16.msra.mxu0 %v3855_v39 }
 0x27f   : > { %3525 = vmatprep.subr.bf16.mxu0 %v3882_v37 }
 0x282   : > { %3526 = vmatpush3.bf16.msra.mxu0 %v3857_v36 }
 0x283   : > { %3527 = vmatprep.subr.bf16.mxu0 %v3882_v37 }
 0x286   : > { %3528 = vmatpush3.bf16.msra.mxu0 %v3859_v40 }
 0x287   : > { %3529 = vmatprep.subr.bf16.mxu0 %v3882_v37 }
 0x28a   : > { %3530 = vmatpush3.bf16.msra.mxu0 %v3861_v41 }
 0x28b   : > { %3531 = vmatprep.subr.bf16.mxu0 %v3882_v37 }
 0x28e   : > { %3532 = vmatpush3.bf16.msra.mxu0 %v3863_v42 }
 0x28f   : > { %3533 = vmatprep.subr.bf16.mxu0 %v3882_v37 }
 0x292   : > { %3534 = vmatpush3.bf16.msra.mxu0 %v3865_v44 }
 0x319   : > { %v3421_v45 = vpop.f32.mrf.mxu0 }
 0x31b   : > { %v3422_v47 = vpop.f32.mrf.mxu0 }
 0x31c   : > { %v3423_v48 = vadd.f32 %v3422_v47, %v3421_v45 }
 0x31d   : > { %v3424_v50 = vpop.f32.mrf.mxu0 }
 0x31e   : > { %v2551_v51 = vadd.f32 %v3423_v48, %v2419_v46 }
 0x31f   : > { %v3425_v54 = vpop.f32.mrf.mxu0 }
 0x320   : > { %v2556_v55 = vmax.f32 %v2551_v51, 0.0 }
 0x322   : > { %v2557_v56 = vpack.c.bf16 %v2556_v55, %v2556_v55 }
 0x324   : > { %3500 = vmatmul.mubr.msk.bf16.vlgmr.msra.gmra.mxu1 %vm2611_vm3, %v2557_v56 }
 0x325   : > { %3504 = vmatpush3.bf16.msra.mxu1 %v2887_v57  ;;  %3517 = vmatprep.mubr.msk.bf16.mxu1 %vm3883_vm0, %v3882_v37 }
 0x326   : > { %3505 = vmatprep.subr.bf16.mxu1 %v3882_v37 }
 0x329   : > { %3506 = vmatpush3.bf16.msra.mxu1 %v3854_v58 }
 0x32a   : > { %3507 = vmatprep.subr.bf16.mxu1 %v3882_v37 }
 0x32d   : > { %3508 = vmatpush3.bf16.msra.mxu1 %v3856_v59 }
 0x32e   : > { %3509 = vmatprep.subr.bf16.mxu1 %v3882_v37 }
 0x331   : > { %3510 = vmatpush3.bf16.msra.mxu1 %v3858_v60 }
 0x332   : > { %3511 = vmatprep.subr.bf16.mxu1 %v3882_v37 }
 0x335   : > { %3512 = vmatpush3.bf16.msra.mxu1 %v3860_v61 }
 0x336   : > { %3513 = vmatprep.subr.bf16.mxu1 %v3882_v37 }
 0x339   : > { %v3451_v63 = vpop.f32.mrf.mxu0  ;;  %3514 = vmatpush3.bf16.msra.mxu1 %v3862_v62 }
 0x33a   : > { %3515 = vmatprep.subr.bf16.mxu1 %v3882_v37 }
 0x33b   : > { %v3452_v2 = vpop.f32.mrf.mxu0 }
 0x33c   : > { %v3453_v3 = vadd.f32 %v3452_v2, %v3451_v63 }
 0x33d   : > { %v3454_v4 = vpop.f32.mrf.mxu0  ;;  %3516 = vmatpush3.bf16.msra.mxu1 %v3864_v0 }
 0x33e   : > { %v2823_v5 = vadd.f32 %v3453_v3, %v2691_v1 }
 0x33f   : > { %v3455_v6 = vpop.f32.mrf.mxu0 }
 0x340   : > { %v2828_v7 = vmax.f32 %v2823_v5, 0.0 }
 0x342   : > { %v2829_v8 = vpack.c.bf16 %v2828_v7, %v2828_v7 }
 0x344   : > { %3518 = vmatmul.mubr.msk.bf16.vlgmr.msra.gmra.mxu1 %vm2611_vm3, %v2829_v8  ;;  %3536 = vmatmul.mubr.msk.bf16.vlgmr.msra.gmra.mxu0 %vm2611_vm3, %v2829_v8 }
 0x3e4   : > { %v2653_v9 = vpop.f32.mrf.mxu1 }
 0x3e5   : > { %v2654_v27 = vadd.f32 %v2653_v9, %v2571_v26 }
 0x3e6   : > { %v3501_v10 = vpop.f32.mrf.mxu1 }
 0x3e8   : > { %v2656_v11 = vpop.f32.mrf.mxu1 }
 0x3ea   : > { %v3502_v37 = vpop.f32.mrf.mxu1 }
 0x404   : > { %v2923_v14 = vpop.f32.mrf.mxu1  ;;  %v3019_v15 = vpop.f32.mrf.mxu0 }
 0x405   : > { %v3020_v16 = vadd.f32 %v3019_v15, %v2942_v13  ;;  %v2924_v29 = vadd.f32 %v2923_v14, %v2843_v28 }
 0x406   : > { %v3519_v17 = vpop.f32.mrf.mxu1  ;;  %v3537_v18 = vpop.f32.mrf.mxu0 }
 0x407   : > { %v3034_v19 = vmin.f32 %v3020_v16, 20.0  ;;  %vm3035_vm4 = vcmp.gt.f32.partialorder %v3020_v16, 20.0  ;;  %v3025_v30 = vmin.f32 %v2924_v29, 20.0  ;;  %vm3026_vm5 = vcmp.gt.f32.partialorder %v2924_v29, 20.0 }
 0x408   : > { %v2926_v20 = vpop.f32.mrf.mxu1  ;;  %v3022_v21 = vpop.f32.mrf.mxu0 }
 0x409   : > { %v3036_v22 = vmul.f32 1.442695, %v3034_v19  ;;  %v3027_v31 = vmul.f32 1.442695, %v3025_v30 }
 0x40a   : > { %v3520_v49 = vpop.f32.mrf.mxu1  ;;  %v3538_v53 = vpop.f32.mrf.mxu0 }
 0x40b   : > { %3866 = vpow2.f32 %v3036_v22 }
 0x418   : > { %v3867_v38 = vpop.eup %3866 }
 0x419   : > { %v3038_v23 = vadd.f32 1.0, %v3867_v38 }
 0x41b   : > { %3868 = vlog2.f32 %v3038_v23 }
 0x41c   : > { %3870 = vpow2.f32 %v3027_v31 }
 0x428   : > { %v3869_v43 = vpop.eup %3868 }
 0x429   : > { %v3040_v12 = vmul.f32 0.6931472, %v3869_v43  ;;  %v3871_v32 = vpop.eup %3870 }
 0x42a   : > { %v3029_v33 = vadd.f32 1.0, %v3871_v32 }
 0x42b   : > { %v3041_v24 = vsel %vm3035_vm4, %v3020_v16, %v3040_v12 }
 0x42c   : > { %v3042_v25 = vadd.f32 1.0, %v3041_v24  ;;  %3872 = vlog2.f32 %v3029_v33 }
 0x42e   : > { %3044 = vrot.lane.b32.xlu0 %v3042_v25, %s3886_s26 }
 0x432   : > { %3048 = vrot.lane.b32.xlu0 %v2654_v27, %s3887_s27 }
 0x439   : > { %v3873_v34 = vpop.eup %3872 }
 0x43a   : > { %v3031_v35 = vmul.f32 0.6931472, %v3873_v34 }
 0x43c   : > { %v3032_v39 = vsel %vm3026_vm5, %v2924_v29, %v3031_v35 }
 0x43d   : > { %v3033_v40 = vadd.f32 1.0, %v3032_v39 }
 0x4a0   : > { %v3045_v36 = vpop.permute.xlu0 %3044 }
 0x4a1   : > { %v3052_v41 = vsel %vm3051_vm6, %v3033_v40, %v3045_v36 }
 0x4a4   : > { %v3049_v42 = vpop.permute.xlu0 %3048 }
 0x4a5   : > { %v3054_v44 = vsel %vm3053_vm7, %v3052_v41, %v3049_v42 }
 0x4a6   : > { %v3056_v45 = vsel %vm3055_vm8, %v3054_v44, 0.0 }
 0x4a7   : > { %3057 = vst [vmem:[%s492_s18] sm:$0x1] %v3056_v45 }
 0x4a8 PF: > { %s27_s20 = sadd.s32 1, %s3880_s20  }
 0x4a9   : > { %p24_p4 = scmp.ge.s32.totalorder %s27_s20, 4  }
 0x4ab   :  { %26 = sbr.rel (!%p24_p4) target bundleno = 3 (0x3), region = 110 }

</bundles_post_ra>
